<compile_context>
chip_gen: v6e
topology: v6e:2x2x1
jax: 0.10.0
libtpu: 0.0.40
codegen_flags: <defaults>
</compile_context>

<pallas_src>
import functools
import math

import jax
import jax.numpy as jnp
from jax.experimental import pallas as pl
from jax.experimental.pallas import tpu as pltpu

F32 = jnp.float32
BF16 = jnp.bfloat16

# -----------------------------------------------------------------------------
# Tile selection helper
# -----------------------------------------------------------------------------

def _pick_tile(dim, align, max_tile):
    """Largest divisor of `dim` that is a multiple of `align` and <= max_tile.

    Prefers a choice that yields >= 2 blocks (keeps both v7x TensorCores busy).
    Falls back to the full dim (always a legal block shape)."""
    cands = [t for t in range(align, min(dim, max_tile) + 1, align) if dim % t == 0]
    if not cands:
        return dim
    multi = [t for t in cands if dim // t >= 2]
    return max(multi) if multi else max(cands)


# -----------------------------------------------------------------------------
# Pallas kernels
# -----------------------------------------------------------------------------

def _matmul_kernel(a_ref, b_ref, bias_ref, o_ref, *, act):
    # bf16 x bf16 -> f32 accumulation on the MXU (single pass).
    a = a_ref[...].astype(BF16)
    b = b_ref[...].astype(BF16)
    r = jnp.dot(a, b, preferred_element_type=jnp.float32) + bias_ref[...]
    if act == "relu":
        r = jnp.maximum(r, 0.0)
    elif act == "tanh":
        r = jnp.tanh(r)
    elif act == "lrelu":                       # eval-BN already folded into W/bias
        r = jnp.where(r >= 0.0, r, 0.01 * r)
    o_ref[...] = r.astype(o_ref.dtype)


def pallas_matmul(a, b, bias=None, act="none", out_dtype=F32):
    """out = act(a @ b + bias).  a:(M,K)  b:(K,N) pre-transposed (bf16)  bias:(1,N)."""
    M, K = a.shape
    K2, N = b.shape
    assert K == K2
    tm = _pick_tile(M, 8, 512)
    tn = _pick_tile(N, 128, 1024)
    if bias is None:
        bias = jnp.zeros((1, N), F32)
    bias = bias.reshape(1, N).astype(F32)

    return pl.pallas_call(
        functools.partial(_matmul_kernel, act=act),
        out_shape=jax.ShapeDtypeStruct((M, N), out_dtype),
        grid_spec=pltpu.PrefetchScalarGridSpec(
            num_scalar_prefetch=0,
            grid=(M // tm, N // tn),
            in_specs=[
                pl.BlockSpec((tm, K), lambda i, j: (i, 0)),
                pl.BlockSpec((K, tn), lambda i, j: (0, j)),   # weight VMEM-resident
                pl.BlockSpec((1, tn), lambda i, j: (0, j)),
            ],
            out_specs=pl.BlockSpec((tm, tn), lambda i, j: (i, j)),
        ),
        compiler_params=pltpu.CompilerParams(
            dimension_semantics=("parallel", "parallel")),
    )(a, b, bias)


def _gemv_kernel(a_ref, w_ref, b_ref, o_ref, *, act):
    a = a_ref[...].astype(jnp.float32)
    w = w_ref[...].astype(jnp.float32)               # (1, K) broadcast row
    r = jnp.sum(a * w, axis=1, keepdims=True) + b_ref[...]
    if act == "tanh":
        r = jnp.tanh(r)
    o_ref[...] = r.astype(o_ref.dtype)


def pallas_gemv(a, w_row, bias11, act="none", out_dtype=F32):
    """Row-wise multiply-reduce: out[m,0] = act(sum_k a[m,k]*w[0,k] + b)."""
    M, K = a.shape
    tm = _pick_tile(M, 8, 512)
    return pl.pallas_call(
        functools.partial(_gemv_kernel, act=act),
        out_shape=jax.ShapeDtypeStruct((M, 1), out_dtype),
        grid_spec=pltpu.PrefetchScalarGridSpec(
            num_scalar_prefetch=0,
            grid=(M // tm,),
            in_specs=[
                pl.BlockSpec((tm, K), lambda i: (i, 0)),
                pl.BlockSpec((1, K), lambda i: (0, 0)),
                pl.BlockSpec((1, 1), lambda i: (0, 0)),
            ],
            out_specs=pl.BlockSpec((tm, 1), lambda i: (i, 0)),
        ),
        compiler_params=pltpu.CompilerParams(dimension_semantics=("parallel",)),
    )(a, w_row, bias11)


def _inorm_kernel(x_ref, o_ref, *, relu, eps=1e-5):
    x = x_ref[...].astype(jnp.float32)               # (1, H*W, C)
    mean = jnp.mean(x, axis=1, keepdims=True)
    xc = x - mean
    var = jnp.mean(xc * xc, axis=1, keepdims=True)
    y = xc * jax.lax.rsqrt(var + eps)
    if relu:
        y = jnp.maximum(y, 0.0)
    o_ref[...] = y.astype(o_ref.dtype)


def instance_norm(x, relu=False):
    """InstanceNorm2d (affine=False, eps=1e-5) on NHWC, optional fused ReLU."""
    B, H, W, C = x.shape
    x2 = x.reshape(B, H * W, C)
    out = pl.pallas_call(
        functools.partial(_inorm_kernel, relu=relu),
        out_shape=jax.ShapeDtypeStruct(x2.shape, x.dtype),
        grid_spec=pltpu.PrefetchScalarGridSpec(
            num_scalar_prefetch=0,
            grid=(B,),
            in_specs=[pl.BlockSpec((1, H * W, C), lambda b: (b, 0, 0))],
            out_specs=pl.BlockSpec((1, H * W, C), lambda b: (b, 0, 0)),
        ),
        compiler_params=pltpu.CompilerParams(dimension_semantics=("parallel",)),
    )(x2)
    return out.reshape(B, H, W, C)


def _fp_scale_kernel(fp_ref, w_ref, o_ref, *, scalar):
    w = w_ref[...].astype(jnp.float32)
    m = jnp.max(w, axis=1, keepdims=True)
    e = jnp.exp(w - m)
    p = e / jnp.sum(e, axis=1, keepdims=True)
    o_ref[...] = (scalar * fp_ref[...].astype(jnp.float32) * p).astype(o_ref.dtype)


def fp_scale(fp, w, scalar):
    """scalar * fp * softmax(w, axis=1)."""
    return pl.pallas_call(
        functools.partial(_fp_scale_kernel, scalar=float(scalar)),
        out_shape=jax.ShapeDtypeStruct(fp.shape, F32),
    )(fp, w)


# -----------------------------------------------------------------------------
# Conv helpers (NHWC im2col glue in XLA, matmul hot-path in Pallas)
# -----------------------------------------------------------------------------

def reflection_pad(x, p):
    return jnp.pad(x, ((0, 0), (p, p), (p, p), (0, 0)), mode="reflect")


def _im2col(x, k, stride):
    """NHWC patch matrix with [kh, kw, cin] ordering (no transpose needed)."""
    B, H, W, C = x.shape
    Ho = (H - k) // stride + 1
    Wo = (W - k) // stride + 1
    cols = [x[:, di:di + stride * (Ho - 1) + 1:stride,
              dj:dj + stride * (Wo - 1) + 1:stride, :]
            for di in range(k) for dj in range(k)]
    patches = jnp.concatenate(cols, axis=-1).reshape(B * Ho * Wo, k * k * C)
    return patches, Ho, Wo


def conv2d(x, w_mat, bias, k, stride=1, act="none", out_dtype=BF16):
    """x: NHWC, w_mat: (k*k*Cin, Cout) pre-transposed bf16, bias: (1, Cout)."""
    B = x.shape[0]
    patches, Ho, Wo = _im2col(x, k, stride)
    Cout = w_mat.shape[1]
    out = pallas_matmul(patches, w_mat, bias=bias, act=act, out_dtype=out_dtype)
    return out.reshape(B, Ho, Wo, Cout)


def conv_transpose2d(x, w_mat, bias, k, stride, padding, output_padding):
    """PyTorch ConvTranspose2d via upsample+pad+conv; w_mat already flipped/prepped."""
    B, H, W, C = x.shape
    Hd, Wd = (H - 1) * stride + 1, (W - 1) * stride + 1
    xd = jnp.zeros((B, Hd, Wd, C), x.dtype).at[:, ::stride, ::stride, :].set(x)
    lo = k - 1 - padding
    hi = k - 1 - padding + output_padding
    xp = jnp.pad(xd, ((0, 0), (lo, hi), (lo, hi), (0, 0)))
    return conv2d(xp, w_mat, bias, k=k, stride=1)


def conv_final_tanh(x, w_row, bias11, k):
    """Conv2d(C->1, kxk) + Tanh as a GEMV kernel (avoids 128x MXU-column waste)."""
    B = x.shape[0]
    patches, Ho, Wo = _im2col(x, k, stride=1)
    out = pallas_gemv(patches, w_row, bias11, act="tanh", out_dtype=F32)
    return out.reshape(B, Ho, Wo, 1)


# -----------------------------------------------------------------------------
# Translator model
# -----------------------------------------------------------------------------

SCALAR = 100000
FP = 2048
EMB = 256
FP_AND_EMB = FP + EMB
FP_AND_EMB_SQRT = int(math.sqrt(FP_AND_EMB))   # 48
EMB_SQRT = int(math.sqrt(EMB))                 # 16
N_RESIDUAL = 4


def init_params(key):
    keys = iter(jax.random.split(key, 64))

    def nrm(shape, scale=0.05):
        return (scale * jax.random.normal(next(keys), shape)).astype(F32)

    def conv_w(shape, scale=0.05):
        # torch (Cout, Cin, kh, kw) -> matmul layout (kh*kw*Cin, Cout), bf16.
        w = nrm(shape, scale)
        Cout, Cin, kh, kw = shape
        return w.transpose(2, 3, 1, 0).reshape(kh * kw * Cin, Cout).astype(BF16)

    def convT_w(shape, scale=0.05):
        # torch (Cin, Cout, kh, kw) -> equivalent fwd-conv weight -> matmul layout.
        w = nrm(shape, scale)
        w_eq = jnp.flip(w, axis=(2, 3)).transpose(1, 0, 2, 3)   # (Cout, Cin, kh, kw)
        Cout, Cin, kh, kw = w_eq.shape
        return w_eq.transpose(2, 3, 1, 0).reshape(kh * kw * Cin, Cout).astype(BF16)

    def lin_w(out_f, in_f, scale=0.02, col_scale=1.0):
        # torch (out, in) -> (in, out), with optional eval-BN scale folded in.
        return (nrm((out_f, in_f), scale).T * col_scale).astype(BF16)

    # eval-mode BatchNorm1d (gamma=1, beta=0, running_mean=0, running_var=1)
    bn_s = 1.0 / math.sqrt(1.0 + 1e-5)

    p = {}
    # model0: Linear(2048, 2048, bias=False)
    p["m0_w"] = lin_w(FP, FP)
    # model (conv stack)
    p["c1_w"] = conv_w((64, 1, 7, 7));    p["c1_b"] = jnp.zeros((1, 64), F32)
    p["c2_w"] = conv_w((128, 64, 3, 3));  p["c2_b"] = jnp.zeros((1, 128), F32)
    for r in range(N_RESIDUAL):
        p[f"r{r}_c1_w"] = conv_w((128, 128, 3, 3)); p[f"r{r}_c1_b"] = nrm((1, 128), 0.01)
        p[f"r{r}_c2_w"] = conv_w((128, 128, 3, 3)); p[f"r{r}_c2_b"] = nrm((1, 128), 0.01)
    p["ct_w"] = convT_w((128, 64, 3, 3)); p["ct_b"] = jnp.zeros((1, 64), F32)
    p["cf_w"] = conv_w((1, 64, 7, 7)).T.astype(BF16)            # (1, 3136) GEMV row
    p["cf_b"] = jnp.zeros((1, 1), F32)
    # model2 (eval-BN folded into l1 weight/bias)
    p["m2_l1_w"] = lin_w(FP_AND_EMB // 2, FP_AND_EMB, col_scale=bn_s)
    p["m2_l1_b"] = jnp.zeros((1, FP_AND_EMB // 2), F32)          # 0*bn_s + 0
    p["m2_l2_w"] = lin_w(EMB, FP_AND_EMB // 2)
    p["m2_l2_b"] = jnp.zeros((1, EMB), F32)
    # model_no_fp (eval-BN folded into l1 weight/bias)
    p["nf_l1_w"] = lin_w(EMB, EMB, col_scale=bn_s)
    p["nf_l1_b"] = jnp.zeros((1, EMB), F32)
    p["nf_l2_w"] = lin_w(EMB, EMB)
    p["nf_l2_b"] = jnp.zeros((1, EMB), F32)
    return p


def conv_model(p, img):
    """The `self.model` Sequential.  img: (B, S, S, 1) bf16 -> (B, S, S, 1) f32."""
    x = reflection_pad(img, 3)
    x = conv2d(x, p["c1_w"], p["c1_b"], k=7)
    x = instance_norm(x, relu=True)
    # downsample: Conv2d(64,128,3,stride=2,padding=1)
    x = jnp.pad(x, ((0, 0), (1, 1), (1, 1), (0, 0)))
    x = conv2d(x, p["c2_w"], p["c2_b"], k=3, stride=2)
    x = instance_norm(x, relu=True)
    # residual blocks
    for r in range(N_RESIDUAL):
        y = reflection_pad(x, 1)
        y = conv2d(y, p[f"r{r}_c1_w"], p[f"r{r}_c1_b"], k=3)
        y = instance_norm(y, relu=True)
        y = reflection_pad(y, 1)
        y = conv2d(y, p[f"r{r}_c2_w"], p[f"r{r}_c2_b"], k=3)
        y = instance_norm(y, relu=False)
        x = x + y
    # upsample: ConvTranspose2d(128,64,3,stride=2,padding=1,output_padding=1)
    x = conv_transpose2d(x, p["ct_w"], p["ct_b"], k=3, stride=2, padding=1,
                         output_padding=1)
    x = instance_norm(x, relu=True)
    # final: ReflectionPad(3) + Conv2d(64,1,7) + Tanh  (GEMV + fused tanh)
    x = reflection_pad(x, 3)
    x = conv_final_tanh(x, p["cf_w"], p["cf_b"], k=7)
    return x


def translator_forward(p, x, fp=None):
    B = x.shape[0]
    if fp is not None:
        # w = model0(fp);  fp = scalar * fp * softmax(w, dim=1)
        w = pallas_matmul(fp, p["m0_w"])                       # Linear, no bias
        fp_s = fp_scale(fp, w, SCALAR)
        xin = jnp.concatenate([x, fp_s], axis=1)               # (B, 2304)
        img = xin.reshape(B, FP_AND_EMB_SQRT, FP_AND_EMB_SQRT, 1).astype(BF16)
        y = conv_model(p, img).reshape(B, -1)                  # (B, 2304)
        # Linear + eval-BN(folded) + LeakyReLU; Dropout(eval) = identity
        h = pallas_matmul(y, p["m2_l1_w"], bias=p["m2_l1_b"], act="lrelu")
        out = pallas_matmul(h, p["m2_l2_w"], bias=p["m2_l2_b"])
    else:
        img = x.reshape(B, EMB_SQRT, EMB_SQRT, 1).astype(BF16)
        y = conv_model(p, img).reshape(B, -1)                  # (B, 256)
        h = pallas_matmul(y, p["nf_l1_w"], bias=p["nf_l1_b"], act="lrelu")
        out = pallas_matmul(h, p["nf_l2_w"], bias=p["nf_l2_b"])
    return out


if __name__ == "__main__":
    key = jax.random.PRNGKey(0)
    kp, kx, kf = jax.random.split(key, 3)
    params = init_params(kp)

    x = jax.random.normal(kx, (2, EMB), F32)     # (batch=2, 256) embedding input
    fp = jax.random.normal(kf, (2, FP), F32)     # (batch=2, 2048) fingerprint input

    fwd_no_fp = jax.jit(lambda p, x_: translator_forward(p, x_, None))
    fwd_fp = jax.jit(lambda p, x_, fp_: translator_forward(p, x_, fp_))

    out_no_fp = jax.block_until_ready(fwd_no_fp(params, x))
    out_fp = jax.block_until_ready(fwd_fp(params, x, fp))

    assert out_no_fp.shape == (2, EMB) and out_fp.shape == (2, EMB)
    assert jnp.all(jnp.isfinite(out_no_fp)) and jnp.all(jnp.isfinite(out_fp))
    print("KERNEL_OK")
</pallas_src>

<mosaic_0001>
module attributes {stable_mosaic.version = 11 : i64} {
  func.func @_inorm_kernel(%arg0: i32, %arg1: memref<1x256x64xbf16, #tpu.memory_space<vmem>>, %arg2: memref<1x256x64xbf16, #tpu.memory_space<vmem>>) attributes {dimension_semantics = [#tpu.dimension_semantics<parallel>], iteration_bounds = array<i64: 2>, scalar_prefetch = 0 : i64, scratch_operands = 0 : i64, tpu.core_type = #tpu.core_type<tc>, window_params = [{transform_indices = @transform_0, window_bounds = array<i64: 1, 256, 64>}, {transform_indices = @transform_1, window_bounds = array<i64: 1, 256, 64>}]} {
    %c0 = arith.constant 0 : index
    %c0_0 = arith.constant 0 : index
    %c0_1 = arith.constant 0 : index
    %0 = vector.load %arg1[%c0, %c0_0, %c0_1] : memref<1x256x64xbf16, #tpu.memory_space<vmem>>, vector<1x256x64xbf16>
    %1 = arith.extf %0 : vector<1x256x64xbf16> to vector<1x256x64xf32>
    %cst = arith.constant dense<0.000000e+00> : vector<1x64xf32>
    %2 = vector.multi_reduction <add>, %1, %cst [1] : vector<1x256x64xf32> to vector<1x64xf32>
    %3 = vector.shape_cast %2 : vector<1x64xf32> to vector<1x1x64xf32>
    %cst_2 = arith.constant 2.560000e+02 : f32
    %4 = vector.broadcast %cst_2 : f32 to vector<1x1x64xf32>
    %5 = arith.divf %3, %4 : vector<1x1x64xf32>
    %6 = vector.broadcast %5 : vector<1x1x64xf32> to vector<1x256x64xf32>
    %7 = arith.subf %1, %6 : vector<1x256x64xf32>
    %8 = arith.mulf %7, %7 : vector<1x256x64xf32>
    %cst_3 = arith.constant dense<0.000000e+00> : vector<1x64xf32>
    %9 = vector.multi_reduction <add>, %8, %cst_3 [1] : vector<1x256x64xf32> to vector<1x64xf32>
    %10 = vector.shape_cast %9 : vector<1x64xf32> to vector<1x1x64xf32>
    %cst_4 = arith.constant 2.560000e+02 : f32
    %11 = vector.broadcast %cst_4 : f32 to vector<1x1x64xf32>
    %12 = arith.divf %10, %11 : vector<1x1x64xf32>
    %cst_5 = arith.constant 9.99999974E-6 : f32
    %13 = vector.broadcast %cst_5 : f32 to vector<1x1x64xf32>
    %14 = arith.addf %12, %13 : vector<1x1x64xf32>
    %15 = math.rsqrt %14 : vector<1x1x64xf32>
    %16 = vector.broadcast %15 : vector<1x1x64xf32> to vector<1x256x64xf32>
    %17 = arith.mulf %7, %16 : vector<1x256x64xf32>
    %cst_6 = arith.constant 0.000000e+00 : f32
    %18 = vector.broadcast %cst_6 : f32 to vector<1x256x64xf32>
    %19 = arith.maximumf %17, %18 : vector<1x256x64xf32>
    %20 = arith.truncf %19 : vector<1x256x64xf32> to vector<1x256x64xbf16>
    %c0_7 = arith.constant 0 : index
    %c0_8 = arith.constant 0 : index
    %c0_9 = arith.constant 0 : index
    %21 = vector.load %arg2[%c0_7, %c0_8, %c0_9] : memref<1x256x64xbf16, #tpu.memory_space<vmem>>, vector<1x256x64xbf16>
    tpu.vector_store %arg2[%c0_7, %c0_8, %c0_9], %20 {strides = array<i32>} : memref<1x256x64xbf16, #tpu.memory_space<vmem>>, vector<1x256x64xbf16>,
    return
  }
  func.func @transform_0(%arg0: i32) -> (i32, i32, i32) {
    %c0_i32 = arith.constant 0 : i32
    %c0_i32_0 = arith.constant 0 : i32
    %c0_i32_1 = arith.constant 0 : i32
    return %arg0, %c0_i32, %c0_i32_0 : i32, i32, i32
  }
  func.func @transform_1(%arg0: i32) -> (i32, i32, i32) {
    %c0_i32 = arith.constant 0 : i32
    %c0_i32_0 = arith.constant 0 : i32
    %c0_i32_1 = arith.constant 0 : i32
    return %arg0, %c0_i32, %c0_i32_0 : i32, i32, i32
  }
}

module attributes {stable_mosaic.version = 11 : i64} {
  func.func @_matmul_kernel(%arg0: i32, %arg1: i32, %arg2: memref<256x49xbf16, #tpu.memory_space<vmem>>, %arg3: memref<49x64xbf16, #tpu.memory_space<vmem>>, %arg4: memref<1x64xf32, #tpu.memory_space<vmem>>, %arg5: memref<256x64xbf16, #tpu.memory_space<vmem>>) attributes {dimension_semantics = [#tpu.dimension_semantics<parallel>, #tpu.dimension_semantics<parallel>], iteration_bounds = array<i64: 2, 1>, scalar_prefetch = 0 : i64, scratch_operands = 0 : i64, tpu.core_type = #tpu.core_type<tc>, window_params = [{transform_indices = @transform_0, window_bounds = array<i64: 256, 49>}, {transform_indices = @transform_1, window_bounds = array<i64: 49, 64>}, {transform_indices = @transform_2, window_bounds = array<i64: 1, 64>}, {transform_indices = @transform_3, window_bounds = array<i64: 256, 64>}]} {
    %c0 = arith.constant 0 : index
    %c0_0 = arith.constant 0 : index
    %0 = vector.load %arg2[%c0, %c0_0] : memref<256x49xbf16, #tpu.memory_space<vmem>>, vector<256x49xbf16>
    %c0_1 = arith.constant 0 : index
    %c0_2 = arith.constant 0 : index
    %1 = vector.load %arg3[%c0_1, %c0_2] : memref<49x64xbf16, #tpu.memory_space<vmem>>, vector<49x64xbf16>
    %cst = arith.constant dense<0.000000e+00> : vector<256x64xf32>
    %2 = tpu.matmul %0, %1, %cst {dimension_numbers = #tpu.dot_dimension_numbers<[1], [0], [0], [1], [0, 0, 1, 1], [], []>} : vector<256x49xbf16>, vector<49x64xbf16>, vector<256x64xf32> -> vector<256x64xf32>
    %c0_3 = arith.constant 0 : index
    %c0_4 = arith.constant 0 : index
    %3 = vector.load %arg4[%c0_3, %c0_4] : memref<1x64xf32, #tpu.memory_space<vmem>>, vector<1x64xf32>
    %4 = vector.broadcast %3 : vector<1x64xf32> to vector<256x64xf32>
    %5 = arith.addf %2, %4 : vector<256x64xf32>
    %6 = arith.truncf %5 : vector<256x64xf32> to vector<256x64xbf16>
    %c0_5 = arith.constant 0 : index
    %c0_6 = arith.constant 0 : index
    %7 = vector.load %arg5[%c0_5, %c0_6] : memref<256x64xbf16, #tpu.memory_space<vmem>>, vector<256x64xbf16>
    tpu.vector_store %arg5[%c0_5, %c0_6], %6 {strides = array<i32>} : memref<256x64xbf16, #tpu.memory_space<vmem>>, vector<256x64xbf16>,
    return
  }
  func.func @transform_0(%arg0: i32, %arg1: i32) -> (i32, i32) {
    %c0_i32 = arith.constant 0 : i32
    %c0_i32_0 = arith.constant 0 : i32
    return %arg0, %c0_i32 : i32, i32
  }
  func.func @transform_1(%arg0: i32, %arg1: i32) -> (i32, i32) {
    %c0_i32 = arith.constant 0 : i32
    %c0_i32_0 = arith.constant 0 : i32
    return %c0_i32, %arg1 : i32, i32
  }
  func.func @transform_2(%arg0: i32, %arg1: i32) -> (i32, i32) {
    %c0_i32 = arith.constant 0 : i32
    %c0_i32_0 = arith.constant 0 : i32
    return %c0_i32, %arg1 : i32, i32
  }
  func.func @transform_3(%arg0: i32, %arg1: i32) -> (i32, i32) {
    %c0_i32 = arith.constant 0 : i32
    return %arg0, %arg1 : i32, i32
  }
}

module attributes {stable_mosaic.version = 11 : i64} {
  func.func @_matmul_kernel(%arg0: i32, %arg1: i32, %arg2: memref<64x576xbf16, #tpu.memory_space<vmem>>, %arg3: memref<576x128xbf16, #tpu.memory_space<vmem>>, %arg4: memref<1x128xf32, #tpu.memory_space<vmem>>, %arg5: memref<64x128xbf16, #tpu.memory_space<vmem>>) attributes {dimension_semantics = [#tpu.dimension_semantics<parallel>, #tpu.dimension_semantics<parallel>], iteration_bounds = array<i64: 2, 1>, scalar_prefetch = 0 : i64, scratch_operands = 0 : i64, tpu.core_type = #tpu.core_type<tc>, window_params = [{transform_indices = @transform_0, window_bounds = array<i64: 64, 576>}, {transform_indices = @transform_1, window_bounds = array<i64: 576, 128>}, {transform_indices = @transform_2, window_bounds = array<i64: 1, 128>}, {transform_indices = @transform_3, window_bounds = array<i64: 64, 128>}]} {
    %c0 = arith.constant 0 : index
    %c0_0 = arith.constant 0 : index
    %0 = vector.load %arg2[%c0, %c0_0] : memref<64x576xbf16, #tpu.memory_space<vmem>>, vector<64x576xbf16>
    %c0_1 = arith.constant 0 : index
    %c0_2 = arith.constant 0 : index
    %1 = vector.load %arg3[%c0_1, %c0_2] : memref<576x128xbf16, #tpu.memory_space<vmem>>, vector<576x128xbf16>
    %cst = arith.constant dense<0.000000e+00> : vector<64x128xf32>
    %2 = tpu.matmul %0, %1, %cst {dimension_numbers = #tpu.dot_dimension_numbers<[1], [0], [0], [1], [0, 0, 1, 1], [], []>} : vector<64x576xbf16>, vector<576x128xbf16>, vector<64x128xf32> -> vector<64x128xf32>
    %c0_3 = arith.constant 0 : index
    %c0_4 = arith.constant 0 : index
    %3 = vector.load %arg4[%c0_3, %c0_4] : memref<1x128xf32, #tpu.memory_space<vmem>>, vector<1x128xf32>
    %4 = vector.broadcast %3 : vector<1x128xf32> to vector<64x128xf32>
    %5 = arith.addf %2, %4 : vector<64x128xf32>
    %6 = arith.truncf %5 : vector<64x128xf32> to vector<64x128xbf16>
    %c0_5 = arith.constant 0 : index
    %c0_6 = arith.constant 0 : index
    %7 = vector.load %arg5[%c0_5, %c0_6] : memref<64x128xbf16, #tpu.memory_space<vmem>>, vector<64x128xbf16>
    tpu.vector_store %arg5[%c0_5, %c0_6], %6 {strides = array<i32>} : memref<64x128xbf16, #tpu.memory_space<vmem>>, vector<64x128xbf16>,
    return
  }
  func.func @transform_0(%arg0: i32, %arg1: i32) -> (i32, i32) {
    %c0_i32 = arith.constant 0 : i32
    %c0_i32_0 = arith.constant 0 : i32
    return %arg0, %c0_i32 : i32, i32
  }
  func.func @transform_1(%arg0: i32, %arg1: i32) -> (i32, i32) {
    %c0_i32 = arith.constant 0 : i32
    %c0_i32_0 = arith.constant 0 : i32
    return %c0_i32, %arg1 : i32, i32
  }
  func.func @transform_2(%arg0: i32, %arg1: i32) -> (i32, i32) {
    %c0_i32 = arith.constant 0 : i32
    %c0_i32_0 = arith.constant 0 : i32
    return %c0_i32, %arg1 : i32, i32
  }
  func.func @transform_3(%arg0: i32, %arg1: i32) -> (i32, i32) {
    %c0_i32 = arith.constant 0 : i32
    return %arg0, %arg1 : i32, i32
  }
}

module attributes {stable_mosaic.version = 11 : i64} {
  func.func @_inorm_kernel(%arg0: i32, %arg1: memref<1x64x128xbf16, #tpu.memory_space<vmem>>, %arg2: memref<1x64x128xbf16, #tpu.memory_space<vmem>>) attributes {dimension_semantics = [#tpu.dimension_semantics<parallel>], iteration_bounds = array<i64: 2>, scalar_prefetch = 0 : i64, scratch_operands = 0 : i64, tpu.core_type = #tpu.core_type<tc>, window_params = [{transform_indices = @transform_0, window_bounds = array<i64: 1, 64, 128>}, {transform_indices = @transform_1, window_bounds = array<i64: 1, 64, 128>}]} {
    %c0 = arith.constant 0 : index
    %c0_0 = arith.constant 0 : index
    %c0_1 = arith.constant 0 : index
    %0 = vector.load %arg1[%c0, %c0_0, %c0_1] : memref<1x64x128xbf16, #tpu.memory_space<vmem>>, vector<1x64x128xbf16>
    %1 = arith.extf %0 : vector<1x64x128xbf16> to vector<1x64x128xf32>
    %cst = arith.constant dense<0.000000e+00> : vector<1x128xf32>
    %2 = vector.multi_reduction <add>, %1, %cst [1] : vector<1x64x128xf32> to vector<1x128xf32>
    %3 = vector.shape_cast %2 : vector<1x128xf32> to vector<1x1x128xf32>
    %cst_2 = arith.constant 6.400000e+01 : f32
    %4 = vector.broadcast %cst_2 : f32 to vector<1x1x128xf32>
    %5 = arith.divf %3, %4 : vector<1x1x128xf32>
    %6 = vector.broadcast %5 : vector<1x1x128xf32> to vector<1x64x128xf32>
    %7 = arith.subf %1, %6 : vector<1x64x128xf32>
    %8 = arith.mulf %7, %7 : vector<1x64x128xf32>
    %cst_3 = arith.constant dense<0.000000e+00> : vector<1x128xf32>
    %9 = vector.multi_reduction <add>, %8, %cst_3 [1] : vector<1x64x128xf32> to vector<1x128xf32>
    %10 = vector.shape_cast %9 : vector<1x128xf32> to vector<1x1x128xf32>
    %cst_4 = arith.constant 6.400000e+01 : f32
    %11 = vector.broadcast %cst_4 : f32 to vector<1x1x128xf32>
    %12 = arith.divf %10, %11 : vector<1x1x128xf32>
    %cst_5 = arith.constant 9.99999974E-6 : f32
    %13 = vector.broadcast %cst_5 : f32 to vector<1x1x128xf32>
    %14 = arith.addf %12, %13 : vector<1x1x128xf32>
    %15 = math.rsqrt %14 : vector<1x1x128xf32>
    %16 = vector.broadcast %15 : vector<1x1x128xf32> to vector<1x64x128xf32>
    %17 = arith.mulf %7, %16 : vector<1x64x128xf32>
    %cst_6 = arith.constant 0.000000e+00 : f32
    %18 = vector.broadcast %cst_6 : f32 to vector<1x64x128xf32>
    %19 = arith.maximumf %17, %18 : vector<1x64x128xf32>
    %20 = arith.truncf %19 : vector<1x64x128xf32> to vector<1x64x128xbf16>
    %c0_7 = arith.constant 0 : index
    %c0_8 = arith.constant 0 : index
    %c0_9 = arith.constant 0 : index
    %21 = vector.load %arg2[%c0_7, %c0_8, %c0_9] : memref<1x64x128xbf16, #tpu.memory_space<vmem>>, vector<1x64x128xbf16>
    tpu.vector_store %arg2[%c0_7, %c0_8, %c0_9], %20 {strides = array<i32>} : memref<1x64x128xbf16, #tpu.memory_space<vmem>>, vector<1x64x128xbf16>,
    return
  }
  func.func @transform_0(%arg0: i32) -> (i32, i32, i32) {
    %c0_i32 = arith.constant 0 : i32
    %c0_i32_0 = arith.constant 0 : i32
    %c0_i32_1 = arith.constant 0 : i32
    return %arg0, %c0_i32, %c0_i32_0 : i32, i32, i32
  }
  func.func @transform_1(%arg0: i32) -> (i32, i32, i32) {
    %c0_i32 = arith.constant 0 : i32
    %c0_i32_0 = arith.constant 0 : i32
    %c0_i32_1 = arith.constant 0 : i32
    return %arg0, %c0_i32, %c0_i32_0 : i32, i32, i32
  }
}

module attributes {stable_mosaic.version = 11 : i64} {
  func.func @_inorm_kernel(%arg0: i32, %arg1: memref<1x64x128xbf16, #tpu.memory_space<vmem>>, %arg2: memref<1x64x128xbf16, #tpu.memory_space<vmem>>) attributes {dimension_semantics = [#tpu.dimension_semantics<parallel>], iteration_bounds = array<i64: 2>, scalar_prefetch = 0 : i64, scratch_operands = 0 : i64, tpu.core_type = #tpu.core_type<tc>, window_params = [{transform_indices = @transform_0, window_bounds = array<i64: 1, 64, 128>}, {transform_indices = @transform_1, window_bounds = array<i64: 1, 64, 128>}]} {
    %c0 = arith.constant 0 : index
    %c0_0 = arith.constant 0 : index
    %c0_1 = arith.constant 0 : index
    %0 = vector.load %arg1[%c0, %c0_0, %c0_1] : memref<1x64x128xbf16, #tpu.memory_space<vmem>>, vector<1x64x128xbf16>
    %1 = arith.extf %0 : vector<1x64x128xbf16> to vector<1x64x128xf32>
    %cst = arith.constant dense<0.000000e+00> : vector<1x128xf32>
    %2 = vector.multi_reduction <add>, %1, %cst [1] : vector<1x64x128xf32> to vector<1x128xf32>
    %3 = vector.shape_cast %2 : vector<1x128xf32> to vector<1x1x128xf32>
    %cst_2 = arith.constant 6.400000e+01 : f32
    %4 = vector.broadcast %cst_2 : f32 to vector<1x1x128xf32>
    %5 = arith.divf %3, %4 : vector<1x1x128xf32>
    %6 = vector.broadcast %5 : vector<1x1x128xf32> to vector<1x64x128xf32>
    %7 = arith.subf %1, %6 : vector<1x64x128xf32>
    %8 = arith.mulf %7, %7 : vector<1x64x128xf32>
    %cst_3 = arith.constant dense<0.000000e+00> : vector<1x128xf32>
    %9 = vector.multi_reduction <add>, %8, %cst_3 [1] : vector<1x64x128xf32> to vector<1x128xf32>
    %10 = vector.shape_cast %9 : vector<1x128xf32> to vector<1x1x128xf32>
    %cst_4 = arith.constant 6.400000e+01 : f32
    %11 = vector.broadcast %cst_4 : f32 to vector<1x1x128xf32>
    %12 = arith.divf %10, %11 : vector<1x1x128xf32>
    %cst_5 = arith.constant 9.99999974E-6 : f32
    %13 = vector.broadcast %cst_5 : f32 to vector<1x1x128xf32>
    %14 = arith.addf %12, %13 : vector<1x1x128xf32>
    %15 = math.rsqrt %14 : vector<1x1x128xf32>
    %16 = vector.broadcast %15 : vector<1x1x128xf32> to vector<1x64x128xf32>
    %17 = arith.mulf %7, %16 : vector<1x64x128xf32>
    %18 = arith.truncf %17 : vector<1x64x128xf32> to vector<1x64x128xbf16>
    %c0_6 = arith.constant 0 : index
    %c0_7 = arith.constant 0 : index
    %c0_8 = arith.constant 0 : index
    %19 = vector.load %arg2[%c0_6, %c0_7, %c0_8] : memref<1x64x128xbf16, #tpu.memory_space<vmem>>, vector<1x64x128xbf16>
    tpu.vector_store %arg2[%c0_6, %c0_7, %c0_8], %18 {strides = array<i32>} : memref<1x64x128xbf16, #tpu.memory_space<vmem>>, vector<1x64x128xbf16>,
    return
  }
  func.func @transform_0(%arg0: i32) -> (i32, i32, i32) {
    %c0_i32 = arith.constant 0 : i32
    %c0_i32_0 = arith.constant 0 : i32
    %c0_i32_1 = arith.constant 0 : i32
    return %arg0, %c0_i32, %c0_i32_0 : i32, i32, i32
  }
  func.func @transform_1(%arg0: i32) -> (i32, i32, i32) {
    %c0_i32 = arith.constant 0 : i32
    %c0_i32_0 = arith.constant 0 : i32
    %c0_i32_1 = arith.constant 0 : i32
    return %arg0, %c0_i32, %c0_i32_0 : i32, i32, i32
  }
}

module attributes {stable_mosaic.version = 11 : i64} {
  func.func @_matmul_kernel(%arg0: i32, %arg1: i32, %arg2: memref<64x1152xbf16, #tpu.memory_space<vmem>>, %arg3: memref<1152x128xbf16, #tpu.memory_space<vmem>>, %arg4: memref<1x128xf32, #tpu.memory_space<vmem>>, %arg5: memref<64x128xbf16, #tpu.memory_space<vmem>>) attributes {dimension_semantics = [#tpu.dimension_semantics<parallel>, #tpu.dimension_semantics<parallel>], iteration_bounds = array<i64: 2, 1>, scalar_prefetch = 0 : i64, scratch_operands = 0 : i64, tpu.core_type = #tpu.core_type<tc>, window_params = [{transform_indices = @transform_0, window_bounds = array<i64: 64, 1152>}, {transform_indices = @transform_1, window_bounds = array<i64: 1152, 128>}, {transform_indices = @transform_2, window_bounds = array<i64: 1, 128>}, {transform_indices = @transform_3, window_bounds = array<i64: 64, 128>}]} {
    %c0 = arith.constant 0 : index
    %c0_0 = arith.constant 0 : index
    %0 = vector.load %arg2[%c0, %c0_0] : memref<64x1152xbf16, #tpu.memory_space<vmem>>, vector<64x1152xbf16>
    %c0_1 = arith.constant 0 : index
    %c0_2 = arith.constant 0 : index
    %1 = vector.load %arg3[%c0_1, %c0_2] : memref<1152x128xbf16, #tpu.memory_space<vmem>>, vector<1152x128xbf16>
    %cst = arith.constant dense<0.000000e+00> : vector<64x128xf32>
    %2 = tpu.matmul %0, %1, %cst {dimension_numbers = #tpu.dot_dimension_numbers<[1], [0], [0], [1], [0, 0, 1, 1], [], []>} : vector<64x1152xbf16>, vector<1152x128xbf16>, vector<64x128xf32> -> vector<64x128xf32>
    %c0_3 = arith.constant 0 : index
    %c0_4 = arith.constant 0 : index
    %3 = vector.load %arg4[%c0_3, %c0_4] : memref<1x128xf32, #tpu.memory_space<vmem>>, vector<1x128xf32>
    %4 = vector.broadcast %3 : vector<1x128xf32> to vector<64x128xf32>
    %5 = arith.addf %2, %4 : vector<64x128xf32>
    %6 = arith.truncf %5 : vector<64x128xf32> to vector<64x128xbf16>
    %c0_5 = arith.constant 0 : index
    %c0_6 = arith.constant 0 : index
    %7 = vector.load %arg5[%c0_5, %c0_6] : memref<64x128xbf16, #tpu.memory_space<vmem>>, vector<64x128xbf16>
    tpu.vector_store %arg5[%c0_5, %c0_6], %6 {strides = array<i32>} : memref<64x128xbf16, #tpu.memory_space<vmem>>, vector<64x128xbf16>,
    return
  }
  func.func @transform_0(%arg0: i32, %arg1: i32) -> (i32, i32) {
    %c0_i32 = arith.constant 0 : i32
    %c0_i32_0 = arith.constant 0 : i32
    return %arg0, %c0_i32 : i32, i32
  }
  func.func @transform_1(%arg0: i32, %arg1: i32) -> (i32, i32) {
    %c0_i32 = arith.constant 0 : i32
    %c0_i32_0 = arith.constant 0 : i32
    return %c0_i32, %arg1 : i32, i32
  }
  func.func @transform_2(%arg0: i32, %arg1: i32) -> (i32, i32) {
    %c0_i32 = arith.constant 0 : i32
    %c0_i32_0 = arith.constant 0 : i32
    return %c0_i32, %arg1 : i32, i32
  }
  func.func @transform_3(%arg0: i32, %arg1: i32) -> (i32, i32) {
    %c0_i32 = arith.constant 0 : i32
    return %arg0, %arg1 : i32, i32
  }
}

module attributes {stable_mosaic.version = 11 : i64} {
  func.func @_matmul_kernel(%arg0: i32, %arg1: i32, %arg2: memref<256x1152xbf16, #tpu.memory_space<vmem>>, %arg3: memref<1152x64xbf16, #tpu.memory_space<vmem>>, %arg4: memref<1x64xf32, #tpu.memory_space<vmem>>, %arg5: memref<256x64xbf16, #tpu.memory_space<vmem>>) attributes {dimension_semantics = [#tpu.dimension_semantics<parallel>, #tpu.dimension_semantics<parallel>], iteration_bounds = array<i64: 2, 1>, scalar_prefetch = 0 : i64, scratch_operands = 0 : i64, tpu.core_type = #tpu.core_type<tc>, window_params = [{transform_indices = @transform_0, window_bounds = array<i64: 256, 1152>}, {transform_indices = @transform_1, window_bounds = array<i64: 1152, 64>}, {transform_indices = @transform_2, window_bounds = array<i64: 1, 64>}, {transform_indices = @transform_3, window_bounds = array<i64: 256, 64>}]} {
    %c0 = arith.constant 0 : index
    %c0_0 = arith.constant 0 : index
    %0 = vector.load %arg2[%c0, %c0_0] : memref<256x1152xbf16, #tpu.memory_space<vmem>>, vector<256x1152xbf16>
    %c0_1 = arith.constant 0 : index
    %c0_2 = arith.constant 0 : index
    %1 = vector.load %arg3[%c0_1, %c0_2] : memref<1152x64xbf16, #tpu.memory_space<vmem>>, vector<1152x64xbf16>
    %cst = arith.constant dense<0.000000e+00> : vector<256x64xf32>
    %2 = tpu.matmul %0, %1, %cst {dimension_numbers = #tpu.dot_dimension_numbers<[1], [0], [0], [1], [0, 0, 1, 1], [], []>} : vector<256x1152xbf16>, vector<1152x64xbf16>, vector<256x64xf32> -> vector<256x64xf32>
    %c0_3 = arith.constant 0 : index
    %c0_4 = arith.constant 0 : index
    %3 = vector.load %arg4[%c0_3, %c0_4] : memref<1x64xf32, #tpu.memory_space<vmem>>, vector<1x64xf32>
    %4 = vector.broadcast %3 : vector<1x64xf32> to vector<256x64xf32>
    %5 = arith.addf %2, %4 : vector<256x64xf32>
    %6 = arith.truncf %5 : vector<256x64xf32> to vector<256x64xbf16>
    %c0_5 = arith.constant 0 : index
    %c0_6 = arith.constant 0 : index
    %7 = vector.load %arg5[%c0_5, %c0_6] : memref<256x64xbf16, #tpu.memory_space<vmem>>, vector<256x64xbf16>
    tpu.vector_store %arg5[%c0_5, %c0_6], %6 {strides = array<i32>} : memref<256x64xbf16, #tpu.memory_space<vmem>>, vector<256x64xbf16>,
    return
  }
  func.func @transform_0(%arg0: i32, %arg1: i32) -> (i32, i32) {
    %c0_i32 = arith.constant 0 : i32
    %c0_i32_0 = arith.constant 0 : i32
    return %arg0, %c0_i32 : i32, i32
  }
  func.func @transform_1(%arg0: i32, %arg1: i32) -> (i32, i32) {
    %c0_i32 = arith.constant 0 : i32
    %c0_i32_0 = arith.constant 0 : i32
    return %c0_i32, %arg1 : i32, i32
  }
  func.func @transform_2(%arg0: i32, %arg1: i32) -> (i32, i32) {
    %c0_i32 = arith.constant 0 : i32
    %c0_i32_0 = arith.constant 0 : i32
    return %c0_i32, %arg1 : i32, i32
  }
  func.func @transform_3(%arg0: i32, %arg1: i32) -> (i32, i32) {
    %c0_i32 = arith.constant 0 : i32
    return %arg0, %arg1 : i32, i32
  }
}

module attributes {stable_mosaic.version = 11 : i64} {
  func.func @_gemv_kernel(%arg0: i32, %arg1: memref<256x3136xbf16, #tpu.memory_space<vmem>>, %arg2: memref<1x3136xbf16, #tpu.memory_space<vmem>>, %arg3: memref<1x1xf32, #tpu.memory_space<vmem>>, %arg4: memref<256x1xf32, #tpu.memory_space<vmem>>) attributes {dimension_semantics = [#tpu.dimension_semantics<parallel>], iteration_bounds = array<i64: 2>, scalar_prefetch = 0 : i64, scratch_operands = 0 : i64, tpu.core_type = #tpu.core_type<tc>, window_params = [{transform_indices = @transform_0, window_bounds = array<i64: 256, 3136>}, {pipeline_mode = #tpu.pipeline_mode<synchronous>, transform_indices = @transform_1, window_bounds = array<i64: 1, 3136>}, {pipeline_mode = #tpu.pipeline_mode<synchronous>, transform_indices = @transform_2, window_bounds = array<i64: 1, 1>}, {transform_indices = @transform_3, window_bounds = array<i64: 256, 1>}]} {
    %c0 = arith.constant 0 : index
    %c0_0 = arith.constant 0 : index
    %0 = vector.load %arg1[%c0, %c0_0] : memref<256x3136xbf16, #tpu.memory_space<vmem>>, vector<256x3136xbf16>
    %1 = arith.extf %0 : vector<256x3136xbf16> to vector<256x3136xf32>
    %c0_1 = arith.constant 0 : index
    %c0_2 = arith.constant 0 : index
    %2 = vector.load %arg2[%c0_1, %c0_2] : memref<1x3136xbf16, #tpu.memory_space<vmem>>, vector<1x3136xbf16>
    %3 = arith.extf %2 : vector<1x3136xbf16> to vector<1x3136xf32>
    %4 = vector.broadcast %3 : vector<1x3136xf32> to vector<256x3136xf32>
    %5 = arith.mulf %1, %4 : vector<256x3136xf32>
    %cst = arith.constant dense<0.000000e+00> : vector<256xf32>
    %6 = vector.multi_reduction <add>, %5, %cst [1] : vector<256x3136xf32> to vector<256xf32>
    %7 = vector.shape_cast %6 : vector<256xf32> to vector<256x1xf32>
    %c0_3 = arith.constant 0 : index
    %c0_4 = arith.constant 0 : index
    %8 = vector.load %arg3[%c0_3, %c0_4] : memref<1x1xf32, #tpu.memory_space<vmem>>, vector<1x1xf32>
    %9 = vector.broadcast %8 : vector<1x1xf32> to vector<256x1xf32>
    %10 = arith.addf %7, %9 : vector<256x1xf32>
    %11 = math.tanh %10 : vector<256x1xf32>
    %c0_5 = arith.constant 0 : index
    %c0_6 = arith.constant 0 : index
    %12 = vector.load %arg4[%c0_5, %c0_6] : memref<256x1xf32, #tpu.memory_space<vmem>>, vector<256x1xf32>
    tpu.vector_store %arg4[%c0_5, %c0_6], %11 {strides = array<i32>} : memref<256x1xf32, #tpu.memory_space<vmem>>, vector<256x1xf32>,
    return
  }
  func.func @transform_0(%arg0: i32) -> (i32, i32) {
    %c0_i32 = arith.constant 0 : i32
    %c0_i32_0 = arith.constant 0 : i32
    return %arg0, %c0_i32 : i32, i32
  }
  func.func @transform_1(%arg0: i32) -> (i32, i32) {
    %c0_i32 = arith.constant 0 : i32
    %c0_i32_0 = arith.constant 0 : i32
    %c0_i32_1 = arith.constant 0 : i32
    return %c0_i32, %c0_i32_0 : i32, i32
  }
  func.func @transform_2(%arg0: i32) -> (i32, i32) {
    %c0_i32 = arith.constant 0 : i32
    %c0_i32_0 = arith.constant 0 : i32
    %c0_i32_1 = arith.constant 0 : i32
    return %c0_i32, %c0_i32_0 : i32, i32
  }
  func.func @transform_3(%arg0: i32) -> (i32, i32) {
    %c0_i32 = arith.constant 0 : i32
    %c0_i32_0 = arith.constant 0 : i32
    return %arg0, %c0_i32 : i32, i32
  }
}

module attributes {stable_mosaic.version = 11 : i64} {
  func.func @_matmul_kernel(%arg0: i32, %arg1: i32, %arg2: memref<2x256xf32, #tpu.memory_space<vmem>>, %arg3: memref<256x128xbf16, #tpu.memory_space<vmem>>, %arg4: memref<1x128xf32, #tpu.memory_space<vmem>>, %arg5: memref<2x128xf32, #tpu.memory_space<vmem>>) attributes {dimension_semantics = [#tpu.dimension_semantics<parallel>, #tpu.dimension_semantics<parallel>], iteration_bounds = array<i64: 1, 2>, scalar_prefetch = 0 : i64, scratch_operands = 0 : i64, tpu.core_type = #tpu.core_type<tc>, window_params = [{transform_indices = @transform_0, window_bounds = array<i64: 2, 256>}, {transform_indices = @transform_1, window_bounds = array<i64: 256, 128>}, {transform_indices = @transform_2, window_bounds = array<i64: 1, 128>}, {transform_indices = @transform_3, window_bounds = array<i64: 2, 128>}]} {
    %c0 = arith.constant 0 : index
    %c0_0 = arith.constant 0 : index
    %0 = vector.load %arg2[%c0, %c0_0] : memref<2x256xf32, #tpu.memory_space<vmem>>, vector<2x256xf32>
    %1 = arith.truncf %0 : vector<2x256xf32> to vector<2x256xbf16>
    %c0_1 = arith.constant 0 : index
    %c0_2 = arith.constant 0 : index
    %2 = vector.load %arg3[%c0_1, %c0_2] : memref<256x128xbf16, #tpu.memory_space<vmem>>, vector<256x128xbf16>
    %cst = arith.constant dense<0.000000e+00> : vector<2x128xf32>
    %3 = tpu.matmul %1, %2, %cst {dimension_numbers = #tpu.dot_dimension_numbers<[1], [0], [0], [1], [0, 0, 1, 1], [], []>} : vector<2x256xbf16>, vector<256x128xbf16>, vector<2x128xf32> -> vector<2x128xf32>
    %c0_3 = arith.constant 0 : index
    %c0_4 = arith.constant 0 : index
    %4 = vector.load %arg4[%c0_3, %c0_4] : memref<1x128xf32, #tpu.memory_space<vmem>>, vector<1x128xf32>
    %5 = vector.broadcast %4 : vector<1x128xf32> to vector<2x128xf32>
    %6 = arith.addf %3, %5 : vector<2x128xf32>
    %cst_5 = arith.constant 0.000000e+00 : f32
    %7 = vector.broadcast %cst_5 : f32 to vector<2x128xf32>
    %8 = arith.cmpf oge, %6, %7 : vector<2x128xf32>
    %cst_6 = arith.constant 0.00999999977 : f32
    %9 = vector.broadcast %cst_6 : f32 to vector<2x128xf32>
    %10 = arith.mulf %9, %6 : vector<2x128xf32>
    %11 = arith.select %8, %6, %10 : vector<2x128xi1>, vector<2x128xf32>
    %c0_7 = arith.constant 0 : index
    %c0_8 = arith.constant 0 : index
    %12 = vector.load %arg5[%c0_7, %c0_8] : memref<2x128xf32, #tpu.memory_space<vmem>>, vector<2x128xf32>
    tpu.vector_store %arg5[%c0_7, %c0_8], %11 {strides = array<i32>} : memref<2x128xf32, #tpu.memory_space<vmem>>, vector<2x128xf32>,
    return
  }
  func.func @transform_0(%arg0: i32, %arg1: i32) -> (i32, i32) {
    %c0_i32 = arith.constant 0 : i32
    %c0_i32_0 = arith.constant 0 : i32
    return %arg0, %c0_i32 : i32, i32
  }
  func.func @transform_1(%arg0: i32, %arg1: i32) -> (i32, i32) {
    %c0_i32 = arith.constant 0 : i32
    %c0_i32_0 = arith.constant 0 : i32
    return %c0_i32, %arg1 : i32, i32
  }
  func.func @transform_2(%arg0: i32, %arg1: i32) -> (i32, i32) {
    %c0_i32 = arith.constant 0 : i32
    %c0_i32_0 = arith.constant 0 : i32
    return %c0_i32, %arg1 : i32, i32
  }
  func.func @transform_3(%arg0: i32, %arg1: i32) -> (i32, i32) {
    %c0_i32 = arith.constant 0 : i32
    return %arg0, %arg1 : i32, i32
  }
}

module attributes {stable_mosaic.version = 11 : i64} {
  func.func @_matmul_kernel(%arg0: i32, %arg1: i32, %arg2: memref<2x256xf32, #tpu.memory_space<vmem>>, %arg3: memref<256x128xbf16, #tpu.memory_space<vmem>>, %arg4: memref<1x128xf32, #tpu.memory_space<vmem>>, %arg5: memref<2x128xf32, #tpu.memory_space<vmem>>) attributes {dimension_semantics = [#tpu.dimension_semantics<parallel>, #tpu.dimension_semantics<parallel>], iteration_bounds = array<i64: 1, 2>, scalar_prefetch = 0 : i64, scratch_operands = 0 : i64, tpu.core_type = #tpu.core_type<tc>, window_params = [{transform_indices = @transform_0, window_bounds = array<i64: 2, 256>}, {transform_indices = @transform_1, window_bounds = array<i64: 256, 128>}, {transform_indices = @transform_2, window_bounds = array<i64: 1, 128>}, {transform_indices = @transform_3, window_bounds = array<i64: 2, 128>}]} {
    %c0 = arith.constant 0 : index
    %c0_0 = arith.constant 0 : index
    %0 = vector.load %arg2[%c0, %c0_0] : memref<2x256xf32, #tpu.memory_space<vmem>>, vector<2x256xf32>
    %1 = arith.truncf %0 : vector<2x256xf32> to vector<2x256xbf16>
    %c0_1 = arith.constant 0 : index
    %c0_2 = arith.constant 0 : index
    %2 = vector.load %arg3[%c0_1, %c0_2] : memref<256x128xbf16, #tpu.memory_space<vmem>>, vector<256x128xbf16>
    %cst = arith.constant dense<0.000000e+00> : vector<2x128xf32>
    %3 = tpu.matmul %1, %2, %cst {dimension_numbers = #tpu.dot_dimension_numbers<[1], [0], [0], [1], [0, 0, 1, 1], [], []>} : vector<2x256xbf16>, vector<256x128xbf16>, vector<2x128xf32> -> vector<2x128xf32>
    %c0_3 = arith.constant 0 : index
    %c0_4 = arith.constant 0 : index
    %4 = vector.load %arg4[%c0_3, %c0_4] : memref<1x128xf32, #tpu.memory_space<vmem>>, vector<1x128xf32>
    %5 = vector.broadcast %4 : vector<1x128xf32> to vector<2x128xf32>
    %6 = arith.addf %3, %5 : vector<2x128xf32>
    %c0_5 = arith.constant 0 : index
    %c0_6 = arith.constant 0 : index
    %7 = vector.load %arg5[%c0_5, %c0_6] : memref<2x128xf32, #tpu.memory_space<vmem>>, vector<2x128xf32>
    tpu.vector_store %arg5[%c0_5, %c0_6], %6 {strides = array<i32>} : memref<2x128xf32, #tpu.memory_space<vmem>>, vector<2x128xf32>,
    return
  }
  func.func @transform_0(%arg0: i32, %arg1: i32) -> (i32, i32) {
    %c0_i32 = arith.constant 0 : i32
    %c0_i32_0 = arith.constant 0 : i32
    return %arg0, %c0_i32 : i32, i32
  }
  func.func @transform_1(%arg0: i32, %arg1: i32) -> (i32, i32) {
    %c0_i32 = arith.constant 0 : i32
    %c0_i32_0 = arith.constant 0 : i32
    return %c0_i32, %arg1 : i32, i32
  }
  func.func @transform_2(%arg0: i32, %arg1: i32) -> (i32, i32) {
    %c0_i32 = arith.constant 0 : i32
    %c0_i32_0 = arith.constant 0 : i32
    return %c0_i32, %arg1 : i32, i32
  }
  func.func @transform_3(%arg0: i32, %arg1: i32) -> (i32, i32) {
    %c0_i32 = arith.constant 0 : i32
    return %arg0, %arg1 : i32, i32
  }
}

</mosaic_0001>

<bundles_post_ra>
// kernel: _lambda_.26
= control target key start
LH: loop header
LB: loop body
LE: loop exit
PB: predicated region body
PF: predicated region fallthrough
CT: control target
= control target key end

     0   :  { %s853_s6 = smov 0   ;;  %s1445_s0 = inlined_call_operand.vmem [shape: bf16[2,256,64], index: 0, kind: input, shape index: {}]   ;;  %s1446_s1 = inlined_call_operand.vmem [shape: bf16[2,256,64], index: 1, kind: output, shape index: {}]  }
   0x1 LB: > { %s669_s7 = sadd.s32 4294967295, %s841_s6   ;;  %p673_p0 = scmp.ge.s32.totalorder %s841_s6, 1  ;;  %s841_s6 = sphi %s853_s6, %s11_s6  }
   0x2   : > { %p87_p1 = scmp.lt.s32.totalorder %s841_s6, 3 }
   0x4   : > { %p88_p2 = pnand %p673_p0, %p87_p1 }
   0x5   : > { %p107_p3 = scmp.lt.s32.totalorder (!%p88_p2), %s669_s7, 1 }
   0x6   : > { %91 = sbr.rel (%p88_p2) target bundleno = 220 (0xdc), region = 24 }
   0xb   : > { %s1448_s7 = smov (!%p107_p3, %s669_s7), 1  ;;  %vm181_vm0 = vcmask 523264   ;;  %vm581_vm1 = vcmask 519168  }
   0xc   : > { %s712_s8 = sshll.u32 %s1448_s7, 7 }
   0xd   : > { %s869_s11 = scalar_lea.vmem %s1445_s0, %s712_s8  ;;  %s1328_s14 = scalar_lea.vmem %s1446_s1, %s712_s8 }
   0xe   : > { %v872_v0 = vld [vmem:[%s869_s11] sm:$0xff]   ;;  %v875_v1 = vld [vmem:[%s869_s11 + $0x8] sm:$0xff]   ;;  %v881_v5 = vld [vmem:[%s869_s11 + $0x10] sm:$0xff]  }
   0xf   : > { %v748_v2 = vunpack.c.l.bf16 %v872_v0  ;;  %v749_v3 = vunpack.c.h.bf16 %v872_v0  ;;  %v752_v4 = vunpack.c.l.bf16 %v875_v1  ;;  %v753_v6 = vunpack.c.h.bf16 %v875_v1  ;;  %v895_v11 = vld [vmem:[%s869_s11 + $0x18] sm:$0xff]   ;;  %v906_v18 = vld [vmem:[%s869_s11 + $0x20] sm:$0xff]   ;;  %v917_v25 = vld [vmem:[%s869_s11 + $0x28] sm:$0xff]  }
  0x10   : > { %v756_v7 = vunpack.c.l.bf16 %v881_v5  ;;  %v757_v13 = vunpack.c.h.bf16 %v881_v5  ;;  %v760_v16 = vunpack.c.l.bf16 %v895_v11  ;;  %v761_v20 = vunpack.c.h.bf16 %v895_v11  ;;  %v928_v32 = vld [vmem:[%s869_s11 + $0x30] sm:$0xff]   ;;  %v939_v39 = vld [vmem:[%s869_s11 + $0x38] sm:$0xff]   ;;  %v950_v46 = vld [vmem:[%s869_s11 + $0x40] sm:$0xff]  }
  0x11   : > { %v182_v8 = vsel %vm181_vm0, %v748_v2, 0.0  ;;  %v183_v9 = vsel %vm181_vm0, %v749_v3, 0.0  ;;  %v185_v10 = vsel %vm181_vm0, %v752_v4, 0.0  ;;  %v187_v14 = vsel %vm181_vm0, %v753_v6, 0.0  ;;  %v961_v53 = vld [vmem:[%s869_s11 + $0x48] sm:$0xff]   ;;  %v972_v60 = vld [vmem:[%s869_s11 + $0x50] sm:$0xff]  }
  0x12   : > { %v184_v12 = vadd.f32 %v183_v9, %v182_v8  ;;  %v189_v17 = vsel %vm181_vm0, %v756_v7, 0.0  ;;  %v191_v21 = vsel %vm181_vm0, %v757_v13, 0.0  ;;  %v764_v23 = vunpack.c.l.bf16 %v906_v18 }
  0x13   : > { %v193_v24 = vsel %vm181_vm0, %v760_v16, 0.0  ;;  %v765_v27 = vunpack.c.h.bf16 %v906_v18  ;;  %v195_v28 = vsel %vm181_vm0, %v761_v20, 0.0  ;;  %v768_v30 = vunpack.c.l.bf16 %v917_v25 }
  0x14   : > { %v186_v15 = vadd.f32 %v185_v10, %v184_v12  ;;  %v197_v31 = vsel %vm181_vm0, %v764_v23, 0.0  ;;  %v769_v34 = vunpack.c.h.bf16 %v917_v25  ;;  %v772_v37 = vunpack.c.l.bf16 %v928_v32  ;;  %v983_v12 = vld [vmem:[%s869_s11 + $0x58] sm:$0xff]  }
  0x15   : > { %v199_v35 = vsel %vm181_vm0, %v765_v27, 0.0  ;;  %v201_v38 = vsel %vm181_vm0, %v768_v30, 0.0  ;;  %v773_v41 = vunpack.c.h.bf16 %v928_v32  ;;  %v776_v44 = vunpack.c.l.bf16 %v939_v39 }
  0x16   : > { %v188_v19 = vadd.f32 %v187_v14, %v186_v15  ;;  %v203_v42 = vsel %vm181_vm0, %v769_v34, 0.0  ;;  %v205_v45 = vsel %vm181_vm0, %v772_v37, 0.0  ;;  %v777_v48 = vunpack.c.h.bf16 %v939_v39 }
  0x17   : > { %v207_v49 = vsel %vm181_vm0, %v773_v41, 0.0  ;;  %v780_v51 = vunpack.c.l.bf16 %v950_v46  ;;  %v209_v52 = vsel %vm181_vm0, %v776_v44, 0.0  ;;  %v781_v55 = vunpack.c.h.bf16 %v950_v46 }
  0x18   : > { %v190_v22 = vadd.f32 %v189_v17, %v188_v19  ;;  %v211_v56 = vsel %vm181_vm0, %v777_v48, 0.0  ;;  %v784_v58 = vunpack.c.l.bf16 %v961_v53  ;;  %v785_v62 = vunpack.c.h.bf16 %v961_v53 }
  0x19   : > { %v213_v59 = vsel %vm181_vm0, %v780_v51, 0.0  ;;  %v215_v63 = vsel %vm181_vm0, %v781_v55, 0.0  ;;  %v788_v9 = vunpack.c.l.bf16 %v972_v60  ;;  %v789_v15 = vunpack.c.h.bf16 %v972_v60 }
  0x1a   : > { %v192_v26 = vadd.f32 %v191_v21, %v190_v22  ;;  %v217_v10 = vsel %vm181_vm0, %v784_v58, 0.0  ;;  %v219_v17 = vsel %vm181_vm0, %v785_v62, 0.0  ;;  %v792_v21 = vunpack.c.l.bf16 %v983_v12 }
  0x1b   : > { %v221_v22 = vsel %vm181_vm0, %v788_v9, 0.0 }
  0x1c   : > { %v194_v29 = vadd.f32 %v193_v24, %v192_v26  ;;  %v994_v24 = vld [vmem:[%s869_s11 + $0x60] sm:$0xff]  }
  0x1e   : > { %v196_v33 = vadd.f32 %v195_v28, %v194_v29  ;;  %v793_v28 = vunpack.c.h.bf16 %v983_v12  ;;  %v223_v29 = vsel %vm181_vm0, %v789_v15, 0.0 }
  0x20   : > { %v198_v36 = vadd.f32 %v197_v31, %v196_v33  ;;  %v796_v33 = vunpack.c.l.bf16 %v994_v24 }
  0x22   : > { %v200_v40 = vadd.f32 %v199_v35, %v198_v36  ;;  %v225_v35 = vsel %vm181_vm0, %v792_v21, 0.0  ;;  %v1005_v36 = vld [vmem:[%s869_s11 + $0x68] sm:$0xff]  }
  0x24   : > { %v202_v43 = vadd.f32 %v201_v38, %v200_v40  ;;  %v797_v40 = vunpack.c.h.bf16 %v994_v24 }
  0x26   : > { %v204_v47 = vadd.f32 %v203_v42, %v202_v43  ;;  %v227_v42 = vsel %vm181_vm0, %v793_v28, 0.0 }
  0x28   : > { %v206_v50 = vadd.f32 %v205_v45, %v204_v47  ;;  %v800_v45 = vunpack.c.l.bf16 %v1005_v36  ;;  %v229_v47 = vsel %vm181_vm0, %v796_v33, 0.0 }
  0x2a   : > { %v208_v54 = vadd.f32 %v207_v49, %v206_v50  ;;  %v1016_v49 = vld [vmem:[%s869_s11 + $0x70] sm:$0xff]  }
  0x2c   : > { %v210_v57 = vadd.f32 %v209_v52, %v208_v54  ;;  %v801_v52 = vunpack.c.h.bf16 %v1005_v36  ;;  %v231_v54 = vsel %vm181_vm0, %v797_v40, 0.0 }
  0x2e   : > { %v212_v61 = vadd.f32 %v211_v56, %v210_v57  ;;  %v804_v57 = vunpack.c.l.bf16 %v1016_v49 }
  0x30   : > { %v214_v8 = vadd.f32 %v213_v59, %v212_v61  ;;  %v233_v59 = vsel %vm181_vm0, %v800_v45, 0.0  ;;  %v1027_v61 = vld [vmem:[%s869_s11 + $0x78] sm:$0xff]  }
  0x32   : > { %v216_v14 = vadd.f32 %v215_v63, %v214_v8  ;;  %v805_v8 = vunpack.c.h.bf16 %v1016_v49 }
  0x34   : > { %v218_v19 = vadd.f32 %v217_v10, %v216_v14  ;;  %v235_v10 = vsel %vm181_vm0, %v801_v52, 0.0 }
  0x36   : > { %v220_v26 = vadd.f32 %v219_v17, %v218_v19  ;;  %v808_v17 = vunpack.c.l.bf16 %v1027_v61  ;;  %v237_v19 = vsel %vm181_vm0, %v804_v57, 0.0 }
  0x38   : > { %v222_v31 = vadd.f32 %v221_v22, %v220_v26  ;;  %v809_v26 = vunpack.c.h.bf16 %v1027_v61 }
  0x3a   : > { %v224_v38 = vadd.f32 %v223_v29, %v222_v31  ;;  %v239_v29 = vsel %vm181_vm0, %v805_v8, 0.0 }
  0x3c   : > { %v226_v43 = vadd.f32 %v225_v35, %v224_v38  ;;  %v241_v35 = vsel %vm181_vm0, %v808_v17, 0.0 }
  0x3e   : > { %v228_v50 = vadd.f32 %v227_v42, %v226_v43  ;;  %v243_v42 = vsel %vm181_vm0, %v809_v26, 0.0 }
  0x40   : > { %v230_v56 = vadd.f32 %v229_v47, %v228_v50 }
  0x42   : > { %v232_v63 = vadd.f32 %v231_v54, %v230_v56 }
  0x44   : > { %v234_v14 = vadd.f32 %v233_v59, %v232_v63 }
  0x46   : > { %v236_v22 = vadd.f32 %v235_v10, %v234_v14 }
  0x48   : > { %v238_v31 = vadd.f32 %v237_v19, %v236_v22 }
  0x4a   : > { %v240_v38 = vadd.f32 %v239_v29, %v238_v31 }
  0x4c   : > { %v242_v43 = vadd.f32 %v241_v35, %v240_v38 }
  0x4e   : > { %v244_v47 = vadd.f32 %v243_v42, %v242_v43 }
  0x50   : > { %v245_v50 = vrot.slane %v244_v47, 4 }
  0x52   : > { %v246_v54 = vadd.f32 %v245_v50, %v244_v47 }
  0x54   : > { %v247_v56 = vrot.slane %v246_v54, 2 }
  0x56   : > { %v248_v59 = vadd.f32 %v247_v56, %v246_v54 }
  0x58   : > { %v249_v63 = vrot.slane %v248_v59, 1 }
  0x5a   : > { %v250_v10 = vadd.f32 %v249_v63, %v248_v59 }
  0x5c   : > { %v1047_v14 = vmul.f32 0.00390625, %v250_v10 }
  0x5e   : > { %v1052_v19 = vsub.f32 %v748_v2, %v1047_v14  ;;  %v1057_v22 = vsub.f32 %v749_v3, %v1047_v14  ;;  %v1062_v29 = vsub.f32 %v752_v4, %v1047_v14  ;;  %v1067_v31 = vsub.f32 %v753_v6, %v1047_v14 }
  0x5f   : > { %v1072_v2 = vsub.f32 %v756_v7, %v1047_v14  ;;  %v1083_v1 = vsub.f32 %v757_v13, %v1047_v14  ;;  %v1090_v7 = vsub.f32 %v760_v16, %v1047_v14  ;;  %v1100_v13 = vsub.f32 %v761_v20, %v1047_v14 }
  0x60   : > { %v285_v0 = vmul.f32 %v1052_v19, %v1052_v19  ;;  %v286_v3 = vmul.f32 %v1057_v22, %v1057_v22  ;;  %v287_v4 = vmul.f32 %v1062_v29, %v1062_v29  ;;  %v288_v6 = vmul.f32 %v1067_v31, %v1067_v31 }
  0x61   : > { %v289_v35 = vmul.f32 %v1072_v2, %v1072_v2  ;;  %v290_v47 = vmul.f32 %v1083_v1, %v1083_v1  ;;  %v1108_v54 = vsub.f32 %v764_v23, %v1047_v14  ;;  %v291_v56 = vmul.f32 %v1090_v7, %v1090_v7 }
  0x62   : > { %v317_v38 = vsel %vm181_vm0, %v285_v0, 0.0  ;;  %v318_v42 = vsel %vm181_vm0, %v286_v3, 0.0  ;;  %v320_v43 = vsel %vm181_vm0, %v287_v4, 0.0  ;;  %v322_v16 = vsel %vm181_vm0, %v288_v6, 0.0 }
  0x63   : > { %v319_v5 = vadd.f32 %v318_v42, %v317_v38  ;;  %v324_v59 = vsel %vm181_vm0, %v289_v35, 0.0  ;;  %v1116_v11 = vsub.f32 %v765_v27, %v1047_v14  ;;  %v292_v20 = vmul.f32 %v1100_v13, %v1100_v13 }
  0x64   : > { %v326_v10 = vsel %vm181_vm0, %v290_v47, 0.0  ;;  %v1124_v23 = vsub.f32 %v768_v30, %v1047_v14  ;;  %v293_v3 = vmul.f32 %v1108_v54, %v1108_v54  ;;  %v328_v4 = vsel %vm181_vm0, %v291_v56, 0.0 }
  0x65   : > { %v321_v50 = vadd.f32 %v320_v43, %v319_v5  ;;  %v1132_v18 = vsub.f32 %v769_v34, %v1047_v14  ;;  %v294_v27 = vmul.f32 %v1116_v11, %v1116_v11  ;;  %v330_v35 = vsel %vm181_vm0, %v292_v20, 0.0 }
  0x66   : > { %v1140_v30 = vsub.f32 %v772_v37, %v1047_v14  ;;  %v295_v42 = vmul.f32 %v1124_v23, %v1124_v23  ;;  %v332_v43 = vsel %vm181_vm0, %v293_v3, 0.0  ;;  %v1148_v25 = vsub.f32 %v773_v41, %v1047_v14 }
  0x67   : > { %v323_v63 = vadd.f32 %v322_v16, %v321_v50  ;;  %v296_v34 = vmul.f32 %v1132_v18, %v1132_v18  ;;  %v334_v47 = vsel %vm181_vm0, %v294_v27, 0.0  ;;  %v1156_v37 = vsub.f32 %v776_v44, %v1047_v14 }
  0x68   : > { %v297_v50 = vmul.f32 %v1140_v30, %v1140_v30  ;;  %v336_v56 = vsel %vm181_vm0, %v295_v42, 0.0  ;;  %v1164_v32 = vsub.f32 %v777_v48, %v1047_v14  ;;  %v298_v41 = vmul.f32 %v1148_v25, %v1148_v25 }
  0x69   : > { %v325_v0 = vadd.f32 %v324_v59, %v323_v63  ;;  %v338_v63 = vsel %vm181_vm0, %v296_v34, 0.0  ;;  %v1172_v44 = vsub.f32 %v780_v51, %v1047_v14  ;;  %v1180_v39 = vsub.f32 %v781_v55, %v1047_v14 }
  0x6a   : > { %v300_v48 = vmul.f32 %v1164_v32, %v1164_v32  ;;  %v1188_v51 = vsub.f32 %v784_v58, %v1047_v14  ;;  %v1196_v46 = vsub.f32 %v785_v62, %v1047_v14  ;;  %v1204_v58 = vsub.f32 %v788_v9, %v1047_v14 }
  0x6b   : > { %v327_v6 = vadd.f32 %v326_v10, %v325_v0  ;;  %v299_v10 = vmul.f32 %v1156_v37, %v1156_v37  ;;  %v340_v0 = vsel %vm181_vm0, %v297_v50, 0.0  ;;  %v301_v27 = vmul.f32 %v1172_v44, %v1172_v44 }
  0x6c   : > { %v302_v55 = vmul.f32 %v1180_v39, %v1180_v39  ;;  %v346_v42 = vsel %vm181_vm0, %v300_v48, 0.0  ;;  %v1212_v53 = vsub.f32 %v789_v15, %v1047_v14  ;;  %v304_v62 = vmul.f32 %v1196_v46, %v1196_v46 }
  0x6d   : > { %v329_v38 = vadd.f32 %v328_v4, %v327_v6  ;;  %v342_v4 = vsel %vm181_vm0, %v298_v41, 0.0  ;;  %v348_v34 = vsel %vm181_vm0, %v301_v27, 0.0  ;;  %v1220_v9 = vsub.f32 %v792_v21, %v1047_v14 }
  0x6e   : > { %v1228_v60 = vsub.f32 %v793_v28, %v1047_v14  ;;  %v306_v15 = vmul.f32 %v1212_v53, %v1212_v53  ;;  %v1236_v21 = vsub.f32 %v796_v33, %v1047_v14  ;;  %v1244_v12 = vsub.f32 %v797_v40, %v1047_v14 }
  0x6f   : > { %v331_v5 = vadd.f32 %v330_v35, %v329_v38  ;;  %v344_v35 = vsel %vm181_vm0, %v299_v10, 0.0  ;;  %v307_v10 = vmul.f32 %v1220_v9, %v1220_v9  ;;  %v1252_v33 = vsub.f32 %v800_v45, %v1047_v14 }
  0x70   : > { %v308_v28 = vmul.f32 %v1228_v60, %v1228_v60  ;;  %v358_v48 = vsel %vm181_vm0, %v306_v15, 0.0  ;;  %v1260_v24 = vsub.f32 %v801_v52, %v1047_v14  ;;  %v310_v40 = vmul.f32 %v1244_v12, %v1244_v12 }
  0x71   : > { %v333_v16 = vadd.f32 %v332_v43, %v331_v5  ;;  %v303_v5 = vmul.f32 %v1188_v51, %v1188_v51  ;;  %v360_v27 = vsel %vm181_vm0, %v307_v10, 0.0  ;;  %v1268_v45 = vsub.f32 %v804_v57, %v1047_v14 }
  0x72   : > { %v1276_v36 = vsub.f32 %v805_v8, %v1047_v14  ;;  %v312_v52 = vmul.f32 %v1260_v24, %v1260_v24  ;;  %v1284_v57 = vsub.f32 %v808_v17, %v1047_v14  ;;  %v1292_v49 = vsub.f32 %v809_v26, %v1047_v14 }
  0x73   : > { %v335_v59 = vadd.f32 %v334_v47, %v333_v16  ;;  %v350_v16 = vsel %vm181_vm0, %v302_v55, 0.0 }
  0x74   : > { %v314_v8 = vmul.f32 %v1276_v36, %v1276_v36  ;;  %v315_v17 = vmul.f32 %v1284_v57, %v1284_v57 }
  0x75   : > { %v337_v20 = vadd.f32 %v336_v56, %v335_v59  ;;  %v305_v56 = vmul.f32 %v1204_v58, %v1204_v58  ;;  %v352_v59 = vsel %vm181_vm0, %v303_v5, 0.0 }
  0x76   : > { %v376_v26 = vsel %vm181_vm0, %v315_v17, 0.0 }
  0x77   : > { %v339_v3 = vadd.f32 %v338_v63, %v337_v20  ;;  %v354_v63 = vsel %vm181_vm0, %v304_v62, 0.0  ;;  %v313_v62 = vmul.f32 %v1268_v45, %v1268_v45 }
  0x79   : > { %v341_v6 = vadd.f32 %v340_v0, %v339_v3  ;;  %v356_v0 = vsel %vm181_vm0, %v305_v56, 0.0  ;;  %v370_v56 = vsel %vm181_vm0, %v312_v52, 0.0 }
  0x7b   : > { %v343_v38 = vadd.f32 %v342_v4, %v341_v6  ;;  %v309_v6 = vmul.f32 %v1236_v21, %v1236_v21 }
  0x7d   : > { %v345_v43 = vadd.f32 %v344_v35, %v343_v38  ;;  %v362_v38 = vsel %vm181_vm0, %v308_v28, 0.0 }
  0x7f   : > { %v347_v47 = vadd.f32 %v346_v42, %v345_v43  ;;  %v311_v42 = vmul.f32 %v1252_v33, %v1252_v33  ;;  %v364_v43 = vsel %vm181_vm0, %v309_v6, 0.0 }
  0x81   : > { %v349_v50 = vadd.f32 %v348_v34, %v347_v47  ;;  %v366_v34 = vsel %vm181_vm0, %v310_v40, 0.0 }
  0x83   : > { %v351_v41 = vadd.f32 %v350_v16, %v349_v50  ;;  %v368_v16 = vsel %vm181_vm0, %v311_v42, 0.0 }
  0x85   : > { %v353_v20 = vadd.f32 %v352_v59, %v351_v41  ;;  %v372_v41 = vsel %vm181_vm0, %v313_v62, 0.0 }
  0x87   : > { %v355_v3 = vadd.f32 %v354_v63, %v353_v20  ;;  %v316_v63 = vmul.f32 %v1292_v49, %v1292_v49  ;;  %v374_v20 = vsel %vm181_vm0, %v314_v8, 0.0 }
  0x89   : > { %v357_v4 = vadd.f32 %v356_v0, %v355_v3  ;;  %v378_v10 = vsel %vm181_vm0, %v316_v63, 0.0 }
  0x8b   : > { %v359_v35 = vadd.f32 %v358_v48, %v357_v4 }
  0x8d   : > { %v361_v55 = vadd.f32 %v360_v27, %v359_v35 }
  0x8f   : > { %v363_v5 = vadd.f32 %v362_v38, %v361_v55 }
  0x91   : > { %v365_v47 = vadd.f32 %v364_v43, %v363_v5 }
  0x93   : > { %v367_v50 = vadd.f32 %v366_v34, %v365_v47 }
  0x95   : > { %v369_v59 = vadd.f32 %v368_v16, %v367_v50 }
  0x97   : > { %v371_v15 = vadd.f32 %v370_v56, %v369_v59 }
  0x99   : > { %v373_v61 = vadd.f32 %v372_v41, %v371_v15 }
  0x9b   : > { %v375_v14 = vadd.f32 %v374_v20, %v373_v61 }
  0x9d   : > { %v377_v0 = vadd.f32 %v376_v26, %v375_v14 }
  0x9f   : > { %v379_v3 = vadd.f32 %v378_v10, %v377_v0 }
  0xa1   : > { %v380_v28 = vrot.slane %v379_v3, 4 }
  0xa3   : > { %v381_v48 = vadd.f32 %v380_v28, %v379_v3 }
  0xa5   : > { %v382_v4 = vrot.slane %v381_v48, 2 }
  0xa7   : > { %v383_v6 = vadd.f32 %v382_v4, %v381_v48 }
  0xa9   : > { %v384_v27 = vrot.slane %v383_v6, 1 }
  0xab   : > { %v385_v35 = vadd.f32 %v384_v27, %v383_v6 }
  0xad   : > { %v386_v40 = vmul.f32 0.00390625, %v385_v35 }
  0xaf   : > { %v387_v38 = vadd.f32 1e-05, %v386_v40 }
  0xb1   : > { %833 = vrsqrt.f32 %v387_v38 }
  0xbe   : > { %v1305_v55 = vpop.eup %833 }
  0xbf   : > { %v389_v42 = vmul.f32 %v1305_v55, %v1052_v19  ;;  %v390_v43 = vmul.f32 %v1305_v55, %v1057_v22  ;;  %v391_v5 = vmul.f32 %v1305_v55, %v1062_v29  ;;  %v392_v52 = vmul.f32 %v1305_v55, %v1067_v31 }
  0xc0   : > { %v393_v34 = vmul.f32 %v1305_v55, %v1072_v2  ;;  %v394_v47 = vmul.f32 %v1305_v55, %v1083_v1  ;;  %v395_v62 = vmul.f32 %v1305_v55, %v1090_v7  ;;  %v396_v19 = vmul.f32 %v1305_v55, %v1100_v13 }
  0xc1   : > { %v421_v16 = vmax.f32 %v389_v42, 0.0  ;;  %v422_v22 = vmax.f32 %v390_v43, 0.0  ;;  %v423_v50 = vmax.f32 %v391_v5, 0.0  ;;  %v424_v8 = vmax.f32 %v392_v52, 0.0 }
  0xc2   : > { %v425_v29 = vmax.f32 %v393_v34, 0.0  ;;  %v426_v31 = vmax.f32 %v394_v47, 0.0  ;;  %v427_v2 = vmax.f32 %v395_v62, 0.0  ;;  %v428_v1 = vmax.f32 %v396_v19, 0.0 }
  0xc3   : > { %v714_v7 = vpack.c.bf16 %v421_v16, %v421_v16  ;;  %v715_v13 = vpack.c.bf16 %v422_v22, %v422_v22  ;;  %v716_v56 = vpack.c.bf16 %v423_v50, %v423_v50  ;;  %v717_v59 = vpack.c.bf16 %v424_v8, %v424_v8 }
  0xc4   : > { %v718_v17 = vpack.c.bf16 %v425_v29, %v425_v29  ;;  %v719_v41 = vpack.c.bf16 %v426_v31, %v426_v31  ;;  %v720_v15 = vpack.c.bf16 %v427_v2, %v427_v2  ;;  %v721_v63 = vpack.c.bf16 %v428_v1, %v428_v1 }
  0xc5   : > { %582 = vst.msk [vmem:[%s1328_s14] sm:$0xf] %vm581_vm1, %v714_v7  ;;  %583 = vst.msk [vmem:[%s1328_s14 + $0x4] sm:$0xf] %vm581_vm1, %v715_v13  ;;  %v397_v20 = vmul.f32 %v1305_v55, %v1108_v54  ;;  %v398_v61 = vmul.f32 %v1305_v55, %v1116_v11  ;;  %v399_v26 = vmul.f32 %v1305_v55, %v1124_v23 }
  0xc6   : > { %584 = vst.msk [vmem:[%s1328_s14 + $0x8] sm:$0xf] %vm581_vm1, %v716_v56  ;;  %585 = vst.msk [vmem:[%s1328_s14 + $0xc] sm:$0xf] %vm581_vm1, %v717_v59  ;;  %v400_v14 = vmul.f32 %v1305_v55, %v1132_v18  ;;  %v401_v54 = vmul.f32 %v1305_v55, %v1140_v30  ;;  %v402_v11 = vmul.f32 %v1305_v55, %v1148_v25 }
  0xc7   : > { %586 = vst.msk [vmem:[%s1328_s14 + $0x10] sm:$0xf] %vm581_vm1, %v718_v17  ;;  %587 = vst.msk [vmem:[%s1328_s14 + $0x14] sm:$0xf] %vm581_vm1, %v719_v41  ;;  %v403_v23 = vmul.f32 %v1305_v55, %v1156_v37  ;;  %v404_v18 = vmul.f32 %v1305_v55, %v1164_v32  ;;  %v429_v10 = vmax.f32 %v397_v20, 0.0  ;;  %v430_v0 = vmax.f32 %v398_v61, 0.0 }
  0xc8   : > { %588 = vst.msk [vmem:[%s1328_s14 + $0x18] sm:$0xf] %vm581_vm1, %v720_v15  ;;  %589 = vst.msk [vmem:[%s1328_s14 + $0x1c] sm:$0xf] %vm581_vm1, %v721_v63  ;;  %v431_v3 = vmax.f32 %v399_v26, 0.0  ;;  %v432_v28 = vmax.f32 %v400_v14, 0.0  ;;  %v405_v43 = vmul.f32 %v1305_v55, %v1172_v44  ;;  %v406_v5 = vmul.f32 %v1305_v55, %v1180_v39 }
  0xc9   : > { %v433_v48 = vmax.f32 %v401_v54, 0.0  ;;  %v434_v4 = vmax.f32 %v402_v11, 0.0  ;;  %v435_v30 = vmax.f32 %v403_v23, 0.0  ;;  %v436_v6 = vmax.f32 %v404_v18, 0.0 }
  0xca   : > { %v722_v27 = vpack.c.bf16 %v429_v10, %v429_v10  ;;  %v723_v25 = vpack.c.bf16 %v430_v0, %v430_v0  ;;  %v724_v37 = vpack.c.bf16 %v431_v3, %v431_v3  ;;  %v725_v35 = vpack.c.bf16 %v432_v28, %v432_v28 }
  0xcb   : > { %v726_v32 = vpack.c.bf16 %v433_v48, %v433_v48  ;;  %v727_v40 = vpack.c.bf16 %v434_v4, %v434_v4  ;;  %v728_v38 = vpack.c.bf16 %v435_v30, %v435_v30  ;;  %v729_v42 = vpack.c.bf16 %v436_v6, %v436_v6 }
  0xcc   : > { %590 = vst.msk [vmem:[%s1328_s14 + $0x20] sm:$0xf] %vm581_vm1, %v722_v27  ;;  %591 = vst.msk [vmem:[%s1328_s14 + $0x24] sm:$0xf] %vm581_vm1, %v723_v25  ;;  %v407_v52 = vmul.f32 %v1305_v55, %v1188_v51  ;;  %v408_v34 = vmul.f32 %v1305_v55, %v1196_v46  ;;  %v409_v44 = vmul.f32 %v1305_v55, %v1204_v58  ;;  %v437_v47 = vmax.f32 %v405_v43, 0.0 }
  0xcd   : > { %592 = vst.msk [vmem:[%s1328_s14 + $0x28] sm:$0xf] %vm581_vm1, %v724_v37  ;;  %593 = vst.msk [vmem:[%s1328_s14 + $0x2c] sm:$0xf] %vm581_vm1, %v725_v35  ;;  %v410_v39 = vmul.f32 %v1305_v55, %v1212_v53  ;;  %v411_v51 = vmul.f32 %v1305_v55, %v1220_v9  ;;  %v412_v46 = vmul.f32 %v1305_v55, %v1228_v60  ;;  %v438_v62 = vmax.f32 %v406_v5, 0.0 }
  0xce   : > { %594 = vst.msk [vmem:[%s1328_s14 + $0x30] sm:$0xf] %vm581_vm1, %v726_v32  ;;  %595 = vst.msk [vmem:[%s1328_s14 + $0x34] sm:$0xf] %vm581_vm1, %v727_v40  ;;  %v439_v19 = vmax.f32 %v407_v52, 0.0  ;;  %v440_v16 = vmax.f32 %v408_v34, 0.0  ;;  %v730_v29 = vpack.c.bf16 %v437_v47, %v437_v47  ;;  %v413_v13 = vmul.f32 %v1305_v55, %v1236_v21 }
  0xcf   : > { %596 = vst.msk [vmem:[%s1328_s14 + $0x38] sm:$0xf] %vm581_vm1, %v728_v38  ;;  %597 = vst.msk [vmem:[%s1328_s14 + $0x3c] sm:$0xf] %vm581_vm1, %v729_v42  ;;  %v441_v22 = vmax.f32 %v409_v44, 0.0  ;;  %v442_v50 = vmax.f32 %v410_v39, 0.0  ;;  %v731_v53 = vpack.c.bf16 %v438_v62, %v438_v62  ;;  %v414_v56 = vmul.f32 %v1305_v55, %v1244_v12 }
  0xd0   : > { %v443_v58 = vmax.f32 %v411_v51, 0.0  ;;  %v444_v8 = vmax.f32 %v412_v46, 0.0  ;;  %v732_v9 = vpack.c.bf16 %v439_v19, %v439_v19  ;;  %v733_v31 = vpack.c.bf16 %v440_v16, %v440_v16  ;;  %598 = vst.msk [vmem:[%s1328_s14 + $0x40] sm:$0xf] %vm581_vm1, %v730_v29 }
  0xd1   : > { %v734_v60 = vpack.c.bf16 %v441_v22, %v441_v22  ;;  %v735_v2 = vpack.c.bf16 %v442_v50, %v442_v50  ;;  %599 = vst.msk [vmem:[%s1328_s14 + $0x44] sm:$0xf] %vm581_vm1, %v731_v53  ;;  %v415_v59 = vmul.f32 %v1305_v55, %v1252_v33  ;;  %v416_v17 = vmul.f32 %v1305_v55, %v1260_v24 }
  0xd2   : > { %v736_v1 = vpack.c.bf16 %v443_v58, %v443_v58  ;;  %v737_v7 = vpack.c.bf16 %v444_v8, %v444_v8  ;;  %600 = vst.msk [vmem:[%s1328_s14 + $0x48] sm:$0xf] %vm581_vm1, %v732_v9  ;;  %601 = vst.msk [vmem:[%s1328_s14 + $0x4c] sm:$0xf] %vm581_vm1, %v733_v31  ;;  %v417_v21 = vmul.f32 %v1305_v55, %v1268_v45  ;;  %v445_v41 = vmax.f32 %v413_v13, 0.0 }
  0xd3   : > { %602 = vst.msk [vmem:[%s1328_s14 + $0x50] sm:$0xf] %vm581_vm1, %v734_v60  ;;  %603 = vst.msk [vmem:[%s1328_s14 + $0x54] sm:$0xf] %vm581_vm1, %v735_v2  ;;  %v418_v12 = vmul.f32 %v1305_v55, %v1276_v36  ;;  %v419_v33 = vmul.f32 %v1305_v55, %v1284_v57  ;;  %v420_v24 = vmul.f32 %v1305_v55, %v1292_v49  ;;  %v446_v15 = vmax.f32 %v414_v56, 0.0 }
  0xd4   : > { %604 = vst.msk [vmem:[%s1328_s14 + $0x58] sm:$0xf] %vm581_vm1, %v736_v1  ;;  %605 = vst.msk [vmem:[%s1328_s14 + $0x5c] sm:$0xf] %vm581_vm1, %v737_v7  ;;  %v447_v63 = vmax.f32 %v415_v59, 0.0  ;;  %v448_v20 = vmax.f32 %v416_v17, 0.0  ;;  %v738_v57 = vpack.c.bf16 %v445_v41, %v445_v41 }
  0xd5   : > { %v449_v61 = vmax.f32 %v417_v21, 0.0  ;;  %v450_v45 = vmax.f32 %v418_v12, 0.0  ;;  %v451_v26 = vmax.f32 %v419_v33, 0.0  ;;  %v452_v36 = vmax.f32 %v420_v24, 0.0 }
  0xd6   : > { %v739_v14 = vpack.c.bf16 %v446_v15, %v446_v15  ;;  %v740_v54 = vpack.c.bf16 %v447_v63, %v447_v63  ;;  %v741_v49 = vpack.c.bf16 %v448_v20, %v448_v20  ;;  %606 = vst.msk [vmem:[%s1328_s14 + $0x60] sm:$0xf] %vm581_vm1, %v738_v57 }
  0xd7   : > { %v742_v55 = vpack.c.bf16 %v449_v61, %v449_v61  ;;  %v743_v11 = vpack.c.bf16 %v450_v45, %v450_v45  ;;  %v744_v23 = vpack.c.bf16 %v451_v26, %v451_v26  ;;  %v745_v18 = vpack.c.bf16 %v452_v36, %v452_v36 }
  0xd8   : > { %607 = vst.msk [vmem:[%s1328_s14 + $0x64] sm:$0xf] %vm581_vm1, %v739_v14  ;;  %608 = vst.msk [vmem:[%s1328_s14 + $0x68] sm:$0xf] %vm581_vm1, %v740_v54 }
  0xd9   : > { %609 = vst.msk [vmem:[%s1328_s14 + $0x6c] sm:$0xf] %vm581_vm1, %v741_v49  ;;  %610 = vst.msk [vmem:[%s1328_s14 + $0x70] sm:$0xf] %vm581_vm1, %v742_v55 }
  0xda   : > { %611 = vst.msk [vmem:[%s1328_s14 + $0x74] sm:$0xf] %vm581_vm1, %v743_v11  ;;  %612 = vst.msk [vmem:[%s1328_s14 + $0x78] sm:$0xf] %vm581_vm1, %v744_v23 }
  0xdb   : > { %613 = vst.msk [vmem:[%s1328_s14 + $0x7c] sm:$0xf] %vm581_vm1, %v745_v18 }
  0xdc PF: > { %s11_s6 = sadd.s32 1, %s841_s6  }
  0xdd   : > { %p8_p4 = scmp.ge.s32.totalorder %s11_s6, 4  }
  0xdf   :  { %10 = sbr.rel (!%p8_p4) target bundleno = 1 (0x1), region = 54 }

// kernel: _lambda_.25
= control target key start
LH: loop header
LB: loop body
LE: loop exit
PB: predicated region body
PF: predicated region fallthrough
CT: control target
= control target key end

     0   :  { %s1124_s12 = smov 0   ;;  %s1126_s13 = smov 0   ;;  %s1313_s0 = inlined_call_operand.vmem [shape: bf16[512,49], index: 0, kind: input, shape index: {}]   ;;  %s1314_s1 = inlined_call_operand.vmem [shape: bf16[49,64], index: 1, kind: input, shape index: {}]   ;;  %s1315_s2 = inlined_call_operand.vmem [shape: f32[1,64], index: 2, kind: input, shape index: {}]   ;;  %s1316_s3 = inlined_call_operand.vmem [shape: bf16[512,64], index: 3, kind: output, shape index: {}]  }
   0x1   :  { %s1128_s14 = smov 0  }
   0x2 LB: > { %s25_s15 = sadd.s32 1, %s1097_s13  ;;  %p858_p0 = scmp.ge.s32.totalorder %s1101_s14, 1  ;;  %s1101_s14 = sphi %s1128_s14, %s13_s14   ;;  %s1097_s13 = sphi %s1126_s13, %s1318_s13   ;;  %s1093_s12 = sphi %s1124_s12, %s1317_s12  }
   0x3   : > { %p27_p1 = scmp.ge.s32.totalorder %s25_s15, 2  ;;  %p169_p2 = scmp.lt.s32.totalorder %s1101_s14, 3 }
   0x5   : > { %s1320_s15 = smov (%p27_p1, %s25_s15), 0  ;;  %p170_p3 = pnand %p858_p0, %p169_p2 }
   0x6   : > { %s859_s20 = sshll.u32 (!%p170_p3), %s1093_s12, 5 }
   0x7   : > { %173 = sbr.rel (%p170_p3) target bundleno = 260 (0x104), region = 32  ;;  %p204_p4 = scmp.lt.s32.totalorder (!%p170_p3), %s859_s20, 63 }
   0xc   : > { %v1059_v0 = vld [vmem:[%s1314_s1 + $0x18] ss:$0 sps:$4 sm:$0x11]   ;;  %vm422_vm0 = vcmask 1040384   ;;  %v1103_v1 = vmov 0   ;;  %v1060_v4 = vld [vmem:[%s1314_s1 + $0x10] sm:$0xff]  }
   0xd   : > { %v424_v2 = vsel %vm422_vm0, 65535, %v1103_v1  ;;  %s1322_s20 = smov (!%p204_p4, %s859_s20), 63  ;;  %v1061_v5 = vld [vmem:[%s1314_s1 + $0x8] sm:$0xff]   ;;  %v1062_v6 = vld [vmem:[%s1314_s1] sm:$0xff]   ;;  %vm373_vm1 = vcmask 400384   ;;  %vm717_vm2 = vcmask 519168  }
   0xe   : > { %v426_v3 = vand.u32 %v1059_v0, %v424_v2  ;;  %s860_s23 = sshll.u32 %s1322_s20, 2  ;;  %v1199_v23 = vld [vmem:[%s1315_s2] ss:$0 sm:$0xff] }
   0xf   : > { %s1162_s28 = scalar_lea.vmem %s1313_s0, %s860_s23  ;;  %s1208_s6 = scalar_lea.vmem %s1316_s3, %s860_s23 }
  0x10   : > { %986 = vmatprep.subr.bf16.mxu0 %v426_v3  ;;  %1026 = vmatprep.subr.bf16.mxu1 %v426_v3  ;;  %v1063_v7 = vld [vmem:[%s1162_s28] sm:$0xff]   ;;  %v1065_v9 = vld [vmem:[%s1162_s28 + $0x8] sm:$0xff]   ;;  %v1067_v11 = vld [vmem:[%s1162_s28 + $0x10] sm:$0xff]  }
  0x11   : > { %987 = vmatpush3.bf16.msra.mxu0 %v426_v3  ;;  %1030 = vmatpush3.bf16.msra.mxu1 %v426_v3  ;;  %v1064_v8 = vld [vmem:[%s1162_s28 + $0x40] sm:$0xff]   ;;  %v1066_v10 = vld [vmem:[%s1162_s28 + $0x48] sm:$0xff]   ;;  %v1068_v12 = vld [vmem:[%s1162_s28 + $0x50] sm:$0xff]  }
  0x12   : > { %988 = vmatprep.subr.bf16.mxu0 %v1060_v4  ;;  %1027 = vmatprep.subr.bf16.mxu1 %v1060_v4  ;;  %v1069_v13 = vld [vmem:[%s1162_s28 + $0x18] sm:$0xff]   ;;  %v1071_v15 = vld [vmem:[%s1162_s28 + $0x20] sm:$0xff]   ;;  %v1073_v17 = vld [vmem:[%s1162_s28 + $0x28] sm:$0xff]  }
  0x13   : > { %994 = vmatprep.mubr.msk.bf16.mxu0 %vm373_vm1, %v1063_v7  ;;  %1010 = vmatprep.mubr.msk.bf16.mxu1 %vm373_vm1, %v1064_v8  ;;  %v1070_v14 = vld [vmem:[%s1162_s28 + $0x58] sm:$0xff]   ;;  %v1072_v16 = vld [vmem:[%s1162_s28 + $0x60] sm:$0xff]   ;;  %v1074_v18 = vld [vmem:[%s1162_s28 + $0x68] sm:$0xff]  }
  0x14   : > { %v1075_v19 = vld [vmem:[%s1162_s28 + $0x30] sm:$0xff]   ;;  %v1077_v21 = vld [vmem:[%s1162_s28 + $0x38] sm:$0xff]  }
  0x15   : > { %989 = vmatpush3.bf16.msra.mxu0 %v1060_v4  ;;  %1031 = vmatpush3.bf16.msra.mxu1 %v1060_v4  ;;  %v1076_v20 = vld [vmem:[%s1162_s28 + $0x70] sm:$0xff]   ;;  %v1078_v22 = vld [vmem:[%s1162_s28 + $0x78] sm:$0xff]  }
  0x16   : > { %990 = vmatprep.subr.bf16.mxu0 %v1061_v5  ;;  %1028 = vmatprep.subr.bf16.mxu1 %v1061_v5 }
  0x19   : > { %991 = vmatpush3.bf16.msra.mxu0 %v1061_v5  ;;  %1032 = vmatpush3.bf16.msra.mxu1 %v1061_v5 }
  0x1a   : > { %992 = vmatprep.subr.bf16.mxu0 %v1062_v6  ;;  %1029 = vmatprep.subr.bf16.mxu1 %v1062_v6 }
  0x1d   : > { %993 = vmatpush3.bf16.msra.mxu0 %v1062_v6  ;;  %1033 = vmatpush3.bf16.msra.mxu1 %v1062_v6 }
  0x20   : > { %995 = vmatmul.mubr.msk.bf16.vlgmr.msra.gmra.mxu0 %vm373_vm1, %v1065_v9  ;;  %1011 = vmatmul.mubr.msk.bf16.vlgmr.msra.gmra.mxu1 %vm373_vm1, %v1066_v10 }
  0x21   : > { %998 = vmatprep.mubr.msk.bf16.mxu0 %vm373_vm1, %v1067_v11  ;;  %1014 = vmatprep.mubr.msk.bf16.mxu1 %vm373_vm1, %v1068_v12 }
  0x28   : > { %999 = vmatmul.mubr.msk.bf16.gmra.mxu0 %vm373_vm1, %v1069_v13  ;;  %1015 = vmatmul.mubr.msk.bf16.gmra.mxu1 %vm373_vm1, %v1070_v14 }
  0x29   : > { %1002 = vmatprep.mubr.msk.bf16.mxu0 %vm373_vm1, %v1071_v15  ;;  %1018 = vmatprep.mubr.msk.bf16.mxu1 %vm373_vm1, %v1072_v16 }
  0x30   : > { %1003 = vmatmul.mubr.msk.bf16.gmra.mxu0 %vm373_vm1, %v1073_v17  ;;  %1019 = vmatmul.mubr.msk.bf16.gmra.mxu1 %vm373_vm1, %v1074_v18 }
  0x31   : > { %1006 = vmatprep.mubr.msk.bf16.mxu0 %vm373_vm1, %v1075_v19  ;;  %1022 = vmatprep.mubr.msk.bf16.mxu1 %vm373_vm1, %v1076_v20 }
  0x38   : > { %1007 = vmatmul.mubr.msk.bf16.gmra.mxu0 %vm373_vm1, %v1077_v21  ;;  %1023 = vmatmul.mubr.msk.bf16.gmra.mxu1 %vm373_vm1, %v1078_v22 }
  0xe0   : > { %v996_v24 = vpop.f32.mrf.mxu0  ;;  %v1012_v25 = vpop.f32.mrf.mxu1 }
  0xe1   : > { %v471_v26 = vadd.f32 %v996_v24, %v1199_v23  ;;  %v535_v27 = vadd.f32 %v1012_v25, %v1199_v23 }
  0xe2   : > { %v462_v28 = vpop.f32.mrf.mxu0  ;;  %v526_v29 = vpop.f32.mrf.mxu1 }
  0xe3   : > { %v936_v30 = vpack.c.bf16 %v471_v26, %v471_v26  ;;  %v952_v31 = vpack.c.bf16 %v535_v27, %v535_v27  ;;  %v463_v32 = vadd.f32 %v1199_v23, %v462_v28  ;;  %v527_v33 = vadd.f32 %v1199_v23, %v526_v29 }
  0xe4   : > { %v997_v34 = vpop.f32.mrf.mxu0  ;;  %v1013_v35 = vpop.f32.mrf.mxu1 }
  0xe5   : > { %720 = vst.msk [vmem:[%s1208_s6 + $0x8] sm:$0xf] %vm717_vm2, %v936_v30  ;;  %736 = vst.msk [vmem:[%s1208_s6 + $0x48] sm:$0xf] %vm717_vm2, %v952_v31  ;;  %v934_v36 = vpack.c.bf16 %v463_v32, %v463_v32  ;;  %v950_v37 = vpack.c.bf16 %v527_v33, %v527_v33  ;;  %v474_v38 = vadd.f32 %v997_v34, %v1199_v23 }
  0xe6   : > { %v538_v39 = vadd.f32 %v1013_v35, %v1199_v23  ;;  %v465_v40 = vpop.f32.mrf.mxu0  ;;  %v529_v41 = vpop.f32.mrf.mxu1 }
  0xe7   : > { %718 = vst.msk [vmem:[%s1208_s6] sm:$0xf] %vm717_vm2, %v934_v36  ;;  %734 = vst.msk [vmem:[%s1208_s6 + $0x40] sm:$0xf] %vm717_vm2, %v950_v37  ;;  %v937_v42 = vpack.c.bf16 %v474_v38, %v474_v38  ;;  %v466_v44 = vadd.f32 %v1199_v23, %v465_v40  ;;  %v530_v45 = vadd.f32 %v1199_v23, %v529_v41 }
  0xe8   : > { %v953_v43 = vpack.c.bf16 %v538_v39, %v538_v39  ;;  %v1000_v46 = vpop.f32.mrf.mxu0  ;;  %v1016_v47 = vpop.f32.mrf.mxu1 }
  0xe9   : > { %721 = vst.msk [vmem:[%s1208_s6 + $0xc] sm:$0xf] %vm717_vm2, %v937_v42  ;;  %v935_v48 = vpack.c.bf16 %v466_v44, %v466_v44  ;;  %v951_v49 = vpack.c.bf16 %v530_v45, %v530_v45  ;;  %v487_v50 = vadd.f32 %v1000_v46, %v1199_v23  ;;  %v551_v51 = vadd.f32 %v1016_v47, %v1199_v23 }
  0xea   : > { %737 = vst.msk [vmem:[%s1208_s6 + $0x4c] sm:$0xf] %vm717_vm2, %v953_v43  ;;  %v478_v52 = vpop.f32.mrf.mxu0  ;;  %v542_v53 = vpop.f32.mrf.mxu1 }
  0xeb   : > { %719 = vst.msk [vmem:[%s1208_s6 + $0x4] sm:$0xf] %vm717_vm2, %v935_v48  ;;  %735 = vst.msk [vmem:[%s1208_s6 + $0x44] sm:$0xf] %vm717_vm2, %v951_v49  ;;  %v940_v54 = vpack.c.bf16 %v487_v50, %v487_v50  ;;  %v956_v55 = vpack.c.bf16 %v551_v51, %v551_v51  ;;  %v479_v56 = vadd.f32 %v1199_v23, %v478_v52 }
  0xec   : > { %v543_v57 = vadd.f32 %v1199_v23, %v542_v53  ;;  %v1001_v58 = vpop.f32.mrf.mxu0  ;;  %v1017_v59 = vpop.f32.mrf.mxu1 }
  0xed   : > { %724 = vst.msk [vmem:[%s1208_s6 + $0x18] sm:$0xf] %vm717_vm2, %v940_v54  ;;  %740 = vst.msk [vmem:[%s1208_s6 + $0x58] sm:$0xf] %vm717_vm2, %v956_v55  ;;  %v938_v60 = vpack.c.bf16 %v479_v56, %v479_v56  ;;  %v490_v62 = vadd.f32 %v1001_v58, %v1199_v23  ;;  %v554_v63 = vadd.f32 %v1017_v59, %v1199_v23 }
  0xee   : > { %v954_v61 = vpack.c.bf16 %v543_v57, %v543_v57  ;;  %v481_v0 = vpop.f32.mrf.mxu0  ;;  %v545_v1 = vpop.f32.mrf.mxu1 }
  0xef   : > { %722 = vst.msk [vmem:[%s1208_s6 + $0x10] sm:$0xf] %vm717_vm2, %v938_v60  ;;  %v941_v2 = vpack.c.bf16 %v490_v62, %v490_v62  ;;  %v957_v3 = vpack.c.bf16 %v554_v63, %v554_v63  ;;  %v482_v4 = vadd.f32 %v1199_v23, %v481_v0  ;;  %v546_v5 = vadd.f32 %v1199_v23, %v545_v1 }
  0xf0   : > { %738 = vst.msk [vmem:[%s1208_s6 + $0x50] sm:$0xf] %vm717_vm2, %v954_v61  ;;  %v1004_v6 = vpop.f32.mrf.mxu0  ;;  %v1020_v7 = vpop.f32.mrf.mxu1 }
  0xf1   : > { %725 = vst.msk [vmem:[%s1208_s6 + $0x1c] sm:$0xf] %vm717_vm2, %v941_v2  ;;  %741 = vst.msk [vmem:[%s1208_s6 + $0x5c] sm:$0xf] %vm717_vm2, %v957_v3  ;;  %v939_v8 = vpack.c.bf16 %v482_v4, %v482_v4  ;;  %v955_v9 = vpack.c.bf16 %v546_v5, %v546_v5  ;;  %v503_v10 = vadd.f32 %v1004_v6, %v1199_v23 }
  0xf2   : > { %v567_v11 = vadd.f32 %v1020_v7, %v1199_v23  ;;  %v494_v12 = vpop.f32.mrf.mxu0  ;;  %v558_v13 = vpop.f32.mrf.mxu1 }
  0xf3   : > { %723 = vst.msk [vmem:[%s1208_s6 + $0x14] sm:$0xf] %vm717_vm2, %v939_v8  ;;  %739 = vst.msk [vmem:[%s1208_s6 + $0x54] sm:$0xf] %vm717_vm2, %v955_v9  ;;  %v944_v14 = vpack.c.bf16 %v503_v10, %v503_v10  ;;  %v495_v16 = vadd.f32 %v1199_v23, %v494_v12  ;;  %v559_v17 = vadd.f32 %v1199_v23, %v558_v13 }
  0xf4   : > { %v960_v15 = vpack.c.bf16 %v567_v11, %v567_v11  ;;  %v1005_v18 = vpop.f32.mrf.mxu0  ;;  %v1021_v19 = vpop.f32.mrf.mxu1 }
  0xf5   : > { %728 = vst.msk [vmem:[%s1208_s6 + $0x28] sm:$0xf] %vm717_vm2, %v944_v14  ;;  %v942_v20 = vpack.c.bf16 %v495_v16, %v495_v16  ;;  %v958_v21 = vpack.c.bf16 %v559_v17, %v559_v17  ;;  %v506_v22 = vadd.f32 %v1005_v18, %v1199_v23  ;;  %v570_v24 = vadd.f32 %v1021_v19, %v1199_v23 }
  0xf6   : > { %744 = vst.msk [vmem:[%s1208_s6 + $0x68] sm:$0xf] %vm717_vm2, %v960_v15  ;;  %v497_v25 = vpop.f32.mrf.mxu0  ;;  %v561_v26 = vpop.f32.mrf.mxu1 }
  0xf7   : > { %726 = vst.msk [vmem:[%s1208_s6 + $0x20] sm:$0xf] %vm717_vm2, %v942_v20  ;;  %742 = vst.msk [vmem:[%s1208_s6 + $0x60] sm:$0xf] %vm717_vm2, %v958_v21  ;;  %v945_v27 = vpack.c.bf16 %v506_v22, %v506_v22  ;;  %v961_v28 = vpack.c.bf16 %v570_v24, %v570_v24  ;;  %v498_v29 = vadd.f32 %v1199_v23, %v497_v25 }
  0xf8   : > { %v562_v30 = vadd.f32 %v1199_v23, %v561_v26  ;;  %v1008_v31 = vpop.f32.mrf.mxu0  ;;  %v1024_v32 = vpop.f32.mrf.mxu1 }
  0xf9   : > { %729 = vst.msk [vmem:[%s1208_s6 + $0x2c] sm:$0xf] %vm717_vm2, %v945_v27  ;;  %745 = vst.msk [vmem:[%s1208_s6 + $0x6c] sm:$0xf] %vm717_vm2, %v961_v28  ;;  %v943_v33 = vpack.c.bf16 %v498_v29, %v498_v29  ;;  %v519_v35 = vadd.f32 %v1008_v31, %v1199_v23  ;;  %v583_v36 = vadd.f32 %v1024_v32, %v1199_v23 }
  0xfa   : > { %v959_v34 = vpack.c.bf16 %v562_v30, %v562_v30  ;;  %v510_v37 = vpop.f32.mrf.mxu0  ;;  %v574_v38 = vpop.f32.mrf.mxu1 }
  0xfb   : > { %727 = vst.msk [vmem:[%s1208_s6 + $0x24] sm:$0xf] %vm717_vm2, %v943_v33  ;;  %v948_v39 = vpack.c.bf16 %v519_v35, %v519_v35  ;;  %v964_v40 = vpack.c.bf16 %v583_v36, %v583_v36  ;;  %v511_v41 = vadd.f32 %v1199_v23, %v510_v37  ;;  %v575_v42 = vadd.f32 %v1199_v23, %v574_v38 }
  0xfc   : > { %743 = vst.msk [vmem:[%s1208_s6 + $0x64] sm:$0xf] %vm717_vm2, %v959_v34  ;;  %v1009_v43 = vpop.f32.mrf.mxu0  ;;  %v1025_v44 = vpop.f32.mrf.mxu1 }
  0xfd   : > { %732 = vst.msk [vmem:[%s1208_s6 + $0x38] sm:$0xf] %vm717_vm2, %v948_v39  ;;  %748 = vst.msk [vmem:[%s1208_s6 + $0x78] sm:$0xf] %vm717_vm2, %v964_v40  ;;  %v946_v45 = vpack.c.bf16 %v511_v41, %v511_v41  ;;  %v962_v46 = vpack.c.bf16 %v575_v42, %v575_v42  ;;  %v522_v47 = vadd.f32 %v1009_v43, %v1199_v23 }
  0xfe   : > { %v586_v48 = vadd.f32 %v1025_v44, %v1199_v23  ;;  %v513_v49 = vpop.f32.mrf.mxu0  ;;  %v577_v50 = vpop.f32.mrf.mxu1 }
  0xff   : > { %730 = vst.msk [vmem:[%s1208_s6 + $0x30] sm:$0xf] %vm717_vm2, %v946_v45  ;;  %746 = vst.msk [vmem:[%s1208_s6 + $0x70] sm:$0xf] %vm717_vm2, %v962_v46  ;;  %v949_v51 = vpack.c.bf16 %v522_v47, %v522_v47  ;;  %v514_v53 = vadd.f32 %v1199_v23, %v513_v49  ;;  %v578_v54 = vadd.f32 %v1199_v23, %v577_v50 }
 0x100   : > { %v965_v52 = vpack.c.bf16 %v586_v48, %v586_v48 }
 0x101   : > { %733 = vst.msk [vmem:[%s1208_s6 + $0x3c] sm:$0xf] %vm717_vm2, %v949_v51  ;;  %v947_v55 = vpack.c.bf16 %v514_v53, %v514_v53  ;;  %v963_v56 = vpack.c.bf16 %v578_v54, %v578_v54 }
 0x102   : > { %749 = vst.msk [vmem:[%s1208_s6 + $0x7c] sm:$0xf] %vm717_vm2, %v965_v52 }
 0x103   : > { %731 = vst.msk [vmem:[%s1208_s6 + $0x34] sm:$0xf] %vm717_vm2, %v947_v55  ;;  %747 = vst.msk [vmem:[%s1208_s6 + $0x74] sm:$0xf] %vm717_vm2, %v963_v56 }
 0x104 PF: > { %s13_s14 = sadd.s32 1, %s1101_s14   ;;  %s1317_s12 = smov %s1097_s13 }
 0x105   : > { %p10_p5 = scmp.ge.s32.totalorder %s13_s14, 4   ;;  %s1318_s13 = smov %s1320_s15 }
 0x107   :  { %12 = sbr.rel (!%p10_p5) target bundleno = 2 (0x2), region = 68 }

// kernel: _lambda_.28
= control target key start
LH: loop header
LB: loop body
LE: loop exit
PB: predicated region body
PF: predicated region fallthrough
CT: control target
= control target key end

     0   :  { %s390_s6 = smov 0   ;;  %s414_s0 = inlined_call_operand.vmem [shape: bf16[2,64,128], index: 0, kind: input, shape index: {}]   ;;  %s415_s1 = inlined_call_operand.vmem [shape: bf16[2,64,128], index: 1, kind: output, shape index: {}]  }
   0x1 LB: > { %s291_s7 = sadd.s32 4294967295, %s378_s6   ;;  %p295_p0 = scmp.ge.s32.totalorder %s378_s6, 1  ;;  %s378_s6 = sphi %s390_s6, %s11_s6  }
   0x2   : > { %p87_p1 = scmp.lt.s32.totalorder %s378_s6, 3 }
   0x4   : > { %p88_p2 = pnand %p295_p0, %p87_p1 }
   0x5   : > { %p107_p3 = scmp.lt.s32.totalorder (!%p88_p2), %s291_s7, 1 }
   0x6   : > { %91 = sbr.rel (%p88_p2) target bundleno = 101 (0x65), region = 24 }
   0xb   : > { %s417_s7 = smov (!%p107_p3, %s291_s7), 1 }
   0xc   : > { %s310_s8 = sshll.u32 %s417_s7, 5 }
   0xd   : > { %s111_s11 = scalar_lea.vmem %s414_s0, %s310_s8  ;;  %s116_s14 = scalar_lea.vmem %s415_s1, %s310_s8 }
   0xe   : > { %v321_v0 = vld [vmem:[%s111_s11] sm:$0xff]   ;;  %v356_v1 = vld [vmem:[%s111_s11 + $0x8] sm:$0xff]   ;;  %v357_v5 = vld [vmem:[%s111_s11 + $0x10] sm:$0xff]  }
   0xf   : > { %v322_v2 = vunpack.c.l.bf16 %v321_v0  ;;  %v323_v3 = vunpack.c.h.bf16 %v321_v0  ;;  %v326_v4 = vunpack.c.l.bf16 %v356_v1  ;;  %v327_v6 = vunpack.c.h.bf16 %v356_v1  ;;  %v358_v10 = vld [vmem:[%s111_s11 + $0x18] sm:$0xff]  }
  0x10   : > { %v330_v8 = vunpack.c.l.bf16 %v357_v5  ;;  %v331_v11 = vunpack.c.h.bf16 %v357_v5  ;;  %v334_v13 = vunpack.c.l.bf16 %v358_v10  ;;  %v335_v15 = vunpack.c.h.bf16 %v358_v10 }
  0x11   : > { %v133_v7 = vadd.f32 %v323_v3, %v322_v2 }
  0x13   : > { %v134_v9 = vadd.f32 %v326_v4, %v133_v7 }
  0x15   : > { %v135_v12 = vadd.f32 %v327_v6, %v134_v9 }
  0x17   : > { %v136_v14 = vadd.f32 %v330_v8, %v135_v12 }
  0x19   : > { %v137_v16 = vadd.f32 %v331_v11, %v136_v14 }
  0x1b   : > { %v138_v17 = vadd.f32 %v334_v13, %v137_v16 }
  0x1d   : > { %v139_v18 = vadd.f32 %v335_v15, %v138_v17 }
  0x1f   : > { %v140_v19 = vrot.slane %v139_v18, 4 }
  0x21   : > { %v141_v20 = vadd.f32 %v140_v19, %v139_v18 }
  0x23   : > { %v142_v21 = vrot.slane %v141_v20, 2 }
  0x25   : > { %v143_v22 = vadd.f32 %v142_v21, %v141_v20 }
  0x27   : > { %v144_v23 = vrot.slane %v143_v22, 1 }
  0x29   : > { %v145_v24 = vadd.f32 %v144_v23, %v143_v22 }
  0x2b   : > { %v147_v25 = vmul.f32 0.015625, %v145_v24 }
  0x2d   : > { %v148_v26 = vsub.f32 %v322_v2, %v147_v25  ;;  %v149_v27 = vsub.f32 %v323_v3, %v147_v25  ;;  %v150_v28 = vsub.f32 %v326_v4, %v147_v25  ;;  %v151_v29 = vsub.f32 %v327_v6, %v147_v25 }
  0x2e   : > { %v152_v30 = vsub.f32 %v330_v8, %v147_v25  ;;  %v153_v34 = vsub.f32 %v331_v11, %v147_v25  ;;  %v154_v37 = vsub.f32 %v334_v13, %v147_v25  ;;  %v155_v40 = vsub.f32 %v335_v15, %v147_v25 }
  0x2f   : > { %v156_v31 = vmul.f32 %v148_v26, %v148_v26  ;;  %v157_v32 = vmul.f32 %v149_v27, %v149_v27  ;;  %v158_v33 = vmul.f32 %v150_v28, %v150_v28  ;;  %v159_v35 = vmul.f32 %v151_v29, %v151_v29 }
  0x30   : > { %v160_v38 = vmul.f32 %v152_v30, %v152_v30  ;;  %v161_v41 = vmul.f32 %v153_v34, %v153_v34  ;;  %v162_v43 = vmul.f32 %v154_v37, %v154_v37  ;;  %v163_v45 = vmul.f32 %v155_v40, %v155_v40 }
  0x31   : > { %v164_v36 = vadd.f32 %v157_v32, %v156_v31 }
  0x33   : > { %v165_v39 = vadd.f32 %v164_v36, %v158_v33 }
  0x35   : > { %v166_v42 = vadd.f32 %v165_v39, %v159_v35 }
  0x37   : > { %v167_v44 = vadd.f32 %v166_v42, %v160_v38 }
  0x39   : > { %v168_v46 = vadd.f32 %v167_v44, %v161_v41 }
  0x3b   : > { %v169_v47 = vadd.f32 %v168_v46, %v162_v43 }
  0x3d   : > { %v170_v48 = vadd.f32 %v169_v47, %v163_v45 }
  0x3f   : > { %v171_v49 = vrot.slane %v170_v48, 4 }
  0x41   : > { %v172_v50 = vadd.f32 %v171_v49, %v170_v48 }
  0x43   : > { %v173_v51 = vrot.slane %v172_v50, 2 }
  0x45   : > { %v174_v52 = vadd.f32 %v173_v51, %v172_v50 }
  0x47   : > { %v175_v53 = vrot.slane %v174_v52, 1 }
  0x49   : > { %v176_v54 = vadd.f32 %v175_v53, %v174_v52 }
  0x4b   : > { %v177_v55 = vmul.f32 0.015625, %v176_v54 }
  0x4d   : > { %v178_v56 = vadd.f32 1e-05, %v177_v55 }
  0x4f   : > { %370 = vrsqrt.f32 %v178_v56 }
  0x5c   : > { %v371_v57 = vpop.eup %370 }
  0x5d   : > { %v180_v58 = vmul.f32 %v371_v57, %v148_v26  ;;  %v181_v59 = vmul.f32 %v371_v57, %v149_v27  ;;  %v182_v60 = vmul.f32 %v371_v57, %v150_v28  ;;  %v183_v61 = vmul.f32 %v371_v57, %v151_v29 }
  0x5e   : > { %v184_v62 = vmul.f32 %v371_v57, %v152_v30  ;;  %v185_v63 = vmul.f32 %v371_v57, %v153_v34  ;;  %v186_v0 = vmul.f32 %v371_v57, %v154_v37  ;;  %v187_v1 = vmul.f32 %v371_v57, %v155_v40 }
  0x5f   : > { %v188_v2 = vmax.f32 %v180_v58, 0.0  ;;  %v189_v3 = vmax.f32 %v181_v59, 0.0  ;;  %v190_v4 = vmax.f32 %v182_v60, 0.0  ;;  %v191_v5 = vmax.f32 %v183_v61, 0.0 }
  0x60   : > { %v192_v6 = vmax.f32 %v184_v62, 0.0  ;;  %v193_v7 = vmax.f32 %v185_v63, 0.0  ;;  %v194_v8 = vmax.f32 %v186_v0, 0.0  ;;  %v195_v9 = vmax.f32 %v187_v1, 0.0 }
  0x61   : > { %v339_v10 = vpack.c.bf16 %v189_v3, %v188_v2  ;;  %v344_v11 = vpack.c.bf16 %v191_v5, %v190_v4 }
  0x62   : > { %v349_v12 = vpack.c.bf16 %v193_v7, %v192_v6  ;;  %v354_v13 = vpack.c.bf16 %v195_v9, %v194_v8 }
  0x63   : > { %340 = vst [vmem:[%s116_s14] sm:$0xff] %v339_v10   ;;  %359 = vst [vmem:[%s116_s14 + $0x8] sm:$0xff] %v344_v11  }
  0x64   : > { %360 = vst [vmem:[%s116_s14 + $0x10] sm:$0xff] %v349_v12   ;;  %361 = vst [vmem:[%s116_s14 + $0x18] sm:$0xff] %v354_v13  }
  0x65 PF: > { %s11_s6 = sadd.s32 1, %s378_s6  }
  0x66   : > { %p8_p4 = scmp.ge.s32.totalorder %s11_s6, 4  }
  0x68   :  { %10 = sbr.rel (!%p8_p4) target bundleno = 1 (0x1), region = 54 }

// kernel: _lambda_.27
= control target key start
LH: loop header
LB: loop body
LE: loop exit
PB: predicated region body
PF: predicated region fallthrough
CT: control target
= control target key end

     0   :  { %s1356_s12 = smov 0   ;;  %s1358_s13 = smov 0   ;;  %s1529_s0 = inlined_call_operand.vmem [shape: bf16[128,576], index: 0, kind: input, shape index: {}]   ;;  %s1530_s1 = inlined_call_operand.vmem [shape: bf16[576,128], index: 1, kind: input, shape index: {}]   ;;  %s1531_s2 = inlined_call_operand.vmem [shape: f32[1,128], index: 2, kind: input, shape index: {}]   ;;  %s1532_s3 = inlined_call_operand.vmem [shape: bf16[128,128], index: 3, kind: output, shape index: {}]  }
   0x1   :  { %s1360_s14 = smov 0  }
   0x2 LB: > { %s25_s15 = sadd.s32 1, %s1330_s13  ;;  %p1004_p0 = scmp.ge.s32.totalorder %s1334_s14, 1  ;;  %s1334_s14 = sphi %s1360_s14, %s13_s14   ;;  %s1330_s13 = sphi %s1358_s13, %s1534_s13   ;;  %s1326_s12 = sphi %s1356_s12, %s1533_s12  }
   0x3   : > { %p27_p1 = scmp.ge.s32.totalorder %s25_s15, 2  ;;  %p170_p2 = scmp.lt.s32.totalorder %s1334_s14, 3 }
   0x5   : > { %s1536_s15 = smov (%p27_p1, %s25_s15), 0  ;;  %p171_p3 = pnand %p1004_p0, %p170_p2 }
   0x6   : > { %s1005_s23 = sshll.u32 (!%p171_p3), %s1326_s12, 3 }
   0x7   : > { %174 = sbr.rel (%p171_p3) target bundleno = 283 (0x11b), region = 32  ;;  %p206_p4 = scmp.lt.s32.totalorder (!%p171_p3), %s1005_s23, 15 }
   0xc   : > { %v1248_v0 = vld [vmem:[%s1530_s1 + $0x78] sm:$0xff]   ;;  %v1252_v4 = vld [vmem:[%s1530_s1 + $0x70] sm:$0xff]   ;;  %v1256_v8 = vld [vmem:[%s1530_s1 + $0x68] sm:$0xff]   ;;  %s1538_s23 = smov (!%p206_p4, %s1005_s23), 15  ;;  %vm648_vm0 = vcmask 523264  }
   0xd   : > { %v1249_v1 = vld [vmem:[%s1530_s1 + $0xf8] sm:$0xff]   ;;  %1111 = vmatprep.subr.bf16.mxu0 %v1248_v0  ;;  %v1253_v5 = vld [vmem:[%s1530_s1 + $0xf0] sm:$0xff]   ;;  %v1257_v9 = vld [vmem:[%s1530_s1 + $0xe8] sm:$0xff]   ;;  %s1223_s22 = smul.u32 20, %s1538_s23  ;;  %s1008_s26 = sshll.u32 %s1538_s23, 2 }
   0xe   : > { %v1250_v2 = vld [vmem:[%s1530_s1 + $0x38] sm:$0xff]   ;;  %1151 = vmatprep.subr.bf16.mxu1 %v1249_v1  ;;  %v1254_v6 = vld [vmem:[%s1530_s1 + $0x30] sm:$0xff]   ;;  %v1258_v10 = vld [vmem:[%s1530_s1 + $0x28] sm:$0xff]   ;;  %s226_s29 = scalar_lea.vmem %s1532_s3, %s1008_s26 }
   0xf   : > { %v1251_v3 = vld [vmem:[%s1530_s1 + $0xb8] sm:$0xff]   ;;  %1112 = vmatpush3.bf16.msra.mxu0 %v1250_v2  ;;  %v1255_v7 = vld [vmem:[%s1530_s1 + $0xb0] sm:$0xff]   ;;  %v1259_v11 = vld [vmem:[%s1530_s1 + $0xa8] sm:$0xff]   ;;  %s1473_s6 = scalar_lea.vmem %s1529_s0, %s1223_s22 }
  0x10   : > { %1152 = vmatpush3.bf16.msra.mxu1 %v1251_v3  ;;  %1113 = vmatprep.subr.bf16.mxu0 %v1252_v4  ;;  %v1260_v12 = vld [vmem:[%s1530_s1 + $0x60] sm:$0xff]   ;;  %v1264_v16 = vld [vmem:[%s1530_s1 + $0x58] sm:$0xff]   ;;  %v1268_v20 = vld [vmem:[%s1530_s1 + $0x50] sm:$0xff]  }
  0x11   : > { %1153 = vmatprep.subr.bf16.mxu1 %v1253_v5  ;;  %v1261_v13 = vld [vmem:[%s1530_s1 + $0xe0] sm:$0xff]   ;;  %v1265_v17 = vld [vmem:[%s1530_s1 + $0xd8] sm:$0xff]   ;;  %v1269_v21 = vld [vmem:[%s1530_s1 + $0xd0] sm:$0xff]  }
  0x12   : > { %v1262_v14 = vld [vmem:[%s1530_s1 + $0x20] sm:$0xff]   ;;  %v1266_v18 = vld [vmem:[%s1530_s1 + $0x18] sm:$0xff]   ;;  %v1270_v22 = vld [vmem:[%s1530_s1 + $0x10] sm:$0xff]  }
  0x13   : > { %1114 = vmatpush3.bf16.msra.mxu0 %v1254_v6  ;;  %v1263_v15 = vld [vmem:[%s1530_s1 + $0xa0] sm:$0xff]   ;;  %v1267_v19 = vld [vmem:[%s1530_s1 + $0x98] sm:$0xff]   ;;  %v1271_v23 = vld [vmem:[%s1530_s1 + $0x90] sm:$0xff]  }
  0x14   : > { %1154 = vmatpush3.bf16.msra.mxu1 %v1255_v7  ;;  %1115 = vmatprep.subr.bf16.mxu0 %v1256_v8  ;;  %v1272_v24 = vld [vmem:[%s1530_s1 + $0x48] sm:$0xff]   ;;  %v1276_v28 = vld [vmem:[%s1530_s1 + $0x40] sm:$0xff]   ;;  %v1286_v36 = vld [vmem:[%s1530_s1 + $0x118] sm:$0xff]  }
  0x15   : > { %1155 = vmatprep.subr.bf16.mxu1 %v1257_v9  ;;  %v1273_v25 = vld [vmem:[%s1530_s1 + $0xc8] sm:$0xff]   ;;  %v1277_v29 = vld [vmem:[%s1530_s1 + $0xc0] sm:$0xff]   ;;  %v1293_v39 = vld [vmem:[%s1530_s1 + $0x110] sm:$0xff]  }
  0x16   : > { %v1274_v26 = vld [vmem:[%s1530_s1 + $0x8] sm:$0xff]   ;;  %v1278_v30 = vld [vmem:[%s1530_s1] sm:$0xff]   ;;  %v1296_v43 = vld [vmem:[%s1473_s6 + $0x5c] ss:$20 sps:$4 sm:$0xff]  }
  0x17   : > { %1116 = vmatpush3.bf16.msra.mxu0 %v1258_v10  ;;  %v1275_v27 = vld [vmem:[%s1530_s1 + $0x88] sm:$0xff]   ;;  %v1279_v31 = vld [vmem:[%s1530_s1 + $0x80] sm:$0xff]   ;;  %v1301_v48 = vld [vmem:[%s1473_s6 + $0x7c] ss:$20 sps:$4 sm:$0xff]  }
  0x18   : > { %1156 = vmatpush3.bf16.msra.mxu1 %v1259_v11  ;;  %1117 = vmatprep.subr.bf16.mxu0 %v1260_v12  ;;  %v1280_v32 = vld [vmem:[%s1473_s6] ss:$20 sps:$4 sm:$0xff]   ;;  %v1282_v33 = vld [vmem:[%s1473_s6 + $0x4] ss:$20 sps:$4 sm:$0xff]   ;;  %v1283_v34 = vld [vmem:[%s1473_s6 + $0x8] ss:$20 sps:$4 sm:$0xff]  }
  0x19   : > { %1157 = vmatprep.subr.bf16.mxu1 %v1261_v13  ;;  %v1285_v35 = vld [vmem:[%s1473_s6 + $0xc] ss:$20 sps:$4 sm:$0xff]   ;;  %693 = vmatprep.mubr.bf16.mxu0 %v1282_v33  ;;  %v1289_v38 = vld [vmem:[%s1473_s6 + $0x34] ss:$20 sps:$4 sm:$0xff]   ;;  %v1292_v41 = vld [vmem:[%s1473_s6 + $0x30] ss:$20 sps:$4 sm:$0xff]  }
  0x1a   : > { %758 = vmatprep.mubr.bf16.mxu1 %v1285_v35  ;;  %v1287_v37 = vld [vmem:[%s1473_s6 + $0x2c] ss:$20 sps:$4 sm:$0xff]   ;;  %v1291_v40 = vld [vmem:[%s1473_s6 + $0x28] ss:$20 sps:$4 sm:$0xff]   ;;  %v1298_v46 = vld [vmem:[%s1473_s6 + $0x50] ss:$20 sps:$4 sm:$0xff]  }
  0x1b   : > { %1118 = vmatpush3.bf16.msra.mxu0 %v1262_v14  ;;  %v1294_v42 = vld [vmem:[%s1473_s6 + $0x54] ss:$20 sps:$4 sm:$0xff]   ;;  %v1307_v45 = vld [vmem:[%s1530_s1 + $0x100] sm:$0xff]   ;;  %v1299_v47 = vld [vmem:[%s1473_s6 + $0x58] ss:$20 sps:$4 sm:$0xff]  }
  0x1c   : > { %1158 = vmatpush3.bf16.msra.mxu1 %v1263_v15  ;;  %1119 = vmatprep.subr.bf16.mxu0 %v1264_v16  ;;  %v1300_v44 = vld [vmem:[%s1530_s1 + $0x108] sm:$0xff]   ;;  %v1303_v49 = vld [vmem:[%s1473_s6 + $0x84] ss:$20 sps:$4 sm:$0xff]   ;;  %v1306_v51 = vld [vmem:[%s1473_s6 + $0x80] ss:$20 sps:$4 sm:$0xff]  }
  0x1d   : > { %1159 = vmatprep.subr.bf16.mxu1 %v1265_v17  ;;  %v1305_v50 = vld [vmem:[%s1473_s6 + $0x78] ss:$20 sps:$4 sm:$0xff]   ;;  %v1308_v52 = vld [vmem:[%s1473_s6 + $0x10] ss:$20 sps:$4 sm:$0xff]   ;;  %v1309_v53 = vld [vmem:[%s1473_s6 + $0x60] ss:$20 sps:$4 sm:$0xff]  }
  0x1e   : > { %v1310_v54 = vld [vmem:[%s1473_s6 + $0x38] ss:$20 sps:$4 sm:$0xff]   ;;  %v1311_v55 = vld [vmem:[%s1473_s6 + $0x88] ss:$20 sps:$4 sm:$0xff]  }
  0x1f   : > { %1120 = vmatpush3.bf16.msra.mxu0 %v1266_v18 }
  0x20   : > { %1160 = vmatpush3.bf16.msra.mxu1 %v1267_v19  ;;  %1121 = vmatprep.subr.bf16.mxu0 %v1268_v20 }
  0x21   : > { %1161 = vmatprep.subr.bf16.mxu1 %v1269_v21 }
  0x23   : > { %1122 = vmatpush3.bf16.msra.mxu0 %v1270_v22 }
  0x24   : > { %1162 = vmatpush3.bf16.msra.mxu1 %v1271_v23  ;;  %1123 = vmatprep.subr.bf16.mxu0 %v1272_v24 }
  0x25   : > { %1163 = vmatprep.subr.bf16.mxu1 %v1273_v25 }
  0x27   : > { %1124 = vmatpush3.bf16.msra.mxu0 %v1274_v26  ;;  %v1009_v26 = vld [vmem:[%s1531_s2] ss:$0 sm:$0xff] }
  0x28   : > { %1164 = vmatpush3.bf16.msra.mxu1 %v1275_v27  ;;  %1125 = vmatprep.subr.bf16.mxu0 %v1276_v28 }
  0x29   : > { %1165 = vmatprep.subr.bf16.mxu1 %v1277_v29 }
  0x2b   : > { %1126 = vmatpush3.bf16.msra.mxu0 %v1278_v30 }
  0x2c   : > { %1166 = vmatpush3.bf16.msra.mxu1 %v1279_v31  ;;  %1199 = vmatprep.subr.bf16.mxu0 %v1286_v36 }
  0x2d   : > { %1215 = vmatprep.subr.bf16.mxu1 %v1286_v36 }
  0x2e   : > { %694 = vmatmul.mubr.bf16.vlgmr.msra.gmra.mxu0 %v1280_v32 }
  0x2f   : > { %759 = vmatmul.mubr.bf16.vlgmr.msra.gmra.mxu1 %v1283_v34  ;;  %1200 = vmatpush3.bf16.msra.mxu0 %v1286_v36 }
  0x30   : > { %1219 = vmatpush3.bf16.msra.mxu1 %v1286_v36  ;;  %701 = vmatprep.mubr.bf16.mxu0 %v1287_v37 }
  0x31   : > { %766 = vmatprep.mubr.bf16.mxu1 %v1289_v38  ;;  %1201 = vmatprep.subr.bf16.mxu0 %v1293_v39 }
  0x32   : > { %1216 = vmatprep.subr.bf16.mxu1 %v1293_v39 }
  0x33   : > { %1202 = vmatpush3.bf16.msra.mxu0 %v1293_v39 }
  0x34   : > { %1220 = vmatpush3.bf16.msra.mxu1 %v1293_v39  ;;  %1203 = vmatprep.subr.bf16.mxu0 %v1300_v44 }
  0x35   : > { %1217 = vmatprep.subr.bf16.mxu1 %v1300_v44 }
  0x36   : > { %702 = vmatmul.mubr.bf16.gmra.mxu0 %v1291_v40 }
  0x37   : > { %767 = vmatmul.mubr.bf16.gmra.mxu1 %v1292_v41  ;;  %709 = vmatprep.mubr.bf16.mxu0 %v1294_v42 }
  0x38   : > { %774 = vmatprep.mubr.bf16.mxu1 %v1296_v43  ;;  %1204 = vmatpush3.bf16.msra.mxu0 %v1300_v44 }
  0x39   : > { %1221 = vmatpush3.bf16.msra.mxu1 %v1300_v44  ;;  %1205 = vmatprep.subr.bf16.mxu0 %v1307_v45 }
  0x3a   : > { %1218 = vmatprep.subr.bf16.mxu1 %v1307_v45 }
  0x3c   : > { %1206 = vmatpush3.bf16.msra.mxu0 %v1307_v45 }
  0x3d   : > { %1222 = vmatpush3.bf16.msra.mxu1 %v1307_v45 }
  0x3e   : > { %710 = vmatmul.mubr.bf16.gmra.mxu0 %v1298_v46 }
  0x3f   : > { %775 = vmatmul.mubr.bf16.gmra.mxu1 %v1299_v47  ;;  %717 = vmatprep.mubr.bf16.mxu0 %v1301_v48 }
  0x40   : > { %782 = vmatprep.mubr.bf16.mxu1 %v1303_v49 }
  0x46   : > { %718 = vmatmul.mubr.bf16.gmra.mxu0 %v1305_v50 }
  0x47   : > { %783 = vmatmul.mubr.bf16.gmra.mxu1 %v1306_v51  ;;  %1207 = vmatprep.mubr.msk.bf16.mxu0 %vm648_vm0, %v1308_v52 }
  0x48   : > { %1211 = vmatprep.mubr.msk.bf16.mxu1 %vm648_vm0, %v1309_v53 }
  0x4e   : > { %1208 = vmatmul.mubr.msk.bf16.vlgmr.msra.gmra.mxu0 %vm648_vm0, %v1310_v54 }
  0x4f   : > { %1212 = vmatmul.mubr.msk.bf16.vlgmr.msra.gmra.mxu1 %vm648_vm0, %v1311_v55 }
  0xee   : > { %v1127_v56 = vpop.f32.mrf.mxu0 }
  0xef   : > { %v1167_v57 = vpop.f32.mrf.mxu1 }
  0xf0   : > { %v1128_v58 = vpop.f32.mrf.mxu0 }
  0xf1   : > { %v1168_v59 = vpop.f32.mrf.mxu1  ;;  %v1129_v23 = vadd.f32 %v1128_v58, %v1127_v56 }
  0xf2   : > { %v1130_v60 = vpop.f32.mrf.mxu0  ;;  %v1169_v45 = vadd.f32 %v1168_v59, %v1167_v57 }
  0xf3   : > { %v1170_v61 = vpop.f32.mrf.mxu1  ;;  %v696_v36 = vadd.f32 %v1129_v23, %v1009_v26 }
  0xf4   : > { %v1131_v62 = vpop.f32.mrf.mxu0 }
  0xf5   : > { %v1171_v63 = vpop.f32.mrf.mxu1  ;;  %v1132_v24 = vadd.f32 %v1131_v62, %v1130_v60  ;;  %v761_v62 = vadd.f32 %v1169_v45, %v696_v36 }
  0xf6   : > { %v1133_v0 = vpop.f32.mrf.mxu0  ;;  %v1172_v50 = vadd.f32 %v1171_v63, %v1170_v61 }
  0xf7   : > { %v1173_v1 = vpop.f32.mrf.mxu1  ;;  %v699_v37 = vadd.f32 %v1132_v24, %v1009_v26 }
  0xf8   : > { %v1134_v2 = vpop.f32.mrf.mxu0 }
  0xf9   : > { %v1174_v3 = vpop.f32.mrf.mxu1  ;;  %v1135_v19 = vadd.f32 %v1134_v2, %v1133_v0  ;;  %v764_v2 = vadd.f32 %v1172_v50, %v699_v37 }
  0xfa   : > { %v1136_v4 = vpop.f32.mrf.mxu0  ;;  %v1175_v40 = vadd.f32 %v1174_v3, %v1173_v1 }
  0xfb   : > { %v1176_v5 = vpop.f32.mrf.mxu1  ;;  %v704_v32 = vadd.f32 %v1135_v19, %v1009_v26 }
  0xfc   : > { %v1137_v6 = vpop.f32.mrf.mxu0 }
  0xfd   : > { %v1177_v7 = vpop.f32.mrf.mxu1  ;;  %v1138_v20 = vadd.f32 %v1137_v6, %v1136_v4  ;;  %v769_v51 = vadd.f32 %v1175_v40, %v704_v32 }
  0xfe   : > { %v1139_v8 = vpop.f32.mrf.mxu0  ;;  %v1178_v41 = vadd.f32 %v1177_v7, %v1176_v5 }
  0xff   : > { %v1179_v9 = vpop.f32.mrf.mxu1  ;;  %v707_v33 = vadd.f32 %v1138_v20, %v1009_v26 }
 0x100   : > { %v1140_v10 = vpop.f32.mrf.mxu0 }
 0x101   : > { %v1180_v11 = vpop.f32.mrf.mxu1  ;;  %v1141_v28 = vadd.f32 %v1140_v10, %v1139_v8  ;;  %v772_v53 = vadd.f32 %v1178_v41, %v707_v33 }
 0x102   : > { %v1142_v12 = vpop.f32.mrf.mxu0  ;;  %v1181_v55 = vadd.f32 %v1180_v11, %v1179_v9 }
 0x103   : > { %v1182_v13 = vpop.f32.mrf.mxu1  ;;  %v712_v46 = vadd.f32 %v1141_v28, %v1009_v26 }
 0x104   : > { %v1143_v14 = vpop.f32.mrf.mxu0 }
 0x105   : > { %v1183_v15 = vpop.f32.mrf.mxu1  ;;  %v1144_v29 = vadd.f32 %v1143_v14, %v1142_v12  ;;  %v777_v57 = vadd.f32 %v1181_v55, %v712_v46 }
 0x106   : > { %v1145_v16 = vpop.f32.mrf.mxu0  ;;  %v1184_v56 = vadd.f32 %v1183_v15, %v1182_v13 }
 0x107   : > { %v1185_v17 = vpop.f32.mrf.mxu1  ;;  %v715_v47 = vadd.f32 %v1144_v29, %v1009_v26 }
 0x108   : > { %v1146_v18 = vpop.f32.mrf.mxu0 }
 0x109   : > { %v1147_v21 = vadd.f32 %v1146_v18, %v1145_v16  ;;  %v1186_v22 = vpop.f32.mrf.mxu1  ;;  %v780_v63 = vadd.f32 %v1184_v56, %v715_v47 }
 0x10a   : > { %v1148_v25 = vpop.f32.mrf.mxu0  ;;  %v1187_v38 = vadd.f32 %v1186_v22, %v1185_v17 }
 0x10b   : > { %v1188_v27 = vpop.f32.mrf.mxu1  ;;  %v720_v30 = vadd.f32 %v1147_v21, %v1009_v26 }
 0x10c   : > { %v1149_v31 = vpop.f32.mrf.mxu0 }
 0x10d   : > { %v1150_v34 = vadd.f32 %v1149_v31, %v1148_v25  ;;  %v1189_v35 = vpop.f32.mrf.mxu1  ;;  %v785_v48 = vadd.f32 %v1187_v38, %v720_v30 }
 0x10e   : > { %v1209_v39 = vpop.f32.mrf.mxu0  ;;  %v1190_v43 = vadd.f32 %v1189_v35, %v1188_v27 }
 0x10f   : > { %v723_v42 = vadd.f32 %v1150_v34, %v1009_v26  ;;  %v1213_v44 = vpop.f32.mrf.mxu1  ;;  %v834_v60 = vadd.f32 %v1209_v39, %v769_v51 }
 0x110   : > { %v825_v49 = vpop.f32.mrf.mxu0  ;;  %v850_v3 = vadd.f32 %v1213_v44, %v785_v48 }
 0x111   : > { %v841_v52 = vpop.f32.mrf.mxu1  ;;  %v788_v54 = vadd.f32 %v1190_v43, %v723_v42  ;;  %v826_v4 = vadd.f32 %v825_v49, %v761_v62 }
 0x112   : > { %v1210_v58 = vpop.f32.mrf.mxu0  ;;  %v842_v8 = vadd.f32 %v841_v52, %v777_v57 }
 0x113   : > { %v837_v0 = vadd.f32 %v1210_v58, %v772_v53  ;;  %v1214_v1 = vpop.f32.mrf.mxu1 }
 0x114   : > { %v853_v59 = vadd.f32 %v1214_v1, %v788_v54  ;;  %v828_v61 = vpop.f32.mrf.mxu0 }
 0x115   : > { %v1096_v5 = vpack.c.bf16 %v837_v0, %v834_v60  ;;  %v829_v6 = vadd.f32 %v828_v61, %v764_v2  ;;  %v844_v7 = vpop.f32.mrf.mxu1 }
 0x116   : > { %v1106_v9 = vpack.c.bf16 %v853_v59, %v850_v3  ;;  %v845_v10 = vadd.f32 %v844_v7, %v780_v63 }
 0x117   : > { %1108 = vst [vmem:[%s226_s29 + $0x8] sm:$0xff] %v1096_v5   ;;  %v1091_v11 = vpack.c.bf16 %v829_v6, %v826_v4 }
 0x118   : > { %1110 = vst [vmem:[%s226_s29 + $0x18] sm:$0xff] %v1106_v9   ;;  %v1101_v12 = vpack.c.bf16 %v845_v10, %v842_v8 }
 0x119   : > { %1092 = vst [vmem:[%s226_s29] sm:$0xff] %v1091_v11  }
 0x11a   : > { %1109 = vst [vmem:[%s226_s29 + $0x10] sm:$0xff] %v1101_v12  }
 0x11b PF: > { %s13_s14 = sadd.s32 1, %s1334_s14   ;;  %s1533_s12 = smov %s1330_s13 }
 0x11c   : > { %p10_p5 = scmp.ge.s32.totalorder %s13_s14, 4   ;;  %s1534_s13 = smov %s1536_s15 }
 0x11e   :  { %12 = sbr.rel (!%p10_p5) target bundleno = 2 (0x2), region = 68 }

// kernel: _lambda_.32
= control target key start
LH: loop header
LB: loop body
LE: loop exit
PB: predicated region body
PF: predicated region fallthrough
CT: control target
= control target key end

     0   :  { %s382_s6 = smov 0   ;;  %s406_s0 = inlined_call_operand.vmem [shape: bf16[2,64,128], index: 0, kind: input, shape index: {}]   ;;  %s407_s1 = inlined_call_operand.vmem [shape: bf16[2,64,128], index: 1, kind: output, shape index: {}]  }
   0x1 LB: > { %s283_s7 = sadd.s32 4294967295, %s370_s6   ;;  %p287_p0 = scmp.ge.s32.totalorder %s370_s6, 1  ;;  %s370_s6 = sphi %s382_s6, %s11_s6  }
   0x2   : > { %p87_p1 = scmp.lt.s32.totalorder %s370_s6, 3 }
   0x4   : > { %p88_p2 = pnand %p287_p0, %p87_p1 }
   0x5   : > { %p107_p3 = scmp.lt.s32.totalorder (!%p88_p2), %s283_s7, 1 }
   0x6   : > { %91 = sbr.rel (%p88_p2) target bundleno = 99 (0x63), region = 24 }
   0xb   : > { %s409_s7 = smov (!%p107_p3, %s283_s7), 1 }
   0xc   : > { %s302_s8 = sshll.u32 %s409_s7, 5 }
   0xd   : > { %s111_s11 = scalar_lea.vmem %s406_s0, %s302_s8  ;;  %s116_s14 = scalar_lea.vmem %s407_s1, %s302_s8 }
   0xe   : > { %v313_v0 = vld [vmem:[%s111_s11] sm:$0xff]   ;;  %v348_v1 = vld [vmem:[%s111_s11 + $0x8] sm:$0xff]   ;;  %v349_v5 = vld [vmem:[%s111_s11 + $0x10] sm:$0xff]  }
   0xf   : > { %v314_v2 = vunpack.c.l.bf16 %v313_v0  ;;  %v315_v3 = vunpack.c.h.bf16 %v313_v0  ;;  %v318_v4 = vunpack.c.l.bf16 %v348_v1  ;;  %v319_v6 = vunpack.c.h.bf16 %v348_v1  ;;  %v350_v10 = vld [vmem:[%s111_s11 + $0x18] sm:$0xff]  }
  0x10   : > { %v322_v8 = vunpack.c.l.bf16 %v349_v5  ;;  %v323_v11 = vunpack.c.h.bf16 %v349_v5  ;;  %v326_v13 = vunpack.c.l.bf16 %v350_v10  ;;  %v327_v15 = vunpack.c.h.bf16 %v350_v10 }
  0x11   : > { %v133_v7 = vadd.f32 %v315_v3, %v314_v2 }
  0x13   : > { %v134_v9 = vadd.f32 %v318_v4, %v133_v7 }
  0x15   : > { %v135_v12 = vadd.f32 %v319_v6, %v134_v9 }
  0x17   : > { %v136_v14 = vadd.f32 %v322_v8, %v135_v12 }
  0x19   : > { %v137_v16 = vadd.f32 %v323_v11, %v136_v14 }
  0x1b   : > { %v138_v17 = vadd.f32 %v326_v13, %v137_v16 }
  0x1d   : > { %v139_v18 = vadd.f32 %v327_v15, %v138_v17 }
  0x1f   : > { %v140_v19 = vrot.slane %v139_v18, 4 }
  0x21   : > { %v141_v20 = vadd.f32 %v140_v19, %v139_v18 }
  0x23   : > { %v142_v21 = vrot.slane %v141_v20, 2 }
  0x25   : > { %v143_v22 = vadd.f32 %v142_v21, %v141_v20 }
  0x27   : > { %v144_v23 = vrot.slane %v143_v22, 1 }
  0x29   : > { %v145_v24 = vadd.f32 %v144_v23, %v143_v22 }
  0x2b   : > { %v147_v25 = vmul.f32 0.015625, %v145_v24 }
  0x2d   : > { %v148_v26 = vsub.f32 %v314_v2, %v147_v25  ;;  %v149_v27 = vsub.f32 %v315_v3, %v147_v25  ;;  %v150_v28 = vsub.f32 %v318_v4, %v147_v25  ;;  %v151_v29 = vsub.f32 %v319_v6, %v147_v25 }
  0x2e   : > { %v152_v30 = vsub.f32 %v322_v8, %v147_v25  ;;  %v153_v34 = vsub.f32 %v323_v11, %v147_v25  ;;  %v154_v37 = vsub.f32 %v326_v13, %v147_v25  ;;  %v155_v40 = vsub.f32 %v327_v15, %v147_v25 }
  0x2f   : > { %v156_v31 = vmul.f32 %v148_v26, %v148_v26  ;;  %v157_v32 = vmul.f32 %v149_v27, %v149_v27  ;;  %v158_v33 = vmul.f32 %v150_v28, %v150_v28  ;;  %v159_v35 = vmul.f32 %v151_v29, %v151_v29 }
  0x30   : > { %v160_v38 = vmul.f32 %v152_v30, %v152_v30  ;;  %v161_v41 = vmul.f32 %v153_v34, %v153_v34  ;;  %v162_v43 = vmul.f32 %v154_v37, %v154_v37  ;;  %v163_v45 = vmul.f32 %v155_v40, %v155_v40 }
  0x31   : > { %v164_v36 = vadd.f32 %v157_v32, %v156_v31 }
  0x33   : > { %v165_v39 = vadd.f32 %v164_v36, %v158_v33 }
  0x35   : > { %v166_v42 = vadd.f32 %v165_v39, %v159_v35 }
  0x37   : > { %v167_v44 = vadd.f32 %v166_v42, %v160_v38 }
  0x39   : > { %v168_v46 = vadd.f32 %v167_v44, %v161_v41 }
  0x3b   : > { %v169_v47 = vadd.f32 %v168_v46, %v162_v43 }
  0x3d   : > { %v170_v48 = vadd.f32 %v169_v47, %v163_v45 }
  0x3f   : > { %v171_v49 = vrot.slane %v170_v48, 4 }
  0x41   : > { %v172_v50 = vadd.f32 %v171_v49, %v170_v48 }
  0x43   : > { %v173_v51 = vrot.slane %v172_v50, 2 }
  0x45   : > { %v174_v52 = vadd.f32 %v173_v51, %v172_v50 }
  0x47   : > { %v175_v53 = vrot.slane %v174_v52, 1 }
  0x49   : > { %v176_v54 = vadd.f32 %v175_v53, %v174_v52 }
  0x4b   : > { %v177_v55 = vmul.f32 0.015625, %v176_v54 }
  0x4d   : > { %v178_v56 = vadd.f32 1e-05, %v177_v55 }
  0x4f   : > { %362 = vrsqrt.f32 %v178_v56 }
  0x5c   : > { %v363_v57 = vpop.eup %362 }
  0x5d   : > { %v180_v58 = vmul.f32 %v363_v57, %v148_v26  ;;  %v181_v59 = vmul.f32 %v363_v57, %v149_v27  ;;  %v182_v60 = vmul.f32 %v363_v57, %v150_v28  ;;  %v183_v61 = vmul.f32 %v363_v57, %v151_v29 }
  0x5e   : > { %v184_v62 = vmul.f32 %v363_v57, %v152_v30  ;;  %v185_v63 = vmul.f32 %v363_v57, %v153_v34  ;;  %v186_v0 = vmul.f32 %v363_v57, %v154_v37  ;;  %v187_v1 = vmul.f32 %v363_v57, %v155_v40 }
  0x5f   : > { %v331_v2 = vpack.c.bf16 %v181_v59, %v180_v58  ;;  %v336_v3 = vpack.c.bf16 %v183_v61, %v182_v60 }
  0x60   : > { %v341_v4 = vpack.c.bf16 %v185_v63, %v184_v62  ;;  %v346_v5 = vpack.c.bf16 %v187_v1, %v186_v0 }
  0x61   : > { %332 = vst [vmem:[%s116_s14] sm:$0xff] %v331_v2   ;;  %351 = vst [vmem:[%s116_s14 + $0x8] sm:$0xff] %v336_v3  }
  0x62   : > { %352 = vst [vmem:[%s116_s14 + $0x10] sm:$0xff] %v341_v4   ;;  %353 = vst [vmem:[%s116_s14 + $0x18] sm:$0xff] %v346_v5  }
  0x63 PF: > { %s11_s6 = sadd.s32 1, %s370_s6  }
  0x64   : > { %p8_p4 = scmp.ge.s32.totalorder %s11_s6, 4  }
  0x66   :  { %10 = sbr.rel (!%p8_p4) target bundleno = 1 (0x1), region = 54 }

// kernel: _lambda_.29
= control target key start
LH: loop header
LB: loop body
LE: loop exit
PB: predicated region body
PF: predicated region fallthrough
CT: control target
= control target key end

     0   :  { %s2069_s12 = smov 0   ;;  %s2071_s13 = smov 0   ;;  %s2432_s0 = inlined_call_operand.vmem [shape: bf16[128,1152], index: 0, kind: input, shape index: {}]   ;;  %s2433_s1 = inlined_call_operand.vmem [shape: bf16[1152,128], index: 1, kind: input, shape index: {}]   ;;  %s2434_s2 = inlined_call_operand.vmem [shape: f32[1,128], index: 2, kind: input, shape index: {}]   ;;  %s2435_s3 = inlined_call_operand.vmem [shape: bf16[128,128], index: 3, kind: output, shape index: {}]  }
   0x1   :  { %s2073_s14 = smov 0  }
   0x2 LB: > { %s25_s15 = sadd.s32 1, %s2043_s13  ;;  %p1509_p0 = scmp.ge.s32.totalorder %s2047_s14, 1  ;;  %s2047_s14 = sphi %s2073_s14, %s13_s14   ;;  %s2043_s13 = sphi %s2071_s13, %s2447_s13   ;;  %s2039_s12 = sphi %s2069_s12, %s2446_s12  }
   0x3   : > { %p27_p1 = scmp.ge.s32.totalorder %s25_s15, 2  ;;  %p170_p2 = scmp.lt.s32.totalorder %s2047_s14, 3 }
   0x5   : > { %s2449_s15 = smov (%p27_p1, %s25_s15), 0  ;;  %p171_p3 = pnand %p1509_p0, %p170_p2 }
   0x7   : > { %174 = sbr.rel (%p171_p3) target bundleno = 316 (0x13c), region = 32 }
   0xc   : > { %v1901_v0 = vld [vmem:[%s2433_s1 + $0x78] sm:$0xff]   ;;  %v1905_v4 = vld [vmem:[%s2433_s1 + $0x70] sm:$0xff]   ;;  %v1909_v8 = vld [vmem:[%s2433_s1 + $0x68] sm:$0xff]   ;;  %s1510_s23 = sshll.u32 %s2039_s12, 3 }
   0xd   : > { %v1902_v1 = vld [vmem:[%s2433_s1 + $0xf8] sm:$0xff]   ;;  %1664 = vmatprep.subr.bf16.mxu0 %v1901_v0  ;;  %v1906_v5 = vld [vmem:[%s2433_s1 + $0xf0] sm:$0xff]   ;;  %v1910_v9 = vld [vmem:[%s2433_s1 + $0xe8] sm:$0xff]   ;;  %p206_p4 = scmp.lt.s32.totalorder %s1510_s23, 15 }
   0xe   : > { %v1903_v2 = vld [vmem:[%s2433_s1 + $0x38] sm:$0xff]   ;;  %1704 = vmatprep.subr.bf16.mxu1 %v1902_v1  ;;  %v1907_v6 = vld [vmem:[%s2433_s1 + $0x30] sm:$0xff]   ;;  %v1911_v10 = vld [vmem:[%s2433_s1 + $0x28] sm:$0xff]  }
   0xf   : > { %v1904_v3 = vld [vmem:[%s2433_s1 + $0xb8] sm:$0xff]   ;;  %1665 = vmatpush3.bf16.msra.mxu0 %v1903_v2  ;;  %v1908_v7 = vld [vmem:[%s2433_s1 + $0xb0] sm:$0xff]   ;;  %v1912_v11 = vld [vmem:[%s2433_s1 + $0xa8] sm:$0xff]   ;;  %s2451_s23 = smov (!%p206_p4, %s1510_s23), 15 }
  0x10   : > { %1705 = vmatpush3.bf16.msra.mxu1 %v1904_v3  ;;  %1666 = vmatprep.subr.bf16.mxu0 %v1905_v4  ;;  %v1913_v12 = vld [vmem:[%s2433_s1 + $0x60] sm:$0xff]   ;;  %v1917_v16 = vld [vmem:[%s2433_s1 + $0x58] sm:$0xff]   ;;  %v1921_v20 = vld [vmem:[%s2433_s1 + $0x50] sm:$0xff]   ;;  %s1876_s22 = smul.u32 36, %s2451_s23  ;;  %s1513_s4 = sshll.u32 %s2451_s23, 2 }
  0x11   : > { %1706 = vmatprep.subr.bf16.mxu1 %v1906_v5  ;;  %v1914_v13 = vld [vmem:[%s2433_s1 + $0xe0] sm:$0xff]   ;;  %v1918_v17 = vld [vmem:[%s2433_s1 + $0xd8] sm:$0xff]   ;;  %v1922_v21 = vld [vmem:[%s2433_s1 + $0xd0] sm:$0xff]   ;;  %s226_s7 = scalar_lea.vmem %s2435_s3, %s1513_s4 }
  0x12   : > { %v1915_v14 = vld [vmem:[%s2433_s1 + $0x20] sm:$0xff]   ;;  %v1919_v18 = vld [vmem:[%s2433_s1 + $0x18] sm:$0xff]   ;;  %v1923_v22 = vld [vmem:[%s2433_s1 + $0x10] sm:$0xff]   ;;  %s2186_s6 = scalar_lea.vmem %s2432_s0, %s1876_s22 }
  0x13   : > { %1667 = vmatpush3.bf16.msra.mxu0 %v1907_v6  ;;  %v1916_v15 = vld [vmem:[%s2433_s1 + $0xa0] sm:$0xff]   ;;  %v1920_v19 = vld [vmem:[%s2433_s1 + $0x98] sm:$0xff]   ;;  %v1924_v23 = vld [vmem:[%s2433_s1 + $0x90] sm:$0xff]  }
  0x14   : > { %1707 = vmatpush3.bf16.msra.mxu1 %v1908_v7  ;;  %1668 = vmatprep.subr.bf16.mxu0 %v1909_v8  ;;  %v1925_v24 = vld [vmem:[%s2433_s1 + $0x48] sm:$0xff]   ;;  %v1929_v28 = vld [vmem:[%s2433_s1 + $0x40] sm:$0xff]   ;;  %v1939_v36 = vld [vmem:[%s2433_s1 + $0x178] sm:$0xff]  }
  0x15   : > { %1708 = vmatprep.subr.bf16.mxu1 %v1910_v9  ;;  %v1926_v25 = vld [vmem:[%s2433_s1 + $0xc8] sm:$0xff]   ;;  %v1930_v29 = vld [vmem:[%s2433_s1 + $0xc0] sm:$0xff]   ;;  %v1940_v37 = vld [vmem:[%s2433_s1 + $0x1f8] sm:$0xff]  }
  0x16   : > { %v1927_v26 = vld [vmem:[%s2433_s1 + $0x8] sm:$0xff]   ;;  %v1931_v30 = vld [vmem:[%s2433_s1] sm:$0xff]   ;;  %v1941_v38 = vld [vmem:[%s2433_s1 + $0x138] sm:$0xff]  }
  0x17   : > { %1669 = vmatpush3.bf16.msra.mxu0 %v1911_v10  ;;  %v1928_v27 = vld [vmem:[%s2433_s1 + $0x88] sm:$0xff]   ;;  %v1932_v31 = vld [vmem:[%s2433_s1 + $0x80] sm:$0xff]   ;;  %v1942_v39 = vld [vmem:[%s2433_s1 + $0x1b8] sm:$0xff]  }
  0x18   : > { %1709 = vmatpush3.bf16.msra.mxu1 %v1912_v11  ;;  %1670 = vmatprep.subr.bf16.mxu0 %v1913_v12  ;;  %v1933_v32 = vld [vmem:[%s2186_s6] ss:$36 sps:$4 sm:$0xff]   ;;  %v1936_v34 = vld [vmem:[%s2186_s6 + $0x8] ss:$36 sps:$4 sm:$0xff]   ;;  %v1943_v40 = vld [vmem:[%s2433_s1 + $0x170] sm:$0xff]  }
  0x19   : > { %1710 = vmatprep.subr.bf16.mxu1 %v1914_v13  ;;  %v1935_v33 = vld [vmem:[%s2186_s6 + $0x4] ss:$36 sps:$4 sm:$0xff]   ;;  %v1938_v35 = vld [vmem:[%s2186_s6 + $0xc] ss:$36 sps:$4 sm:$0xff]   ;;  %v1949_v45 = vld [vmem:[%s2186_s6 + $0x54] ss:$36 sps:$4 sm:$0xff]  }
  0x1a   : > { %1068 = vmatprep.mubr.bf16.mxu0 %v1935_v33  ;;  %1133 = vmatprep.mubr.bf16.mxu1 %v1938_v35  ;;  %v1944_v41 = vld [vmem:[%s2433_s1 + $0x1f0] sm:$0xff]   ;;  %v1951_v46 = vld [vmem:[%s2186_s6 + $0x48] ss:$36 sps:$4 sm:$0xff]   ;;  %v1957_v52 = vld [vmem:[%s2433_s1 + $0x160] sm:$0xff]  }
  0x1b   : > { %1671 = vmatpush3.bf16.msra.mxu0 %v1915_v14  ;;  %v1945_v42 = vld [vmem:[%s2433_s1 + $0x130] sm:$0xff]   ;;  %v1953_v48 = vld [vmem:[%s2433_s1 + $0x168] sm:$0xff]   ;;  %v1958_v53 = vld [vmem:[%s2433_s1 + $0x1e0] sm:$0xff]  }
  0x1c   : > { %1711 = vmatpush3.bf16.msra.mxu1 %v1916_v15  ;;  %1672 = vmatprep.subr.bf16.mxu0 %v1917_v16  ;;  %v1946_v43 = vld [vmem:[%s2433_s1 + $0x1b0] sm:$0xff]   ;;  %v1954_v49 = vld [vmem:[%s2433_s1 + $0x1e8] sm:$0xff]   ;;  %v1959_v54 = vld [vmem:[%s2433_s1 + $0x120] sm:$0xff]  }
  0x1d   : > { %1712 = vmatprep.subr.bf16.mxu1 %v1918_v17  ;;  %v1947_v44 = vld [vmem:[%s2186_s6 + $0x4c] ss:$36 sps:$4 sm:$0xff]   ;;  %v1960_v55 = vld [vmem:[%s2433_s1 + $0x1a0] sm:$0xff]   ;;  %v1961_v56 = vld [vmem:[%s2186_s6 + $0x94] ss:$36 sps:$4 sm:$0xff]  }
  0x1e   : > { %v1952_v47 = vld [vmem:[%s2186_s6 + $0x50] ss:$36 sps:$4 sm:$0xff]   ;;  %v1955_v50 = vld [vmem:[%s2433_s1 + $0x128] sm:$0xff]   ;;  %v1963_v57 = vld [vmem:[%s2186_s6 + $0x9c] ss:$36 sps:$4 sm:$0xff]  }
  0x1f   : > { %1673 = vmatpush3.bf16.msra.mxu0 %v1919_v18  ;;  %v1956_v51 = vld [vmem:[%s2433_s1 + $0x1a8] sm:$0xff]   ;;  %v1965_v58 = vld [vmem:[%s2186_s6 + $0x90] ss:$36 sps:$4 sm:$0xff]   ;;  %v1966_v59 = vld [vmem:[%s2186_s6 + $0x98] ss:$36 sps:$4 sm:$0xff]  }
  0x20   : > { %1713 = vmatpush3.bf16.msra.mxu1 %v1920_v19  ;;  %1674 = vmatprep.subr.bf16.mxu0 %v1921_v20  ;;  %v1967_v60 = vld [vmem:[%s2433_s1 + $0x158] sm:$0xff]   ;;  %v1971_v0 = vld [vmem:[%s2433_s1 + $0x150] sm:$0xff]   ;;  %v1977_v5 = vld [vmem:[%s2186_s6 + $0xe4] ss:$36 sps:$4 sm:$0xff]  }
  0x21   : > { %1714 = vmatprep.subr.bf16.mxu1 %v1922_v21  ;;  %v1968_v61 = vld [vmem:[%s2433_s1 + $0x1d8] sm:$0xff]   ;;  %v1972_v1 = vld [vmem:[%s2433_s1 + $0x1d0] sm:$0xff]   ;;  %v1980_v7 = vld [vmem:[%s2186_s6 + $0xe0] ss:$36 sps:$4 sm:$0xff]  }
  0x22   : > { %v1969_v62 = vld [vmem:[%s2433_s1 + $0x118] sm:$0xff]   ;;  %v1973_v2 = vld [vmem:[%s2433_s1 + $0x110] sm:$0xff]   ;;  %v1981_v8 = vld [vmem:[%s2433_s1 + $0x148] sm:$0xff]  }
  0x23   : > { %1675 = vmatpush3.bf16.msra.mxu0 %v1923_v22  ;;  %v1970_v63 = vld [vmem:[%s2433_s1 + $0x198] sm:$0xff]   ;;  %v1974_v3 = vld [vmem:[%s2433_s1 + $0x190] sm:$0xff]   ;;  %v1982_v9 = vld [vmem:[%s2433_s1 + $0x1c8] sm:$0xff]  }
  0x24   : > { %1715 = vmatpush3.bf16.msra.mxu1 %v1924_v23  ;;  %1676 = vmatprep.subr.bf16.mxu0 %v1925_v24  ;;  %v1975_v4 = vld [vmem:[%s2186_s6 + $0xdc] ss:$36 sps:$4 sm:$0xff]   ;;  %v1983_v10 = vld [vmem:[%s2433_s1 + $0x108] sm:$0xff]   ;;  %v1989_v16 = vld [vmem:[%s2186_s6 + $0x10] ss:$36 sps:$4 sm:$0xff]  }
  0x25   : > { %1716 = vmatprep.subr.bf16.mxu1 %v1926_v25  ;;  %v1979_v6 = vld [vmem:[%s2186_s6 + $0xd8] ss:$36 sps:$4 sm:$0xff]   ;;  %v1984_v11 = vld [vmem:[%s2433_s1 + $0x188] sm:$0xff]   ;;  %v1985_v12 = vld [vmem:[%s2433_s1 + $0x140] sm:$0xff]  }
  0x26   : > { %v1986_v13 = vld [vmem:[%s2433_s1 + $0x1c0] sm:$0xff]   ;;  %v1991_v17 = vld [vmem:[%s2186_s6 + $0x14] ss:$36 sps:$4 sm:$0xff]   ;;  %v2013_v33 = vld [vmem:[%s2186_s6 + $0xec] ss:$36 sps:$4 sm:$0xff]  }
  0x27   : > { %1677 = vmatpush3.bf16.msra.mxu0 %v1927_v26  ;;  %v1987_v14 = vld [vmem:[%s2433_s1 + $0x100] sm:$0xff]   ;;  %v1992_v18 = vld [vmem:[%s2186_s6 + $0x18] ss:$36 sps:$4 sm:$0xff]   ;;  %v1996_v21 = vld [vmem:[%s2433_s1 + $0x230] sm:$0xff]  }
  0x28   : > { %1717 = vmatpush3.bf16.msra.mxu1 %v1928_v27  ;;  %1678 = vmatprep.subr.bf16.mxu0 %v1929_v28  ;;  %v1988_v15 = vld [vmem:[%s2433_s1 + $0x180] sm:$0xff]   ;;  %v1995_v20 = vld [vmem:[%s2433_s1 + $0x238] sm:$0xff]   ;;  %v2003_v26 = vld [vmem:[%s2433_s1 + $0x228] sm:$0xff]  }
  0x29   : > { %1718 = vmatprep.subr.bf16.mxu1 %v1930_v29  ;;  %v1994_v19 = vld [vmem:[%s2186_s6 + $0x1c] ss:$36 sps:$4 sm:$0xff]   ;;  %v1999_v23 = vld [vmem:[%s2186_s6 + $0x64] ss:$36 sps:$4 sm:$0xff]   ;;  %v2007_v28 = vld [vmem:[%s2186_s6 + $0xac] ss:$36 sps:$4 sm:$0xff]  }
  0x2a   : > { %v1997_v22 = vld [vmem:[%s2186_s6 + $0x5c] ss:$36 sps:$4 sm:$0xff]   ;;  %v2005_v27 = vld [vmem:[%s2186_s6 + $0xa4] ss:$36 sps:$4 sm:$0xff]   ;;  %v2012_v35 = vld [vmem:[%s2433_s1 + $0x210] sm:$0xff]  }
  0x2b   : > { %1679 = vmatpush3.bf16.msra.mxu0 %v1931_v30  ;;  %v2001_v24 = vld [vmem:[%s2186_s6 + $0x58] ss:$36 sps:$4 sm:$0xff]   ;;  %v2002_v25 = vld [vmem:[%s2186_s6 + $0x60] ss:$36 sps:$4 sm:$0xff]  }
  0x2c   : > { %1719 = vmatpush3.bf16.msra.mxu1 %v1932_v31  ;;  %1744 = vmatprep.subr.bf16.mxu0 %v1939_v36  ;;  %v2004_v29 = vld [vmem:[%s2433_s1 + $0x220] sm:$0xff]   ;;  %v2010_v31 = vld [vmem:[%s2186_s6 + $0xa8] ss:$36 sps:$4 sm:$0xff]  }
  0x2d   : > { %1784 = vmatprep.subr.bf16.mxu1 %v1940_v37  ;;  %v2009_v30 = vld [vmem:[%s2186_s6 + $0xa0] ss:$36 sps:$4 sm:$0xff]   ;;  %v2017_v36 = vld [vmem:[%s2186_s6 + $0xe8] ss:$36 sps:$4 sm:$0xff]  }
  0x2e   : > { %1069 = vmatmul.mubr.bf16.vlgmr.msra.gmra.mxu0 %v1933_v32  ;;  %v2011_v32 = vld [vmem:[%s2433_s1 + $0x218] sm:$0xff]   ;;  %v2019_v37 = vld [vmem:[%s2433_s1 + $0x208] sm:$0xff]  }
  0x2f   : > { %1134 = vmatmul.mubr.bf16.vlgmr.msra.gmra.mxu1 %v1936_v34  ;;  %1745 = vmatpush3.bf16.msra.mxu0 %v1941_v38  ;;  %v2015_v34 = vld [vmem:[%s2186_s6 + $0xf4] ss:$36 sps:$4 sm:$0xff]  }
  0x30   : > { %1785 = vmatpush3.bf16.msra.mxu1 %v1942_v39  ;;  %1746 = vmatprep.subr.bf16.mxu0 %v1943_v40  ;;  %v2018_v38 = vld [vmem:[%s2186_s6 + $0xf0] ss:$36 sps:$4 sm:$0xff]   ;;  %v2021_v39 = vld [vmem:[%s2186_s6 + $0x20] ss:$36 sps:$4 sm:$0xff]  }
  0x31   : > { %1786 = vmatprep.subr.bf16.mxu1 %v1944_v41  ;;  %1076 = vmatprep.mubr.bf16.mxu0 %v1947_v44  ;;  %v2022_v40 = vld [vmem:[%s2186_s6 + $0xb0] ss:$36 sps:$4 sm:$0xff]   ;;  %v2020_v41 = vld [vmem:[%s2433_s1 + $0x200] sm:$0xff]  }
  0x32   : > { %1141 = vmatprep.mubr.bf16.mxu1 %v1949_v45 }
  0x33   : > { %1747 = vmatpush3.bf16.msra.mxu0 %v1945_v42  ;;  %v2023_v42 = vld [vmem:[%s2186_s6 + $0x68] ss:$36 sps:$4 sm:$0xff]  }
  0x34   : > { %1787 = vmatpush3.bf16.msra.mxu1 %v1946_v43  ;;  %1748 = vmatprep.subr.bf16.mxu0 %v1953_v48  ;;  %v2024_v43 = vld [vmem:[%s2186_s6 + $0xf8] ss:$36 sps:$4 sm:$0xff]  }
  0x35   : > { %1788 = vmatprep.subr.bf16.mxu1 %v1954_v49 }
  0x36   : > { %1077 = vmatmul.mubr.bf16.gmra.mxu0 %v1951_v46 }
  0x37   : > { %1142 = vmatmul.mubr.bf16.gmra.mxu1 %v1952_v47  ;;  %1749 = vmatpush3.bf16.msra.mxu0 %v1955_v50 }
  0x38   : > { %1789 = vmatpush3.bf16.msra.mxu1 %v1956_v51  ;;  %1750 = vmatprep.subr.bf16.mxu0 %v1957_v52 }
  0x39   : > { %1790 = vmatprep.subr.bf16.mxu1 %v1958_v53  ;;  %1084 = vmatprep.mubr.bf16.mxu0 %v1961_v56 }
  0x3a   : > { %1149 = vmatprep.mubr.bf16.mxu1 %v1963_v57 }
  0x3b   : > { %1751 = vmatpush3.bf16.msra.mxu0 %v1959_v54 }
  0x3c   : > { %1791 = vmatpush3.bf16.msra.mxu1 %v1960_v55  ;;  %1752 = vmatprep.subr.bf16.mxu0 %v1967_v60 }
  0x3d   : > { %1792 = vmatprep.subr.bf16.mxu1 %v1968_v61 }
  0x3e   : > { %1085 = vmatmul.mubr.bf16.gmra.mxu0 %v1965_v58 }
  0x3f   : > { %1150 = vmatmul.mubr.bf16.gmra.mxu1 %v1966_v59  ;;  %1753 = vmatpush3.bf16.msra.mxu0 %v1969_v62 }
  0x40   : > { %1793 = vmatpush3.bf16.msra.mxu1 %v1970_v63  ;;  %1754 = vmatprep.subr.bf16.mxu0 %v1971_v0 }
  0x41   : > { %1794 = vmatprep.subr.bf16.mxu1 %v1972_v1  ;;  %1092 = vmatprep.mubr.bf16.mxu0 %v1975_v4 }
  0x42   : > { %1157 = vmatprep.mubr.bf16.mxu1 %v1977_v5 }
  0x43   : > { %1755 = vmatpush3.bf16.msra.mxu0 %v1973_v2 }
  0x44   : > { %1795 = vmatpush3.bf16.msra.mxu1 %v1974_v3  ;;  %1756 = vmatprep.subr.bf16.mxu0 %v1981_v8 }
  0x45   : > { %1796 = vmatprep.subr.bf16.mxu1 %v1982_v9 }
  0x46   : > { %1093 = vmatmul.mubr.bf16.gmra.mxu0 %v1979_v6 }
  0x47   : > { %1158 = vmatmul.mubr.bf16.gmra.mxu1 %v1980_v7  ;;  %1757 = vmatpush3.bf16.msra.mxu0 %v1983_v10 }
  0x48   : > { %1797 = vmatpush3.bf16.msra.mxu1 %v1984_v11  ;;  %1758 = vmatprep.subr.bf16.mxu0 %v1985_v12 }
  0x49   : > { %1798 = vmatprep.subr.bf16.mxu1 %v1986_v13  ;;  %1198 = vmatprep.mubr.bf16.mxu0 %v1991_v17 }
  0x4a   : > { %1263 = vmatprep.mubr.bf16.mxu1 %v1994_v19 }
  0x4b   : > { %1759 = vmatpush3.bf16.msra.mxu0 %v1987_v14 }
  0x4c   : > { %1799 = vmatpush3.bf16.msra.mxu1 %v1988_v15  ;;  %1836 = vmatprep.subr.bf16.mxu0 %v1995_v20 }
  0x4d   : > { %1860 = vmatprep.subr.bf16.mxu1 %v1995_v20 }
  0x4e   : > { %1199 = vmatmul.mubr.bf16.vlgmr.msra.gmra.mxu0 %v1989_v16 }
  0x4f   : > { %1264 = vmatmul.mubr.bf16.vlgmr.msra.gmra.mxu1 %v1992_v18  ;;  %1837 = vmatpush3.bf16.msra.mxu0 %v1995_v20 }
  0x50   : > { %1868 = vmatpush3.bf16.msra.mxu1 %v1995_v20  ;;  %1838 = vmatprep.subr.bf16.mxu0 %v1996_v21 }
  0x51   : > { %1861 = vmatprep.subr.bf16.mxu1 %v1996_v21  ;;  %1206 = vmatprep.mubr.bf16.mxu0 %v1997_v22 }
  0x52   : > { %1271 = vmatprep.mubr.bf16.mxu1 %v1999_v23 }
  0x53   : > { %1839 = vmatpush3.bf16.msra.mxu0 %v1996_v21 }
  0x54   : > { %1869 = vmatpush3.bf16.msra.mxu1 %v1996_v21  ;;  %1840 = vmatprep.subr.bf16.mxu0 %v2003_v26 }
  0x55   : > { %1862 = vmatprep.subr.bf16.mxu1 %v2003_v26 }
  0x56   : > { %1207 = vmatmul.mubr.bf16.gmra.mxu0 %v2001_v24 }
  0x57   : > { %1272 = vmatmul.mubr.bf16.gmra.mxu1 %v2002_v25  ;;  %1214 = vmatprep.mubr.bf16.mxu0 %v2005_v27 }
  0x58   : > { %1841 = vmatpush3.bf16.msra.mxu0 %v2003_v26  ;;  %1279 = vmatprep.mubr.bf16.mxu1 %v2007_v28 }
  0x59   : > { %1870 = vmatpush3.bf16.msra.mxu1 %v2003_v26  ;;  %1842 = vmatprep.subr.bf16.mxu0 %v2004_v29 }
  0x5a   : > { %1863 = vmatprep.subr.bf16.mxu1 %v2004_v29 }
  0x5c   : > { %1843 = vmatpush3.bf16.msra.mxu0 %v2004_v29 }
  0x5d   : > { %1871 = vmatpush3.bf16.msra.mxu1 %v2004_v29  ;;  %1844 = vmatprep.subr.bf16.mxu0 %v2011_v32 }
  0x5e   : > { %1215 = vmatmul.mubr.bf16.gmra.mxu0 %v2009_v30  ;;  %1864 = vmatprep.subr.bf16.mxu1 %v2011_v32 }
  0x5f   : > { %1280 = vmatmul.mubr.bf16.gmra.mxu1 %v2010_v31  ;;  %1222 = vmatprep.mubr.bf16.mxu0 %v2013_v33 }
  0x60   : > { %1845 = vmatpush3.bf16.msra.mxu0 %v2011_v32  ;;  %1287 = vmatprep.mubr.bf16.mxu1 %v2015_v34 }
  0x61   : > { %1872 = vmatpush3.bf16.msra.mxu1 %v2011_v32  ;;  %1846 = vmatprep.subr.bf16.mxu0 %v2012_v35  ;;  %v1514_v32 = vld [vmem:[%s2434_s2] ss:$0 sm:$0xff] }
  0x62   : > { %1865 = vmatprep.subr.bf16.mxu1 %v2012_v35 }
  0x64   : > { %1847 = vmatpush3.bf16.msra.mxu0 %v2012_v35 }
  0x65   : > { %1873 = vmatpush3.bf16.msra.mxu1 %v2012_v35  ;;  %1848 = vmatprep.subr.bf16.mxu0 %v2019_v37 }
  0x66   : > { %1223 = vmatmul.mubr.bf16.gmra.mxu0 %v2017_v36  ;;  %1866 = vmatprep.subr.bf16.mxu1 %v2019_v37 }
  0x67   : > { %1288 = vmatmul.mubr.bf16.gmra.mxu1 %v2018_v38  ;;  %1852 = vmatprep.mubr.bf16.mxu0 %v2021_v39 }
  0x68   : > { %1849 = vmatpush3.bf16.msra.mxu0 %v2019_v37  ;;  %1856 = vmatprep.mubr.bf16.mxu1 %v2022_v40 }
  0x69   : > { %1874 = vmatpush3.bf16.msra.mxu1 %v2019_v37  ;;  %1850 = vmatprep.subr.bf16.mxu0 %v2020_v41 }
  0x6a   : > { %1867 = vmatprep.subr.bf16.mxu1 %v2020_v41 }
  0x6c   : > { %1851 = vmatpush3.bf16.msra.mxu0 %v2020_v41 }
  0x6d   : > { %1875 = vmatpush3.bf16.msra.mxu1 %v2020_v41 }
  0x6f   : > { %1853 = vmatmul.mubr.bf16.vlgmr.msra.gmra.mxu0 %v2023_v42 }
  0x70   : > { %1857 = vmatmul.mubr.bf16.vlgmr.msra.gmra.mxu1 %v2024_v43 }
  0xee   : > { %v1680_v44 = vpop.f32.mrf.mxu0 }
  0xef   : > { %v2350_v45 = vpop.f32.mrf.mxu1 }
  0xf0   : > { %v1681_v46 = vpop.f32.mrf.mxu0 }
  0xf1   : > { %v2352_v47 = vpop.f32.mrf.mxu1  ;;  %v1682_v31 = vadd.f32 %v1681_v46, %v1680_v44 }
  0xf2   : > { %v1683_v48 = vpop.f32.mrf.mxu0  ;;  %v1722_v46 = vadd.f32 %v2352_v47, %v2350_v45 }
  0xf3   : > { %v2354_v49 = vpop.f32.mrf.mxu1  ;;  %v1071_v40 = vadd.f32 %v1682_v31, %v1514_v32 }
  0xf4   : > { %v1684_v50 = vpop.f32.mrf.mxu0 }
  0xf5   : > { %v2356_v51 = vpop.f32.mrf.mxu1  ;;  %v1685_v42 = vadd.f32 %v1684_v50, %v1683_v48 }
  0xf6   : > { %v1686_v52 = vpop.f32.mrf.mxu0 }
  0xf7   : > { %v1726_v53 = vpop.f32.mrf.mxu1 }
  0xf8   : > { %v1687_v54 = vpop.f32.mrf.mxu0 }
  0xf9   : > { %v1727_v55 = vpop.f32.mrf.mxu1  ;;  %v1688_v33 = vadd.f32 %v1687_v54, %v1686_v52 }
  0xfa   : > { %v1689_v56 = vpop.f32.mrf.mxu0  ;;  %v1728_v52 = vadd.f32 %v1727_v55, %v1726_v53 }
  0xfb   : > { %v2358_v57 = vpop.f32.mrf.mxu1  ;;  %v1079_v43 = vadd.f32 %v1688_v33, %v1514_v32 }
  0xfc   : > { %v1690_v58 = vpop.f32.mrf.mxu0 }
  0xfd   : > { %v1730_v59 = vpop.f32.mrf.mxu1  ;;  %v1691_v36 = vadd.f32 %v1690_v58, %v1689_v56 }
  0xfe   : > { %v1692_v60 = vpop.f32.mrf.mxu0  ;;  %v1731_v48 = vadd.f32 %v1730_v59, %v2358_v57 }
  0xff   : > { %v2360_v61 = vpop.f32.mrf.mxu1 }
 0x100   : > { %v1693_v62 = vpop.f32.mrf.mxu0 }
 0x101   : > { %v2362_v63 = vpop.f32.mrf.mxu1  ;;  %v1694_v54 = vadd.f32 %v1693_v62, %v1692_v60 }
 0x102   : > { %v1695_v0 = vpop.f32.mrf.mxu0 }
 0x103   : > { %v2364_v1 = vpop.f32.mrf.mxu1  ;;  %v1087_v62 = vadd.f32 %v1694_v54, %v1514_v32 }
 0x104   : > { %v1696_v2 = vpop.f32.mrf.mxu0 }
 0x105   : > { %v2366_v3 = vpop.f32.mrf.mxu1 }
 0x106   : > { %v1698_v4 = vpop.f32.mrf.mxu0 }
 0x107   : > { %v1738_v5 = vpop.f32.mrf.mxu1 }
 0x108   : > { %v1699_v6 = vpop.f32.mrf.mxu0 }
 0x109   : > { %v1739_v7 = vpop.f32.mrf.mxu1  ;;  %v1700_v37 = vadd.f32 %v1699_v6, %v1698_v4  ;;  %v1136_v4 = vadd.f32 %v1722_v46, %v1071_v40  ;;  %v1725_v6 = vadd.f32 %v2356_v51, %v2354_v49 }
 0x10a   : > { %v1701_v8 = vpop.f32.mrf.mxu0  ;;  %v1740_v31 = vadd.f32 %v1739_v7, %v1738_v5  ;;  %v1737_v7 = vadd.f32 %v2366_v3, %v2364_v1 }
 0x10b   : > { %v1741_v9 = vpop.f32.mrf.mxu1 }
 0x10c   : > { %v1702_v10 = vpop.f32.mrf.mxu0 }
 0x10d   : > { %v1742_v11 = vpop.f32.mrf.mxu1  ;;  %v1703_v41 = vadd.f32 %v1702_v10, %v1701_v8  ;;  %v1074_v8 = vadd.f32 %v1685_v42, %v1514_v32  ;;  %v1144_v10 = vadd.f32 %v1728_v52, %v1079_v43 }
 0x10e   : > { %v2368_v12 = vpop.f32.mrf.mxu0  ;;  %v1743_v53 = vadd.f32 %v1742_v11, %v1741_v9 }
 0x10f   : > { %v2370_v13 = vpop.f32.mrf.mxu1  ;;  %v1098_v50 = vadd.f32 %v1703_v41, %v1514_v32 }
 0x110   : > { %v1761_v14 = vpop.f32.mrf.mxu0 }
 0x111   : > { %v2372_v15 = vpop.f32.mrf.mxu1  ;;  %v1163_v57 = vadd.f32 %v1743_v53, %v1098_v50  ;;  %v1762_v59 = vadd.f32 %v1761_v14, %v2368_v12 }
 0x112   : > { %v1763_v16 = vpop.f32.mrf.mxu0 }
 0x113   : > { %v2374_v17 = vpop.f32.mrf.mxu1  ;;  %v1201_v12 = vadd.f32 %v1762_v59, %v1136_v4 }
 0x114   : > { %2436 = vst [vmem:[#allocation2_spill] sm:$0xff] %v2374_v17  ;;  %v1764_v18 = vpop.f32.mrf.mxu0  ;;  %v1095_v17 = vadd.f32 %v1700_v37, %v1514_v32 }
 0x115   : > { %v2376_v19 = vpop.f32.mrf.mxu1  ;;  %v1765_v37 = vadd.f32 %v1764_v18, %v1763_v16 }
 0x116   : > { %2437 = vst [vmem:[#allocation3_spill] sm:$0xff] %v2376_v19  ;;  %v1766_v20 = vpop.f32.mrf.mxu0  ;;  %v1082_v19 = vadd.f32 %v1691_v36, %v1514_v32  ;;  %v1160_v36 = vadd.f32 %v1740_v31, %v1095_v17 }
 0x117   : > { %v2378_v21 = vpop.f32.mrf.mxu1 }
 0x118   : > { %v1767_v22 = vpop.f32.mrf.mxu0  ;;  %v1147_v47 = vadd.f32 %v1731_v48, %v1082_v19 }
 0x119   : > { %v2380_v23 = vpop.f32.mrf.mxu1  ;;  %v1768_v55 = vadd.f32 %v1767_v22, %v1766_v20  ;;  %v1139_v22 = vadd.f32 %v1725_v6, %v1074_v8 }
 0x11a   : > { %v1769_v24 = vpop.f32.mrf.mxu0  ;;  %v1808_v16 = vadd.f32 %v2380_v23, %v2378_v21 }
 0x11b   : > { %v2382_v25 = vpop.f32.mrf.mxu1  ;;  %v1204_v14 = vadd.f32 %v1765_v37, %v1139_v22  ;;  %v2441_v41 = vld [vmem:[#allocation2_spill] sm:$0xff] }
 0x11c   : > { %v1770_v26 = vpop.f32.mrf.mxu0 }
 0x11d   : > { %v2384_v27 = vpop.f32.mrf.mxu1  ;;  %v1771_v60 = vadd.f32 %v1770_v26, %v1769_v24  ;;  %v1209_v24 = vadd.f32 %v1768_v55, %v1144_v10  ;;  %v2442_v42 = vld [vmem:[#allocation3_spill] sm:$0xff] }
 0x11e   : > { %v1772_v28 = vpop.f32.mrf.mxu0  ;;  %v1811_v1 = vadd.f32 %v2384_v27, %v2382_v25  ;;  %v1805_v43 = vadd.f32 %v2442_v42, %v2441_v41 }
 0x11f   : > { %v2386_v29 = vpop.f32.mrf.mxu1  ;;  %v1212_v26 = vadd.f32 %v1771_v60, %v1147_v47 }
 0x120   : > { %2438 = vst [vmem:[#allocation4_spill] sm:$0xff] %v2386_v29  ;;  %v1773_v30 = vpop.f32.mrf.mxu0  ;;  %v1269_v50 = vadd.f32 %v1805_v43, %v1204_v14 }
 0x121   : > { %v2391_v34 = vpop.f32.mrf.mxu1  ;;  %v1774_v19 = vadd.f32 %v1773_v30, %v1772_v28  ;;  %v1277_v52 = vadd.f32 %v1811_v1, %v1212_v26 }
 0x122   : > { %2439 = vst [vmem:[#allocation5_spill] sm:$0xff] %v2391_v34  ;;  %v1775_v35 = vpop.f32.mrf.mxu0  ;;  %v1697_v34 = vadd.f32 %v1696_v2, %v1695_v0  ;;  %v1734_v0 = vadd.f32 %v2362_v63, %v2360_v61 }
 0x123   : > { %v2393_v38 = vpop.f32.mrf.mxu1 }
 0x124   : > { %v1776_v39 = vpop.f32.mrf.mxu0  ;;  %v1090_v2 = vadd.f32 %v1697_v34, %v1514_v32  ;;  %v1152_v63 = vadd.f32 %v1734_v0, %v1087_v62 }
 0x125   : > { %v2395_v29 = vpop.f32.mrf.mxu1  ;;  %v1777_v9 = vadd.f32 %v1776_v39, %v1775_v35 }
 0x126   : > { %2440 = vst [vmem:[#allocation6_spill] sm:$0xff] %v2395_v29  ;;  %v1778_v44 = vpop.f32.mrf.mxu0  ;;  %v1155_v17 = vadd.f32 %v1737_v7, %v1090_v2  ;;  %v1217_v18 = vadd.f32 %v1774_v19, %v1152_v63 }
 0x127   : > { %v1818_v56 = vpop.f32.mrf.mxu1  ;;  %v2443_v21 = vld [vmem:[#allocation4_spill] sm:$0xff] }
 0x128   : > { %v1779_v58 = vpop.f32.mrf.mxu0  ;;  %v1220_v28 = vadd.f32 %v1777_v9, %v1155_v17 }
 0x129   : > { %v1780_v33 = vadd.f32 %v1779_v58, %v1778_v44  ;;  %v1819_v29 = vpop.f32.mrf.mxu1  ;;  %v1274_v44 = vadd.f32 %v1808_v16, %v1209_v24  ;;  %v2444_v23 = vld [vmem:[#allocation5_spill] sm:$0xff] }
 0x12a   : > { %v1781_v45 = vpop.f32.mrf.mxu0  ;;  %v1820_v32 = vadd.f32 %v1819_v29, %v1818_v56  ;;  %v1802_v29 = vadd.f32 %v2372_v15, %v2370_v13  ;;  %v1814_v54 = vadd.f32 %v2444_v23, %v2443_v21 }
 0x12b   : > { %v1821_v49 = vpop.f32.mrf.mxu1  ;;  %v1225_v11 = vadd.f32 %v1780_v33, %v1160_v36 }
 0x12c   : > { %v1782_v51 = vpop.f32.mrf.mxu0  ;;  %v1266_v4 = vadd.f32 %v1802_v29, %v1201_v12  ;;  %v1282_v15 = vadd.f32 %v1814_v54, %v1217_v18 }
 0x12d   : > { %v1783_v5 = vadd.f32 %v1782_v51, %v1781_v45  ;;  %v1822_v20 = vpop.f32.mrf.mxu1  ;;  %v1290_v30 = vadd.f32 %v1820_v32, %v1225_v11  ;;  %v2445_v25 = vld [vmem:[#allocation6_spill] sm:$0xff] }
 0x12e   : > { %v1823_v34 = vadd.f32 %v1822_v20, %v1821_v49  ;;  %v1817_v27 = vadd.f32 %v2445_v25, %v2393_v38 }
 0x12f   : > { %v1228_v61 = vadd.f32 %v1783_v5, %v1163_v57  ;;  %v1854_v40 = vpop.f32.mrf.mxu0 }
 0x130   : > { %v1858_v3 = vpop.f32.mrf.mxu1  ;;  %v1339_v58 = vadd.f32 %v1854_v40, %v1274_v44  ;;  %v1285_v31 = vadd.f32 %v1817_v27, %v1220_v28 }
 0x131   : > { %v1330_v35 = vpop.f32.mrf.mxu0  ;;  %v1293_v39 = vadd.f32 %v1823_v34, %v1228_v61  ;;  %v1355_v13 = vadd.f32 %v1858_v3, %v1290_v30 }
 0x132   : > { %v1346_v46 = vpop.f32.mrf.mxu1  ;;  %v1331_v33 = vadd.f32 %v1330_v35, %v1266_v4 }
 0x133   : > { %v1855_v56 = vpop.f32.mrf.mxu0  ;;  %v1347_v38 = vadd.f32 %v1346_v46, %v1282_v15 }
 0x134   : > { %v1342_v6 = vadd.f32 %v1855_v56, %v1277_v52  ;;  %v1859_v48 = vpop.f32.mrf.mxu1 }
 0x135   : > { %v1358_v8 = vadd.f32 %v1859_v48, %v1293_v39  ;;  %v1333_v10 = vpop.f32.mrf.mxu0 }
 0x136   : > { %v1649_v45 = vpack.c.bf16 %v1342_v6, %v1339_v58  ;;  %v1334_v47 = vadd.f32 %v1333_v10, %v1269_v50  ;;  %v1349_v53 = vpop.f32.mrf.mxu1 }
 0x137   : > { %v1659_v55 = vpack.c.bf16 %v1358_v8, %v1355_v13  ;;  %v1350_v60 = vadd.f32 %v1349_v53, %v1285_v31 }
 0x138   : > { %1661 = vst [vmem:[%s226_s7 + $0x8] sm:$0xff] %v1649_v45   ;;  %v1644_v62 = vpack.c.bf16 %v1334_v47, %v1331_v33 }
 0x139   : > { %1663 = vst [vmem:[%s226_s7 + $0x18] sm:$0xff] %v1659_v55   ;;  %v1654_v0 = vpack.c.bf16 %v1350_v60, %v1347_v38 }
 0x13a   : > { %1645 = vst [vmem:[%s226_s7] sm:$0xff] %v1644_v62  }
 0x13b   : > { %1662 = vst [vmem:[%s226_s7 + $0x10] sm:$0xff] %v1654_v0  }
 0x13c PF: > { %s13_s14 = sadd.s32 1, %s2047_s14   ;;  %s2446_s12 = smov %s2043_s13 }
 0x13d   : > { %p10_p5 = scmp.ge.s32.totalorder %s13_s14, 4   ;;  %s2447_s13 = smov %s2449_s15 }
 0x13f   :  { %12 = sbr.rel (!%p10_p5) target bundleno = 2 (0x2), region = 68 }

// kernel: _lambda_.45
= control target key start
LH: loop header
LB: loop body
LE: loop exit
PB: predicated region body
PF: predicated region fallthrough
CT: control target
= control target key end

     0   :  { %s3955_s12 = smov 0   ;;  %s3957_s13 = smov 0   ;;  %s4871_s0 = inlined_call_operand.vmem [shape: bf16[512,1152], index: 0, kind: input, shape index: {}]   ;;  %s4872_s1 = inlined_call_operand.vmem [shape: bf16[1152,64], index: 1, kind: input, shape index: {}]   ;;  %s4873_s2 = inlined_call_operand.vmem [shape: f32[1,64], index: 2, kind: input, shape index: {}]   ;;  %s4874_s3 = inlined_call_operand.vmem [shape: bf16[512,64], index: 3, kind: output, shape index: {}]  }
   0x1   :  { %s3959_s14 = smov 0  }
   0x2 LB: > { %s25_s15 = sadd.s32 1, %s3929_s13  ;;  %p2782_p0 = scmp.ge.s32.totalorder %s3933_s14, 1  ;;  %s3933_s14 = sphi %s3959_s14, %s13_s14   ;;  %s3929_s13 = sphi %s3957_s13, %s4896_s13   ;;  %s3925_s12 = sphi %s3955_s12, %s4895_s12  }
   0x3   : > { %p27_p1 = scmp.ge.s32.totalorder %s25_s15, 2  ;;  %p170_p2 = scmp.lt.s32.totalorder %s3933_s14, 3 }
   0x5   : > { %s4898_s15 = smov (%p27_p1, %s25_s15), 0  ;;  %p171_p3 = pnand %p2782_p0, %p170_p2 }
   0x7   : > { %174 = sbr.rel (%p171_p3) target bundleno = 533 (0x215), region = 32 }
   0xc   : > { %v3631_v0 = vld [vmem:[%s4872_s1 + $0x78] sm:$0xff]   ;;  %s2783_s18 = sshll.u32 %s3925_s12, 5  ;;  %v3633_v2 = vld [vmem:[%s4872_s1 + $0x70] sm:$0xff]   ;;  %v3635_v4 = vld [vmem:[%s4872_s1 + $0x68] sm:$0xff]   ;;  %vm2641_vm0 = vcmask 519168  }
   0xd   : > { %v3632_v1 = vld [vmem:[%s4872_s1 + $0x38] sm:$0xff]   ;;  %3070 = vmatprep.subr.bf16.mxu0 %v3631_v0  ;;  %3590 = vmatprep.subr.bf16.mxu1 %v3631_v0  ;;  %p206_p4 = scmp.lt.s32.totalorder %s2783_s18, 63  ;;  %v3634_v3 = vld [vmem:[%s4872_s1 + $0x30] sm:$0xff]   ;;  %v3636_v5 = vld [vmem:[%s4872_s1 + $0x28] sm:$0xff]  }
   0xe   : > { %3071 = vmatpush3.bf16.msra.mxu0 %v3632_v1  ;;  %3598 = vmatpush3.bf16.msra.mxu1 %v3632_v1  ;;  %v3637_v6 = vld [vmem:[%s4872_s1 + $0x60] sm:$0xff]   ;;  %v3639_v8 = vld [vmem:[%s4872_s1 + $0x58] sm:$0xff]   ;;  %v3641_v10 = vld [vmem:[%s4872_s1 + $0x50] sm:$0xff]  }
   0xf   : > { %3072 = vmatprep.subr.bf16.mxu0 %v3633_v2  ;;  %3591 = vmatprep.subr.bf16.mxu1 %v3633_v2  ;;  %s4900_s18 = smov (!%p206_p4, %s2783_s18), 63  ;;  %v3638_v7 = vld [vmem:[%s4872_s1 + $0x20] sm:$0xff]   ;;  %v3640_v9 = vld [vmem:[%s4872_s1 + $0x18] sm:$0xff]   ;;  %v3642_v13 = vld [vmem:[%s4872_s1 + $0x10] sm:$0xff]  }
  0x10   : > { %s3606_s4 = smul.u32 36, %s4900_s18  ;;  %v3643_v14 = vld [vmem:[%s4872_s1 + $0x48] sm:$0xff]   ;;  %v3645_v16 = vld [vmem:[%s4872_s1 + $0x40] sm:$0xff]   ;;  %v3653_v18 = vld [vmem:[%s4872_s1 + $0xf8] sm:$0xff]  }
  0x11   : > { %v3644_v15 = vld [vmem:[%s4872_s1 + $0x8] sm:$0xff]   ;;  %v3646_v17 = vld [vmem:[%s4872_s1] sm:$0xff]   ;;  %v3656_v21 = vld [vmem:[%s4872_s1 + $0x178] sm:$0xff]  }
  0x12   : > { %3073 = vmatpush3.bf16.msra.mxu0 %v3634_v3  ;;  %3599 = vmatpush3.bf16.msra.mxu1 %v3634_v3  ;;  %s4006_s11 = scalar_lea.vmem %s4871_s0, %s3606_s4  ;;  %v3654_v22 = vld [vmem:[%s4872_s1 + $0xb8] sm:$0xff]   ;;  %v3655_v23 = vld [vmem:[%s4872_s1 + $0xf0] sm:$0xff]   ;;  %v3665_v31 = vld [vmem:[%s4872_s1 + $0xe8] sm:$0xff]  }
  0x13   : > { %3074 = vmatprep.subr.bf16.mxu0 %v3635_v4  ;;  %3592 = vmatprep.subr.bf16.mxu1 %v3635_v4  ;;  %v3649_v11 = vld [vmem:[%s4006_s11 + $0x4] ss:$36 sps:$4 sm:$0xff]   ;;  %v3658_v24 = vld [vmem:[%s4872_s1 + $0x138] sm:$0xff]   ;;  %v3659_v25 = vld [vmem:[%s4006_s11 + $0x4c] ss:$36 sps:$4 sm:$0xff]  }
  0x14   : > { %v3652_v12 = vld [vmem:[%s4006_s11 + $0x364] ss:$36 sps:$4 sm:$0xff]   ;;  %1740 = vmatprep.mubr.bf16.mxu0 %v3649_v11  ;;  %v3661_v26 = vld [vmem:[%s4006_s11 + $0x3ac] ss:$36 sps:$4 sm:$0xff]   ;;  %v3669_v35 = vld [vmem:[%s4006_s11 + $0x94] ss:$36 sps:$4 sm:$0xff]  }
  0x15   : > { %1836 = vmatprep.mubr.bf16.mxu1 %v3652_v12  ;;  %v3647_v19 = vld [vmem:[%s4006_s11] ss:$36 sps:$4 sm:$0xff]   ;;  %v3657_v27 = vld [vmem:[%s4872_s1 + $0xb0] sm:$0xff]   ;;  %v3663_v29 = vld [vmem:[%s4006_s11 + $0x48] ss:$36 sps:$4 sm:$0xff]  }
  0x16   : > { %3075 = vmatpush3.bf16.msra.mxu0 %v3636_v5  ;;  %3600 = vmatpush3.bf16.msra.mxu1 %v3636_v5  ;;  %v3650_v20 = vld [vmem:[%s4006_s11 + $0x360] ss:$36 sps:$4 sm:$0xff]   ;;  %v3676_v28 = vld [vmem:[%s4872_s1 + $0x170] sm:$0xff]   ;;  %v3664_v30 = vld [vmem:[%s4006_s11 + $0x3a8] ss:$36 sps:$4 sm:$0xff]  }
  0x17   : > { %3076 = vmatprep.subr.bf16.mxu0 %v3637_v6  ;;  %3593 = vmatprep.subr.bf16.mxu1 %v3637_v6  ;;  %v3666_v32 = vld [vmem:[%s4872_s1 + $0xa8] sm:$0xff]   ;;  %v3678_v33 = vld [vmem:[%s4872_s1 + $0x130] sm:$0xff]   ;;  %v3667_v34 = vld [vmem:[%s4872_s1 + $0xe0] sm:$0xff]  }
  0x18   : > { %v3671_v36 = vld [vmem:[%s4006_s11 + $0x3f4] ss:$36 sps:$4 sm:$0xff]   ;;  %v3668_v37 = vld [vmem:[%s4872_s1 + $0xa0] sm:$0xff]   ;;  %v3690_v43 = vld [vmem:[%s4872_s1 + $0x168] sm:$0xff]  }
  0x19   : > { %v3673_v38 = vld [vmem:[%s4006_s11 + $0x90] ss:$36 sps:$4 sm:$0xff]   ;;  %v3675_v40 = vld [vmem:[%s4872_s1 + $0xd8] sm:$0xff]   ;;  %v3692_v46 = vld [vmem:[%s4872_s1 + $0x128] sm:$0xff]  }
  0x1a   : > { %3077 = vmatpush3.bf16.msra.mxu0 %v3638_v7  ;;  %3601 = vmatpush3.bf16.msra.mxu1 %v3638_v7  ;;  %v3674_v39 = vld [vmem:[%s4006_s11 + $0x3f0] ss:$36 sps:$4 sm:$0xff]   ;;  %v3677_v41 = vld [vmem:[%s4872_s1 + $0x98] sm:$0xff]   ;;  %v3687_v48 = vld [vmem:[%s4872_s1 + $0xc8] sm:$0xff]  }
  0x1b   : > { %3078 = vmatprep.subr.bf16.mxu0 %v3639_v8  ;;  %3594 = vmatprep.subr.bf16.mxu1 %v3639_v8  ;;  %v3679_v42 = vld [vmem:[%s4872_s1 + $0xd0] sm:$0xff]   ;;  %v3681_v44 = vld [vmem:[%s4006_s11 + $0xdc] ss:$36 sps:$4 sm:$0xff]   ;;  %v3688_v51 = vld [vmem:[%s4872_s1 + $0x88] sm:$0xff]  }
  0x1c   : > { %v3683_v45 = vld [vmem:[%s4006_s11 + $0x43c] ss:$36 sps:$4 sm:$0xff]   ;;  %v3680_v47 = vld [vmem:[%s4872_s1 + $0x90] sm:$0xff]   ;;  %v3693_v53 = vld [vmem:[%s4006_s11 + $0x124] ss:$36 sps:$4 sm:$0xff]  }
  0x1d   : > { %v3685_v49 = vld [vmem:[%s4006_s11 + $0xd8] ss:$36 sps:$4 sm:$0xff]   ;;  %v3689_v52 = vld [vmem:[%s4872_s1 + $0xc0] sm:$0xff]   ;;  %v3697_v54 = vld [vmem:[%s4006_s11 + $0xc] ss:$36 sps:$4 sm:$0xff]  }
  0x1e   : > { %3079 = vmatpush3.bf16.msra.mxu0 %v3640_v9  ;;  %3602 = vmatpush3.bf16.msra.mxu1 %v3640_v9  ;;  %v3686_v50 = vld [vmem:[%s4006_s11 + $0x438] ss:$36 sps:$4 sm:$0xff]   ;;  %v3707_v55 = vld [vmem:[%s4872_s1 + $0x160] sm:$0xff]   ;;  %v3695_v58 = vld [vmem:[%s4006_s11 + $0x8] ss:$36 sps:$4 sm:$0xff]  }
  0x1f   : > { %3080 = vmatprep.subr.bf16.mxu0 %v3641_v10  ;;  %3595 = vmatprep.subr.bf16.mxu1 %v3641_v10  ;;  %v3708_v56 = vld [vmem:[%s4872_s1 + $0x120] sm:$0xff]   ;;  %v3699_v60 = vld [vmem:[%s4872_s1 + $0x1f8] sm:$0xff]   ;;  %v3701_v62 = vld [vmem:[%s4006_s11 + $0x16c] ss:$36 sps:$4 sm:$0xff]  }
  0x20   : > { %v3691_v57 = vld [vmem:[%s4872_s1 + $0x80] sm:$0xff]   ;;  %v3700_v61 = vld [vmem:[%s4872_s1 + $0x1b8] sm:$0xff]   ;;  %v3715_v1 = vld [vmem:[%s4872_s1 + $0x1f0] sm:$0xff]  }
  0x21   : > { %v3698_v59 = vld [vmem:[%s4006_s11 + $0x120] ss:$36 sps:$4 sm:$0xff]   ;;  %v3703_v63 = vld [vmem:[%s4006_s11 + $0x54] ss:$36 sps:$4 sm:$0xff]   ;;  %v3705_v4 = vld [vmem:[%s4006_s11 + $0x168] ss:$36 sps:$4 sm:$0xff]  }
  0x22   : > { %3081 = vmatpush3.bf16.msra.mxu0 %v3642_v13  ;;  %3603 = vmatpush3.bf16.msra.mxu1 %v3642_v13  ;;  %v3717_v0 = vld [vmem:[%s4872_s1 + $0x158] sm:$0xff]   ;;  %v3716_v3 = vld [vmem:[%s4872_s1 + $0x1b0] sm:$0xff]   ;;  %v3732_v9 = vld [vmem:[%s4872_s1 + $0x1e8] sm:$0xff]  }
  0x23   : > { %3082 = vmatprep.subr.bf16.mxu0 %v3643_v14  ;;  %3596 = vmatprep.subr.bf16.mxu1 %v3643_v14  ;;  %v3718_v2 = vld [vmem:[%s4872_s1 + $0x118] sm:$0xff]   ;;  %v3706_v5 = vld [vmem:[%s4006_s11 + $0x50] ss:$36 sps:$4 sm:$0xff]   ;;  %v3734_v11 = vld [vmem:[%s4872_s1 + $0x1a8] sm:$0xff]  }
  0x24   : > { %v3709_v6 = vld [vmem:[%s4006_s11 + $0x1b4] ss:$36 sps:$4 sm:$0xff]   ;;  %v3711_v7 = vld [vmem:[%s4006_s11 + $0x9c] ss:$36 sps:$4 sm:$0xff]  }
  0x25   : > { %v3731_v8 = vld [vmem:[%s4872_s1 + $0x150] sm:$0xff]   ;;  %v3714_v13 = vld [vmem:[%s4006_s11 + $0x98] ss:$36 sps:$4 sm:$0xff]  }
  0x26   : > { %3083 = vmatpush3.bf16.msra.mxu0 %v3644_v15  ;;  %3604 = vmatpush3.bf16.msra.mxu1 %v3644_v15  ;;  %v3733_v10 = vld [vmem:[%s4872_s1 + $0x110] sm:$0xff]   ;;  %v3719_v14 = vld [vmem:[%s4006_s11 + $0x1fc] ss:$36 sps:$4 sm:$0xff]   ;;  %v3741_v15 = vld [vmem:[%s4872_s1 + $0x148] sm:$0xff]  }
  0x27   : > { %3084 = vmatprep.subr.bf16.mxu0 %v3645_v16  ;;  %3597 = vmatprep.subr.bf16.mxu1 %v3645_v16  ;;  %v3713_v12 = vld [vmem:[%s4006_s11 + $0x1b0] ss:$36 sps:$4 sm:$0xff]   ;;  %v3742_v16 = vld [vmem:[%s4872_s1 + $0x108] sm:$0xff]  }
  0x2a   : > { %3085 = vmatpush3.bf16.msra.mxu0 %v3646_v17  ;;  %3605 = vmatpush3.bf16.msra.mxu1 %v3646_v17  ;;  %v3721_v17 = vld [vmem:[%s4006_s11 + $0xe4] ss:$36 sps:$4 sm:$0xff]  }
  0x2b   : > { %3182 = vmatprep.subr.bf16.mxu1 %v3653_v18  ;;  %3294 = vmatprep.subr.bf16.mxu0 %v3656_v21  ;;  %v3749_v18 = vld [vmem:[%s4872_s1 + $0x1e0] sm:$0xff]  }
  0x2c   : > { %v3724_v21 = vld [vmem:[%s4006_s11 + $0xe0] ss:$36 sps:$4 sm:$0xff]  }
  0x2d   : > { %1741 = vmatmul.mubr.bf16.vlgmr.msra.gmra.mxu0 %v3647_v19  ;;  %1837 = vmatmul.mubr.bf16.vlgmr.msra.gmra.mxu1 %v3650_v20  ;;  %v3750_v19 = vld [vmem:[%s4872_s1 + $0x1a0] sm:$0xff]   ;;  %v3723_v20 = vld [vmem:[%s4006_s11 + $0x1f8] ss:$36 sps:$4 sm:$0xff]  }
  0x2e   : > { %3183 = vmatpush3.bf16.msra.mxu1 %v3654_v22  ;;  %3295 = vmatpush3.bf16.msra.mxu0 %v3658_v24  ;;  %v3725_v22 = vld [vmem:[%s4006_s11 + $0x244] ss:$36 sps:$4 sm:$0xff]  }
  0x2f   : > { %3184 = vmatprep.subr.bf16.mxu1 %v3655_v23  ;;  %1748 = vmatprep.mubr.bf16.mxu0 %v3659_v25  ;;  %v3727_v23 = vld [vmem:[%s4006_s11 + $0x12c] ss:$36 sps:$4 sm:$0xff]   ;;  %v3757_v24 = vld [vmem:[%s4872_s1 + $0x140] sm:$0xff]  }
  0x30   : > { %1844 = vmatprep.mubr.bf16.mxu1 %v3661_v26  ;;  %3296 = vmatprep.subr.bf16.mxu0 %v3676_v28  ;;  %v3758_v25 = vld [vmem:[%s4872_s1 + $0x100] sm:$0xff]   ;;  %v3765_v26 = vld [vmem:[%s4872_s1 + $0x1d8] sm:$0xff]  }
  0x31   : > { %v3766_v28 = vld [vmem:[%s4872_s1 + $0x198] sm:$0xff]  }
  0x32   : > { %3185 = vmatpush3.bf16.msra.mxu1 %v3657_v27  ;;  %3297 = vmatpush3.bf16.msra.mxu0 %v3678_v33  ;;  %v3729_v27 = vld [vmem:[%s4006_s11 + $0x240] ss:$36 sps:$4 sm:$0xff]   ;;  %v3780_v33 = vld [vmem:[%s4872_s1 + $0x1d0] sm:$0xff]  }
  0x33   : > { %3186 = vmatprep.subr.bf16.mxu1 %v3665_v31  ;;  %3298 = vmatprep.subr.bf16.mxu0 %v3690_v43  ;;  %v3735_v31 = vld [vmem:[%s4006_s11 + $0x28c] ss:$36 sps:$4 sm:$0xff]   ;;  %v3751_v43 = vld [vmem:[%s4006_s11 + $0x31c] ss:$36 sps:$4 sm:$0xff]  }
  0x35   : > { %1749 = vmatmul.mubr.bf16.gmra.mxu0 %v3663_v29  ;;  %1845 = vmatmul.mubr.bf16.gmra.mxu1 %v3664_v30  ;;  %v3767_v29 = vld [vmem:[%s4872_s1 + $0x238] sm:$0xff]   ;;  %v3730_v30 = vld [vmem:[%s4006_s11 + $0x128] ss:$36 sps:$4 sm:$0xff]  }
  0x36   : > { %3187 = vmatpush3.bf16.msra.mxu1 %v3666_v32  ;;  %1756 = vmatprep.mubr.bf16.mxu0 %v3669_v35  ;;  %v3737_v32 = vld [vmem:[%s4006_s11 + $0x174] ss:$36 sps:$4 sm:$0xff]  }
  0x37   : > { %3188 = vmatprep.subr.bf16.mxu1 %v3667_v34  ;;  %1852 = vmatprep.mubr.bf16.mxu1 %v3671_v36  ;;  %v3739_v34 = vld [vmem:[%s4006_s11 + $0x288] ss:$36 sps:$4 sm:$0xff]   ;;  %v3781_v35 = vld [vmem:[%s4872_s1 + $0x190] sm:$0xff]  }
  0x38   : > { %3299 = vmatpush3.bf16.msra.mxu0 %v3692_v46  ;;  %v3740_v36 = vld [vmem:[%s4006_s11 + $0x170] ss:$36 sps:$4 sm:$0xff]   ;;  %v3756_v46 = vld [vmem:[%s4006_s11 + $0x200] ss:$36 sps:$4 sm:$0xff]  }
  0x39   : > { %3300 = vmatprep.subr.bf16.mxu0 %v3707_v55  ;;  %v3782_v55 = vld [vmem:[%s4872_s1 + $0x230] sm:$0xff]  }
  0x3a   : > { %3189 = vmatpush3.bf16.msra.mxu1 %v3668_v37  ;;  %v3743_v37 = vld [vmem:[%s4006_s11 + $0x2d4] ss:$36 sps:$4 sm:$0xff]  }
  0x3b   : > { %3190 = vmatprep.subr.bf16.mxu1 %v3675_v40  ;;  %v3748_v40 = vld [vmem:[%s4006_s11 + $0x1b8] ss:$36 sps:$4 sm:$0xff]  }
  0x3c   : > { %3301 = vmatpush3.bf16.msra.mxu0 %v3708_v56  ;;  %v3797_v56 = vld [vmem:[%s4872_s1 + $0x228] sm:$0xff]  }
  0x3d   : > { %1757 = vmatmul.mubr.bf16.gmra.mxu0 %v3673_v38  ;;  %1853 = vmatmul.mubr.bf16.gmra.mxu1 %v3674_v39  ;;  %v3745_v38 = vld [vmem:[%s4006_s11 + $0x1bc] ss:$36 sps:$4 sm:$0xff]   ;;  %v3747_v39 = vld [vmem:[%s4006_s11 + $0x2d0] ss:$36 sps:$4 sm:$0xff]  }
  0x3e   : > { %3191 = vmatpush3.bf16.msra.mxu1 %v3677_v41  ;;  %1764 = vmatprep.mubr.bf16.mxu0 %v3681_v44  ;;  %v3795_v41 = vld [vmem:[%s4872_s1 + $0x1c8] sm:$0xff]  }
  0x3f   : > { %3192 = vmatprep.subr.bf16.mxu1 %v3679_v42  ;;  %1860 = vmatprep.mubr.bf16.mxu1 %v3683_v45  ;;  %v3796_v42 = vld [vmem:[%s4872_s1 + $0x188] sm:$0xff]   ;;  %v3755_v45 = vld [vmem:[%s4006_s11 + $0x318] ss:$36 sps:$4 sm:$0xff]  }
  0x40   : > { %3302 = vmatprep.subr.bf16.mxu0 %v3717_v0  ;;  %v3753_v44 = vld [vmem:[%s4006_s11 + $0x204] ss:$36 sps:$4 sm:$0xff]  }
  0x41   : > { %3303 = vmatpush3.bf16.msra.mxu0 %v3718_v2  ;;  %v3779_v0 = vld [vmem:[%s4006_s11 + $0xa0] ss:$36 sps:$4 sm:$0xff]   ;;  %v3785_v2 = vld [vmem:[%s4006_s11 + $0xec] ss:$36 sps:$4 sm:$0xff]  }
  0x42   : > { %3193 = vmatpush3.bf16.msra.mxu1 %v3680_v47  ;;  %3304 = vmatprep.subr.bf16.mxu0 %v3731_v8  ;;  %v3810_v47 = vld [vmem:[%s4872_s1 + $0x1c0] sm:$0xff]   ;;  %v3791_v8 = vld [vmem:[%s4006_s11 + $0x134] ss:$36 sps:$4 sm:$0xff]  }
  0x43   : > { %3194 = vmatprep.subr.bf16.mxu1 %v3687_v48  ;;  %v3811_v48 = vld [vmem:[%s4872_s1 + $0x180] sm:$0xff]  }
  0x45   : > { %1765 = vmatmul.mubr.bf16.gmra.mxu0 %v3685_v49  ;;  %1861 = vmatmul.mubr.bf16.gmra.mxu1 %v3686_v50  ;;  %v3759_v49 = vld [vmem:[%s4006_s11 + $0x24c] ss:$36 sps:$4 sm:$0xff]   ;;  %v3763_v50 = vld [vmem:[%s4006_s11 + $0x14] ss:$36 sps:$4 sm:$0xff]  }
  0x46   : > { %3195 = vmatpush3.bf16.msra.mxu1 %v3688_v51  ;;  %1772 = vmatprep.mubr.bf16.mxu0 %v3693_v53  ;;  %v3761_v51 = vld [vmem:[%s4006_s11 + $0x10] ss:$36 sps:$4 sm:$0xff]  }
  0x47   : > { %3196 = vmatprep.subr.bf16.mxu1 %v3689_v52  ;;  %1901 = vmatprep.mubr.bf16.mxu1 %v3697_v54  ;;  %v3764_v52 = vld [vmem:[%s4006_s11 + $0x248] ss:$36 sps:$4 sm:$0xff]   ;;  %v3768_v53 = vld [vmem:[%s4006_s11 + $0x294] ss:$36 sps:$4 sm:$0xff]   ;;  %v3770_v54 = vld [vmem:[%s4006_s11 + $0x5c] ss:$36 sps:$4 sm:$0xff]  }
  0x48   : > { %3305 = vmatpush3.bf16.msra.mxu0 %v3733_v10  ;;  %v3793_v10 = vld [vmem:[%s4006_s11 + $0x368] ss:$36 sps:$4 sm:$0xff]  }
  0x49   : > { %3306 = vmatprep.subr.bf16.mxu0 %v3741_v15  ;;  %v3803_v15 = vld [vmem:[%s4006_s11 + $0x178] ss:$36 sps:$4 sm:$0xff]  }
  0x4a   : > { %3197 = vmatpush3.bf16.msra.mxu1 %v3691_v57  ;;  %v3772_v57 = vld [vmem:[%s4006_s11 + $0x290] ss:$36 sps:$4 sm:$0xff]  }
  0x4b   : > { %3406 = vmatprep.subr.bf16.mxu1 %v3699_v60  ;;  %v3776_v60 = vld [vmem:[%s4006_s11 + $0xa4] ss:$36 sps:$4 sm:$0xff]  }
  0x4c   : > { %3307 = vmatpush3.bf16.msra.mxu0 %v3742_v16  ;;  %v3804_v16 = vld [vmem:[%s4006_s11 + $0x3fc] ss:$36 sps:$4 sm:$0xff]  }
  0x4d   : > { %1773 = vmatmul.mubr.bf16.gmra.mxu0 %v3698_v59  ;;  %1902 = vmatmul.mubr.bf16.vlgmr.msra.gmra.mxu1 %v3695_v58  ;;  %v3773_v58 = vld [vmem:[%s4006_s11 + $0x58] ss:$36 sps:$4 sm:$0xff]  }
  0x4e   : > { %3407 = vmatpush3.bf16.msra.mxu1 %v3700_v61  ;;  %1780 = vmatprep.mubr.bf16.mxu0 %v3701_v62  ;;  %v3774_v59 = vld [vmem:[%s4006_s11 + $0x2dc] ss:$36 sps:$4 sm:$0xff]  }
  0x4f   : > { %1909 = vmatprep.mubr.bf16.mxu1 %v3703_v63  ;;  %3408 = vmatprep.subr.bf16.mxu1 %v3715_v1  ;;  %v3812_v61 = vld [vmem:[%s4872_s1 + $0x220] sm:$0xff]   ;;  %v3778_v62 = vld [vmem:[%s4006_s11 + $0x2d8] ss:$36 sps:$4 sm:$0xff]  }
  0x50   : > { %3308 = vmatprep.subr.bf16.mxu0 %v3757_v24  ;;  %v3825_v63 = vld [vmem:[%s4872_s1 + $0x218] sm:$0xff]   ;;  %v3783_v1 = vld [vmem:[%s4006_s11 + $0x324] ss:$36 sps:$4 sm:$0xff]  }
  0x51   : > { %3309 = vmatpush3.bf16.msra.mxu0 %v3758_v25  ;;  %v3819_v24 = vld [vmem:[%s4006_s11 + $0x254] ss:$36 sps:$4 sm:$0xff]   ;;  %v3823_v25 = vld [vmem:[%s4006_s11 + $0x1c] ss:$36 sps:$4 sm:$0xff]  }
  0x52   : > { %3409 = vmatpush3.bf16.msra.mxu1 %v3716_v3  ;;  %3542 = vmatprep.subr.bf16.mxu0 %v3767_v29  ;;  %v3838_v3 = vld [vmem:[%s4872_s1 + $0x210] sm:$0xff]  }
  0x53   : > { %3410 = vmatprep.subr.bf16.mxu1 %v3732_v9  ;;  %v3864_v9 = vld [vmem:[%s4872_s1 + $0x200] sm:$0xff]  }
  0x55   : > { %1781 = vmatmul.mubr.bf16.gmra.mxu0 %v3705_v4  ;;  %1910 = vmatmul.mubr.bf16.gmra.mxu1 %v3706_v5  ;;  %v3787_v4 = vld [vmem:[%s4006_s11 + $0x320] ss:$36 sps:$4 sm:$0xff]   ;;  %v3851_v5 = vld [vmem:[%s4872_s1 + $0x208] sm:$0xff]  }
  0x56   : > { %1788 = vmatprep.mubr.bf16.mxu0 %v3709_v6  ;;  %1917 = vmatprep.mubr.bf16.mxu1 %v3711_v7  ;;  %v3788_v6 = vld [vmem:[%s4006_s11 + $0xe8] ss:$36 sps:$4 sm:$0xff]  }
  0x57   : > { %3411 = vmatpush3.bf16.msra.mxu1 %v3734_v11  ;;  %v3789_v7 = vld [vmem:[%s4006_s11 + $0x36c] ss:$36 sps:$4 sm:$0xff]  }
  0x58   : > { %3412 = vmatprep.subr.bf16.mxu1 %v3749_v18  ;;  %v3794_v11 = vld [vmem:[%s4006_s11 + $0x130] ss:$36 sps:$4 sm:$0xff]   ;;  %v3808_v18 = vld [vmem:[%s4006_s11 + $0x3f8] ss:$36 sps:$4 sm:$0xff]  }
  0x5b   : > { %3413 = vmatpush3.bf16.msra.mxu1 %v3750_v19  ;;  %v3809_v19 = vld [vmem:[%s4006_s11 + $0x1c0] ss:$36 sps:$4 sm:$0xff]  }
  0x5c   : > { %3414 = vmatprep.subr.bf16.mxu1 %v3765_v26  ;;  %v3821_v26 = vld [vmem:[%s4006_s11 + $0x18] ss:$36 sps:$4 sm:$0xff]  }
  0x5d   : > { %1789 = vmatmul.mubr.bf16.gmra.mxu0 %v3713_v12  ;;  %1918 = vmatmul.mubr.bf16.gmra.mxu1 %v3714_v13  ;;  %v3798_v12 = vld [vmem:[%s4006_s11 + $0x3b4] ss:$36 sps:$4 sm:$0xff]   ;;  %v3800_v13 = vld [vmem:[%s4006_s11 + $0x17c] ss:$36 sps:$4 sm:$0xff]  }
  0x5e   : > { %1796 = vmatprep.mubr.bf16.mxu0 %v3719_v14  ;;  %1925 = vmatprep.mubr.bf16.mxu1 %v3721_v17  ;;  %v3802_v14 = vld [vmem:[%s4006_s11 + $0x3b0] ss:$36 sps:$4 sm:$0xff]   ;;  %v3806_v17 = vld [vmem:[%s4006_s11 + $0x1c4] ss:$36 sps:$4 sm:$0xff]  }
  0x5f   : > { %3415 = vmatpush3.bf16.msra.mxu1 %v3766_v28  ;;  %v3826_v28 = vld [vmem:[%s4006_s11 + $0x29c] ss:$36 sps:$4 sm:$0xff]  }
  0x60   : > { %3416 = vmatprep.subr.bf16.mxu1 %v3780_v33  ;;  %v3834_v33 = vld [vmem:[%s4006_s11 + $0xac] ss:$36 sps:$4 sm:$0xff]  }
  0x63   : > { %3417 = vmatpush3.bf16.msra.mxu1 %v3781_v35  ;;  %v3837_v35 = vld [vmem:[%s4006_s11 + $0xa8] ss:$36 sps:$4 sm:$0xff]  }
  0x64   : > { %3418 = vmatprep.subr.bf16.mxu1 %v3795_v41  ;;  %v3847_v41 = vld [vmem:[%s4006_s11 + $0x13c] ss:$36 sps:$4 sm:$0xff]  }
  0x65   : > { %1797 = vmatmul.mubr.bf16.gmra.mxu0 %v3723_v20  ;;  %1926 = vmatmul.mubr.bf16.gmra.mxu1 %v3724_v21  ;;  %v3813_v20 = vld [vmem:[%s4006_s11 + $0x444] ss:$36 sps:$4 sm:$0xff]   ;;  %v3815_v21 = vld [vmem:[%s4006_s11 + $0x20c] ss:$36 sps:$4 sm:$0xff]  }
  0x66   : > { %1804 = vmatprep.mubr.bf16.mxu0 %v3725_v22  ;;  %1933 = vmatprep.mubr.bf16.mxu1 %v3727_v23  ;;  %v3817_v22 = vld [vmem:[%s4006_s11 + $0x440] ss:$36 sps:$4 sm:$0xff]   ;;  %v3818_v23 = vld [vmem:[%s4006_s11 + $0x208] ss:$36 sps:$4 sm:$0xff]  }
  0x67   : > { %3419 = vmatpush3.bf16.msra.mxu1 %v3796_v42  ;;  %v3849_v42 = vld [vmem:[%s4006_s11 + $0x370] ss:$36 sps:$4 sm:$0xff]  }
  0x68   : > { %3420 = vmatprep.subr.bf16.mxu1 %v3810_v47 }
  0x6b   : > { %3421 = vmatpush3.bf16.msra.mxu1 %v3811_v48 }
  0x6d   : > { %1805 = vmatmul.mubr.bf16.gmra.mxu0 %v3729_v27  ;;  %1934 = vmatmul.mubr.bf16.gmra.mxu1 %v3730_v30  ;;  %v3824_v27 = vld [vmem:[%s4006_s11 + $0x250] ss:$36 sps:$4 sm:$0xff]   ;;  %v3830_v30 = vld [vmem:[%s4006_s11 + $0x298] ss:$36 sps:$4 sm:$0xff]  }
  0x6e   : > { %1812 = vmatprep.mubr.bf16.mxu0 %v3735_v31  ;;  %1941 = vmatprep.mubr.bf16.mxu1 %v3737_v32  ;;  %v3831_v31 = vld [vmem:[%s4006_s11 + $0x60] ss:$36 sps:$4 sm:$0xff]  }
  0x6f   : > { %v3832_v32 = vld [vmem:[%s4006_s11 + $0x2e4] ss:$36 sps:$4 sm:$0xff]  }
  0x75   : > { %1813 = vmatmul.mubr.bf16.gmra.mxu0 %v3739_v34  ;;  %1942 = vmatmul.mubr.bf16.gmra.mxu1 %v3740_v36  ;;  %v3836_v34 = vld [vmem:[%s4006_s11 + $0x2e0] ss:$36 sps:$4 sm:$0xff]   ;;  %v3839_v36 = vld [vmem:[%s4006_s11 + $0x32c] ss:$36 sps:$4 sm:$0xff]  }
  0x76   : > { %1820 = vmatprep.mubr.bf16.mxu0 %v3743_v37  ;;  %1949 = vmatprep.mubr.bf16.mxu1 %v3745_v38  ;;  %v3841_v37 = vld [vmem:[%s4006_s11 + $0xf4] ss:$36 sps:$4 sm:$0xff]   ;;  %v3843_v38 = vld [vmem:[%s4006_s11 + $0x328] ss:$36 sps:$4 sm:$0xff]  }
  0x7d   : > { %1821 = vmatmul.mubr.bf16.gmra.mxu0 %v3747_v39  ;;  %1950 = vmatmul.mubr.bf16.gmra.mxu1 %v3748_v40  ;;  %v3844_v39 = vld [vmem:[%s4006_s11 + $0xf0] ss:$36 sps:$4 sm:$0xff]  }
  0x7e   : > { %1828 = vmatprep.mubr.bf16.mxu0 %v3751_v43  ;;  %1957 = vmatprep.mubr.bf16.mxu1 %v3753_v44  ;;  %v3845_v40 = vld [vmem:[%s4006_s11 + $0x374] ss:$36 sps:$4 sm:$0xff]   ;;  %v3852_v44 = vld [vmem:[%s4006_s11 + $0x3bc] ss:$36 sps:$4 sm:$0xff]  }
  0x7f   : > { %v3850_v43 = vld [vmem:[%s4006_s11 + $0x138] ss:$36 sps:$4 sm:$0xff]  }
  0x85   : > { %1829 = vmatmul.mubr.bf16.gmra.mxu0 %v3755_v45  ;;  %1958 = vmatmul.mubr.bf16.gmra.mxu1 %v3756_v46  ;;  %v3854_v45 = vld [vmem:[%s4006_s11 + $0x184] ss:$36 sps:$4 sm:$0xff]  }
  0x86   : > { %1965 = vmatprep.mubr.bf16.mxu1 %v3759_v49  ;;  %2062 = vmatprep.mubr.bf16.mxu0 %v3763_v50 }
  0x8d   : > { %1966 = vmatmul.mubr.bf16.gmra.mxu1 %v3764_v52  ;;  %2063 = vmatmul.mubr.bf16.vlgmr.msra.gmra.mxu0 %v3761_v51 }
  0x8e   : > { %3543 = vmatpush3.bf16.msra.mxu0 %v3767_v29  ;;  %1973 = vmatprep.mubr.bf16.mxu1 %v3768_v53  ;;  %v3828_v29 = vld [vmem:[%s4006_s11 + $0x64] ss:$36 sps:$4 sm:$0xff]  }
  0x8f   : > { %2070 = vmatprep.mubr.bf16.mxu0 %v3770_v54  ;;  %3544 = vmatprep.subr.bf16.mxu0 %v3782_v55  ;;  %v3856_v54 = vld [vmem:[%s4006_s11 + $0x3b8] ss:$36 sps:$4 sm:$0xff]  }
  0x92   : > { %3545 = vmatpush3.bf16.msra.mxu0 %v3782_v55  ;;  %v3857_v55 = vld [vmem:[%s4006_s11 + $0x180] ss:$36 sps:$4 sm:$0xff]  }
  0x93   : > { %3546 = vmatprep.subr.bf16.mxu0 %v3797_v56 }
  0x95   : > { %1974 = vmatmul.mubr.bf16.gmra.mxu1 %v3772_v57  ;;  %2071 = vmatmul.mubr.bf16.gmra.mxu0 %v3773_v58  ;;  %v3860_v57 = vld [vmem:[%s4006_s11 + $0x1cc] ss:$36 sps:$4 sm:$0xff]  }
  0x96   : > { %1981 = vmatprep.mubr.bf16.mxu1 %v3774_v59  ;;  %2078 = vmatprep.mubr.bf16.mxu0 %v3776_v60 }
  0x97   : > { %3547 = vmatpush3.bf16.msra.mxu0 %v3797_v56  ;;  %v3858_v56 = vld [vmem:[%s4006_s11 + $0x404] ss:$36 sps:$4 sm:$0xff]  }
  0x98   : > { %3548 = vmatprep.subr.bf16.mxu0 %v3812_v61 }
  0x9b   : > { %3549 = vmatpush3.bf16.msra.mxu0 %v3812_v61 }
  0x9c   : > { %3550 = vmatprep.subr.bf16.mxu0 %v3825_v63 }
  0x9d   : > { %1982 = vmatmul.mubr.bf16.gmra.mxu1 %v3778_v62  ;;  %2079 = vmatmul.mubr.bf16.gmra.mxu0 %v3779_v0 }
  0x9e   : > { %1989 = vmatprep.mubr.bf16.mxu1 %v3783_v1  ;;  %2086 = vmatprep.mubr.bf16.mxu0 %v3785_v2 }
  0x9f   : > { %3551 = vmatpush3.bf16.msra.mxu0 %v3825_v63 }
  0xa0   : > { %3552 = vmatprep.subr.bf16.mxu0 %v3838_v3 }
  0xa3   : > { %3553 = vmatpush3.bf16.msra.mxu0 %v3838_v3 }
  0xa4   : > { %3554 = vmatprep.subr.bf16.mxu0 %v3851_v5 }
  0xa5   : > { %1990 = vmatmul.mubr.bf16.gmra.mxu1 %v3787_v4  ;;  %2087 = vmatmul.mubr.bf16.gmra.mxu0 %v3788_v6  ;;  %v3862_v6 = vld [vmem:[%s4006_s11 + $0x400] ss:$36 sps:$4 sm:$0xff]  }
  0xa6   : > { %1997 = vmatprep.mubr.bf16.mxu1 %v3789_v7  ;;  %2094 = vmatprep.mubr.bf16.mxu0 %v3791_v8  ;;  %v3863_v7 = vld [vmem:[%s4006_s11 + $0x1c8] ss:$36 sps:$4 sm:$0xff]  }
  0xa7   : > { %3555 = vmatpush3.bf16.msra.mxu0 %v3851_v5  ;;  %v3865_v8 = vld [vmem:[%s4006_s11 + $0x44c] ss:$36 sps:$4 sm:$0xff]  }
  0xa8   : > { %3556 = vmatprep.subr.bf16.mxu0 %v3864_v9 }
  0xab   : > { %3557 = vmatpush3.bf16.msra.mxu0 %v3864_v9  ;;  %v3867_v9 = vld [vmem:[%s4006_s11 + $0x214] ss:$36 sps:$4 sm:$0xff]  }
  0xad   : > { %1998 = vmatmul.mubr.bf16.gmra.mxu1 %v3793_v10  ;;  %2095 = vmatmul.mubr.bf16.gmra.mxu0 %v3794_v11 }
  0xae   : > { %2005 = vmatprep.mubr.bf16.mxu1 %v3798_v12  ;;  %2102 = vmatprep.mubr.bf16.mxu0 %v3800_v13 }
  0xb5   : > { %2006 = vmatmul.mubr.bf16.gmra.mxu1 %v3802_v14  ;;  %2103 = vmatmul.mubr.bf16.gmra.mxu0 %v3803_v15 }
  0xb6   : > { %2013 = vmatprep.mubr.bf16.mxu1 %v3804_v16  ;;  %2110 = vmatprep.mubr.bf16.mxu0 %v3806_v17 }
  0xbd   : > { %2014 = vmatmul.mubr.bf16.gmra.mxu1 %v3808_v18  ;;  %2111 = vmatmul.mubr.bf16.gmra.mxu0 %v3809_v19 }
  0xbe   : > { %2021 = vmatprep.mubr.bf16.mxu1 %v3813_v20  ;;  %2118 = vmatprep.mubr.bf16.mxu0 %v3815_v21 }
  0xc5   : > { %2022 = vmatmul.mubr.bf16.gmra.mxu1 %v3817_v22  ;;  %2119 = vmatmul.mubr.bf16.gmra.mxu0 %v3818_v23  ;;  %v3869_v22 = vld [vmem:[%s4006_s11 + $0x448] ss:$36 sps:$4 sm:$0xff]   ;;  %v3870_v23 = vld [vmem:[%s4006_s11 + $0x210] ss:$36 sps:$4 sm:$0xff]  }
  0xc6   : > { %2126 = vmatprep.mubr.bf16.mxu0 %v3819_v24  ;;  %2223 = vmatprep.mubr.bf16.mxu1 %v3823_v25  ;;  %v3873_v24 = vld [vmem:[%s4006_s11 + $0x25c] ss:$36 sps:$4 sm:$0xff]  }
  0xc7   : > { %v3874_v25 = vld [vmem:[%s4006_s11 + $0x20] ss:$36 sps:$4 sm:$0xff]  }
  0xcd   : > { %2127 = vmatmul.mubr.bf16.gmra.mxu0 %v3824_v27  ;;  %2224 = vmatmul.mubr.bf16.vlgmr.msra.gmra.mxu1 %v3821_v26 }
  0xce   : > { %2134 = vmatprep.mubr.bf16.mxu0 %v3826_v28  ;;  %2231 = vmatprep.mubr.bf16.mxu1 %v3828_v29 }
  0xd5   : > { %2135 = vmatmul.mubr.bf16.gmra.mxu0 %v3830_v30  ;;  %2232 = vmatmul.mubr.bf16.gmra.mxu1 %v3831_v31 }
  0xd6   : > { %2142 = vmatprep.mubr.bf16.mxu0 %v3832_v32  ;;  %2239 = vmatprep.mubr.bf16.mxu1 %v3834_v33 }
  0xdd   : > { %2143 = vmatmul.mubr.bf16.gmra.mxu0 %v3836_v34  ;;  %2240 = vmatmul.mubr.bf16.gmra.mxu1 %v3837_v35 }
  0xde   : > { %2150 = vmatprep.mubr.bf16.mxu0 %v3839_v36  ;;  %2247 = vmatprep.mubr.bf16.mxu1 %v3841_v37 }
  0xe5   : > { %2151 = vmatmul.mubr.bf16.gmra.mxu0 %v3843_v38  ;;  %2248 = vmatmul.mubr.bf16.gmra.mxu1 %v3844_v39  ;;  %v3871_v38 = vld [vmem:[%s4006_s11 + $0x258] ss:$36 sps:$4 sm:$0xff]   ;;  %v3875_v39 = vld [vmem:[%s4006_s11 + $0x68] ss:$36 sps:$4 sm:$0xff]  }
  0xe6   : > { %2158 = vmatprep.mubr.bf16.mxu0 %v3845_v40  ;;  %2255 = vmatprep.mubr.bf16.mxu1 %v3847_v41  ;;  %v3878_v40 = vld [vmem:[%s4006_s11 + $0x2a4] ss:$36 sps:$4 sm:$0xff]   ;;  %v3879_v41 = vld [vmem:[%s4006_s11 + $0xb0] ss:$36 sps:$4 sm:$0xff]  }
  0xed   : > { %v3086_v46 = vpop.f32.mrf.mxu0  ;;  %v3158_v47 = vpop.f32.mrf.mxu1  ;;  %2159 = vmatmul.mubr.bf16.gmra.mxu0 %v3849_v42  ;;  %2256 = vmatmul.mubr.bf16.gmra.mxu1 %v3850_v43 }
  0xee   : > { %2166 = vmatprep.mubr.bf16.mxu0 %v3852_v44  ;;  %2263 = vmatprep.mubr.bf16.mxu1 %v3854_v45 }
  0xef   : > { %v3087_v48 = vpop.f32.mrf.mxu0  ;;  %v3159_v49 = vpop.f32.mrf.mxu1 }
  0xf0   : > { %v4299_v50 = vadd.f32 %v3087_v48, %v3086_v46  ;;  %v4301_v51 = vadd.f32 %v3159_v49, %v3158_v47  ;;  %v4350_v48 = vld [vmem:[%s4873_s2] ss:$0 sm:$0xff] }
  0xf1   : > { %v3089_v52 = vpop.f32.mrf.mxu0  ;;  %v3161_v53 = vpop.f32.mrf.mxu1 }
  0xf3   : > { %v3090_v58 = vpop.f32.mrf.mxu0  ;;  %v3162_v59 = vpop.f32.mrf.mxu1 }
  0xf4   : > { %v4307_v60 = vadd.f32 %v3090_v58, %v3089_v52  ;;  %v4309_v61 = vadd.f32 %v3162_v59, %v3161_v53  ;;  %v1743_v53 = vadd.f32 %v4299_v50, %v4350_v48  ;;  %v3876_v58 = vld [vmem:[%s4006_s11 + $0x2a0] ss:$36 sps:$4 sm:$0xff]   ;;  %v3880_v59 = vld [vmem:[%s4006_s11 + $0xf8] ss:$36 sps:$4 sm:$0xff]  }
  0xf5   : > { %v3092_v62 = vpop.f32.mrf.mxu0  ;;  %v3164_v63 = vpop.f32.mrf.mxu1  ;;  %2167 = vmatmul.mubr.bf16.gmra.mxu0 %v3856_v54  ;;  %2264 = vmatmul.mubr.bf16.gmra.mxu1 %v3857_v55 }
  0xf6   : > { %2174 = vmatprep.mubr.bf16.mxu0 %v3858_v56  ;;  %2271 = vmatprep.mubr.bf16.mxu1 %v3860_v57 }
  0xf7   : > { %v3093_v0 = vpop.f32.mrf.mxu0  ;;  %v3165_v1 = vpop.f32.mrf.mxu1 }
  0xf8   : > { %v4311_v2 = vadd.f32 %v3093_v0, %v3092_v62  ;;  %v4313_v3 = vadd.f32 %v3165_v1, %v3164_v63  ;;  %v3883_v63 = vld [vmem:[%s4006_s11 + $0x2ec] ss:$36 sps:$4 sm:$0xff]   ;;  %v3884_v0 = vld [vmem:[%s4006_s11 + $0x140] ss:$36 sps:$4 sm:$0xff]  }
  0xf9   : > { %v3095_v4 = vpop.f32.mrf.mxu0  ;;  %v3167_v5 = vpop.f32.mrf.mxu1 }
  0xfb   : > { %v3096_v10 = vpop.f32.mrf.mxu0  ;;  %v3168_v11 = vpop.f32.mrf.mxu1 }
  0xfc   : > { %v4319_v12 = vadd.f32 %v3096_v10, %v3095_v4  ;;  %v4321_v13 = vadd.f32 %v3168_v11, %v3167_v5  ;;  %v1746_v5 = vadd.f32 %v4307_v60, %v4350_v48  ;;  %v1751_v60 = vadd.f32 %v4311_v2, %v4350_v48 }
  0xfd   : > { %v3098_v14 = vpop.f32.mrf.mxu0  ;;  %v3170_v15 = vpop.f32.mrf.mxu1  ;;  %2175 = vmatmul.mubr.bf16.gmra.mxu0 %v3862_v6  ;;  %2272 = vmatmul.mubr.bf16.gmra.mxu1 %v3863_v7 }
  0xfe   : > { %2182 = vmatprep.mubr.bf16.mxu0 %v3865_v8  ;;  %2279 = vmatprep.mubr.bf16.mxu1 %v3867_v9 }
  0xff   : > { %v3099_v16 = vpop.f32.mrf.mxu0  ;;  %v3171_v17 = vpop.f32.mrf.mxu1 }
 0x100   : > { %v4323_v18 = vadd.f32 %v3099_v16, %v3098_v14  ;;  %v4325_v19 = vadd.f32 %v3171_v17, %v3170_v15 }
 0x101   : > { %v3101_v20 = vpop.f32.mrf.mxu0  ;;  %v3173_v21 = vpop.f32.mrf.mxu1 }
 0x103   : > { %v3102_v26 = vpop.f32.mrf.mxu0  ;;  %v3174_v27 = vpop.f32.mrf.mxu1 }
 0x104   : > { %v4331_v28 = vadd.f32 %v3102_v26, %v3101_v20  ;;  %v4333_v29 = vadd.f32 %v3174_v27, %v3173_v21  ;;  %v3881_v20 = vld [vmem:[%s4006_s11 + $0x2e8] ss:$36 sps:$4 sm:$0xff]   ;;  %v1754_v27 = vadd.f32 %v4319_v12, %v4350_v48  ;;  %v1759_v12 = vadd.f32 %v4323_v18, %v4350_v48 }
 0x105   : > { %v3104_v30 = vpop.f32.mrf.mxu0  ;;  %v3176_v31 = vpop.f32.mrf.mxu1  ;;  %2183 = vmatmul.mubr.bf16.gmra.mxu0 %v3869_v22  ;;  %2280 = vmatmul.mubr.bf16.gmra.mxu1 %v3870_v23  ;;  %v3885_v21 = vld [vmem:[%s4006_s11 + $0x188] ss:$36 sps:$4 sm:$0xff]   ;;  %v3888_v23 = vld [vmem:[%s4006_s11 + $0x334] ss:$36 sps:$4 sm:$0xff]  }
 0x106   : > { %2287 = vmatprep.mubr.bf16.mxu1 %v3873_v24  ;;  %3558 = vmatprep.mubr.bf16.mxu0 %v3874_v25  ;;  %v3889_v24 = vld [vmem:[%s4006_s11 + $0x1d0] ss:$36 sps:$4 sm:$0xff]  }
 0x107   : > { %v3105_v32 = vpop.f32.mrf.mxu0  ;;  %v3177_v33 = vpop.f32.mrf.mxu1 }
 0x108   : > { %v4335_v34 = vadd.f32 %v3105_v32, %v3104_v30  ;;  %v4337_v35 = vadd.f32 %v3177_v33, %v3176_v31 }
 0x109   : > { %v3107_v36 = vpop.f32.mrf.mxu0  ;;  %v3179_v37 = vpop.f32.mrf.mxu1 }
 0x10b   : > { %v3108_v42 = vpop.f32.mrf.mxu0  ;;  %v3180_v43 = vpop.f32.mrf.mxu1 }
 0x10c   : > { %v4343_v44 = vadd.f32 %v3108_v42, %v3107_v36  ;;  %v4345_v45 = vadd.f32 %v3180_v43, %v3179_v37  ;;  %v3886_v42 = vld [vmem:[%s4006_s11 + $0x330] ss:$36 sps:$4 sm:$0xff]   ;;  %v3890_v43 = vld [vmem:[%s4006_s11 + $0x218] ss:$36 sps:$4 sm:$0xff]  }
 0x10d   : > { %v3110_v46 = vpop.f32.mrf.mxu0  ;;  %v3198_v47 = vpop.f32.mrf.mxu1  ;;  %2288 = vmatmul.mubr.bf16.gmra.mxu1 %v3871_v38  ;;  %3559 = vmatmul.mubr.bf16.vlgmr.msra.gmra.mxu0 %v3875_v39 }
 0x10e   : > { %2295 = vmatprep.mubr.bf16.mxu1 %v3878_v40  ;;  %3562 = vmatprep.mubr.bf16.mxu0 %v3879_v41 }
 0x10f   : > { %v3111_v49 = vpop.f32.mrf.mxu0  ;;  %v3199_v52 = vpop.f32.mrf.mxu1 }
 0x110   : > { %v4354_v54 = vadd.f32 %v3111_v49, %v3110_v46  ;;  %v3200_v55 = vadd.f32 %v3199_v52, %v3198_v47  ;;  %v3893_v47 = vld [vmem:[%s4006_s11 + $0x37c] ss:$36 sps:$4 sm:$0xff]  }
 0x111   : > { %v3113_v56 = vpop.f32.mrf.mxu0  ;;  %v3201_v57 = vpop.f32.mrf.mxu1  ;;  %v3894_v49 = vld [vmem:[%s4006_s11 + $0x260] ss:$36 sps:$4 sm:$0xff]  }
 0x112   : > { %v4358_v62 = vadd.f32 %v3200_v55, %v1743_v53  ;;  %v1762_v55 = vadd.f32 %v4331_v28, %v4350_v48  ;;  %v1767_v28 = vadd.f32 %v4335_v34, %v4350_v48 }
 0x113   : > { %v3114_v1 = vpop.f32.mrf.mxu0  ;;  %v3202_v4 = vpop.f32.mrf.mxu1 }
 0x114   : > { %v4364_v6 = vadd.f32 %v3114_v1, %v3113_v56  ;;  %v3203_v50 = vadd.f32 %v3202_v4, %v3201_v57 }
 0x115   : > { %v3116_v7 = vpop.f32.mrf.mxu0  ;;  %v3204_v8 = vpop.f32.mrf.mxu1  ;;  %2296 = vmatmul.mubr.bf16.gmra.mxu1 %v3876_v58  ;;  %3563 = vmatmul.mubr.bf16.gmra.mxu0 %v3880_v59 }
 0x116   : > { %v4366_v9 = vadd.f32 %v3203_v50, %v1746_v5  ;;  %2303 = vmatprep.mubr.bf16.mxu1 %v3883_v63  ;;  %3566 = vmatprep.mubr.bf16.mxu0 %v3884_v0 }
 0x117   : > { %v3117_v10 = vpop.f32.mrf.mxu0  ;;  %v3205_v11 = vpop.f32.mrf.mxu1 }
 0x118   : > { %v4370_v14 = vadd.f32 %v3117_v10, %v3116_v7  ;;  %v3206_v15 = vadd.f32 %v3205_v11, %v3204_v8  ;;  %v3891_v7 = vld [vmem:[%s4006_s11 + $0x378] ss:$36 sps:$4 sm:$0xff]   ;;  %v3895_v8 = vld [vmem:[%s4006_s11 + $0x2a8] ss:$36 sps:$4 sm:$0xff]  }
 0x119   : > { %v3119_v16 = vpop.f32.mrf.mxu0  ;;  %v3207_v17 = vpop.f32.mrf.mxu1  ;;  %v3898_v11 = vld [vmem:[%s4006_s11 + $0x3c4] ss:$36 sps:$4 sm:$0xff]  }
 0x11a   : > { %v4374_v22 = vadd.f32 %v3206_v15, %v1751_v60  ;;  %v3899_v60 = vld [vmem:[%s4006_s11 + $0x2f0] ss:$36 sps:$4 sm:$0xff]  }
 0x11b   : > { %v3120_v25 = vpop.f32.mrf.mxu0  ;;  %v3208_v26 = vpop.f32.mrf.mxu1 }
 0x11c   : > { %v4380_v30 = vadd.f32 %v3120_v25, %v3119_v16  ;;  %v3209_v2 = vadd.f32 %v3208_v26, %v3207_v17  ;;  %v1770_v17 = vadd.f32 %v4343_v44, %v4350_v48  ;;  %v1775_v44 = vadd.f32 %v4354_v54, %v4350_v48 }
 0x11d   : > { %v3122_v31 = vpop.f32.mrf.mxu0  ;;  %v3210_v32 = vpop.f32.mrf.mxu1  ;;  %2304 = vmatmul.mubr.bf16.gmra.mxu1 %v3881_v20  ;;  %3567 = vmatmul.mubr.bf16.gmra.mxu0 %v3885_v21 }
 0x11e   : > { %v4382_v33 = vadd.f32 %v3209_v2, %v1754_v27  ;;  %2311 = vmatprep.mubr.bf16.mxu1 %v3888_v23  ;;  %3570 = vmatprep.mubr.bf16.mxu0 %v3889_v24 }
 0x11f   : > { %v3123_v36 = vpop.f32.mrf.mxu0  ;;  %v3211_v37 = vpop.f32.mrf.mxu1 }
 0x120   : > { %v4386_v38 = vadd.f32 %v3123_v36, %v3122_v31  ;;  %v3212_v39 = vadd.f32 %v3211_v37, %v3210_v32  ;;  %v3896_v36 = vld [vmem:[%s4006_s11 + $0x3c0] ss:$36 sps:$4 sm:$0xff]   ;;  %v3900_v37 = vld [vmem:[%s4006_s11 + $0x338] ss:$36 sps:$4 sm:$0xff]  }
 0x121   : > { %v3125_v40 = vpop.f32.mrf.mxu0  ;;  %v3213_v41 = vpop.f32.mrf.mxu1 }
 0x122   : > { %v4390_v46 = vadd.f32 %v3212_v39, %v1759_v12  ;;  %v3903_v39 = vld [vmem:[%s4006_s11 + $0x40c] ss:$36 sps:$4 sm:$0xff]  }
 0x123   : > { %v3126_v52 = vpop.f32.mrf.mxu0  ;;  %v3214_v53 = vpop.f32.mrf.mxu1 }
 0x124   : > { %v4396_v56 = vadd.f32 %v3126_v52, %v3125_v40  ;;  %v3215_v18 = vadd.f32 %v3214_v53, %v3213_v41  ;;  %v3904_v40 = vld [vmem:[%s4006_s11 + $0x380] ss:$36 sps:$4 sm:$0xff]  }
 0x125   : > { %v3128_v57 = vpop.f32.mrf.mxu0  ;;  %v3216_v58 = vpop.f32.mrf.mxu1  ;;  %2312 = vmatmul.mubr.bf16.gmra.mxu1 %v3886_v42  ;;  %3571 = vmatmul.mubr.bf16.gmra.mxu0 %v3890_v43  ;;  %v1778_v43 = vadd.f32 %v4364_v6, %v4350_v48  ;;  %v1783_v6 = vadd.f32 %v4370_v14, %v4350_v48 }
 0x126   : > { %v4398_v59 = vadd.f32 %v3215_v18, %v1762_v55  ;;  %2319 = vmatprep.mubr.bf16.mxu1 %v3893_v47  ;;  %3574 = vmatprep.mubr.bf16.mxu0 %v3894_v49 }
 0x127   : > { %v3129_v63 = vpop.f32.mrf.mxu0  ;;  %v3217_v0 = vpop.f32.mrf.mxu1 }
 0x128   : > { %v4402_v1 = vadd.f32 %v3129_v63, %v3128_v57  ;;  %v3218_v4 = vadd.f32 %v3217_v0, %v3216_v58 }
 0x129   : > { %v3131_v5 = vpop.f32.mrf.mxu0  ;;  %v3219_v50 = vpop.f32.mrf.mxu1 }
 0x12a   : > { %v4406_v10 = vadd.f32 %v3218_v4, %v1767_v28  ;;  %v3901_v28 = vld [vmem:[%s4006_s11 + $0x408] ss:$36 sps:$4 sm:$0xff]  }
 0x12b   : > { %v3132_v15 = vpop.f32.mrf.mxu0  ;;  %v3220_v16 = vpop.f32.mrf.mxu1  ;;  %v3905_v4 = vld [vmem:[%s4006_s11 + $0x3c8] ss:$36 sps:$4 sm:$0xff]  }
 0x12c   : > { %v4412_v20 = vadd.f32 %v3132_v15, %v3131_v5  ;;  %v3221_v34 = vadd.f32 %v3220_v16, %v3219_v50  ;;  %v3908_v50 = vld [vmem:[%s4006_s11 + $0x454] ss:$36 sps:$4 sm:$0xff]  }
 0x12d   : > { %v3134_v21 = vpop.f32.mrf.mxu0  ;;  %v3222_v23 = vpop.f32.mrf.mxu1  ;;  %2320 = vmatmul.mubr.bf16.gmra.mxu1 %v3891_v7  ;;  %3575 = vmatmul.mubr.bf16.gmra.mxu0 %v3895_v8  ;;  %v3909_v7 = vld [vmem:[%s4006_s11 + $0x410] ss:$36 sps:$4 sm:$0xff]  }
 0x12e   : > { %v4414_v24 = vadd.f32 %v3221_v34, %v1770_v17  ;;  %2327 = vmatprep.mubr.bf16.mxu1 %v3898_v11  ;;  %3578 = vmatprep.mubr.bf16.mxu0 %v3899_v60  ;;  %v1786_v60 = vadd.f32 %v4380_v30, %v4350_v48 }
 0x12f   : > { %v3135_v25 = vpop.f32.mrf.mxu0  ;;  %v3223_v26 = vpop.f32.mrf.mxu1 }
 0x130   : > { %v4418_v27 = vadd.f32 %v3135_v25, %v3134_v21  ;;  %v3224_v2 = vadd.f32 %v3223_v26, %v3222_v23  ;;  %v1791_v25 = vadd.f32 %v4386_v38, %v4350_v48 }
 0x131   : > { %v3137_v31 = vpop.f32.mrf.mxu0  ;;  %v3225_v32 = vpop.f32.mrf.mxu1 }
 0x132   : > { %v4422_v12 = vadd.f32 %v3224_v2, %v1775_v44 }
 0x133   : > { %v3138_v41 = vpop.f32.mrf.mxu0  ;;  %v3226_v42 = vpop.f32.mrf.mxu1 }
 0x134   : > { %v4428_v47 = vadd.f32 %v3138_v41, %v3137_v31  ;;  %v3227_v54 = vadd.f32 %v3226_v42, %v3225_v32  ;;  %v3906_v31 = vld [vmem:[%s4006_s11 + $0x450] ss:$36 sps:$4 sm:$0xff]   ;;  %v3910_v32 = vld [vmem:[%s4006_s11 + $0x458] ss:$36 sps:$4 sm:$0xff]   ;;  %s2786_s11 = sshll.u32 %s4900_s18, 2 }
 0x135   : > { %v3140_v49 = vpop.f32.mrf.mxu0  ;;  %v3228_v52 = vpop.f32.mrf.mxu1  ;;  %2328 = vmatmul.mubr.bf16.gmra.mxu1 %v3896_v36  ;;  %3579 = vmatmul.mubr.bf16.gmra.mxu0 %v3900_v37  ;;  %s4714_s9 = scalar_lea.vmem %s4874_s3, %s2786_s11 }
 0x136   : > { %v4430_v53 = vadd.f32 %v3227_v54, %v1778_v43  ;;  %2335 = vmatprep.mubr.bf16.mxu1 %v3903_v39  ;;  %3582 = vmatprep.mubr.bf16.mxu0 %v3904_v40  ;;  %v1794_v40 = vadd.f32 %v4396_v56, %v4350_v48 }
 0x137   : > { %v3141_v55 = vpop.f32.mrf.mxu0  ;;  %v3229_v18 = vpop.f32.mrf.mxu1 }
 0x138   : > { %v4434_v57 = vadd.f32 %v3141_v55, %v3140_v49  ;;  %v3230_v58 = vadd.f32 %v3229_v18, %v3228_v52  ;;  %v1799_v55 = vadd.f32 %v4402_v1, %v4350_v48 }
 0x139   : > { %v3143_v63 = vpop.f32.mrf.mxu0  ;;  %v3231_v0 = vpop.f32.mrf.mxu1 }
 0x13a   : > { %v4438_v5 = vadd.f32 %v3230_v58, %v1783_v6 }
 0x13b   : > { %v3144_v8 = vpop.f32.mrf.mxu0  ;;  %v3232_v11 = vpop.f32.mrf.mxu1 }
 0x13c   : > { %v4444_v15 = vadd.f32 %v3144_v8, %v3143_v63  ;;  %v3233_v14 = vadd.f32 %v3232_v11, %v3231_v0 }
 0x13d   : > { %v3146_v16 = vpop.f32.mrf.mxu0  ;;  %v3234_v17 = vpop.f32.mrf.mxu1  ;;  %2336 = vmatmul.mubr.bf16.gmra.mxu1 %v3901_v28  ;;  %3583 = vmatmul.mubr.bf16.gmra.mxu0 %v3905_v4  ;;  %v1802_v4 = vadd.f32 %v4412_v20, %v4350_v48 }
 0x13e   : > { %v4446_v34 = vadd.f32 %v3233_v14, %v1786_v60  ;;  %2343 = vmatprep.mubr.bf16.mxu1 %v3908_v50  ;;  %3586 = vmatprep.mubr.bf16.mxu0 %v3909_v7 }
 0x13f   : > { %v3147_v21 = vpop.f32.mrf.mxu0  ;;  %v3235_v23 = vpop.f32.mrf.mxu1 }
 0x140   : > { %v4450_v26 = vadd.f32 %v3147_v21, %v3146_v16  ;;  %v3236_v30 = vadd.f32 %v3235_v23, %v3234_v17  ;;  %v1807_v16 = vadd.f32 %v4418_v27, %v4350_v48 }
 0x141   : > { %v3149_v44 = vpop.f32.mrf.mxu0  ;;  %v3237_v2 = vpop.f32.mrf.mxu1 }
 0x142   : > { %v4454_v36 = vadd.f32 %v3236_v30, %v1791_v25 }
 0x143   : > { %v3150_v37 = vpop.f32.mrf.mxu0  ;;  %v3238_v39 = vpop.f32.mrf.mxu1 }
 0x144   : > { %v4458_v41 = vadd.f32 %v3150_v37, %v3149_v44  ;;  %v3239_v42 = vadd.f32 %v3238_v39, %v3237_v2 }
 0x145   : > { %v3152_v43 = vpop.f32.mrf.mxu0  ;;  %v3240_v54 = vpop.f32.mrf.mxu1  ;;  %2344 = vmatmul.mubr.bf16.gmra.mxu1 %v3906_v31  ;;  %3587 = vmatmul.mubr.bf16.gmra.mxu0 %v3910_v32  ;;  %v1810_v31 = vadd.f32 %v4428_v47, %v4350_v48 }
 0x146   : > { %v4460_v38 = vadd.f32 %v3239_v42, %v1794_v40 }
 0x147   : > { %v3153_v49 = vpop.f32.mrf.mxu0  ;;  %v3241_v52 = vpop.f32.mrf.mxu1 }
 0x148   : > { %v4464_v18 = vadd.f32 %v3153_v49, %v3152_v43  ;;  %v3242_v6 = vadd.f32 %v3241_v52, %v3240_v54 }
 0x149   : > { %v3155_v58 = vpop.f32.mrf.mxu0  ;;  %v3243_v63 = vpop.f32.mrf.mxu1 }
 0x14a   : > { %v4466_v56 = vadd.f32 %v3242_v6, %v1799_v55 }
 0x14b   : > { %v3156_v0 = vpop.f32.mrf.mxu0  ;;  %v3244_v28 = vpop.f32.mrf.mxu1 }
 0x14c   : > { %v4470_v50 = vadd.f32 %v3156_v0, %v3155_v58  ;;  %v3245_v7 = vadd.f32 %v3244_v28, %v3243_v63 }
 0x14d   : > { %v3246_v8 = vpop.f32.mrf.mxu1  ;;  %v3310_v11 = vpop.f32.mrf.mxu0 }
 0x14e   : > { %v4472_v60 = vadd.f32 %v3245_v7, %v1802_v4 }
 0x14f   : > { %v3247_v1 = vpop.f32.mrf.mxu1  ;;  %v3311_v14 = vpop.f32.mrf.mxu0 }
 0x150   : > { %v3248_v17 = vadd.f32 %v3247_v1, %v3246_v8  ;;  %v3312_v21 = vadd.f32 %v3311_v14, %v3310_v11 }
 0x151   : > { %v3249_v23 = vpop.f32.mrf.mxu1  ;;  %v3313_v25 = vpop.f32.mrf.mxu0 }
 0x152   : > { %v4476_v30 = vadd.f32 %v3248_v17, %v1807_v16  ;;  %v4479_v20 = vadd.f32 %v3312_v21, %v4358_v62  ;;  %v1815_v62 = vadd.f32 %v4434_v57, %v4350_v48 }
 0x153   : > { %v3250_v44 = vpop.f32.mrf.mxu1  ;;  %v3314_v2 = vpop.f32.mrf.mxu0 }
 0x154   : > { %v3251_v32 = vadd.f32 %v3250_v44, %v3249_v23  ;;  %v3315_v37 = vadd.f32 %v3314_v2, %v3313_v25 }
 0x155   : > { %v3252_v39 = vpop.f32.mrf.mxu1  ;;  %v3316_v40 = vpop.f32.mrf.mxu0 }
 0x156   : > { %v4483_v42 = vadd.f32 %v3251_v32, %v1810_v31  ;;  %v4486_v27 = vadd.f32 %v3315_v37, %v4366_v9  ;;  %v1818_v9 = vadd.f32 %v4444_v15, %v4350_v48 }
 0x157   : > { %v3253_v43 = vpop.f32.mrf.mxu1  ;;  %v3317_v54 = vpop.f32.mrf.mxu0 }
 0x158   : > { %v3254_v49 = vadd.f32 %v3253_v43, %v3252_v39  ;;  %v3318_v52 = vadd.f32 %v3317_v54, %v3316_v40 }
 0x159   : > { %v3255_v55 = vpop.f32.mrf.mxu1  ;;  %v3319_v6 = vpop.f32.mrf.mxu0 }
 0x15a   : > { %v4490_v58 = vadd.f32 %v3254_v49, %v1815_v62  ;;  %v4493_v47 = vadd.f32 %v3318_v52, %v4374_v22  ;;  %v1823_v22 = vadd.f32 %v4450_v26, %v4350_v48 }
 0x15b   : > { %v3256_v63 = vpop.f32.mrf.mxu1  ;;  %v3320_v0 = vpop.f32.mrf.mxu0 }
 0x15c   : > { %v3257_v28 = vadd.f32 %v3256_v63, %v3255_v55  ;;  %v3321_v4 = vadd.f32 %v3320_v0, %v3319_v6 }
 0x15d   : > { %v3258_v7 = vpop.f32.mrf.mxu1  ;;  %v3322_v8 = vpop.f32.mrf.mxu0 }
 0x15e   : > { %v4497_v11 = vadd.f32 %v3257_v28, %v1818_v9  ;;  %v4500_v57 = vadd.f32 %v3321_v4, %v4382_v33  ;;  %v1826_v33 = vadd.f32 %v4458_v41, %v4350_v48 }
 0x15f   : > { %v3259_v1 = vpop.f32.mrf.mxu1  ;;  %v3323_v14 = vpop.f32.mrf.mxu0 }
 0x160   : > { %v3260_v16 = vadd.f32 %v3259_v1, %v3258_v7  ;;  %v3324_v17 = vadd.f32 %v3323_v14, %v3322_v8 }
 0x161   : > { %v3261_v21 = vpop.f32.mrf.mxu1  ;;  %v3325_v23 = vpop.f32.mrf.mxu0 }
 0x162   : > { %v4504_v25 = vadd.f32 %v3260_v16, %v1823_v22  ;;  %v4507_v15 = vadd.f32 %v3324_v17, %v4390_v46  ;;  %v1831_v46 = vadd.f32 %v4464_v18, %v4350_v48 }
 0x163   : > { %v3262_v44 = vpop.f32.mrf.mxu1  ;;  %v3326_v2 = vpop.f32.mrf.mxu0 }
 0x164   : > { %v3263_v31 = vadd.f32 %v3262_v44, %v3261_v21  ;;  %v3327_v32 = vadd.f32 %v3326_v2, %v3325_v23 }
 0x165   : > { %v3264_v37 = vpop.f32.mrf.mxu1  ;;  %v3328_v39 = vpop.f32.mrf.mxu0 }
 0x166   : > { %v4511_v40 = vadd.f32 %v3263_v31, %v1826_v33  ;;  %v4514_v26 = vadd.f32 %v3327_v32, %v4398_v59  ;;  %v1834_v59 = vadd.f32 %v4470_v50, %v4350_v48 }
 0x167   : > { %v3265_v43 = vpop.f32.mrf.mxu1  ;;  %v3329_v54 = vpop.f32.mrf.mxu0 }
 0x168   : > { %v3266_v62 = vadd.f32 %v3265_v43, %v3264_v37  ;;  %v3330_v49 = vadd.f32 %v3329_v54, %v3328_v39 }
 0x169   : > { %v3267_v52 = vpop.f32.mrf.mxu1  ;;  %v3331_v55 = vpop.f32.mrf.mxu0 }
 0x16a   : > { %v4518_v6 = vadd.f32 %v3266_v62, %v1831_v46  ;;  %v4521_v41 = vadd.f32 %v3330_v49, %v4406_v10  ;;  %v1839_v10 = vadd.f32 %v4301_v51, %v4350_v48 }
 0x16b   : > { %v3268_v63 = vpop.f32.mrf.mxu1  ;;  %v3332_v0 = vpop.f32.mrf.mxu0 }
 0x16c   : > { %v3269_v9 = vadd.f32 %v3268_v63, %v3267_v52  ;;  %v3333_v28 = vadd.f32 %v3332_v0, %v3331_v55 }
 0x16d   : > { %v3270_v4 = vpop.f32.mrf.mxu1  ;;  %v3334_v7 = vpop.f32.mrf.mxu0 }
 0x16e   : > { %v4525_v8 = vadd.f32 %v3269_v9, %v1834_v59  ;;  %v4528_v18 = vadd.f32 %v3333_v28, %v4414_v24  ;;  %v1842_v24 = vadd.f32 %v4309_v61, %v4350_v48 }
 0x16f   : > { %v3271_v1 = vpop.f32.mrf.mxu1  ;;  %v3335_v14 = vpop.f32.mrf.mxu0 }
 0x170   : > { %v3272_v22 = vadd.f32 %v3271_v1, %v3270_v4  ;;  %v3336_v16 = vadd.f32 %v3335_v14, %v3334_v7 }
 0x171   : > { %v3273_v17 = vpop.f32.mrf.mxu1  ;;  %v3337_v21 = vpop.f32.mrf.mxu0 }
 0x172   : > { %v4532_v23 = vadd.f32 %v3272_v22, %v1839_v10  ;;  %v4535_v50 = vadd.f32 %v3336_v16, %v4422_v12  ;;  %v1847_v12 = vadd.f32 %v4313_v3, %v4350_v48 }
 0x173   : > { %v3274_v44 = vpop.f32.mrf.mxu1  ;;  %v3338_v2 = vpop.f32.mrf.mxu0 }
 0x174   : > { %v3275_v33 = vadd.f32 %v3274_v44, %v3273_v17  ;;  %v3339_v31 = vadd.f32 %v3338_v2, %v3337_v21 }
 0x175   : > { %v3276_v32 = vpop.f32.mrf.mxu1  ;;  %v3340_v37 = vpop.f32.mrf.mxu0 }
 0x176   : > { %v4539_v39 = vadd.f32 %v3275_v33, %v1842_v24  ;;  %v4542_v51 = vadd.f32 %v3339_v31, %v4430_v53  ;;  %v1850_v53 = vadd.f32 %v4321_v13, %v4350_v48 }
 0x177   : > { %v3277_v43 = vpop.f32.mrf.mxu1  ;;  %v3341_v54 = vpop.f32.mrf.mxu0 }
 0x178   : > { %v3278_v46 = vadd.f32 %v3277_v43, %v3276_v32  ;;  %v3342_v62 = vadd.f32 %v3341_v54, %v3340_v37 }
 0x179   : > { %v3279_v49 = vpop.f32.mrf.mxu1  ;;  %v3343_v52 = vpop.f32.mrf.mxu0 }
 0x17a   : > { %v4546_v55 = vadd.f32 %v3278_v46, %v1847_v12  ;;  %v4549_v61 = vadd.f32 %v3342_v62, %v4438_v5  ;;  %v1855_v5 = vadd.f32 %v4325_v19, %v4350_v48 }
 0x17b   : > { %v3280_v63 = vpop.f32.mrf.mxu1  ;;  %v3344_v0 = vpop.f32.mrf.mxu0 }
 0x17c   : > { %v3281_v59 = vadd.f32 %v3280_v63, %v3279_v49  ;;  %v3345_v9 = vadd.f32 %v3344_v0, %v3343_v52 }
 0x17d   : > { %v3282_v28 = vpop.f32.mrf.mxu1  ;;  %v3346_v4 = vpop.f32.mrf.mxu0 }
 0x17e   : > { %v4553_v7 = vadd.f32 %v3281_v59, %v1850_v53  ;;  %v4556_v3 = vadd.f32 %v3345_v9, %v4446_v34  ;;  %v1858_v34 = vadd.f32 %v4333_v29, %v4350_v48 }
 0x17f   : > { %v3283_v1 = vpop.f32.mrf.mxu1  ;;  %v3347_v14 = vpop.f32.mrf.mxu0 }
 0x180   : > { %v3284_v10 = vadd.f32 %v3283_v1, %v3282_v28  ;;  %v3348_v22 = vadd.f32 %v3347_v14, %v3346_v4 }
 0x181   : > { %v3285_v16 = vpop.f32.mrf.mxu1  ;;  %v3349_v17 = vpop.f32.mrf.mxu0 }
 0x182   : > { %v4560_v21 = vadd.f32 %v3284_v10, %v1855_v5  ;;  %v4563_v13 = vadd.f32 %v3348_v22, %v4454_v36  ;;  %v1863_v36 = vadd.f32 %v4337_v35, %v4350_v48 }
 0x183   : > { %v3286_v44 = vpop.f32.mrf.mxu1  ;;  %v3350_v2 = vpop.f32.mrf.mxu0 }
 0x184   : > { %v3287_v24 = vadd.f32 %v3286_v44, %v3285_v16  ;;  %v3351_v33 = vadd.f32 %v3350_v2, %v3349_v17 }
 0x185   : > { %v3288_v31 = vpop.f32.mrf.mxu1  ;;  %v3352_v32 = vpop.f32.mrf.mxu0 }
 0x186   : > { %v4567_v37 = vadd.f32 %v3287_v24, %v1858_v34  ;;  %v4570_v19 = vadd.f32 %v3351_v33, %v4460_v38  ;;  %v1866_v38 = vadd.f32 %v4345_v45, %v4350_v48 }
 0x187   : > { %v3289_v43 = vpop.f32.mrf.mxu1  ;;  %v3353_v54 = vpop.f32.mrf.mxu0 }
 0x188   : > { %v3290_v12 = vadd.f32 %v3289_v43, %v3288_v31  ;;  %v3354_v46 = vadd.f32 %v3353_v54, %v3352_v32 }
 0x189   : > { %v3291_v62 = vpop.f32.mrf.mxu1  ;;  %v3355_v49 = vpop.f32.mrf.mxu0 }
 0x18a   : > { %v4574_v52 = vadd.f32 %v3290_v12, %v1863_v36  ;;  %v4577_v29 = vadd.f32 %v3354_v46, %v4466_v56 }
 0x18b   : > { %v3292_v63 = vpop.f32.mrf.mxu1  ;;  %v3356_v0 = vpop.f32.mrf.mxu0 }
 0x18c   : > { %v3293_v53 = vadd.f32 %v3292_v63, %v3291_v62  ;;  %v3357_v59 = vadd.f32 %v3356_v0, %v3355_v49 }
 0x18d   : > { %v3358_v9 = vpop.f32.mrf.mxu0  ;;  %v4581_v28 = vpop.f32.mrf.mxu1 }
 0x18e   : > { %v4583_v35 = vadd.f32 %v3293_v53, %v1866_v38  ;;  %v4586_v4 = vadd.f32 %v3357_v59, %v4472_v60 }
 0x18f   : > { %v3359_v1 = vpop.f32.mrf.mxu0  ;;  %v4588_v14 = vpop.f32.mrf.mxu1 }
 0x190   : > { %v3360_v56 = vadd.f32 %v3359_v1, %v3358_v9 }
 0x191   : > { %v3361_v5 = vpop.f32.mrf.mxu0  ;;  %v4590_v10 = vpop.f32.mrf.mxu1 }
 0x192   : > { %v4593_v22 = vadd.f32 %v3360_v56, %v4476_v30 }
 0x193   : > { %v3362_v45 = vpop.f32.mrf.mxu0  ;;  %v4595_v48 = vpop.f32.mrf.mxu1 }
 0x194   : > { %v3363_v16 = vadd.f32 %v3362_v45, %v3361_v5 }
 0x195   : > { %v3364_v17 = vpop.f32.mrf.mxu0  ;;  %v4597_v44 = vpop.f32.mrf.mxu1 }
 0x196   : > { %v4600_v60 = vadd.f32 %v3363_v16, %v4483_v42 }
 0x197   : > { %v3365_v2 = vpop.f32.mrf.mxu0  ;;  %v4602_v34 = vpop.f32.mrf.mxu1 }
 0x198   : > { %4875 = vst [vmem:[#allocation2_spill] sm:$0xff] %v4600_v60  ;;  %v3366_v24 = vadd.f32 %v3365_v2, %v3364_v17 }
 0x199   : > { %v3367_v33 = vpop.f32.mrf.mxu0  ;;  %v4604_v31 = vpop.f32.mrf.mxu1 }
 0x19a   : > { %v4607_v30 = vadd.f32 %v3366_v24, %v4490_v58 }
 0x19b   : > { %v3368_v32 = vpop.f32.mrf.mxu0  ;;  %v4609_v43 = vpop.f32.mrf.mxu1 }
 0x19c   : > { %v3369_v54 = vadd.f32 %v3368_v32, %v3367_v33 }
 0x19d   : > { %v3370_v36 = vpop.f32.mrf.mxu0  ;;  %v4611_v12 = vpop.f32.mrf.mxu1 }
 0x19e   : > { %v4614_v42 = vadd.f32 %v3369_v54, %v4497_v11 }
 0x19f   : > { %v3371_v46 = vpop.f32.mrf.mxu0  ;;  %v4616_v62 = vpop.f32.mrf.mxu1 }
 0x1a0   : > { %v3372_v49 = vadd.f32 %v3371_v46, %v3370_v36 }
 0x1a1   : > { %v3373_v63 = vpop.f32.mrf.mxu0  ;;  %v4618_v0 = vpop.f32.mrf.mxu1 }
 0x1a2   : > { %v4621_v58 = vadd.f32 %v3372_v49, %v4504_v25 }
 0x1a3   : > { %v3374_v38 = vpop.f32.mrf.mxu0  ;;  %v4623_v53 = vpop.f32.mrf.mxu1 }
 0x1a4   : > { %4876 = vst [vmem:[#allocation3_spill] sm:$0xff] %v4621_v58  ;;  %v3375_v59 = vadd.f32 %v3374_v38, %v3373_v63 }
 0x1a5   : > { %v3376_v9 = vpop.f32.mrf.mxu0  ;;  %v4625_v1 = vpop.f32.mrf.mxu1 }
 0x1a6   : > { %v4628_v11 = vadd.f32 %v3375_v59, %v4511_v40 }
 0x1a7   : > { %v3377_v56 = vpop.f32.mrf.mxu0  ;;  %v4630_v5 = vpop.f32.mrf.mxu1 }
 0x1a8   : > { %4877 = vst [vmem:[#allocation4_spill] sm:$0xff] %v4628_v11  ;;  %v3378_v45 = vadd.f32 %v3377_v56, %v3376_v9 }
 0x1a9   : > { %v3379_v16 = vpop.f32.mrf.mxu0  ;;  %v4632_v17 = vpop.f32.mrf.mxu1 }
 0x1aa   : > { %v4635_v25 = vadd.f32 %v3378_v45, %v4518_v6 }
 0x1ab   : > { %v3380_v2 = vpop.f32.mrf.mxu0  ;;  %v4637_v24 = vpop.f32.mrf.mxu1 }
 0x1ac   : > { %4878 = vst [vmem:[#allocation5_spill] sm:$0xff] %v4635_v25  ;;  %v3381_v33 = vadd.f32 %v3380_v2, %v3379_v16 }
 0x1ad   : > { %v3382_v32 = vpop.f32.mrf.mxu0  ;;  %v4639_v54 = vpop.f32.mrf.mxu1 }
 0x1ae   : > { %v4642_v40 = vadd.f32 %v3381_v33, %v4525_v8 }
 0x1af   : > { %v3383_v36 = vpop.f32.mrf.mxu0  ;;  %v4644_v46 = vpop.f32.mrf.mxu1 }
 0x1b0   : > { %4879 = vst [vmem:[#allocation6_spill] sm:$0xff] %v4642_v40  ;;  %v3384_v49 = vadd.f32 %v3383_v36, %v3382_v32 }
 0x1b1   : > { %v3385_v63 = vpop.f32.mrf.mxu0  ;;  %v4646_v38 = vpop.f32.mrf.mxu1 }
 0x1b2   : > { %v4649_v6 = vadd.f32 %v3384_v49, %v4532_v23 }
 0x1b3   : > { %v3386_v59 = vpop.f32.mrf.mxu0  ;;  %v4651_v9 = vpop.f32.mrf.mxu1 }
 0x1b4   : > { %4880 = vst [vmem:[#allocation7_spill] sm:$0xff] %v4649_v6  ;;  %v3387_v56 = vadd.f32 %v3386_v59, %v3385_v63 }
 0x1b5   : > { %v3388_v45 = vpop.f32.mrf.mxu0  ;;  %v4653_v16 = vpop.f32.mrf.mxu1 }
 0x1b6   : > { %v4656_v8 = vadd.f32 %v3387_v56, %v4539_v39 }
 0x1b7   : > { %v3389_v2 = vpop.f32.mrf.mxu0  ;;  %v4658_v33 = vpop.f32.mrf.mxu1 }
 0x1b8   : > { %4881 = vst [vmem:[#allocation8_spill] sm:$0xff] %v4656_v8  ;;  %v3390_v32 = vadd.f32 %v3389_v2, %v3388_v45 }
 0x1b9   : > { %v3391_v36 = vpop.f32.mrf.mxu0  ;;  %v4660_v11 = vpop.f32.mrf.mxu1 }
 0x1ba   : > { %v4663_v23 = vadd.f32 %v3390_v32, %v4546_v55 }
 0x1bb   : > { %v3392_v49 = vpop.f32.mrf.mxu0  ;;  %v4665_v6 = vpop.f32.mrf.mxu1 }
 0x1bc   : > { %4882 = vst [vmem:[#allocation9_spill] sm:$0xff] %v4663_v23  ;;  %v3393_v63 = vadd.f32 %v3392_v49, %v3391_v36 }
 0x1bd   : > { %v3394_v59 = vpop.f32.mrf.mxu0  ;;  %v4667_v40 = vpop.f32.mrf.mxu1 }
 0x1be   : > { %v4670_v39 = vadd.f32 %v3393_v63, %v4553_v7 }
 0x1bf   : > { %v3395_v56 = vpop.f32.mrf.mxu0  ;;  %v4672_v8 = vpop.f32.mrf.mxu1 }
 0x1c0   : > { %4883 = vst [vmem:[#allocation10_spill] sm:$0xff] %v4670_v39  ;;  %v3396_v45 = vadd.f32 %v3395_v56, %v3394_v59  ;;  %v3430_v59 = vadd.f32 %v4602_v34, %v4597_v44 }
 0x1c1   : > { %v3397_v2 = vpop.f32.mrf.mxu0  ;;  %v4674_v58 = vpop.f32.mrf.mxu1 }
 0x1c2   : > { %v4677_v55 = vadd.f32 %v3396_v45, %v4560_v21  ;;  %v2234_v44 = vadd.f32 %v3430_v59, %v4493_v47  ;;  %v3436_v59 = vadd.f32 %v4616_v62, %v4611_v12 }
 0x1c3   : > { %v3398_v32 = vpop.f32.mrf.mxu0  ;;  %v4679_v23 = vpop.f32.mrf.mxu1 }
 0x1c4   : > { %4884 = vst [vmem:[#allocation11_spill] sm:$0xff] %v4677_v55  ;;  %v3399_v36 = vadd.f32 %v3398_v32, %v3397_v2  ;;  %v3424_v2 = vadd.f32 %v4588_v14, %v4581_v28 }
 0x1c5   : > { %v3400_v49 = vpop.f32.mrf.mxu0  ;;  %v4681_v25 = vpop.f32.mrf.mxu1 }
 0x1c6   : > { %v4684_v7 = vadd.f32 %v3399_v36, %v4567_v37  ;;  %v3433_v37 = vadd.f32 %v4609_v43, %v4604_v31  ;;  %v2226_v14 = vadd.f32 %v3424_v2, %v4479_v20 }
 0x1c7   : > { %v3401_v63 = vpop.f32.mrf.mxu0  ;;  %v4686_v39 = vpop.f32.mrf.mxu1 }
 0x1c8   : > { %v3402_v56 = vadd.f32 %v3401_v63, %v3400_v49  ;;  %v3427_v63 = vadd.f32 %v4595_v48, %v4590_v10  ;;  %v3442_v10 = vadd.f32 %v4630_v5, %v4625_v1  ;;  %v2237_v43 = vadd.f32 %v3433_v37, %v4500_v57 }
 0x1c9   : > { %v3403_v21 = vpop.f32.mrf.mxu0  ;;  %v4690_v45 = vpop.f32.mrf.mxu1  ;;  %v3445_v57 = vadd.f32 %v4637_v24, %v4632_v17 }
 0x1ca   : > { %v4695_v32 = vadd.f32 %v3402_v56, %v4574_v52  ;;  %v2229_v2 = vadd.f32 %v3427_v63, %v4486_v27  ;;  %v3439_v27 = vadd.f32 %v4623_v53, %v4618_v0  ;;  %v3448_v53 = vadd.f32 %v4644_v46, %v4639_v54 }
 0x1cb   : > { %v3404_v55 = vpop.f32.mrf.mxu0  ;;  %v4697_v60 = vpop.f32.mrf.mxu1  ;;  %v3451_v46 = vadd.f32 %v4651_v9, %v4646_v38 }
 0x1cc   : > { %v3405_v36 = vadd.f32 %v3404_v55, %v3403_v21 }
 0x1cd   : > { %v4703_v34 = vpop.f32.mrf.mxu1  ;;  %v3560_v49 = vpop.f32.mrf.mxu0 }
 0x1ce   : > { %v4708_v28 = vadd.f32 %v3405_v36, %v4583_v35  ;;  %v2395_v52 = vadd.f32 %v3560_v49, %v2234_v44  ;;  %v2250_v44 = vadd.f32 %v3442_v10, %v4521_v41  ;;  %v2253_v10 = vadd.f32 %v3445_v57, %v4528_v18 }
 0x1cf   : > { %v4716_v47 = vpop.f32.mrf.mxu1  ;;  %v2386_v31 = vpop.f32.mrf.mxu0 }
 0x1d0   : > { %v3040_v48 = vpack.c.bf16 %v2395_v52, %v2395_v52  ;;  %v2387_v35 = vadd.f32 %v2386_v31, %v2226_v14  ;;  %v2242_v52 = vadd.f32 %v3436_v59, %v4507_v15  ;;  %v3454_v14 = vadd.f32 %v4658_v33, %v4653_v16 }
 0x1d1   : > { %v4721_v55 = vpop.f32.mrf.mxu1  ;;  %v3561_v20 = vpop.f32.mrf.mxu0 }
 0x1d2   : > { %2644 = vst.msk [vmem:[%s4714_s9 + $0x8] sm:$0xf] %vm2641_vm0, %v3040_v48  ;;  %v3038_v56 = vpack.c.bf16 %v2387_v35, %v2387_v35  ;;  %v2398_v21 = vadd.f32 %v3561_v20, %v2237_v43  ;;  %v2245_v43 = vadd.f32 %v3439_v27, %v4514_v26  ;;  %v3457_v20 = vadd.f32 %v4665_v6, %v4660_v11 }
 0x1d3   : > { %v4728_v36 = vpop.f32.mrf.mxu1  ;;  %v2389_v1 = vpop.f32.mrf.mxu0  ;;  %v2261_v27 = vadd.f32 %v3451_v46, %v4542_v51 }
 0x1d4   : > { %2642 = vst.msk [vmem:[%s4714_s9] sm:$0xf] %vm2641_vm0, %v3038_v56  ;;  %v3041_v5 = vpack.c.bf16 %v2398_v21, %v2398_v21  ;;  %v2390_v37 = vadd.f32 %v2389_v1, %v2229_v2  ;;  %v2266_v56 = vadd.f32 %v3454_v14, %v4549_v61  ;;  %v2258_v1 = vadd.f32 %v3448_v53, %v4535_v50 }
 0x1d5   : > { %v4735_v12 = vpop.f32.mrf.mxu1  ;;  %v3564_v62 = vpop.f32.mrf.mxu0  ;;  %v3466_v61 = vadd.f32 %v4686_v39, %v4681_v25  ;;  %v3460_v50 = vadd.f32 %v4672_v8, %v4667_v40 }
 0x1d6   : > { %2645 = vst.msk [vmem:[%s4714_s9 + $0xc] sm:$0xf] %vm2641_vm0, %v3041_v5  ;;  %v3039_v49 = vpack.c.bf16 %v2390_v37, %v2390_v37  ;;  %v2411_v63 = vadd.f32 %v3564_v62, %v2250_v44  ;;  %v2269_v37 = vadd.f32 %v3457_v20, %v4556_v3  ;;  %v3469_v3 = vadd.f32 %v4697_v60, %v4690_v45 }
 0x1d7   : > { %v3477_v17 = vpop.f32.mrf.mxu1  ;;  %v2402_v24 = vpop.f32.mrf.mxu0 }
 0x1d8   : > { %2643 = vst.msk [vmem:[%s4714_s9 + $0x4] sm:$0xf] %vm2641_vm0, %v3039_v49  ;;  %v3044_v41 = vpack.c.bf16 %v2411_v63, %v2411_v63  ;;  %v2403_v31 = vadd.f32 %v2402_v24, %v2242_v52  ;;  %v2282_v52 = vadd.f32 %v3466_v61, %v4577_v29  ;;  %v3463_v24 = vadd.f32 %v4679_v23, %v4674_v58 }
 0x1d9   : > { %v4747_v48 = vpop.f32.mrf.mxu1  ;;  %v3565_v0 = vpop.f32.mrf.mxu0  ;;  %v3478_v45 = vadd.f32 %v3477_v17, %v4735_v12  ;;  %v3472_v58 = vadd.f32 %v4716_v47, %v4703_v34  ;;  %v3475_v34 = vadd.f32 %v4728_v36, %v4721_v55 }
 0x1da   : > { %2648 = vst.msk [vmem:[%s4714_s9 + $0x18] sm:$0xf] %vm2641_vm0, %v3044_v41  ;;  %v3042_v15 = vpack.c.bf16 %v2403_v31, %v2403_v31  ;;  %v2414_v35 = vadd.f32 %v3565_v0, %v2253_v10  ;;  %v2274_v41 = vadd.f32 %v3460_v50, %v4563_v13  ;;  %v2285_v0 = vadd.f32 %v3469_v3, %v4586_v4  ;;  %v4886_v50 = vld [vmem:[#allocation5_spill] sm:$0xff]  ;;  %v4887_v3 = vld [vmem:[#allocation3_spill] sm:$0xff] }
 0x1db   : > { %v3480_v16 = vpop.f32.mrf.mxu1  ;;  %v2405_v33 = vpop.f32.mrf.mxu0  ;;  %v2298_v20 = vadd.f32 %v3478_v45, %v4607_v30  ;;  %v4889_v45 = vld [vmem:[#allocation4_spill] sm:$0xff] }
 0x1dc   : > { %2646 = vst.msk [vmem:[%s4714_s9 + $0x10] sm:$0xf] %vm2641_vm0, %v3042_v15  ;;  %v3045_v18 = vpack.c.bf16 %v2414_v35, %v2414_v35  ;;  %v2406_v59 = vadd.f32 %v2405_v33, %v2245_v43  ;;  %v2277_v35 = vadd.f32 %v3463_v24, %v4570_v19  ;;  %v3481_v17 = vadd.f32 %v3480_v16, %v4747_v48 }
 0x1dd   : > { %v4759_v21 = vpop.f32.mrf.mxu1  ;;  %v3568_v54 = vpop.f32.mrf.mxu0 }
 0x1de   : > { %2649 = vst.msk [vmem:[%s4714_s9 + $0x1c] sm:$0xf] %vm2641_vm0, %v3045_v18  ;;  %v3043_v26 = vpack.c.bf16 %v2406_v59, %v2406_v59  ;;  %v2427_v2 = vadd.f32 %v3568_v54, %v2266_v56  ;;  %v2290_v56 = vadd.f32 %v3472_v58, %v4593_v22 }
 0x1df   : > { %v4766_v11 = vpop.f32.mrf.mxu1  ;;  %v2418_v6 = vpop.f32.mrf.mxu0 }
 0x1e0   : > { %2647 = vst.msk [vmem:[%s4714_s9 + $0x14] sm:$0xf] %vm2641_vm0, %v3043_v26  ;;  %v3048_v57 = vpack.c.bf16 %v2427_v2, %v2427_v2  ;;  %v2419_v5 = vadd.f32 %v2418_v6, %v2258_v1  ;;  %v2301_v26 = vadd.f32 %v3481_v17, %v4614_v42  ;;  %v3484_v55 = vadd.f32 %v4766_v11, %v4759_v21  ;;  %v4885_v6 = vld [vmem:[#allocation2_spill] sm:$0xff] }
 0x1e1   : > { %v4773_v38 = vpop.f32.mrf.mxu1  ;;  %v3569_v9 = vpop.f32.mrf.mxu0  ;;  %v2293_v61 = vadd.f32 %v3475_v34, %v4885_v6 }
 0x1e2   : > { %2652 = vst.msk [vmem:[%s4714_s9 + $0x28] sm:$0xf] %vm2641_vm0, %v3048_v57  ;;  %v3046_v44 = vpack.c.bf16 %v2419_v5, %v2419_v5  ;;  %v2430_v62 = vadd.f32 %v3569_v9, %v2269_v37 }
 0x1e3   : > { %v4780_v25 = vpop.f32.mrf.mxu1  ;;  %v2421_v39 = vpop.f32.mrf.mxu0 }
 0x1e4   : > { %2650 = vst.msk [vmem:[%s4714_s9 + $0x20] sm:$0xf] %vm2641_vm0, %v3046_v44  ;;  %v3049_v49 = vpack.c.bf16 %v2430_v62, %v2430_v62  ;;  %v2422_v63 = vadd.f32 %v2421_v39, %v2261_v27  ;;  %v3487_v21 = vadd.f32 %v4780_v25, %v4773_v38 }
 0x1e5   : > { %v3488_v40 = vpop.f32.mrf.mxu1  ;;  %v3572_v8 = vpop.f32.mrf.mxu0 }
 0x1e6   : > { %2653 = vst.msk [vmem:[%s4714_s9 + $0x2c] sm:$0xf] %vm2641_vm0, %v3049_v49  ;;  %v3047_v51 = vpack.c.bf16 %v2422_v63, %v2422_v63  ;;  %v2443_v14 = vadd.f32 %v3572_v8, %v2282_v52  ;;  %v2306_v49 = vadd.f32 %v3484_v55, %v4887_v3 }
 0x1e7   : > { %v3489_v31 = vpop.f32.mrf.mxu1  ;;  %v2434_v60 = vpop.f32.mrf.mxu0 }
 0x1e8   : > { %2651 = vst.msk [vmem:[%s4714_s9 + $0x24] sm:$0xf] %vm2641_vm0, %v3047_v51  ;;  %v3052_v29 = vpack.c.bf16 %v2443_v14, %v2443_v14  ;;  %v2435_v10 = vadd.f32 %v2434_v60, %v2274_v41  ;;  %v3490_v16 = vadd.f32 %v3489_v31, %v3488_v40  ;;  %v4888_v51 = vld [vmem:[#allocation6_spill] sm:$0xff] }
 0x1e9   : > { %v3491_v53 = vpop.f32.mrf.mxu1  ;;  %v3573_v15 = vpop.f32.mrf.mxu0 }
 0x1ea   : > { %2656 = vst.msk [vmem:[%s4714_s9 + $0x38] sm:$0xf] %vm2641_vm0, %v3052_v29  ;;  %v3050_v13 = vpack.c.bf16 %v2435_v10, %v2435_v10  ;;  %v2446_v23 = vadd.f32 %v3573_v15, %v2285_v0  ;;  %v2314_v44 = vadd.f32 %v3490_v16, %v4886_v50  ;;  %v2309_v29 = vadd.f32 %v3487_v21, %v4889_v45 }
 0x1eb   : > { %v3492_v43 = vpop.f32.mrf.mxu1  ;;  %v2437_v12 = vpop.f32.mrf.mxu0 }
 0x1ec   : > { %2654 = vst.msk [vmem:[%s4714_s9 + $0x30] sm:$0xf] %vm2641_vm0, %v3050_v13  ;;  %v3053_v4 = vpack.c.bf16 %v2446_v23, %v2446_v23  ;;  %v2438_v33 = vadd.f32 %v2437_v12, %v2277_v35  ;;  %v3493_v37 = vadd.f32 %v3492_v43, %v3491_v53  ;;  %v4890_v13 = vld [vmem:[#allocation9_spill] sm:$0xff] }
 0x1ed   : > { %v3494_v18 = vpop.f32.mrf.mxu1  ;;  %v3576_v59 = vpop.f32.mrf.mxu0 }
 0x1ee   : > { %2657 = vst.msk [vmem:[%s4714_s9 + $0x3c] sm:$0xf] %vm2641_vm0, %v3053_v4  ;;  %v3051_v19 = vpack.c.bf16 %v2438_v33, %v2438_v33  ;;  %v2459_v47 = vadd.f32 %v3576_v59, %v2298_v20  ;;  %v2317_v14 = vadd.f32 %v3493_v37, %v4888_v51  ;;  %v4891_v33 = vld [vmem:[#allocation7_spill] sm:$0xff] }
 0x1ef   : > { %v3495_v54 = vpop.f32.mrf.mxu1  ;;  %v2450_v48 = vpop.f32.mrf.mxu0  ;;  %v4894_v37 = vld [vmem:[#allocation11_spill] sm:$0xff] }
 0x1f0   : > { %2655 = vst.msk [vmem:[%s4714_s9 + $0x34] sm:$0xf] %vm2641_vm0, %v3051_v19  ;;  %v3056_v46 = vpack.c.bf16 %v2459_v47, %v2459_v47  ;;  %v2451_v30 = vadd.f32 %v2450_v48, %v2290_v56  ;;  %v3496_v38 = vadd.f32 %v3495_v54, %v3494_v18  ;;  %v4892_v47 = vld [vmem:[#allocation10_spill] sm:$0xff] }
 0x1f1   : > { %v3497_v2 = vpop.f32.mrf.mxu1  ;;  %v3577_v1 = vpop.f32.mrf.mxu0 }
 0x1f2   : > { %2660 = vst.msk [vmem:[%s4714_s9 + $0x48] sm:$0xf] %vm2641_vm0, %v3056_v46  ;;  %v3054_v36 = vpack.c.bf16 %v2451_v30, %v2451_v30  ;;  %v2462_v22 = vadd.f32 %v3577_v1, %v2301_v26  ;;  %v2322_v20 = vadd.f32 %v3496_v38, %v4891_v33  ;;  %v4893_v26 = vld [vmem:[#allocation8_spill] sm:$0xff] }
 0x1f3   : > { %v3498_v57 = vpop.f32.mrf.mxu1  ;;  %v2453_v5 = vpop.f32.mrf.mxu0 }
 0x1f4   : > { %2658 = vst.msk [vmem:[%s4714_s9 + $0x40] sm:$0xf] %vm2641_vm0, %v3054_v36  ;;  %v3057_v9 = vpack.c.bf16 %v2462_v22, %v2462_v22  ;;  %v2454_v42 = vadd.f32 %v2453_v5, %v2293_v61  ;;  %v3499_v12 = vadd.f32 %v3498_v57, %v3497_v2 }
 0x1f5   : > { %v3500_v62 = vpop.f32.mrf.mxu1  ;;  %v3580_v27 = vpop.f32.mrf.mxu0 }
 0x1f6   : > { %2661 = vst.msk [vmem:[%s4714_s9 + $0x4c] sm:$0xf] %vm2641_vm0, %v3057_v9  ;;  %v3055_v11 = vpack.c.bf16 %v2454_v42, %v2454_v42  ;;  %v2475_v39 = vadd.f32 %v3580_v27, %v2314_v44  ;;  %v2325_v2 = vadd.f32 %v3499_v12, %v4893_v26 }
 0x1f7   : > { %v3501_v63 = vpop.f32.mrf.mxu1  ;;  %v2466_v52 = vpop.f32.mrf.mxu0 }
 0x1f8   : > { %2659 = vst.msk [vmem:[%s4714_s9 + $0x44] sm:$0xf] %vm2641_vm0, %v3055_v11  ;;  %v3060_v40 = vpack.c.bf16 %v2475_v39, %v2475_v39  ;;  %v3502_v8 = vadd.f32 %v3501_v63, %v3500_v62  ;;  %v2467_v24 = vadd.f32 %v2466_v52, %v2306_v49 }
 0x1f9   : > { %v3503_v41 = vpop.f32.mrf.mxu1  ;;  %v3581_v31 = vpop.f32.mrf.mxu0 }
 0x1fa   : > { %2664 = vst.msk [vmem:[%s4714_s9 + $0x58] sm:$0xf] %vm2641_vm0, %v3060_v40  ;;  %v3058_v25 = vpack.c.bf16 %v2467_v24, %v2467_v24  ;;  %v2478_v60 = vadd.f32 %v3581_v31, %v2317_v14  ;;  %v2330_v23 = vadd.f32 %v3502_v8, %v4890_v13 }
 0x1fb   : > { %v3504_v10 = vpop.f32.mrf.mxu1  ;;  %v2469_v0 = vpop.f32.mrf.mxu0 }
 0x1fc   : > { %2662 = vst.msk [vmem:[%s4714_s9 + $0x50] sm:$0xf] %vm2641_vm0, %v3058_v25  ;;  %v3061_v53 = vpack.c.bf16 %v2478_v60, %v2478_v60  ;;  %v3505_v15 = vadd.f32 %v3504_v10, %v3503_v41  ;;  %v2470_v58 = vadd.f32 %v2469_v0, %v2309_v29 }
 0x1fd   : > { %v3506_v35 = vpop.f32.mrf.mxu1  ;;  %v3584_v43 = vpop.f32.mrf.mxu0 }
 0x1fe   : > { %2665 = vst.msk [vmem:[%s4714_s9 + $0x5c] sm:$0xf] %vm2641_vm0, %v3061_v53  ;;  %v3059_v17 = vpack.c.bf16 %v2470_v58, %v2470_v58  ;;  %v2491_v4 = vadd.f32 %v3584_v43, %v2330_v23  ;;  %v2333_v56 = vadd.f32 %v3505_v15, %v4892_v47 }
 0x1ff   : > { %v3507_v18 = vpop.f32.mrf.mxu1  ;;  %v2482_v59 = vpop.f32.mrf.mxu0 }
 0x200   : > { %2663 = vst.msk [vmem:[%s4714_s9 + $0x54] sm:$0xf] %vm2641_vm0, %v3059_v17  ;;  %v3064_v34 = vpack.c.bf16 %v2491_v4, %v2491_v4  ;;  %v2483_v19 = vadd.f32 %v2482_v59, %v2322_v20  ;;  %v3508_v16 = vadd.f32 %v3507_v18, %v3506_v35 }
 0x201   : > { %v3509_v54 = vpop.f32.mrf.mxu1  ;;  %v3585_v48 = vpop.f32.mrf.mxu0 }
 0x202   : > { %2668 = vst.msk [vmem:[%s4714_s9 + $0x68] sm:$0xf] %vm2641_vm0, %v3064_v34  ;;  %v3062_v46 = vpack.c.bf16 %v2483_v19, %v2483_v19  ;;  %v2494_v30 = vadd.f32 %v3585_v48, %v2333_v56  ;;  %v2338_v9 = vadd.f32 %v3508_v16, %v4894_v37 }
 0x203   : > { %v3510_v1 = vpop.f32.mrf.mxu1  ;;  %v2485_v55 = vpop.f32.mrf.mxu0 }
 0x204   : > { %2666 = vst.msk [vmem:[%s4714_s9 + $0x60] sm:$0xf] %vm2641_vm0, %v3062_v46  ;;  %v3065_v36 = vpack.c.bf16 %v2494_v30, %v2494_v30  ;;  %v2486_v22 = vadd.f32 %v2485_v55, %v2325_v2  ;;  %v3511_v57 = vadd.f32 %v3510_v1, %v3509_v54 }
 0x205   : > { %v3512_v6 = vpop.f32.mrf.mxu1  ;;  %v3588_v61 = vpop.f32.mrf.mxu0 }
 0x206   : > { %2669 = vst.msk [vmem:[%s4714_s9 + $0x6c] sm:$0xf] %vm2641_vm0, %v3065_v36  ;;  %v3063_v5 = vpack.c.bf16 %v2486_v22, %v2486_v22  ;;  %v2341_v3 = vadd.f32 %v3511_v57, %v4684_v7 }
 0x207   : > { %v3513_v42 = vpop.f32.mrf.mxu1  ;;  %v2498_v50 = vpop.f32.mrf.mxu0 }
 0x208   : > { %2667 = vst.msk [vmem:[%s4714_s9 + $0x64] sm:$0xf] %vm2641_vm0, %v3063_v5  ;;  %v3514_v44 = vadd.f32 %v3513_v42, %v3512_v6  ;;  %v2499_v62 = vadd.f32 %v2498_v50, %v2338_v9 }
 0x209   : > { %v3515_v27 = vpop.f32.mrf.mxu1  ;;  %v3589_v21 = vpop.f32.mrf.mxu0 }
 0x20a   : > { %v2346_v11 = vadd.f32 %v3514_v44, %v4695_v32  ;;  %v3066_v39 = vpack.c.bf16 %v2499_v62, %v2499_v62 }
 0x20b   : > { %v3516_v49 = vpop.f32.mrf.mxu1  ;;  %v2501_v63 = vpop.f32.mrf.mxu0 }
 0x20c   : > { %v2507_v52 = vadd.f32 %v3588_v61, %v2346_v11  ;;  %2670 = vst.msk [vmem:[%s4714_s9 + $0x70] sm:$0xf] %vm2641_vm0, %v3066_v39  ;;  %v3517_v40 = vadd.f32 %v3516_v49, %v3515_v27  ;;  %v2502_v8 = vadd.f32 %v2501_v63, %v2341_v3 }
 0x20e   : > { %v3068_v24 = vpack.c.bf16 %v2507_v52, %v2507_v52  ;;  %v2349_v51 = vadd.f32 %v3517_v40, %v4708_v28  ;;  %v3067_v14 = vpack.c.bf16 %v2502_v8, %v2502_v8 }
 0x210   : > { %2672 = vst.msk [vmem:[%s4714_s9 + $0x78] sm:$0xf] %vm2641_vm0, %v3068_v24  ;;  %v2510_v41 = vadd.f32 %v3589_v21, %v2349_v51  ;;  %2671 = vst.msk [vmem:[%s4714_s9 + $0x74] sm:$0xf] %vm2641_vm0, %v3067_v14 }
 0x212   : > { %v3069_v32 = vpack.c.bf16 %v2510_v41, %v2510_v41 }
 0x214   : > { %2673 = vst.msk [vmem:[%s4714_s9 + $0x7c] sm:$0xf] %vm2641_vm0, %v3069_v32 }
 0x215 PF: > { %s13_s14 = sadd.s32 1, %s3933_s14   ;;  %s4895_s12 = smov %s3929_s13 }
 0x216   : > { %p10_p5 = scmp.ge.s32.totalorder %s13_s14, 4   ;;  %s4896_s13 = smov %s4898_s15 }
 0x218   :  { %12 = sbr.rel (!%p10_p5) target bundleno = 2 (0x2), region = 68 }

// kernel: _lambda_.48
= control target key start
LH: loop header
LB: loop body
LE: loop exit
PB: predicated region body
PF: predicated region fallthrough
CT: control target
= control target key end

     0   :  { %s862_s12 = smov 0   ;;  %s864_s13 = smov 0   ;;  %s1020_s0 = inlined_call_operand.vmem [shape: f32[2,256], index: 0, kind: input, shape index: {}]   ;;  %s1021_s1 = inlined_call_operand.vmem [shape: bf16[256,256], index: 1, kind: input, shape index: {}]   ;;  %s1022_s2 = inlined_call_operand.vmem [shape: f32[1,256], index: 2, kind: input, shape index: {}]   ;;  %s1023_s3 = inlined_call_operand.vmem [shape: f32[2,256], index: 3, kind: output, shape index: {}]  }
   0x1   :  { %s866_s14 = smov 0   ;;  %s868_s15 = smov 0  }
   0x2   :  { %s870_s16 = smov 0  }
   0x3 LB: > { %s22_s17 = sadd.s32 1, %s836_s15  ;;  %p65_p1 = scmp.ne.s32.totalorder %s828_s13, %s824_s12  ;;  %s840_s16 = sphi %s870_s16, %s13_s16   ;;  %s836_s15 = sphi %s868_s15, %s1027_s15   ;;  %s832_s14 = sphi %s866_s14, %s1026_s14   ;;  %s828_s13 = sphi %s864_s13, %s1025_s13   ;;  %s824_s12 = sphi %s862_s12, %s1024_s12  }
   0x4   : > { %p23_p0 = scmp.ge.s32.totalorder %s22_s17, 2  ;;  %p66_p2 = scmp.eq.s32.totalorder %s840_s16, 0 }
   0x5   : > { %s58_s19 = sadd.s32 1, %s828_s13  ;;  %p698_p5 = scmp.ge.s32.totalorder %s840_s16, 2 }
   0x6   : > { %s1029_s17 = smov (%p23_p0, %s22_s17), 0  ;;  %p67_p3 = por %p66_p2, %p65_p1 }
   0x7   : > { %s55_s18 = ssub.s32 %s836_s15, %s1029_s17  ;;  %153 = sbr.rel (%p698_p5) target bundleno = 37 (0x25), region = 20 }
   0x8   : > { %p56_p4 = scmp.eq.s32.totalorder %s55_s18, 0 }
   0xa   : > { %s897_s20 = scalar_select %p56_p4, %s828_s13, %s58_s19  }
   0xc   : > { %156 = sbr.rel (!%p67_p3) target bundleno = 37 (0x25), region = 24  ;;  %s158_s21 = sand.u32 (%p67_p3), 1, %s828_s13  }
   0xd   : > { %s700_s22 = sshll.u32 (%p67_p3), %s836_s15, 2  ;;  %s699_s23 = sshll.u32 (%p67_p3), %s158_s21, 7 }
   0xe   : > { %s905_s26 = scalar_lea.vmem (%p67_p3), %s1021_s1, %s700_s22  ;;  %s909_s27 = scalar_lea.vmem (%p67_p3), [#allocation2], %s699_s23 }
   0xf   : > { %v179_v0 = vld [vmem:[%s905_s26] sm:$0xf] (%p67_p3)  ;;  %v181_v1 = vld [vmem:[%s905_s26 + $0x8] sm:$0xf] (%p67_p3)  ;;  %v183_v2 = vld [vmem:[%s905_s26 + $0x10] sm:$0xf] (%p67_p3) }
  0x10   : > { %180 = vst [vmem:[%s909_s27] sm:$0xf] (%p67_p3), %v179_v0  ;;  %182 = vst [vmem:[%s909_s27 + $0x4] sm:$0xf] (%p67_p3), %v181_v1  ;;  %v185_v3 = vld [vmem:[%s905_s26 + $0x18] sm:$0xf] (%p67_p3) }
  0x11   : > { %v187_v4 = vld [vmem:[%s905_s26 + $0x20] sm:$0xf]  ;;  %184 = vst [vmem:[%s909_s27 + $0x8] sm:$0xf] %v183_v2  ;;  %186 = vst [vmem:[%s909_s27 + $0xc] sm:$0xf] %v185_v3 }
  0x12   : > { %188 = vst [vmem:[%s909_s27 + $0x10] sm:$0xf] %v187_v4  ;;  %v189_v5 = vld [vmem:[%s905_s26 + $0x28] sm:$0xf]  ;;  %v191_v6 = vld [vmem:[%s905_s26 + $0x30] sm:$0xf] }
  0x13   : > { %v193_v7 = vld [vmem:[%s905_s26 + $0x38] sm:$0xf]  ;;  %190 = vst [vmem:[%s909_s27 + $0x14] sm:$0xf] %v189_v5  ;;  %192 = vst [vmem:[%s909_s27 + $0x18] sm:$0xf] %v191_v6 }
  0x14   : > { %194 = vst [vmem:[%s909_s27 + $0x1c] sm:$0xf] %v193_v7  ;;  %v195_v8 = vld [vmem:[%s905_s26 + $0x40] sm:$0xf]  ;;  %v197_v9 = vld [vmem:[%s905_s26 + $0x48] sm:$0xf] }
  0x15   : > { %v199_v10 = vld [vmem:[%s905_s26 + $0x50] sm:$0xf]  ;;  %196 = vst [vmem:[%s909_s27 + $0x20] sm:$0xf] %v195_v8  ;;  %198 = vst [vmem:[%s909_s27 + $0x24] sm:$0xf] %v197_v9 }
  0x16   : > { %200 = vst [vmem:[%s909_s27 + $0x28] sm:$0xf] %v199_v10  ;;  %v201_v11 = vld [vmem:[%s905_s26 + $0x58] sm:$0xf]  ;;  %v203_v12 = vld [vmem:[%s905_s26 + $0x60] sm:$0xf] }
  0x17   : > { %v205_v13 = vld [vmem:[%s905_s26 + $0x68] sm:$0xf]  ;;  %202 = vst [vmem:[%s909_s27 + $0x2c] sm:$0xf] %v201_v11  ;;  %204 = vst [vmem:[%s909_s27 + $0x30] sm:$0xf] %v203_v12 }
  0x18   : > { %206 = vst [vmem:[%s909_s27 + $0x34] sm:$0xf] %v205_v13  ;;  %v207_v14 = vld [vmem:[%s905_s26 + $0x70] sm:$0xf]  ;;  %v209_v15 = vld [vmem:[%s905_s26 + $0x78] sm:$0xf] }
  0x19   : > { %v211_v16 = vld [vmem:[%s905_s26 + $0x80] sm:$0xf]  ;;  %208 = vst [vmem:[%s909_s27 + $0x38] sm:$0xf] %v207_v14  ;;  %210 = vst [vmem:[%s909_s27 + $0x3c] sm:$0xf] %v209_v15 }
  0x1a   : > { %212 = vst [vmem:[%s909_s27 + $0x40] sm:$0xf] %v211_v16  ;;  %v213_v17 = vld [vmem:[%s905_s26 + $0x88] sm:$0xf]  ;;  %v215_v18 = vld [vmem:[%s905_s26 + $0x90] sm:$0xf] }
  0x1b   : > { %v217_v19 = vld [vmem:[%s905_s26 + $0x98] sm:$0xf]  ;;  %214 = vst [vmem:[%s909_s27 + $0x44] sm:$0xf] %v213_v17  ;;  %216 = vst [vmem:[%s909_s27 + $0x48] sm:$0xf] %v215_v18 }
  0x1c   : > { %218 = vst [vmem:[%s909_s27 + $0x4c] sm:$0xf] %v217_v19  ;;  %v219_v20 = vld [vmem:[%s905_s26 + $0xa0] sm:$0xf]  ;;  %v221_v21 = vld [vmem:[%s905_s26 + $0xa8] sm:$0xf] }
  0x1d   : > { %v223_v22 = vld [vmem:[%s905_s26 + $0xb0] sm:$0xf]  ;;  %220 = vst [vmem:[%s909_s27 + $0x50] sm:$0xf] %v219_v20  ;;  %222 = vst [vmem:[%s909_s27 + $0x54] sm:$0xf] %v221_v21 }
  0x1e   : > { %224 = vst [vmem:[%s909_s27 + $0x58] sm:$0xf] %v223_v22  ;;  %v225_v23 = vld [vmem:[%s905_s26 + $0xb8] sm:$0xf]  ;;  %v227_v24 = vld [vmem:[%s905_s26 + $0xc0] sm:$0xf] }
  0x1f   : > { %v229_v25 = vld [vmem:[%s905_s26 + $0xc8] sm:$0xf]  ;;  %226 = vst [vmem:[%s909_s27 + $0x5c] sm:$0xf] %v225_v23  ;;  %228 = vst [vmem:[%s909_s27 + $0x60] sm:$0xf] %v227_v24 }
  0x20   : > { %230 = vst [vmem:[%s909_s27 + $0x64] sm:$0xf] %v229_v25  ;;  %v231_v26 = vld [vmem:[%s905_s26 + $0xd0] sm:$0xf]  ;;  %v233_v27 = vld [vmem:[%s905_s26 + $0xd8] sm:$0xf] }
  0x21   : > { %v235_v28 = vld [vmem:[%s905_s26 + $0xe0] sm:$0xf]  ;;  %232 = vst [vmem:[%s909_s27 + $0x68] sm:$0xf] %v231_v26  ;;  %234 = vst [vmem:[%s909_s27 + $0x6c] sm:$0xf] %v233_v27 }
  0x22   : > { %236 = vst [vmem:[%s909_s27 + $0x70] sm:$0xf] %v235_v28  ;;  %v237_v29 = vld [vmem:[%s905_s26 + $0xe8] sm:$0xf]  ;;  %v239_v30 = vld [vmem:[%s905_s26 + $0xf0] sm:$0xf] }
  0x23   : > { %v241_v31 = vld [vmem:[%s905_s26 + $0xf8] sm:$0xf]  ;;  %238 = vst [vmem:[%s909_s27 + $0x74] sm:$0xf] %v237_v29  ;;  %240 = vst [vmem:[%s909_s27 + $0x78] sm:$0xf] %v239_v30 }
  0x24   : > { %242 = vst [vmem:[%s909_s27 + $0x7c] sm:$0xf] %v241_v31 }
  0x25 PF: > { %p701_p6 = scmp.ge.s32.totalorder %s840_s16, 1  ;;  %p335_p7 = scmp.lt.s32.totalorder %s840_s16, 3 }
  0x27   : > { %p336_p8 = pnand %p701_p6, %p335_p7 }
  0x28   : > { %s342_s28 = sand.u32 (!%p336_p8), 1, %s824_s12   ;;  %p381_p9 = scmp.lt.s32.totalorder (!%p336_p8), %s832_s14, 1 }
  0x29   : > { %339 = sbr.rel (%p336_p8) target bundleno = 282 (0x11a), region = 69  ;;  %s702_s4 = sshll.u32 (!%p336_p8), %s342_s28, 7 }
  0x2a   : > { %s979_s5 = scalar_lea.vmem (!%p336_p8), [#allocation2], %s702_s4 }
  0x2e   : > { %v704_v32 = vld.sshfl [vmem:[%s1020_s0] sm:$0x33 pattern:$0x76325410]  ;;  %v786_v34 = vld [vmem:[%s979_s5 + $0x78] sm:$0xff]   ;;  %v788_v37 = vld [vmem:[%s979_s5 + $0x70] sm:$0xff]  }
  0x2f   : > { %v402_v33 = vcombine.high %v704_v32, %v704_v32  ;;  %v787_v36 = vld [vmem:[%s979_s5 + $0x38] sm:$0xff]   ;;  %724 = vmatprep.subr.bf16.mxu0 %v786_v34  ;;  %v789_v38 = vld [vmem:[%s979_s5 + $0x30] sm:$0xff]   ;;  %v790_v39 = vld [vmem:[%s979_s5 + $0x68] sm:$0xff]   ;;  %v405_v51 = vpack.c.bf16 %v704_v32, %v704_v32  ;;  %s1031_s14 = smov (!%p381_p9, %s832_s14), 1 }
  0x30   : > { %725 = vmatpush3.bf16.msra.mxu0 %v787_v36  ;;  %v791_v40 = vld [vmem:[%s979_s5 + $0x28] sm:$0xff]   ;;  %v792_v41 = vld [vmem:[%s979_s5 + $0x60] sm:$0xff]   ;;  %v794_v43 = vld [vmem:[%s979_s5 + $0x58] sm:$0xff]   ;;  %s383_s8 = scalar_lea.vmem %s1022_s2, %s1031_s14  ;;  %s703_s9 = sshll.u32 %s1031_s14, 1 }
  0x31   : > { %v406_v35 = vpack.c.bf16 %v402_v33, %v402_v33  ;;  %726 = vmatprep.subr.bf16.mxu0 %v788_v37  ;;  %v793_v42 = vld [vmem:[%s979_s5 + $0x20] sm:$0xff]   ;;  %v795_v44 = vld [vmem:[%s979_s5 + $0x18] sm:$0xff]   ;;  %v796_v45 = vld [vmem:[%s979_s5 + $0x50] sm:$0xff]   ;;  %s391_s12 = scalar_lea.vmem %s1023_s3, %s703_s9 }
  0x32   : > { %v797_v46 = vld [vmem:[%s979_s5 + $0x10] sm:$0xff]   ;;  %v798_v47 = vld [vmem:[%s979_s5 + $0x48] sm:$0xff]   ;;  %v800_v49 = vld [vmem:[%s979_s5 + $0x40] sm:$0xff]  }
  0x33   : > { %574 = vmatprep.mubr.bf16.mxu0 %v406_v35  ;;  %v799_v48 = vld [vmem:[%s979_s5 + $0x8] sm:$0xff]   ;;  %v801_v50 = vld [vmem:[%s979_s5] sm:$0xff]  }
  0x34   : > { %727 = vmatpush3.bf16.msra.mxu0 %v789_v38  ;;  %v705_v53 = vld [vmem:[%s383_s8] ss:$0 sm:$0xff] }
  0x35   : > { %728 = vmatprep.subr.bf16.mxu0 %v790_v39 }
  0x38   : > { %729 = vmatpush3.bf16.msra.mxu0 %v791_v40 }
  0x39   : > { %730 = vmatprep.subr.bf16.mxu0 %v792_v41 }
  0x3c   : > { %731 = vmatpush3.bf16.msra.mxu0 %v793_v42 }
  0x3d   : > { %732 = vmatprep.subr.bf16.mxu0 %v794_v43 }
  0x40   : > { %733 = vmatpush3.bf16.msra.mxu0 %v795_v44 }
  0x41   : > { %734 = vmatprep.subr.bf16.mxu0 %v796_v45 }
  0x44   : > { %735 = vmatpush3.bf16.msra.mxu0 %v797_v46 }
  0x45   : > { %736 = vmatprep.subr.bf16.mxu0 %v798_v47 }
  0x48   : > { %737 = vmatpush3.bf16.msra.mxu0 %v799_v48 }
  0x49   : > { %738 = vmatprep.subr.bf16.mxu0 %v800_v49 }
  0x4c   : > { %739 = vmatpush3.bf16.msra.mxu0 %v801_v50 }
  0x4f   : > { %575 = vmatmul.mubr.bf16.vlgmr.msra.gmra.mxu0 %v405_v51 }
 0x10f   : > { %v740_v52 = vpop.f32.mrf.mxu0 }
 0x111   : > { %v741_v54 = vpop.f32.mrf.mxu0 }
 0x112   : > { %v742_v55 = vadd.f32 %v741_v54, %v740_v52 }
 0x113   : > { %v743_v56 = vpop.f32.mrf.mxu0 }
 0x114   : > { %v577_v57 = vadd.f32 %v742_v55, %v705_v53 }
 0x115   : > { %v744_v58 = vpop.f32.mrf.mxu0 }
 0x116   : > { %vm582_vm0 = vcmp.ge.f32.partialorder %v577_v57, 0.0  ;;  %v583_v59 = vmul.f32 0.01, %v577_v57 }
 0x118   : > { %v584_v60 = vsel %vm582_vm0, %v577_v57, %v583_v59 }
 0x119   : > { %585 = vst [vmem:[%s391_s12] sm:$0x3] %v584_v60 }
 0x11a PF: > { %s13_s16 = sadd.s32 1, %s840_s16   ;;  %s1024_s12 = smov %s828_s13 }
 0x11b   : > { %p10_p10 = scmp.ge.s32.totalorder %s13_s16, 4   ;;  %s1025_s13 = smov %s897_s20 }
 0x11c   : > { %s1026_s14 = smov %s836_s15  ;;  %s1027_s15 = smov %s1029_s17 }
 0x11d   :  { %12 = sbr.rel (!%p10_p10) target bundleno = 3 (0x3), region = 114 }

// kernel: _lambda_.49
= control target key start
LH: loop header
LB: loop body
LE: loop exit
PB: predicated region body
PF: predicated region fallthrough
CT: control target
= control target key end

     0   :  { %8 = vsyncpa [#allocation4], 0  ;;  %s1123_s0 = inlined_call_operand.vmem [shape: f32[2,256], index: 0, kind: input, shape index: {}]   ;;  %s1124_s1 = inlined_call_operand.vmem [shape: bf16[256,256], index: 1, kind: input, shape index: {}]   ;;  %s1125_s2 = inlined_call_operand.vmem [shape: f32[1,256], index: 2, kind: input, shape index: {}]   ;;  %s1126_s3 = inlined_call_operand.hbm [shape: f32[2,256], index: 3, kind: output, shape index: {}]  }
   0x1   :  { %10 = vsyncpa [#allocation4 + $0x1], 0  ;;  %s914_s12 = smov 0   ;;  %s916_s13 = smov 0  }
   0x2   :  { %s918_s14 = smov 0   ;;  %s920_s15 = smov 0  }
   0x3   :  { %s922_s16 = smov 0   ;;  %s924_s17 = smov 0  }
   0x4 LB: > { %s690_s18 = sadd.s32 4294967295, %s891_s17   ;;  %s691_s19 = sadd.s32 4294967294, %s891_s17   ;;  %s891_s17 = sphi %s924_s17, %s16_s17   ;;  %s887_s16 = sphi %s922_s16, %s1133_s16   ;;  %s883_s15 = sphi %s920_s15, %s1132_s15   ;;  %s879_s14 = sphi %s918_s14, %s1131_s14   ;;  %s875_s13 = sphi %s916_s13, %s1130_s13   ;;  %s871_s12 = sphi %s914_s12, %s1129_s12  }
   0x5   : > { %s25_s20 = sadd.s32 1, %s887_s16  ;;  %s61_s21 = sadd.s32 1, %s879_s14 }
   0x6   : > { %p26_p0 = scmp.ge.s32.totalorder %s25_s20, 2  ;;  %p68_p1 = scmp.ne.s32.totalorder %s879_s14, %s875_s13 }
   0x7   : > { %p69_p2 = scmp.eq.s32.totalorder %s891_s17, 0  ;;  %p126_p3 = scmp.eq.s32.totalorder %s690_s18, 1 }
   0x8   : > { %s1135_s20 = smov (%p26_p0, %s25_s20), 0  ;;  %p131_p6 = scmp.ne.s32.totalorder %s875_s13, %s871_s12 }
   0x9   : > { %p70_p4 = por %p69_p2, %p68_p1  ;;  %p953_p5 = por %p126_p3, %p68_p1 }
   0xa   : > { %s58_s23 = ssub.s32 %s887_s16, %s1135_s20  ;;  %p132_p8 = scmp.eq.s32.totalorder %s691_s19, 1 }
   0xb   : > { %p59_p7 = scmp.eq.s32.totalorder %s58_s23, 0  ;;  %p694_p10 = scmp.ge.s32.totalorder %s891_s17, 2 }
   0xc   : > { %p964_p9 = por %p132_p8, %p131_p6 }
   0xd   : > { %s962_s24 = scalar_select %p59_p7, %s879_s14, %s61_s21  }
   0xe   : > { %156 = sbr.rel (%p694_p10) target bundleno = 44 (0x2c), region = 20 }
  0x13   : > { %159 = sbr.rel (!%p70_p4) target bundleno = 44 (0x2c), region = 24  ;;  %s161_s26 = sand.u32 (%p70_p4), 1, %s879_s14  }
  0x14   : > { %s696_s27 = sshll.u32 (%p70_p4), %s887_s16, 2  ;;  %s695_s28 = sshll.u32 (%p70_p4), %s161_s26, 7 }
  0x15   : > { %s976_s4 = scalar_lea.vmem (%p70_p4), %s1124_s1, %s696_s27  ;;  %s980_s5 = scalar_lea.vmem (%p70_p4), [#allocation2], %s695_s28 }
  0x16   : > { %v182_v0 = vld [vmem:[%s976_s4] sm:$0xf] (%p70_p4)  ;;  %v184_v1 = vld [vmem:[%s976_s4 + $0x8] sm:$0xf] (%p70_p4)  ;;  %v186_v2 = vld [vmem:[%s976_s4 + $0x10] sm:$0xf] (%p70_p4) }
  0x17   : > { %183 = vst [vmem:[%s980_s5] sm:$0xf] (%p70_p4), %v182_v0  ;;  %185 = vst [vmem:[%s980_s5 + $0x4] sm:$0xf] (%p70_p4), %v184_v1  ;;  %v188_v3 = vld [vmem:[%s976_s4 + $0x18] sm:$0xf] (%p70_p4) }
  0x18   : > { %v190_v4 = vld [vmem:[%s976_s4 + $0x20] sm:$0xf]  ;;  %187 = vst [vmem:[%s980_s5 + $0x8] sm:$0xf] %v186_v2  ;;  %189 = vst [vmem:[%s980_s5 + $0xc] sm:$0xf] %v188_v3 }
  0x19   : > { %191 = vst [vmem:[%s980_s5 + $0x10] sm:$0xf] %v190_v4  ;;  %v192_v5 = vld [vmem:[%s976_s4 + $0x28] sm:$0xf]  ;;  %v194_v6 = vld [vmem:[%s976_s4 + $0x30] sm:$0xf] }
  0x1a   : > { %v196_v7 = vld [vmem:[%s976_s4 + $0x38] sm:$0xf]  ;;  %193 = vst [vmem:[%s980_s5 + $0x14] sm:$0xf] %v192_v5  ;;  %195 = vst [vmem:[%s980_s5 + $0x18] sm:$0xf] %v194_v6 }
  0x1b   : > { %197 = vst [vmem:[%s980_s5 + $0x1c] sm:$0xf] %v196_v7  ;;  %v198_v8 = vld [vmem:[%s976_s4 + $0x40] sm:$0xf]  ;;  %v200_v9 = vld [vmem:[%s976_s4 + $0x48] sm:$0xf] }
  0x1c   : > { %v202_v10 = vld [vmem:[%s976_s4 + $0x50] sm:$0xf]  ;;  %199 = vst [vmem:[%s980_s5 + $0x20] sm:$0xf] %v198_v8  ;;  %201 = vst [vmem:[%s980_s5 + $0x24] sm:$0xf] %v200_v9 }
  0x1d   : > { %203 = vst [vmem:[%s980_s5 + $0x28] sm:$0xf] %v202_v10  ;;  %v204_v11 = vld [vmem:[%s976_s4 + $0x58] sm:$0xf]  ;;  %v206_v12 = vld [vmem:[%s976_s4 + $0x60] sm:$0xf] }
  0x1e   : > { %v208_v13 = vld [vmem:[%s976_s4 + $0x68] sm:$0xf]  ;;  %205 = vst [vmem:[%s980_s5 + $0x2c] sm:$0xf] %v204_v11  ;;  %207 = vst [vmem:[%s980_s5 + $0x30] sm:$0xf] %v206_v12 }
  0x1f   : > { %209 = vst [vmem:[%s980_s5 + $0x34] sm:$0xf] %v208_v13  ;;  %v210_v14 = vld [vmem:[%s976_s4 + $0x70] sm:$0xf]  ;;  %v212_v15 = vld [vmem:[%s976_s4 + $0x78] sm:$0xf] }
  0x20   : > { %v214_v16 = vld [vmem:[%s976_s4 + $0x80] sm:$0xf]  ;;  %211 = vst [vmem:[%s980_s5 + $0x38] sm:$0xf] %v210_v14  ;;  %213 = vst [vmem:[%s980_s5 + $0x3c] sm:$0xf] %v212_v15 }
  0x21   : > { %215 = vst [vmem:[%s980_s5 + $0x40] sm:$0xf] %v214_v16  ;;  %v216_v17 = vld [vmem:[%s976_s4 + $0x88] sm:$0xf]  ;;  %v218_v18 = vld [vmem:[%s976_s4 + $0x90] sm:$0xf] }
  0x22   : > { %v220_v19 = vld [vmem:[%s976_s4 + $0x98] sm:$0xf]  ;;  %217 = vst [vmem:[%s980_s5 + $0x44] sm:$0xf] %v216_v17  ;;  %219 = vst [vmem:[%s980_s5 + $0x48] sm:$0xf] %v218_v18 }
  0x23   : > { %221 = vst [vmem:[%s980_s5 + $0x4c] sm:$0xf] %v220_v19  ;;  %v222_v20 = vld [vmem:[%s976_s4 + $0xa0] sm:$0xf]  ;;  %v224_v21 = vld [vmem:[%s976_s4 + $0xa8] sm:$0xf] }
  0x24   : > { %v226_v22 = vld [vmem:[%s976_s4 + $0xb0] sm:$0xf]  ;;  %223 = vst [vmem:[%s980_s5 + $0x50] sm:$0xf] %v222_v20  ;;  %225 = vst [vmem:[%s980_s5 + $0x54] sm:$0xf] %v224_v21 }
  0x25   : > { %227 = vst [vmem:[%s980_s5 + $0x58] sm:$0xf] %v226_v22  ;;  %v228_v23 = vld [vmem:[%s976_s4 + $0xb8] sm:$0xf]  ;;  %v230_v24 = vld [vmem:[%s976_s4 + $0xc0] sm:$0xf] }
  0x26   : > { %v232_v25 = vld [vmem:[%s976_s4 + $0xc8] sm:$0xf]  ;;  %229 = vst [vmem:[%s980_s5 + $0x5c] sm:$0xf] %v228_v23  ;;  %231 = vst [vmem:[%s980_s5 + $0x60] sm:$0xf] %v230_v24 }
  0x27   : > { %233 = vst [vmem:[%s980_s5 + $0x64] sm:$0xf] %v232_v25  ;;  %v234_v26 = vld [vmem:[%s976_s4 + $0xd0] sm:$0xf]  ;;  %v236_v27 = vld [vmem:[%s976_s4 + $0xd8] sm:$0xf] }
  0x28   : > { %v238_v28 = vld [vmem:[%s976_s4 + $0xe0] sm:$0xf]  ;;  %235 = vst [vmem:[%s980_s5 + $0x68] sm:$0xf] %v234_v26  ;;  %237 = vst [vmem:[%s980_s5 + $0x6c] sm:$0xf] %v236_v27 }
  0x29   : > { %239 = vst [vmem:[%s980_s5 + $0x70] sm:$0xf] %v238_v28  ;;  %v240_v29 = vld [vmem:[%s976_s4 + $0xe8] sm:$0xf]  ;;  %v242_v30 = vld [vmem:[%s976_s4 + $0xf0] sm:$0xf] }
  0x2a   : > { %v244_v31 = vld [vmem:[%s976_s4 + $0xf8] sm:$0xf]  ;;  %241 = vst [vmem:[%s980_s5 + $0x74] sm:$0xf] %v240_v29  ;;  %243 = vst [vmem:[%s980_s5 + $0x78] sm:$0xf] %v242_v30 }
  0x2b   : > { %245 = vst [vmem:[%s980_s5 + $0x7c] sm:$0xf] %v244_v31 }
  0x2c PF: > { %p697_p11 = scmp.ge.s32.totalorder %s891_s17, 1  ;;  %p338_p12 = scmp.lt.s32.totalorder %s891_s17, 3 }
  0x2e   : > { %p339_p13 = pnand %p697_p11, %p338_p12 }
  0x2f   : > { %s1047_s6 = sand.u32 (!%p339_p13), 1, %s875_s13   ;;  %p381_p0 = scmp.lt.s32.totalorder (!%p339_p13), %s883_s15, 1 }
  0x30   : > { %342 = sbr.rel (%p339_p13) target bundleno = 298 (0x12a), region = 69  ;;  %s698_s9 = sshll.u32 (!%p339_p13), %s1047_s6, 7 }
  0x31   : > { %s1053_s10 = scalar_lea.vmem (!%p339_p13), [#allocation2], %s698_s9  ;;  %s699_s18 = sshll.u32 (!%p339_p13), %s1047_s6, 1 }
  0x32   : > { %s719_s26 = sshll.u32 (!%p339_p13), %s883_s15, 5  ;;  %s375_s27 = scalar_lea.vmem (!%p339_p13), [#allocation3], %s699_s18 }
  0x33   : > { %s591_s28 = sshll.u32 (!%p339_p13), %s375_s27, 4  ;;  %s1081_s4 = scalar_lea.hbm (!%p339_p13), %s1126_s3, %s719_s26  ;;  %s592_s28 = int_to_ptr.vmem [resolvable:$true] %s591_s28 }
  0x34   : > { %s576_s5 = scalar_lea.sflag (!%p339_p13), [#allocation4], %s1047_s6  ;;  %s815_s7 = scalar_lea.vmem (!%p339_p13), %s592_s28, 32 }
  0x35   : > { %v700_v32 = vld.sshfl [vmem:[%s1123_s0] sm:$0x33 pattern:$0x76325410]  ;;  %v799_v34 = vld [vmem:[%s1053_s10 + $0x78] sm:$0xff]   ;;  %v801_v37 = vld [vmem:[%s1053_s10 + $0x70] sm:$0xff]   ;;  %p816_p1 = scmp.ne.s32.totalorder %s592_s28, %s815_s7 }
  0x36   : > { %v394_v33 = vcombine.high %v700_v32, %v700_v32  ;;  %v800_v36 = vld [vmem:[%s1053_s10 + $0x38] sm:$0xff]   ;;  %722 = vmatprep.subr.bf16.mxu0 %v799_v34  ;;  %v802_v38 = vld [vmem:[%s1053_s10 + $0x30] sm:$0xff]   ;;  %v803_v39 = vld [vmem:[%s1053_s10 + $0x68] sm:$0xff]   ;;  %v397_v51 = vpack.c.bf16 %v700_v32, %v700_v32  ;;  %s382_s11 = scalar_select %p381_p0, %s883_s15, 1 }
  0x37   : > { %723 = vmatpush3.bf16.msra.mxu0 %v800_v36  ;;  %v804_v40 = vld [vmem:[%s1053_s10 + $0x28] sm:$0xff]   ;;  %v805_v41 = vld [vmem:[%s1053_s10 + $0x60] sm:$0xff]   ;;  %v807_v43 = vld [vmem:[%s1053_s10 + $0x58] sm:$0xff]   ;;  %p817_p2 = pnand %p816_p1, %p953_p5  ;;  %s893_s15 = smov [#allocation3]  }
  0x38   : > { %v398_v35 = vpack.c.bf16 %v394_v33, %v394_v33  ;;  %724 = vmatprep.subr.bf16.mxu0 %v801_v37  ;;  %v806_v42 = vld [vmem:[%s1053_s10 + $0x20] sm:$0xff]   ;;  %v808_v44 = vld [vmem:[%s1053_s10 + $0x18] sm:$0xff]   ;;  %v809_v45 = vld [vmem:[%s1053_s10 + $0x50] sm:$0xff]   ;;  %s383_s23 = scalar_lea.vmem %s1125_s2, %s382_s11  ;;  %s819_s8 = sshll.u32 %s893_s15, 4  ;;  %s820_s8 = int_to_ptr.vmem [resolvable:$false] %s819_s8 }
  0x39   : > { %v810_v46 = vld [vmem:[%s1053_s10 + $0x10] sm:$0xff]   ;;  %v811_v47 = vld [vmem:[%s1053_s10 + $0x48] sm:$0xff]   ;;  %v813_v49 = vld [vmem:[%s1053_s10 + $0x40] sm:$0xff]   ;;  %p818_p3 = pneg %p817_p2  ;;  %s821_s9 = scalar_lea.vmem %s820_s8, 64 }
  0x3a   : > { %566 = vmatprep.mubr.bf16.mxu0 %v398_v35  ;;  %v812_v48 = vld [vmem:[%s1053_s10 + $0x8] sm:$0xff]   ;;  %v814_v50 = vld [vmem:[%s1053_s10] sm:$0xff]   ;;  %p822_p4 = scmp.lt.s32.totalorder %s592_s28, %s820_s8  ;;  %p823_p6 = scmp.lt.s32.totalorder %s821_s9, %s815_s7 }
  0x3b   : > { %725 = vmatpush3.bf16.msra.mxu0 %v802_v38  ;;  %v701_v53 = vld [vmem:[%s383_s23] ss:$0 sm:$0xff] }
  0x3c   : > { %726 = vmatprep.subr.bf16.mxu0 %v803_v39  ;;  %p824_p7 = por %p823_p6, %p822_p4 }
  0x3e   : > { %p825_p8 = pnand %p824_p7, %p818_p3 }
  0x3f   : > { %727 = vmatpush3.bf16.msra.mxu0 %v804_v40 }
  0x40   : > { %728 = vmatprep.subr.bf16.mxu0 %v805_v41 }
  0x43   : > { %729 = vmatpush3.bf16.msra.mxu0 %v806_v42 }
  0x44   : > { %730 = vmatprep.subr.bf16.mxu0 %v807_v43 }
  0x47   : > { %731 = vmatpush3.bf16.msra.mxu0 %v808_v44 }
  0x48   : > { %732 = vmatprep.subr.bf16.mxu0 %v809_v45 }
  0x4b   : > { %733 = vmatpush3.bf16.msra.mxu0 %v810_v46 }
  0x4c   : > { %734 = vmatprep.subr.bf16.mxu0 %v811_v47 }
  0x4f   : > { %735 = vmatpush3.bf16.msra.mxu0 %v812_v48 }
  0x50   : > { %736 = vmatprep.subr.bf16.mxu0 %v813_v49 }
  0x53   : > { %737 = vmatpush3.bf16.msra.mxu0 %v814_v50 }
  0x56   : > { %567 = vmatmul.mubr.bf16.vlgmr.msra.gmra.mxu0 %v397_v51 }
 0x116   : > { %v738_v52 = vpop.f32.mrf.mxu0 }
 0x118   : > { %v739_v54 = vpop.f32.mrf.mxu0 }
 0x119   : > { %v740_v55 = vadd.f32 %v739_v54, %v738_v52 }
 0x11a   : > { %v741_v56 = vpop.f32.mrf.mxu0 }
 0x11b   : > { %v569_v57 = vadd.f32 %v740_v55, %v701_v53 }
 0x11c   : > { %v742_v58 = vpop.f32.mrf.mxu0 }
 0x11d   : > { %574 = vst [vmem:[%s375_s27] sm:$0x3] %v569_v57 }
 0x11e   : > { %828 = shalt.err (!%p825_p8)
}
 0x11f   : > { %s829_s10 = scalar_lea.hbm %s1081_s4, 32  ;;  %s833_s18 = scalar_lea.hbm %s1126_s3, 64 }
 0x120   : > { %p830_p11 = scmp.ne.s32.totalorder %s1081_s4, %s829_s10  ;;  %p834_p0 = scmp.lt.s32.totalorder %s1081_s4, %s1126_s3 }
 0x121   : > { %p835_p1 = scmp.lt.s32.totalorder %s833_s18, %s829_s10 }
 0x122   : > { %p831_p12 = pnand %p830_p11, %p953_p5 }
 0x123   : > { %p836_p2 = por %p835_p1, %p834_p0 }
 0x124   : > { %p832_p13 = pneg %p831_p12 }
 0x126   : > { %p837_p3 = pnand %p836_p2, %p832_p13 }
 0x128   : > { %840 = shalt.err (!%p837_p3)
}
 0x129   : > { %744 = dma.vmem_to_hbm [thread:$0]  (%p953_p5), %s592_s28, 32, %s1081_s4, %s576_s5  }
 0x12a PF: > { %s603_s23 = sand.u32 1, %s871_s12   ;;  %p747_p4 = pnand %p694_p10, %p964_p9 }
 0x12b   : > { %s604_s26 = scalar_lea.sflag [#allocation4], %s603_s23 }
 0x12c   : > { %p748_p6 = pneg %p747_p4 }
 0x12e   : > { %866 = dma.done.wait (%p748_p6), %s604_s26, 32  }
 0x12f   : > { %868 = vsyncadd (%p748_p6), %s604_s26, 4294967264  ;;  %s16_s17 = sadd.s32 1, %s891_s17   ;;  %s1129_s12 = smov %s875_s13 }
 0x130   : > { %p13_p7 = scmp.ge.s32.totalorder %s16_s17, 4   ;;  %s1130_s13 = smov %s879_s14 }
 0x131   : > { %s1131_s14 = smov %s962_s24  ;;  %s1132_s15 = smov %s887_s16 }
 0x132   : > { %s1133_s16 = smov %s1135_s20  ;;  %15 = sbr.rel (!%p13_p7) target bundleno = 4 (0x4), region = 119 }
 0x137   :  { %609 = vsyncpa [#allocation4], 1 }
 0x138   :  { %611 = vsyncpa [#allocation4 + $0x1], 1 }

// kernel: _lambda_.47
= control target key start
LH: loop header
LB: loop body
LE: loop exit
PB: predicated region body
PF: predicated region fallthrough
CT: control target
= control target key end

     0   :  { %s3579_s14 = smov 0   ;;  %s6482_s0 = inlined_call_operand.vmem [shape: bf16[512,3136], index: 0, kind: input, shape index: {}]   ;;  %s6483_s1 = inlined_call_operand.vmem [shape: bf16[1,3136], index: 1, kind: input, shape index: {}]   ;;  %s6484_s2 = inlined_call_operand.<no memory space> [shape: f32[1,1], index: 2, kind: input, shape index: {}]   ;;  %s6485_s3 = inlined_call_operand.vmem [shape: f32[512,1], index: 3, kind: output, shape index: {}]  }
   0x1   :  { %v8_v0 = vstv %s6484_s2 }
   0x2   :  { %9 = vst [vmem:[#allocation2] sm:$0x1] %v8_v0 }
   0x3 LB: > { %s3463_s15 = sadd.s32 4294967295, %s3554_s14   ;;  %p3467_p0 = scmp.ge.s32.totalorder %s3554_s14, 1  ;;  %s3554_s14 = sphi %s3579_s14, %s15_s14  }
   0x4   : > { %p141_p1 = scmp.lt.s32.totalorder %s3554_s14, 3 }
   0x6   : > { %p142_p2 = pnand %p3467_p0, %p141_p1 }
   0x8   : > { %145 = sbr.rel (%p142_p2) target bundleno = 814 (0x32e), region = 32 }
   0xd   : > { %s3468_s16 = sshll.u32 %s3463_s15, 5  ;;  %v1413_v1 = vlaneseq  ;;  %v1395_v3 = vld [vmem:[%s6483_s1] sm:$0xff]  ;;  %v1396_v4 = vld [vmem:[%s6483_s1 + $0x8] sm:$0xff]  ;;  %v1397_v5 = vld [vmem:[%s6483_s1 + $0x10] sm:$0xff]  ;;  %vm2461_vm0 = vcmask 523264   ;;  %vm3374_vm1 = vcmask 7168  }
   0xe   : > { %p167_p3 = scmp.lt.s32.totalorder %s3468_s16, 63  ;;  %v3599_v6 = vunpack.c.l.bf16 %v1395_v3  ;;  %v3615_v10 = vld [vmem:[%s6483_s1 + $0x18] sm:$0x1]  ;;  %v3617_v11 = vunpack.c.h.bf16 %v1395_v3  ;;  %v3621_v13 = vunpack.c.l.bf16 %v1396_v4  ;;  %v3623_v14 = vunpack.c.h.bf16 %v1396_v4 }
   0xf   : > { %v1414_v2 = vshrl.u32 %v1413_v1, 7  ;;  %v3625_v15 = vunpack.c.l.bf16 %v1397_v5  ;;  %v3627_v16 = vunpack.c.h.bf16 %v1397_v5  ;;  %v1405_v19 = vunpack.c.l.bf16 %v3615_v10 }
  0x10   : > { %s7102_s16 = smov (!%p167_p3, %s3468_s16), 63 }
  0x11   : > { %s3475_s2 = smul.u32 100, %s7102_s16  ;;  %v3601_v7 = vsub.s32 0, %v1414_v2  ;;  %v3603_v8 = vsub.s32 2, %v1414_v2  ;;  %v3605_v9 = vsub.s32 4, %v1414_v2  ;;  %v3619_v12 = vsub.s32 6, %v1414_v2  ;;  %s3471_s28 = sshll.u32 %s7102_s16, 3 }
  0x12   : > { %s6359_s4 = scalar_lea.vmem %s6485_s3, %s3471_s28 }
  0x13   : > { %s3610_s25 = scalar_lea.vmem %s6482_s0, %s3475_s2  ;;  %v1416_v20 = vrot.slane %v3599_v6, %v3601_v7  ;;  %v1420_v21 = vrot.slane %v3599_v6, %v3603_v8  ;;  %v1424_v22 = vrot.slane %v3599_v6, %v3605_v9  ;;  %v1428_v25 = vrot.slane %v3599_v6, %v3619_v12 }
  0x14   : > { %v3630_v17 = vld [vmem:[%s3610_s25 + $0xc8] sm:$0xff]  ;;  %v3633_v18 = vld [vmem:[%s3610_s25 + $0xd0] sm:$0xff]  ;;  %v3643_v23 = vld [vmem:[%s3610_s25 + $0xd8] sm:$0xff]  ;;  %v1432_v26 = vrot.slane %v3617_v11, %v3601_v7  ;;  %v1436_v27 = vrot.slane %v3617_v11, %v3603_v8  ;;  %v1440_v28 = vrot.slane %v3617_v11, %v3605_v9  ;;  %v1444_v31 = vrot.slane %v3617_v11, %v3619_v12 }
  0x15   : > { %v3646_v24 = vld [vmem:[%s3610_s25 + $0xe0] sm:$0xff]  ;;  %v3657_v29 = vld [vmem:[%s3610_s25 + $0xe8] sm:$0xff]  ;;  %v3660_v30 = vld [vmem:[%s3610_s25 + $0xf0] sm:$0xff]  ;;  %v1448_v32 = vrot.slane %v3621_v13, %v3601_v7  ;;  %v1452_v33 = vrot.slane %v3621_v13, %v3603_v8  ;;  %v1456_v34 = vrot.slane %v3621_v13, %v3605_v9  ;;  %v645_v37 = vunpack.c.l.bf16 %v3630_v17 }
  0x16   : > { %v3671_v35 = vld [vmem:[%s3610_s25 + $0xf8] sm:$0xff]  ;;  %v3674_v36 = vld [vmem:[%s3610_s25 + $0x100] sm:$0xff]  ;;  %v646_v38 = vunpack.c.h.bf16 %v3630_v17  ;;  %v647_v39 = vunpack.c.l.bf16 %v3633_v18  ;;  %v1460_v40 = vrot.slane %v3621_v13, %v3619_v12  ;;  %v3682_v41 = vld [vmem:[%s3610_s25 + $0x108] sm:$0xff]  ;;  %v648_v43 = vunpack.c.h.bf16 %v3633_v18 }
  0x17   : > { %v3685_v42 = vld [vmem:[%s3610_s25 + $0x110] sm:$0xff]  ;;  %v649_v44 = vunpack.c.l.bf16 %v3643_v23  ;;  %v650_v45 = vunpack.c.h.bf16 %v3643_v23  ;;  %v651_v46 = vunpack.c.l.bf16 %v3646_v24  ;;  %v3692_v47 = vld [vmem:[%s3610_s25 + $0x118] sm:$0xff]  ;;  %v652_v48 = vunpack.c.h.bf16 %v3646_v24  ;;  %v3699_v52 = vld [vmem:[%s3610_s25 + $0x120] sm:$0xff] }
  0x18   : > { %v653_v49 = vunpack.c.l.bf16 %v3657_v29  ;;  %v654_v50 = vunpack.c.h.bf16 %v3657_v29  ;;  %v655_v51 = vunpack.c.l.bf16 %v3660_v30  ;;  %v3702_v53 = vld [vmem:[%s3610_s25 + $0x60] ss:$200 sps:$4 sm:$0xff]   ;;  %v656_v54 = vunpack.c.h.bf16 %v3660_v30 }
  0x19   : > { %v657_v55 = vunpack.c.l.bf16 %v3671_v35  ;;  %v658_v56 = vunpack.c.h.bf16 %v3671_v35  ;;  %v659_v57 = vunpack.c.l.bf16 %v3674_v36  ;;  %v660_v58 = vunpack.c.h.bf16 %v3674_v36 }
  0x1a   : > { %v661_v59 = vunpack.c.l.bf16 %v3682_v41  ;;  %v662_v60 = vunpack.c.h.bf16 %v3682_v41  ;;  %v3715_v0 = vrot.slane %v1416_v20, %v3601_v7  ;;  %v3718_v1 = vrot.slane %v1420_v21, %v3601_v7 }
  0x1b   : > { %v1464_v6 = vrot.slane %v3623_v14, %v3601_v7  ;;  %v1468_v11 = vrot.slane %v3623_v14, %v3603_v8  ;;  %v1472_v13 = vrot.slane %v3623_v14, %v3605_v9  ;;  %v3731_v17 = vrot.slane %v1424_v22, %v3601_v7 }
  0x1c   : > { %6550 = vst [vmem:[#allocation3_spill] sm:$0xff] %v3718_v1  ;;  %v1476_v18 = vrot.slane %v3623_v14, %v3619_v12  ;;  %v1480_v20 = vrot.slane %v3625_v15, %v3601_v7  ;;  %v1484_v21 = vrot.slane %v3625_v15, %v3603_v8  ;;  %v1488_v4 = vrot.slane %v3625_v15, %v3605_v9 }
  0x1d   : > { %6551 = vst [vmem:[#allocation4_spill] sm:$0xff] %v3731_v17  ;;  %v1492_v3 = vrot.slane %v3625_v15, %v3619_v12  ;;  %v3744_v2 = vrot.slane %v1428_v25, %v3601_v7  ;;  %v1688_v22 = vmul.f32 %v3715_v0, %v645_v37  ;;  %v1689_v63 = vmul.f32 %v3718_v1, %v646_v38 }
  0x1e   : > { %v1496_v14 = vrot.slane %v3627_v16, %v3601_v7  ;;  %v1500_v62 = vrot.slane %v3627_v16, %v3603_v8  ;;  %v1504_v5 = vrot.slane %v3627_v16, %v3605_v9  ;;  %v1508_v61 = vrot.slane %v3627_v16, %v3619_v12 }
  0x1f   : > { %6552 = vst [vmem:[#allocation5_spill] sm:$0xff] %v3744_v2  ;;  %v1512_v15 = vrot.slane %v1405_v19, %v3601_v7  ;;  %v3760_v25 = vrot.slane %v1432_v26, %v3601_v7  ;;  %v3763_v37 = vrot.slane %v1436_v27, %v3601_v7  ;;  %v1690_v38 = vmul.f32 %v3731_v17, %v647_v39 }
  0x20   : > { %v3767_v8 = vrot.slane %v1440_v28, %v3601_v7  ;;  %v3770_v9 = vrot.slane %v1444_v31, %v3601_v7  ;;  %v3773_v12 = vrot.slane %v1448_v32, %v3601_v7  ;;  %v3776_v10 = vrot.slane %v1452_v33, %v3601_v7 }
  0x21   : > { %6553 = vst [vmem:[#allocation6_spill] sm:$0xff] %v3760_v25  ;;  %6554 = vst [vmem:[#allocation7_spill] sm:$0xff] %v3763_v37  ;;  %v3779_v16 = vrot.slane %v1456_v34, %v3601_v7  ;;  %v3782_v19 = vrot.slane %v1460_v40, %v3601_v7  ;;  %v1691_v26 = vmul.f32 %v3744_v2, %v648_v43 }
  0x22   : > { %v2493_v27 = vadd.f32 %v1689_v63, %v1688_v22  ;;  %v3786_v28 = vrot.slane %v1464_v6, %v3601_v7  ;;  %v3789_v31 = vrot.slane %v1468_v11, %v3601_v7  ;;  %v3792_v32 = vrot.slane %v1472_v13, %v3601_v7  ;;  %v180_v22 = vld [vmem:[%s3610_s25 + $0x8] sm:$0xff] }
  0x23   : > { %v3795_v33 = vrot.slane %v1476_v18, %v3601_v7  ;;  %v3798_v34 = vrot.slane %v1480_v20, %v3601_v7  ;;  %v3801_v39 = vrot.slane %v1484_v21, %v3601_v7  ;;  %v1692_v40 = vmul.f32 %v3760_v25, %v649_v44  ;;  %v179_v18 = vld [vmem:[%s3610_s25] sm:$0xff] }
  0x24   : > { %v2494_v43 = vadd.f32 %v2493_v27, %v1690_v38  ;;  %v3805_v63 = vrot.slane %v1488_v4, %v3601_v7  ;;  %v3808_v6 = vrot.slane %v1492_v3, %v3601_v7  ;;  %v3811_v11 = vrot.slane %v1496_v14, %v3601_v7 }
  0x25   : > { %v3814_v13 = vrot.slane %v1500_v62, %v3601_v7  ;;  %v3818_v20 = vrot.slane %v1504_v5, %v3601_v7  ;;  %v3821_v44 = vrot.slane %v1508_v61, %v3601_v7  ;;  %v1693_v4 = vmul.f32 %v3763_v37, %v650_v45 }
  0x26   : > { %6555 = vst [vmem:[#allocation8_spill] sm:$0xff] %v3805_v63  ;;  %6556 = vst [vmem:[#allocation9_spill] sm:$0xff] %v3808_v6  ;;  %v2495_v21 = vadd.f32 %v2494_v43, %v1691_v26  ;;  %v3827_v3 = vrot.slane %v1512_v15, %v3601_v7  ;;  %v1694_v62 = vmul.f32 %v3767_v8, %v651_v46  ;;  %v595_v45 = vunpack.c.l.bf16 %v179_v18 }
  0x27   : > { %6557 = vst [vmem:[#allocation10_spill] sm:$0xff] %v3811_v11  ;;  %6558 = vst [vmem:[#allocation11_spill] sm:$0xff] %v3814_v13  ;;  %v1695_v5 = vmul.f32 %v3770_v9, %v652_v48  ;;  %v1696_v61 = vmul.f32 %v3773_v12, %v653_v49  ;;  %v1697_v23 = vmul.f32 %v3776_v10, %v654_v50  ;;  %v596_v14 = vunpack.c.h.bf16 %v179_v18 }
  0x28   : > { %6559 = vst [vmem:[#allocation12_spill] sm:$0xff] %v3818_v20  ;;  %6560 = vst [vmem:[#allocation13_spill] sm:$0xff] %v3821_v44  ;;  %v2496_v7 = vadd.f32 %v2495_v21, %v1692_v40  ;;  %v1698_v24 = vmul.f32 %v3779_v16, %v655_v51  ;;  %v1699_v46 = vmul.f32 %v3782_v19, %v656_v54  ;;  %v597_v51 = vunpack.c.l.bf16 %v180_v22 }
  0x29   : > { %6561 = vst [vmem:[#allocation14_spill] sm:$0xff] %v3827_v3  ;;  %v3851_v48 = vmul.f32 %v3786_v28, %v657_v55  ;;  %v3856_v29 = vmul.f32 %v3789_v31, %v658_v56  ;;  %v3861_v49 = vmul.f32 %v3792_v32, %v659_v57  ;;  %v3866_v30 = vmul.f32 %v3795_v33, %v660_v58  ;;  %v181_v58 = vld [vmem:[%s3610_s25 + $0x10] sm:$0xff] }
  0x2a   : > { %v2497_v50 = vadd.f32 %v2496_v7, %v1693_v4  ;;  %v3871_v35 = vmul.f32 %v3798_v34, %v661_v59  ;;  %v3876_v54 = vmul.f32 %v3801_v39, %v662_v60  ;;  %v6564_v55 = vunpack.c.l.bf16 %v3685_v42  ;;  %v182_v59 = vld [vmem:[%s3610_s25 + $0x18] sm:$0xff] }
  0x2b   : > { %v6566_v56 = vunpack.c.h.bf16 %v3702_v53  ;;  %v598_v38 = vunpack.c.h.bf16 %v180_v22  ;;  %v1638_v41 = vmul.f32 %v3715_v0, %v595_v45  ;;  %v1639_v60 = vmul.f32 %v3718_v1, %v596_v14  ;;  %v184_v14 = vld [vmem:[%s3610_s25 + $0x28] sm:$0xff] }
  0x2c   : > { %6562 = vst [vmem:[#allocation15_spill] sm:$0xff] %v3871_v35  ;;  %6563 = vst [vmem:[#allocation16_spill] sm:$0xff] %v3876_v54  ;;  %v3881_v36 = vmul.f32 %v3805_v63, %v6564_v55  ;;  %v2498_v15 = vadd.f32 %v2497_v50, %v1694_v62  ;;  %v6567_v26 = vunpack.c.h.bf16 %v3685_v42  ;;  %v6569_v40 = vunpack.c.l.bf16 %v3692_v47  ;;  %v183_v42 = vld [vmem:[%s3610_s25 + $0x20] sm:$0xff]  ;;  %v185_v50 = vld [vmem:[%s3610_s25 + $0x30] sm:$0xff] }
  0x2d   : > { %v1712_v57 = vmul.f32 %v3827_v3, %v6566_v56  ;;  %v6571_v18 = vunpack.c.h.bf16 %v3692_v47  ;;  %v6573_v21 = vunpack.c.l.bf16 %v3699_v52  ;;  %v6575_v22 = vunpack.c.h.bf16 %v3699_v52  ;;  %v186_v52 = vld [vmem:[%s3610_s25 + $0x38] sm:$0xff] }
  0x2e   : > { %6565 = vst [vmem:[#allocation17_spill] sm:$0xff] %v3881_v36  ;;  %v3893_v27 = vmul.f32 %v3808_v6, %v6567_v26  ;;  %v3898_v43 = vmul.f32 %v3811_v11, %v6569_v40  ;;  %v2499_v45 = vadd.f32 %v2498_v15, %v1695_v5  ;;  %v599_v47 = vunpack.c.l.bf16 %v181_v58  ;;  %v188_v15 = vld [vmem:[%s3610_s25 + $0x48] sm:$0xff] }
  0x2f   : > { %v3903_v4 = vmul.f32 %v3814_v13, %v6571_v18  ;;  %v3908_v62 = vmul.f32 %v3818_v20, %v6573_v21  ;;  %v3914_v7 = vmul.f32 %v3821_v44, %v6575_v22  ;;  %v1640_v55 = vmul.f32 %v3731_v17, %v597_v51 }
  0x30   : > { %6568 = vst [vmem:[#allocation18_spill] sm:$0xff] %v3893_v27  ;;  %6570 = vst [vmem:[#allocation19_spill] sm:$0xff] %v3898_v43  ;;  %v3920_v56 = vsel %vm2461_vm0, %v1712_v57, 0.0  ;;  %v600_v26 = vunpack.c.h.bf16 %v181_v58  ;;  %v601_v40 = vunpack.c.l.bf16 %v182_v59  ;;  %v602_v18 = vunpack.c.h.bf16 %v182_v59  ;;  %v189_v57 = vld [vmem:[%s3610_s25 + $0x50] sm:$0xff] }
  0x31   : > { %6572 = vst [vmem:[#allocation20_spill] sm:$0xff] %v3903_v4  ;;  %6574 = vst [vmem:[#allocation21_spill] sm:$0xff] %v3908_v62  ;;  %v2500_v21 = vadd.f32 %v2499_v45, %v1696_v61  ;;  %v187_v62 = vld [vmem:[%s3610_s25 + $0x40] sm:$0xff]  ;;  %v603_v22 = vunpack.c.l.bf16 %v183_v42  ;;  %v2438_v5 = vadd.f32 %v1639_v60, %v1638_v41  ;;  %v604_v4 = vunpack.c.h.bf16 %v183_v42 }
  0x32   : > { %6576 = vst [vmem:[#allocation22_spill] sm:$0xff] %v3914_v7  ;;  %6577 = vst [vmem:[#allocation23_spill] sm:$0xff] %v3920_v56  ;;  %v1641_v7 = vmul.f32 %v3744_v2, %v598_v38  ;;  %v605_v43 = vunpack.c.l.bf16 %v184_v14  ;;  %v606_v27 = vunpack.c.h.bf16 %v184_v14  ;;  %v607_v51 = vunpack.c.l.bf16 %v185_v50  ;;  %v190_v56 = vld [vmem:[%s3610_s25 + $0x58] sm:$0xff] }
  0x33   : > { %v2501_v36 = vadd.f32 %v2500_v21, %v1697_v23  ;;  %v608_v54 = vunpack.c.h.bf16 %v185_v50  ;;  %v1642_v58 = vmul.f32 %v3760_v25, %v599_v47  ;;  %v2439_v35 = vadd.f32 %v2438_v5, %v1640_v55  ;;  %v218_v5 = vld [vmem:[%s3610_s25 + $0x12c] sm:$0xff] }
  0x34   : > { %v609_v59 = vunpack.c.l.bf16 %v186_v52  ;;  %v610_v61 = vunpack.c.h.bf16 %v186_v52  ;;  %v611_v45 = vunpack.c.l.bf16 %v187_v62  ;;  %v612_v17 = vunpack.c.h.bf16 %v187_v62 }
  0x35   : > { %v2502_v44 = vadd.f32 %v2501_v36, %v1698_v24  ;;  %v613_v38 = vunpack.c.l.bf16 %v188_v15  ;;  %v1643_v41 = vmul.f32 %v3763_v37, %v600_v26  ;;  %v2440_v60 = vadd.f32 %v2439_v35, %v1641_v7 }
  0x36   : > { %v614_v42 = vunpack.c.h.bf16 %v188_v15  ;;  %v615_v14 = vunpack.c.l.bf16 %v189_v57  ;;  %v616_v23 = vunpack.c.h.bf16 %v189_v57  ;;  %v617_v21 = vunpack.c.l.bf16 %v190_v56 }
  0x37   : > { %v2503_v2 = vadd.f32 %v2502_v44, %v1699_v46  ;;  %v618_v50 = vunpack.c.h.bf16 %v190_v56  ;;  %v1644_v47 = vmul.f32 %v3767_v8, %v601_v40  ;;  %v2441_v55 = vadd.f32 %v2440_v60, %v1642_v58  ;;  %v219_v46 = vld [vmem:[%s3610_s25 + $0x134] sm:$0xff] }
  0x38   : > { %v619_v52 = vunpack.c.l.bf16 %v3702_v53  ;;  %v1645_v62 = vmul.f32 %v3770_v9, %v602_v18  ;;  %v1646_v24 = vmul.f32 %v3773_v12, %v603_v22  ;;  %v1647_v36 = vmul.f32 %v3776_v10, %v604_v4 }
  0x39   : > { %v2504_v35 = vadd.f32 %v2503_v2, %v3851_v48  ;;  %v1648_v7 = vmul.f32 %v3779_v16, %v605_v43  ;;  %v1649_v26 = vmul.f32 %v3782_v19, %v606_v27  ;;  %v2442_v44 = vadd.f32 %v2441_v55, %v1643_v41  ;;  %v222_v55 = vld [vmem:[%s3610_s25 + $0x14c] sm:$0xff] }
  0x3a   : > { %v3941_v56 = vmul.f32 %v3786_v28, %v607_v51  ;;  %v3944_v53 = vmul.f32 %v3789_v31, %v608_v54  ;;  %v670_v40 = vunpack.c.l.bf16 %v218_v5  ;;  %v671_v18 = vunpack.c.h.bf16 %v218_v5 }
  0x3b   : > { %v2505_v4 = vadd.f32 %v2504_v35, %v3856_v29  ;;  %v3948_v2 = vmul.f32 %v3792_v32, %v609_v59  ;;  %v3951_v48 = vmul.f32 %v3795_v33, %v610_v61  ;;  %v2443_v27 = vadd.f32 %v2442_v44, %v1644_v47  ;;  %v220_v59 = vld [vmem:[%s3610_s25 + $0x13c] sm:$0xff]  ;;  %v6585_v44 = vld [vmem:[#allocation4_spill] sm:$0xff] }
  0x3c   : > { %v3954_v43 = vmul.f32 %v3798_v34, %v611_v45  ;;  %v3957_v22 = vmul.f32 %v3801_v39, %v612_v17  ;;  %v1662_v54 = vmul.f32 %v3827_v3, %v619_v52  ;;  %v672_v15 = vunpack.c.l.bf16 %v219_v46  ;;  %v221_v17 = vld [vmem:[%s3610_s25 + $0x144] sm:$0xff] }
  0x3d   : > { %v2506_v51 = vadd.f32 %v2505_v4, %v3861_v49  ;;  %v3962_v29 = vmul.f32 %v3805_v63, %v613_v38  ;;  %v3965_v57 = vmul.f32 %v3808_v6, %v614_v42  ;;  %v2444_v58 = vadd.f32 %v2443_v27, %v1645_v62  ;;  %v223_v62 = vld [vmem:[%s3610_s25 + $0x154] sm:$0xff] }
  0x3e   : > { %v3969_v61 = vmul.f32 %v3811_v11, %v615_v14  ;;  %v673_v45 = vunpack.c.h.bf16 %v219_v46  ;;  %v1713_v41 = vmul.f32 %v3715_v0, %v670_v40  ;;  %v1714_v60 = vmul.f32 %v3718_v1, %v671_v18  ;;  %v6582_v14 = vld [vmem:[#allocation13_spill] sm:$0xff]  ;;  %v224_v18 = vld [vmem:[%s3610_s25 + $0x15c] sm:$0xff] }
  0x3f   : > { %6578 = vst [vmem:[#allocation24_spill] sm:$0xff] %v3965_v57  ;;  %v2507_v49 = vadd.f32 %v2506_v51, %v3866_v30  ;;  %v3976_v38 = vmul.f32 %v3814_v13, %v616_v23  ;;  %v3979_v42 = vmul.f32 %v3818_v20, %v617_v21  ;;  %v2445_v47 = vadd.f32 %v2444_v58, %v1646_v24  ;;  %v6586_v30 = vld [vmem:[#allocation15_spill] sm:$0xff]  ;;  %v6587_v51 = vld [vmem:[#allocation5_spill] sm:$0xff] }
  0x40   : > { %6579 = vst [vmem:[#allocation25_spill] sm:$0xff] %v3969_v61  ;;  %v3983_v5 = vmul.f32 %v6582_v14, %v618_v50  ;;  %v3986_v52 = vsel %vm2461_vm0, %v1662_v54, 0.0  ;;  %v674_v35 = vunpack.c.l.bf16 %v220_v59  ;;  %v1715_v46 = vmul.f32 %v6585_v44, %v672_v15  ;;  %v225_v24 = vld [vmem:[%s3610_s25 + $0x164] sm:$0xff]  ;;  %v227_v57 = vld [vmem:[%s3610_s25 + $0x174] sm:$0xff]  ;;  %v4000_v14 = vld [vmem:[%s3610_s25 + $0x17c] sm:$0xff] }
  0x41   : > { %6580 = vst [vmem:[#allocation26_spill] sm:$0xff] %v3976_v38  ;;  %6581 = vst [vmem:[#allocation27_spill] sm:$0xff] %v3979_v42  ;;  %v2508_v23 = vadd.f32 %v2507_v49, %v6586_v30  ;;  %v2446_v40 = vadd.f32 %v2445_v47, %v1647_v36  ;;  %v675_v21 = vunpack.c.h.bf16 %v220_v59  ;;  %v676_v4 = vunpack.c.l.bf16 %v221_v17  ;;  %v226_v38 = vld [vmem:[%s3610_s25 + $0x16c] sm:$0xff] }
  0x42   : > { %6583 = vst [vmem:[#allocation28_spill] sm:$0xff] %v3983_v5  ;;  %6584 = vst [vmem:[#allocation29_spill] sm:$0xff] %v3986_v52  ;;  %v677_v27 = vunpack.c.h.bf16 %v221_v17  ;;  %v678_v50 = vunpack.c.l.bf16 %v222_v55  ;;  %v1716_v58 = vmul.f32 %v6587_v51, %v673_v45  ;;  %v2520_v54 = vadd.f32 %v1714_v60, %v1713_v41  ;;  %v6588_v52 = vld [vmem:[#allocation16_spill] sm:$0xff]  ;;  %v6589_v17 = vld [vmem:[#allocation17_spill] sm:$0xff] }
  0x43   : > { %v2509_v5 = vadd.f32 %v2508_v23, %v6588_v52  ;;  %v2447_v42 = vadd.f32 %v2446_v40, %v1648_v7  ;;  %v679_v15 = vunpack.c.h.bf16 %v222_v55  ;;  %v680_v61 = vunpack.c.l.bf16 %v223_v62  ;;  %v4003_v60 = vld [vmem:[%s3610_s25 + $0x184] sm:$0xff] }
  0x44   : > { %v681_v49 = vunpack.c.h.bf16 %v223_v62  ;;  %v682_v36 = vunpack.c.l.bf16 %v224_v18  ;;  %v1717_v59 = vmul.f32 %v3760_v25, %v674_v35  ;;  %v2521_v47 = vadd.f32 %v2520_v54, %v1715_v46  ;;  %v6590_v62 = vld [vmem:[#allocation18_spill] sm:$0xff]  ;;  %v4009_v35 = vld [vmem:[%s3610_s25 + $0xc4] ss:$200 sps:$4 sm:$0xff]  }
  0x45   : > { %v2510_v30 = vadd.f32 %v2509_v5, %v6589_v17  ;;  %v2448_v44 = vadd.f32 %v2447_v42, %v1649_v26  ;;  %v683_v45 = vunpack.c.h.bf16 %v224_v18  ;;  %v684_v41 = vunpack.c.l.bf16 %v225_v24  ;;  %6591 = vst [vmem:[#allocation15_spill] sm:$0xff] %v4009_v35 }
  0x46   : > { %v685_v7 = vunpack.c.h.bf16 %v225_v24  ;;  %v686_v52 = vunpack.c.l.bf16 %v226_v38  ;;  %v1718_v55 = vmul.f32 %v3763_v37, %v675_v21  ;;  %v2522_v23 = vadd.f32 %v2521_v47, %v1716_v58  ;;  %v6592_v24 = vld [vmem:[#allocation19_spill] sm:$0xff] }
  0x47   : > { %v2511_v40 = vadd.f32 %v2510_v30, %v6590_v62  ;;  %v2449_v51 = vadd.f32 %v2448_v44, %v3941_v56  ;;  %v687_v46 = vunpack.c.h.bf16 %v226_v38  ;;  %v688_v5 = vunpack.c.l.bf16 %v227_v57  ;;  %v6593_v30 = vld [vmem:[#allocation20_spill] sm:$0xff] }
  0x48   : > { %v689_v26 = vunpack.c.h.bf16 %v227_v57  ;;  %v690_v42 = vunpack.c.l.bf16 %v4000_v14  ;;  %v1719_v18 = vmul.f32 %v3767_v8, %v676_v4  ;;  %v2523_v54 = vadd.f32 %v2522_v23, %v1717_v59 }
  0x49   : > { %v2512_v17 = vadd.f32 %v2511_v40, %v6592_v24  ;;  %v2450_v21 = vadd.f32 %v2449_v51, %v3944_v53  ;;  %v691_v58 = vunpack.c.h.bf16 %v4000_v14  ;;  %v692_v47 = vunpack.c.l.bf16 %v4003_v60  ;;  %v192_v51 = vld [vmem:[%s3610_s25 + $0x64] sm:$0xff]  ;;  %v6594_v24 = vld [vmem:[#allocation21_spill] sm:$0xff] }
  0x4a   : > { %v693_v56 = vunpack.c.h.bf16 %v4003_v60  ;;  %v694_v38 = vunpack.c.h.bf16 %v4009_v35  ;;  %v1720_v57 = vmul.f32 %v3770_v9, %v677_v27  ;;  %v2524_v44 = vadd.f32 %v2523_v54, %v1718_v55 }
  0x4b   : > { %v2513_v62 = vadd.f32 %v2512_v17, %v6593_v30  ;;  %v2451_v4 = vadd.f32 %v2450_v21, %v3948_v2  ;;  %v1721_v59 = vmul.f32 %v3773_v12, %v678_v50  ;;  %v1722_v53 = vmul.f32 %v3776_v10, %v679_v15  ;;  %v193_v50 = vld [vmem:[%s3610_s25 + $0x6c] sm:$0xff] }
  0x4c   : > { %v1723_v14 = vmul.f32 %v3779_v16, %v680_v61  ;;  %v1724_v23 = vmul.f32 %v3782_v19, %v681_v49  ;;  %v1725_v60 = vmul.f32 %v3786_v28, %v682_v36  ;;  %v2525_v40 = vadd.f32 %v2524_v44, %v1719_v18  ;;  %v6595_v36 = vld [vmem:[#allocation22_spill] sm:$0xff]  ;;  %v6596_v44 = vld [vmem:[#allocation23_spill] sm:$0xff] }
  0x4d   : > { %v2514_v35 = vadd.f32 %v2513_v62, %v6594_v24  ;;  %v2452_v27 = vadd.f32 %v2451_v4, %v3951_v48  ;;  %v1726_v55 = vmul.f32 %v3789_v31, %v683_v45  ;;  %v4032_v2 = vmul.f32 %v3792_v32, %v684_v41 }
  0x4e   : > { %v4036_v15 = vmul.f32 %v3795_v33, %v685_v7  ;;  %v2526_v61 = vadd.f32 %v2525_v40, %v1720_v57  ;;  %v620_v54 = vunpack.c.l.bf16 %v192_v51  ;;  %v621_v49 = vunpack.c.h.bf16 %v192_v51 }
  0x4f   : > { %v2515_v18 = vadd.f32 %v2514_v35, %v6595_v36  ;;  %v2453_v17 = vadd.f32 %v2452_v27, %v3954_v43  ;;  %v4041_v48 = vmul.f32 %v3798_v34, %v686_v52  ;;  %v4044_v45 = vmul.f32 %v3801_v39, %v687_v46  ;;  %v194_v46 = vld [vmem:[%s3610_s25 + $0x74] sm:$0xff] }
  0x50   : > { %v4047_v41 = vmul.f32 %v3805_v63, %v688_v5  ;;  %v1737_v7 = vmul.f32 %v3827_v3, %v694_v38  ;;  %v2527_v21 = vadd.f32 %v2526_v61, %v1721_v59  ;;  %v622_v57 = vunpack.c.l.bf16 %v193_v50  ;;  %v195_v5 = vld [vmem:[%s3610_s25 + $0x7c] sm:$0xff] }
  0x51   : > { %v2517_v30 = vadd.f32 %v6596_v44, %v2515_v18  ;;  %v2454_v35 = vadd.f32 %v2453_v17, %v3957_v22  ;;  %v4053_v43 = vmul.f32 %v3808_v6, %v689_v26  ;;  %v4056_v52 = vmul.f32 %v3811_v11, %v690_v42  ;;  %v6600_v42 = vld [vmem:[#allocation13_spill] sm:$0xff] }
  0x52   : > { %v2528_v62 = vadd.f32 %v2527_v21, %v1722_v53  ;;  %v623_v4 = vunpack.c.h.bf16 %v193_v50  ;;  %v1663_v38 = vmul.f32 %v3715_v0, %v620_v54  ;;  %v1664_v59 = vmul.f32 %v3718_v1, %v621_v49  ;;  %v196_v53 = vld [vmem:[%s3610_s25 + $0x84] sm:$0xff]  ;;  %v197_v50 = vld [vmem:[%s3610_s25 + $0x8c] sm:$0xff] }
  0x53   : > { %6597 = vst [vmem:[#allocation16_spill] sm:$0xff] %v4056_v52  ;;  %2518 = vadd.xlane.f32.xlu1 %v2517_v30  ;;  %v2455_v51 = vadd.f32 %v2454_v35, %v3962_v29  ;;  %v4064_v22 = vmul.f32 %v3814_v13, %v691_v58  ;;  %v4067_v26 = vmul.f32 %v3818_v20, %v692_v47  ;;  %v4074_v27 = vsel %vm2461_vm0, %v1737_v7, 0.0  ;;  %v6603_v54 = vld [vmem:[#allocation4_spill] sm:$0xff]  ;;  %v198_v58 = vld [vmem:[%s3610_s25 + $0x94] sm:$0xff] }
  0x54   : > { %v4070_v40 = vmul.f32 %v6600_v42, %v693_v56  ;;  %v2529_v24 = vadd.f32 %v2528_v62, %v1723_v14  ;;  %6602 = vst [vmem:[#allocation20_spill] sm:$0xff] %v4074_v27  ;;  %v624_v61 = vunpack.c.l.bf16 %v194_v46  ;;  %v1665_v29 = vmul.f32 %v6603_v54, %v622_v57  ;;  %v6604_v49 = vld [vmem:[#allocation24_spill] sm:$0xff]  ;;  %v199_v56 = vld [vmem:[%s3610_s25 + $0x9c] sm:$0xff]  ;;  %v6605_v14 = vld [vmem:[#allocation5_spill] sm:$0xff] }
  0x55   : > { %6598 = vst [vmem:[#allocation17_spill] sm:$0xff] %v4064_v22  ;;  %6599 = vst [vmem:[#allocation18_spill] sm:$0xff] %v4067_v26  ;;  %v2456_v36 = vadd.f32 %v2455_v51, %v6604_v49  ;;  %v625_v18 = vunpack.c.h.bf16 %v194_v46  ;;  %v626_v47 = vunpack.c.l.bf16 %v195_v5  ;;  %v627_v17 = vunpack.c.h.bf16 %v195_v5  ;;  %v6606_v7 = vld [vmem:[#allocation25_spill] sm:$0xff]  ;;  %v200_v27 = vld [vmem:[%s3610_s25 + $0xa4] sm:$0xff] }
  0x56   : > { %6601 = vst [vmem:[#allocation19_spill] sm:$0xff] %v4070_v40  ;;  %v2530_v21 = vadd.f32 %v2529_v24, %v1724_v23  ;;  %v628_v44 = vunpack.c.l.bf16 %v196_v53  ;;  %v1666_v30 = vmul.f32 %v6605_v14, %v623_v4  ;;  %v2466_v35 = vadd.f32 %v1664_v59, %v1663_v38  ;;  %v201_v49 = vld [vmem:[%s3610_s25 + $0xac] sm:$0xff]  ;;  %v6607_v23 = vld [vmem:[#allocation26_spill] sm:$0xff]  ;;  %v6608_v14 = vld [vmem:[#allocation27_spill] sm:$0xff] }
  0x57   : > { %v2457_v62 = vadd.f32 %v2456_v36, %v6606_v7  ;;  %v629_v40 = vunpack.c.h.bf16 %v196_v53  ;;  %v630_v57 = vunpack.c.l.bf16 %v197_v50  ;;  %v631_v26 = vunpack.c.h.bf16 %v197_v50  ;;  %v202_v52 = vld [vmem:[%s3610_s25 + $0xb4] sm:$0xff]  ;;  %v203_v59 = vld [vmem:[%s3610_s25 + $0xbc] sm:$0xff] }
  0x58   : > { %v2531_v51 = vadd.f32 %v2530_v21, %v1725_v60  ;;  %v632_v22 = vunpack.c.l.bf16 %v198_v58  ;;  %v1667_v46 = vmul.f32 %v3760_v25, %v624_v61  ;;  %v2467_v5 = vadd.f32 %v2466_v35, %v1665_v29 }
  0x59   : > { %v2458_v24 = vadd.f32 %v2457_v62, %v6607_v23  ;;  %v633_v54 = vunpack.c.h.bf16 %v198_v58  ;;  %v634_v42 = vunpack.c.l.bf16 %v199_v56  ;;  %v635_v4 = vunpack.c.h.bf16 %v199_v56  ;;  %v6609_v62 = vld [vmem:[#allocation28_spill] sm:$0xff] }
  0x5a   : > { %v2532_v38 = vadd.f32 %v2531_v51, %v1726_v55  ;;  %v636_v36 = vunpack.c.l.bf16 %v200_v27  ;;  %v1668_v7 = vmul.f32 %v3763_v37, %v625_v18  ;;  %v2468_v53 = vadd.f32 %v2467_v5, %v1666_v30  ;;  %v6610_v30 = vld [vmem:[#allocation15_spill] sm:$0xff] }
  0x5b   : > { %v2459_v50 = vadd.f32 %v2458_v24, %v6608_v14  ;;  %v637_v60 = vunpack.c.h.bf16 %v200_v27  ;;  %v638_v21 = vunpack.c.l.bf16 %v201_v49  ;;  %v639_v20 = vunpack.c.h.bf16 %v201_v49  ;;  %v244_v49 = vld [vmem:[%s3610_s25 + $0x1f4] sm:$0xff] }
  0x5c   : > { %v2533_v61 = vadd.f32 %v2532_v38, %v4032_v2  ;;  %v640_v29 = vunpack.c.l.bf16 %v202_v52  ;;  %v1669_v35 = vmul.f32 %v3767_v8, %v626_v47  ;;  %v2469_v58 = vadd.f32 %v2468_v53, %v1667_v46  ;;  %v6611_v24 = vld [vmem:[#allocation29_spill] sm:$0xff] }
  0x5d   : > { %v2460_v56 = vadd.f32 %v2459_v50, %v6609_v62  ;;  %v641_v55 = vunpack.c.h.bf16 %v202_v52  ;;  %v642_v51 = vunpack.c.l.bf16 %v203_v59  ;;  %v643_v23 = vunpack.c.h.bf16 %v203_v59  ;;  %v245_v50 = vld [vmem:[%s3610_s25 + $0x1fc] sm:$0xff]  ;;  %v246_v62 = vld [vmem:[%s3610_s25 + $0x204] sm:$0xff] }
  0x5e   : > { %v2534_v18 = vadd.f32 %v2533_v61, %v4036_v15  ;;  %v644_v14 = vunpack.c.l.bf16 %v6610_v30  ;;  %v1670_v27 = vmul.f32 %v3770_v9, %v627_v17  ;;  %v2470_v5 = vadd.f32 %v2469_v58, %v1668_v7 }
  0x5f   : > { %v2463_v2 = vadd.f32 %v6611_v24, %v2460_v56  ;;  %v1671_v38 = vmul.f32 %v3773_v12, %v628_v44  ;;  %v1672_v47 = vmul.f32 %v3776_v10, %v629_v40  ;;  %v1673_v46 = vmul.f32 %v3779_v16, %v630_v57  ;;  %v249_v24 = vld [vmem:[%s3610_s25 + $0x21c] sm:$0xff] }
  0x60   : > { %v2535_v52 = vadd.f32 %v2534_v18, %v4041_v48  ;;  %v1674_v59 = vmul.f32 %v3782_v19, %v631_v26  ;;  %v1675_v15 = vmul.f32 %v3786_v28, %v632_v22  ;;  %v2471_v53 = vadd.f32 %v2470_v5, %v1669_v35 }
  0x61   : > { %2464 = vadd.xlane.f32.xlu0 %v2463_v2  ;;  %v4107_v17 = vmul.f32 %v3789_v31, %v633_v54  ;;  %v4110_v7 = vmul.f32 %v3792_v32, %v634_v42  ;;  %v720_v44 = vunpack.c.l.bf16 %v244_v49  ;;  %v721_v40 = vunpack.c.h.bf16 %v244_v49  ;;  %v248_v49 = vld [vmem:[%s3610_s25 + $0x214] sm:$0xff] }
  0x62   : > { %v2536_v57 = vadd.f32 %v2535_v52, %v4044_v45  ;;  %v4114_v48 = vmul.f32 %v3795_v33, %v635_v4  ;;  %v4117_v22 = vmul.f32 %v3798_v34, %v636_v36  ;;  %v2472_v26 = vadd.f32 %v2471_v53, %v1670_v27  ;;  %v6620_v52 = vld [vmem:[#allocation4_spill] sm:$0xff] }
  0x63   : > { %v4120_v61 = vmul.f32 %v3801_v39, %v637_v60  ;;  %v4123_v54 = vmul.f32 %v3805_v63, %v638_v21  ;;  %v1687_v42 = vmul.f32 %v3827_v3, %v644_v14  ;;  %v722_v35 = vunpack.c.l.bf16 %v245_v50  ;;  %v247_v21 = vld [vmem:[%s3610_s25 + $0x20c] sm:$0xff] }
  0x64   : > { %v2537_v58 = vadd.f32 %v2536_v57, %v4047_v41  ;;  %v4128_v45 = vmul.f32 %v3808_v6, %v639_v20  ;;  %v4131_v4 = vmul.f32 %v3811_v11, %v640_v29  ;;  %v2473_v36 = vadd.f32 %v2472_v26, %v1671_v38  ;;  %v6615_v20 = vld [vmem:[#allocation12_spill] sm:$0xff]  ;;  %v6617_v29 = vld [vmem:[#allocation13_spill] sm:$0xff] }
  0x65   : > { %v4135_v60 = vmul.f32 %v3814_v13, %v641_v55  ;;  %v723_v56 = vunpack.c.h.bf16 %v245_v50  ;;  %v1763_v18 = vmul.f32 %v3715_v0, %v720_v44  ;;  %v1764_v30 = vmul.f32 %v3718_v1, %v721_v40  ;;  %v6621_v50 = vld [vmem:[#allocation16_spill] sm:$0xff] }
  0x66   : > { %6612 = vst [vmem:[#allocation21_spill] sm:$0xff] %v4128_v45  ;;  %6613 = vst [vmem:[#allocation22_spill] sm:$0xff] %v4131_v4  ;;  %v2538_v41 = vadd.f32 %v2537_v58, %v4053_v43  ;;  %v4142_v14 = vmul.f32 %v6615_v20, %v642_v51  ;;  %v4145_v27 = vmul.f32 %v6617_v29, %v643_v23  ;;  %v4149_v55 = vsel %vm2461_vm0, %v1687_v42, 0.0  ;;  %v250_v51 = vld [vmem:[%s3610_s25 + $0x224] sm:$0xff]  ;;  %v251_v23 = vld [vmem:[%s3610_s25 + $0x22c] sm:$0xff] }
  0x67   : > { %6614 = vst [vmem:[#allocation23_spill] sm:$0xff] %v4135_v60  ;;  %v2474_v5 = vadd.f32 %v2473_v36, %v1672_v47  ;;  %6619 = vst [vmem:[#allocation26_spill] sm:$0xff] %v4149_v55  ;;  %v724_v2 = vunpack.c.l.bf16 %v246_v62  ;;  %v725_v38 = vunpack.c.h.bf16 %v246_v62  ;;  %v1765_v53 = vmul.f32 %v6620_v52, %v722_v35  ;;  %v6622_v58 = vld [vmem:[#allocation5_spill] sm:$0xff]  ;;  %v253_v4 = vld [vmem:[%s3610_s25 + $0x23c] sm:$0xff] }
  0x68   : > { %6616 = vst [vmem:[#allocation24_spill] sm:$0xff] %v4142_v14  ;;  %6618 = vst [vmem:[#allocation25_spill] sm:$0xff] %v4145_v27  ;;  %v2539_v43 = vadd.f32 %v2538_v41, %v6621_v50  ;;  %v726_v40 = vunpack.c.l.bf16 %v247_v21  ;;  %v727_v57 = vunpack.c.h.bf16 %v247_v21  ;;  %v728_v26 = vunpack.c.l.bf16 %v248_v49  ;;  %v6623_v55 = vld [vmem:[#allocation17_spill] sm:$0xff]  ;;  %v6624_v50 = vld [vmem:[#allocation18_spill] sm:$0xff] }
  0x69   : > { %v2475_v44 = vadd.f32 %v2474_v5, %v1673_v46  ;;  %v729_v47 = vunpack.c.h.bf16 %v248_v49  ;;  %v1766_v42 = vmul.f32 %v6622_v58, %v723_v56  ;;  %v2574_v36 = vadd.f32 %v1764_v30, %v1763_v18  ;;  %v252_v14 = vld [vmem:[%s3610_s25 + $0x234] sm:$0xff]  ;;  %v254_v45 = vld [vmem:[%s3610_s25 + $0x244] sm:$0xff]  ;;  %v255_v30 = vld [vmem:[%s3610_s25 + $0x24c] sm:$0xff] }
  0x6a   : > { %v2540_v27 = vadd.f32 %v2539_v43, %v6623_v55  ;;  %v730_v35 = vunpack.c.l.bf16 %v249_v24  ;;  %v731_v60 = vunpack.c.h.bf16 %v249_v24  ;;  %v732_v41 = vunpack.c.l.bf16 %v250_v51  ;;  %v6625_v24 = vld [vmem:[#allocation19_spill] sm:$0xff] }
  0x6b   : > { %v2476_v62 = vadd.f32 %v2475_v44, %v1674_v59  ;;  %v733_v46 = vunpack.c.h.bf16 %v250_v51  ;;  %v1767_v21 = vmul.f32 %v3760_v25, %v724_v2  ;;  %v2575_v5 = vadd.f32 %v2574_v36, %v1765_v53  ;;  %v4168_v51 = vld [vmem:[%s3610_s25 + $0x1f0] ss:$100 sps:$4 sm:$0xff]  }
  0x6c   : > { %v2541_v52 = vadd.f32 %v2540_v27, %v6624_v50  ;;  %v734_v56 = vunpack.c.l.bf16 %v251_v23  ;;  %v735_v18 = vunpack.c.h.bf16 %v251_v23  ;;  %v736_v58 = vunpack.c.l.bf16 %v252_v14 }
  0x6d   : > { %v2477_v49 = vadd.f32 %v2476_v62, %v1675_v15  ;;  %v737_v55 = vunpack.c.h.bf16 %v252_v14  ;;  %v1768_v59 = vmul.f32 %v3763_v37, %v725_v38  ;;  %v2576_v43 = vadd.f32 %v2575_v5, %v1766_v42  ;;  %v6626_v62 = vld [vmem:[#allocation20_spill] sm:$0xff] }
  0x6e   : > { %v2542_v44 = vadd.f32 %v2541_v52, %v6625_v24  ;;  %v738_v2 = vunpack.c.l.bf16 %v253_v4  ;;  %v739_v53 = vunpack.c.h.bf16 %v253_v4  ;;  %v740_v27 = vunpack.c.l.bf16 %v254_v45  ;;  %v231_v4 = vld [vmem:[%s3610_s25 + $0x190] sm:$0xff] }
  0x6f   : > { %v2478_v29 = vadd.f32 %v2477_v49, %v4107_v17  ;;  %v741_v15 = vunpack.c.h.bf16 %v254_v45  ;;  %v1769_v36 = vmul.f32 %v3767_v8, %v726_v40  ;;  %v2577_v23 = vadd.f32 %v2576_v43, %v1767_v21 }
  0x70   : > { %v2544_v50 = vadd.f32 %v6626_v62, %v2542_v44  ;;  %v742_v38 = vunpack.c.l.bf16 %v255_v30  ;;  %v743_v42 = vunpack.c.h.bf16 %v255_v30  ;;  %v744_v52 = vunpack.c.h.bf16 %v4168_v51  ;;  %v233_v44 = vld [vmem:[%s3610_s25 + $0x1a0] sm:$0xff]  ;;  %v234_v62 = vld [vmem:[%s3610_s25 + $0x1a8] sm:$0xff] }
  0x71   : > { %v2479_v14 = vadd.f32 %v2478_v29, %v4110_v7  ;;  %v1770_v17 = vmul.f32 %v3770_v9, %v727_v57  ;;  %v1771_v5 = vmul.f32 %v3773_v12, %v728_v26  ;;  %v2578_v49 = vadd.f32 %v2577_v23, %v1768_v59  ;;  %v232_v59 = vld [vmem:[%s3610_s25 + $0x198] sm:$0xff] }
  0x72   : > { %2545 = vadd.xlane.f32.xlu1 %v2544_v50  ;;  %v1772_v40 = vmul.f32 %v3776_v10, %v729_v47  ;;  %v1773_v21 = vmul.f32 %v3779_v16, %v730_v35  ;;  %v1774_v7 = vmul.f32 %v3782_v19, %v731_v60  ;;  %v1775_v29 = vmul.f32 %v3786_v28, %v732_v41 }
  0x73   : > { %v2480_v45 = vadd.f32 %v2479_v14, %v4114_v48  ;;  %v4183_v30 = vmul.f32 %v3789_v31, %v733_v46  ;;  %v4186_v57 = vmul.f32 %v3792_v32, %v734_v56  ;;  %v2579_v26 = vadd.f32 %v2578_v49, %v1769_v36 }
  0x74   : > { %v4191_v48 = vmul.f32 %v3795_v33, %v735_v18  ;;  %v695_v47 = vunpack.c.l.bf16 %v231_v4  ;;  %v696_v35 = vunpack.c.h.bf16 %v231_v4  ;;  %v4194_v60 = vmul.f32 %v3798_v34, %v736_v58  ;;  %v6635_v4 = vld [vmem:[#allocation21_spill] sm:$0xff] }
  0x75   : > { %v2481_v43 = vadd.f32 %v2480_v45, %v4117_v22  ;;  %v4197_v41 = vmul.f32 %v3801_v39, %v737_v55  ;;  %v1787_v46 = vmul.f32 %v3827_v3, %v744_v52  ;;  %v2580_v56 = vadd.f32 %v2579_v26, %v1770_v17 }
  0x76   : > { %v4202_v22 = vmul.f32 %v3805_v63, %v738_v2  ;;  %v4205_v18 = vmul.f32 %v3808_v6, %v739_v53  ;;  %v697_v36 = vunpack.c.l.bf16 %v232_v59  ;;  %v4209_v58 = vmul.f32 %v3811_v11, %v740_v27  ;;  %v235_v53 = vld [vmem:[%s3610_s25 + $0x1b0] sm:$0xff] }
  0x77   : > { %v2482_v24 = vadd.f32 %v2481_v43, %v4120_v61  ;;  %v4212_v55 = vmul.f32 %v3814_v13, %v741_v15  ;;  %v4215_v23 = vmul.f32 %v6615_v20, %v742_v38  ;;  %v2581_v61 = vadd.f32 %v2580_v56, %v1771_v5  ;;  %v6632_v27 = vld [vmem:[#allocation13_spill] sm:$0xff]  ;;  %v6636_v43 = vld [vmem:[#allocation4_spill] sm:$0xff] }
  0x78   : > { %6627 = vst [vmem:[#allocation27_spill] sm:$0xff] %v4202_v22  ;;  %6628 = vst [vmem:[#allocation28_spill] sm:$0xff] %v4205_v18  ;;  %v698_v50 = vunpack.c.h.bf16 %v232_v59  ;;  %v1738_v14 = vmul.f32 %v3715_v0, %v695_v47  ;;  %v1739_v52 = vmul.f32 %v3718_v1, %v696_v35  ;;  %v4223_v17 = vmul.f32 %v6632_v27, %v743_v42  ;;  %v236_v38 = vld [vmem:[%s3610_s25 + $0x1b8] sm:$0xff]  ;;  %v238_v35 = vld [vmem:[%s3610_s25 + $0x1c8] sm:$0xff] }
  0x79   : > { %6629 = vst [vmem:[#allocation15_spill] sm:$0xff] %v4209_v58  ;;  %6630 = vst [vmem:[#allocation29_spill] sm:$0xff] %v4212_v55  ;;  %v2483_v2 = vadd.f32 %v2482_v24, %v4123_v54  ;;  %v2582_v15 = vadd.f32 %v2581_v61, %v1772_v40  ;;  %v4226_v49 = vsel %vm2461_vm0, %v1787_v46, 0.0  ;;  %v699_v5 = vunpack.c.l.bf16 %v233_v44  ;;  %v237_v54 = vld [vmem:[%s3610_s25 + $0x1c0] sm:$0xff]  ;;  %v239_v46 = vld [vmem:[%s3610_s25 + $0x1d0] sm:$0xff] }
  0x7a   : > { %6631 = vst [vmem:[#allocation16_spill] sm:$0xff] %v4215_v23  ;;  %6633 = vst [vmem:[#allocation17_spill] sm:$0xff] %v4223_v17  ;;  %v700_v26 = vunpack.c.h.bf16 %v233_v44  ;;  %v701_v59 = vunpack.c.l.bf16 %v234_v62  ;;  %v1740_v47 = vmul.f32 %v6636_v43, %v697_v36  ;;  %v702_v42 = vunpack.c.h.bf16 %v234_v62  ;;  %v6637_v40 = vld [vmem:[#allocation22_spill] sm:$0xff]  ;;  %v6638_v23 = vld [vmem:[#allocation5_spill] sm:$0xff] }
  0x7b   : > { %6634 = vst [vmem:[#allocation18_spill] sm:$0xff] %v4226_v49  ;;  %v2484_v45 = vadd.f32 %v2483_v2, %v6635_v4  ;;  %v2583_v56 = vadd.f32 %v2582_v15, %v1773_v21  ;;  %v703_v24 = vunpack.c.l.bf16 %v235_v53  ;;  %v704_v17 = vunpack.c.h.bf16 %v235_v53  ;;  %v240_v58 = vld [vmem:[%s3610_s25 + $0x1d8] sm:$0xff]  ;;  %v6639_v36 = vld [vmem:[#allocation23_spill] sm:$0xff]  ;;  %v6640_v1 = vld [vmem:[#allocation24_spill] sm:$0xff] }
  0x7c   : > { %v705_v49 = vunpack.c.l.bf16 %v236_v38  ;;  %v1741_v55 = vmul.f32 %v6638_v23, %v698_v50  ;;  %v2547_v2 = vadd.f32 %v1739_v52, %v1738_v14  ;;  %v706_v44 = vunpack.c.h.bf16 %v236_v38  ;;  %v241_v15 = vld [vmem:[%s3610_s25 + $0x1e0] sm:$0xff] }
  0x7d   : > { %v2485_v61 = vadd.f32 %v2484_v45, %v6637_v40  ;;  %v2584_v4 = vadd.f32 %v2583_v56, %v1774_v7  ;;  %v707_v18 = vunpack.c.l.bf16 %v237_v54  ;;  %v708_v27 = vunpack.c.h.bf16 %v237_v54  ;;  %v242_v45 = vld [vmem:[%s3610_s25 + $0x1e8] sm:$0xff] }
  0x7e   : > { %v709_v43 = vunpack.c.l.bf16 %v238_v35  ;;  %v1742_v62 = vmul.f32 %v3760_v25, %v699_v5  ;;  %v2548_v53 = vadd.f32 %v2547_v2, %v1740_v47  ;;  %v710_v40 = vunpack.c.h.bf16 %v238_v35 }
  0x7f   : > { %v2486_v21 = vadd.f32 %v2485_v61, %v6639_v36  ;;  %v2585_v20 = vadd.f32 %v2584_v4, %v1775_v29  ;;  %v711_v13 = vunpack.c.l.bf16 %v239_v46  ;;  %v712_v22 = vunpack.c.h.bf16 %v239_v46  ;;  %v6641_v36 = vld [vmem:[#allocation25_spill] sm:$0xff]  ;;  %v6642_v4 = vld [vmem:[#allocation26_spill] sm:$0xff] }
  0x80   : > { %v713_v7 = vunpack.c.l.bf16 %v240_v58  ;;  %v1743_v14 = vmul.f32 %v3763_v37, %v700_v26  ;;  %v2549_v52 = vadd.f32 %v2548_v53, %v1741_v55  ;;  %v714_v54 = vunpack.c.h.bf16 %v240_v58  ;;  %v270_v55 = vld [vmem:[%s3610_s25 + $0x2bc] sm:$0xff]  ;;  %v271_v53 = vld [vmem:[%s3610_s25 + $0x2c4] sm:$0xff] }
  0x81   : > { %v2487_v50 = vadd.f32 %v2486_v21, %v6640_v1  ;;  %v2586_v38 = vadd.f32 %v2585_v20, %v4183_v30  ;;  %v715_v56 = vunpack.c.l.bf16 %v241_v15  ;;  %v716_v61 = vunpack.c.h.bf16 %v241_v15 }
  0x82   : > { %v717_v47 = vunpack.c.l.bf16 %v242_v45  ;;  %v1744_v29 = vmul.f32 %v3767_v8, %v701_v59  ;;  %v2550_v35 = vadd.f32 %v2549_v52, %v1742_v62  ;;  %v718_v1 = vunpack.c.h.bf16 %v242_v45 }
  0x83   : > { %v2488_v5 = vadd.f32 %v2487_v50, %v6641_v36  ;;  %v2587_v46 = vadd.f32 %v2586_v38, %v4186_v57  ;;  %v719_v2 = vunpack.c.l.bf16 %v4168_v51  ;;  %v1745_v26 = vmul.f32 %v3770_v9, %v702_v42  ;;  %v273_v38 = vld [vmem:[%s3610_s25 + $0x2d4] sm:$0xff] }
  0x84   : > { %v1746_v30 = vmul.f32 %v3773_v12, %v703_v24  ;;  %v1747_v58 = vmul.f32 %v3776_v10, %v704_v17  ;;  %v2551_v21 = vadd.f32 %v2550_v35, %v1743_v14  ;;  %v1748_v59 = vmul.f32 %v3779_v16, %v705_v49 }
  0x85   : > { %v2490_v20 = vadd.f32 %v6642_v4, %v2488_v5  ;;  %v2588_v15 = vadd.f32 %v2587_v46, %v4191_v48  ;;  %v1749_v62 = vmul.f32 %v3782_v19, %v706_v44  ;;  %v1750_v57 = vmul.f32 %v3786_v28, %v707_v18  ;;  %v274_v4 = vld [vmem:[%s3610_s25 + $0x2dc] sm:$0xff] }
  0x86   : > { %v4259_v51 = vmul.f32 %v3789_v31, %v708_v27  ;;  %v2552_v42 = vadd.f32 %v2551_v21, %v1744_v29  ;;  %v770_v45 = vunpack.c.l.bf16 %v270_v55  ;;  %v771_v24 = vunpack.c.h.bf16 %v270_v55  ;;  %v6645_v29 = vld [vmem:[#allocation3_spill] sm:$0xff] }
  0x87   : > { %2491 = vadd.xlane.f32.xlu0 %v2490_v20  ;;  %v2589_v17 = vadd.f32 %v2588_v15, %v4194_v60  ;;  %v4263_v48 = vmul.f32 %v3792_v32, %v709_v43  ;;  %v4266_v49 = vmul.f32 %v3795_v33, %v710_v40  ;;  %v4269_v18 = vmul.f32 %v3798_v34, %v711_v13  ;;  %v272_v40 = vld [vmem:[%s3610_s25 + $0x2cc] sm:$0xff]  ;;  %v275_v21 = vld [vmem:[%s3610_s25 + $0x2e4] sm:$0xff] }
  0x88   : > { %v4272_v44 = vmul.f32 %v3801_v39, %v712_v22  ;;  %v1762_v27 = vmul.f32 %v3827_v3, %v719_v2  ;;  %v2553_v50 = vadd.f32 %v2552_v42, %v1745_v26  ;;  %v772_v14 = vunpack.c.l.bf16 %v271_v53 }
  0x89   : > { %v2590_v52 = vadd.f32 %v2589_v17, %v4197_v41  ;;  %v4277_v60 = vmul.f32 %v3805_v63, %v713_v7  ;;  %v4280_v43 = vmul.f32 %v3808_v6, %v714_v54  ;;  %v4283_v13 = vmul.f32 %v3811_v11, %v715_v56  ;;  %v6646_v41 = vld [vmem:[#allocation27_spill] sm:$0xff]  ;;  %v6649_v54 = vld [vmem:[#allocation12_spill] sm:$0xff]  ;;  %v6651_v56 = vld [vmem:[#allocation13_spill] sm:$0xff] }
  0x8a   : > { %v2554_v22 = vadd.f32 %v2553_v50, %v1746_v30  ;;  %v773_v36 = vunpack.c.h.bf16 %v271_v53  ;;  %v1813_v5 = vmul.f32 %v3715_v0, %v770_v45  ;;  %v1814_v35 = vmul.f32 %v6645_v29, %v771_v24  ;;  %v6647_v7 = vld [vmem:[#allocation11_spill] sm:$0xff]  ;;  %v6654_v53 = vld [vmem:[#allocation4_spill] sm:$0xff] }
  0x8b   : > { %6643 = vst [vmem:[#allocation19_spill] sm:$0xff] %v4280_v43  ;;  %6644 = vst [vmem:[#allocation20_spill] sm:$0xff] %v4283_v13  ;;  %v2591_v46 = vadd.f32 %v2590_v52, %v6646_v41  ;;  %v4291_v2 = vmul.f32 %v6647_v7, %v716_v61  ;;  %v4294_v26 = vmul.f32 %v6649_v54, %v717_v47  ;;  %v4301_v30 = vsel %vm2461_vm0, %v1762_v27, 0.0  ;;  %v6655_v45 = vld [vmem:[#allocation28_spill] sm:$0xff]  ;;  %v6656_v27 = vld [vmem:[#allocation15_spill] sm:$0xff] }
  0x8c   : > { %v4297_v55 = vmul.f32 %v6651_v56, %v718_v1  ;;  %v2555_v20 = vadd.f32 %v2554_v22, %v1747_v58  ;;  %6653 = vst [vmem:[#allocation24_spill] sm:$0xff] %v4301_v30  ;;  %v774_v15 = vunpack.c.l.bf16 %v272_v40  ;;  %v1815_v42 = vmul.f32 %v6654_v53, %v772_v14  ;;  %v276_v61 = vld [vmem:[%s3610_s25 + $0x2ec] sm:$0xff]  ;;  %v277_v1 = vld [vmem:[%s3610_s25 + $0x2f4] sm:$0xff] }
  0x8d   : > { %6648 = vst [vmem:[#allocation21_spill] sm:$0xff] %v4291_v2  ;;  %6650 = vst [vmem:[#allocation22_spill] sm:$0xff] %v4294_v26  ;;  %v2592_v24 = vadd.f32 %v2591_v46, %v6655_v45  ;;  %v775_v17 = vunpack.c.h.bf16 %v272_v40  ;;  %v776_v47 = vunpack.c.l.bf16 %v273_v38  ;;  %v777_v50 = vunpack.c.h.bf16 %v273_v38  ;;  %v279_v45 = vld [vmem:[%s3610_s25 + $0x304] sm:$0xff]  ;;  %v280_v43 = vld [vmem:[%s3610_s25 + $0x30c] sm:$0xff] }
  0x8e   : > { %6652 = vst [vmem:[#allocation23_spill] sm:$0xff] %v4297_v55  ;;  %v2556_v52 = vadd.f32 %v2555_v20, %v1748_v59  ;;  %v778_v41 = vunpack.c.l.bf16 %v274_v4  ;;  %v1816_v58 = vmul.f32 %v6638_v23, %v773_v36  ;;  %v2628_v22 = vadd.f32 %v1814_v35, %v1813_v5  ;;  %v278_v55 = vld [vmem:[%s3610_s25 + $0x2fc] sm:$0xff]  ;;  %v6657_v20 = vld [vmem:[#allocation29_spill] sm:$0xff] }
  0x8f   : > { %v2593_v30 = vadd.f32 %v2592_v24, %v6656_v27  ;;  %v779_v26 = vunpack.c.h.bf16 %v274_v4  ;;  %v780_v14 = vunpack.c.l.bf16 %v275_v21  ;;  %v781_v2 = vunpack.c.h.bf16 %v275_v21  ;;  %v281_v24 = vld [vmem:[%s3610_s25 + $0x314] sm:$0xff]  ;;  %v6658_v21 = vld [vmem:[#allocation16_spill] sm:$0xff] }
  0x90   : > { %v2557_v46 = vadd.f32 %v2556_v52, %v1749_v62  ;;  %v782_v40 = vunpack.c.l.bf16 %v276_v61  ;;  %v1817_v38 = vmul.f32 %v3760_v25, %v774_v15  ;;  %v2629_v59 = vadd.f32 %v2628_v22, %v1815_v42  ;;  %v4319_v52 = vld [vmem:[%s3610_s25 + $0x2b8] ss:$100 sps:$4 sm:$0xff]  }
  0x91   : > { %v2594_v13 = vadd.f32 %v2593_v30, %v6657_v20  ;;  %v783_v53 = vunpack.c.h.bf16 %v276_v61  ;;  %v784_v36 = vunpack.c.l.bf16 %v277_v1  ;;  %v785_v5 = vunpack.c.h.bf16 %v277_v1 }
  0x92   : > { %v2558_v35 = vadd.f32 %v2557_v46, %v1750_v57  ;;  %v786_v27 = vunpack.c.l.bf16 %v278_v55  ;;  %v1818_v4 = vmul.f32 %v3763_v37, %v775_v17  ;;  %v2630_v23 = vadd.f32 %v2629_v59, %v1816_v58  ;;  %v6659_v57 = vld [vmem:[#allocation17_spill] sm:$0xff]  ;;  %v6660_v37 = vld [vmem:[#allocation18_spill] sm:$0xff] }
  0x93   : > { %v2595_v62 = vadd.f32 %v2594_v13, %v6658_v21  ;;  %v787_v56 = vunpack.c.h.bf16 %v278_v55  ;;  %v788_v15 = vunpack.c.l.bf16 %v279_v45  ;;  %v789_v42 = vunpack.c.h.bf16 %v279_v45  ;;  %v257_v45 = vld [vmem:[%s3610_s25 + $0x258] sm:$0xff] }
  0x94   : > { %v2559_v30 = vadd.f32 %v2558_v35, %v4259_v51  ;;  %v790_v22 = vunpack.c.l.bf16 %v280_v43  ;;  %v1819_v61 = vmul.f32 %v3767_v8, %v776_v47  ;;  %v2631_v1 = vadd.f32 %v2630_v23, %v1817_v38 }
  0x95   : > { %v2596_v46 = vadd.f32 %v2595_v62, %v6659_v57  ;;  %v791_v20 = vunpack.c.h.bf16 %v280_v43  ;;  %v792_v17 = vunpack.c.l.bf16 %v281_v24  ;;  %v793_v58 = vunpack.c.h.bf16 %v281_v24  ;;  %v258_v62 = vld [vmem:[%s3610_s25 + $0x260] sm:$0xff] }
  0x96   : > { %v2560_v13 = vadd.f32 %v2559_v30, %v4263_v48  ;;  %v794_v59 = vunpack.c.h.bf16 %v4319_v52  ;;  %v1820_v55 = vmul.f32 %v3770_v9, %v777_v50  ;;  %v2632_v21 = vadd.f32 %v2631_v1, %v1818_v4  ;;  %v259_v1 = vld [vmem:[%s3610_s25 + $0x268] sm:$0xff] }
  0x97   : > { %v2598_v51 = vadd.f32 %v6660_v37, %v2596_v46  ;;  %v1821_v35 = vmul.f32 %v3773_v12, %v778_v41  ;;  %v1822_v23 = vmul.f32 %v3776_v10, %v779_v26  ;;  %v1823_v47 = vmul.f32 %v3779_v16, %v780_v14 }
  0x98   : > { %v2561_v43 = vadd.f32 %v2560_v13, %v4266_v49  ;;  %v1824_v38 = vmul.f32 %v3782_v19, %v781_v2  ;;  %v1825_v48 = vmul.f32 %v3786_v28, %v782_v40  ;;  %v2633_v24 = vadd.f32 %v2632_v21, %v1819_v61  ;;  %v261_v21 = vld [vmem:[%s3610_s25 + $0x278] sm:$0xff] }
  0x99   : > { %2599 = vadd.xlane.f32.xlu1 %v2598_v51  ;;  %v4337_v50 = vmul.f32 %v3789_v31, %v783_v53  ;;  %v4340_v37 = vmul.f32 %v3792_v32, %v784_v36  ;;  %v745_v41 = vunpack.c.l.bf16 %v257_v45  ;;  %v746_v26 = vunpack.c.h.bf16 %v257_v45  ;;  %v262_v45 = vld [vmem:[%s3610_s25 + $0x280] sm:$0xff] }
  0x9a   : > { %v2562_v14 = vadd.f32 %v2561_v43, %v4269_v18  ;;  %v4344_v49 = vmul.f32 %v3795_v33, %v785_v5  ;;  %v4347_v2 = vmul.f32 %v3798_v34, %v786_v27  ;;  %v2634_v40 = vadd.f32 %v2633_v24, %v1820_v55  ;;  %v6668_v43 = vld [vmem:[#allocation4_spill] sm:$0xff] }
  0x9b   : > { %v4350_v4 = vmul.f32 %v3801_v39, %v787_v56  ;;  %v4353_v53 = vmul.f32 %v3805_v63, %v788_v15  ;;  %v1837_v36 = vmul.f32 %v3827_v3, %v794_v59  ;;  %v747_v30 = vunpack.c.l.bf16 %v258_v62  ;;  %v260_v15 = vld [vmem:[%s3610_s25 + $0x270] sm:$0xff] }
  0x9c   : > { %v2563_v61 = vadd.f32 %v2562_v14, %v4272_v44  ;;  %v4358_v18 = vmul.f32 %v3808_v6, %v789_v42  ;;  %v4361_v5 = vmul.f32 %v3811_v11, %v790_v22  ;;  %v2635_v27 = vadd.f32 %v2634_v40, %v1821_v35  ;;  %v6665_v22 = vld [vmem:[#allocation13_spill] sm:$0xff] }
  0x9d   : > { %v4365_v56 = vmul.f32 %v6647_v7, %v791_v20  ;;  %v748_v57 = vunpack.c.h.bf16 %v258_v62  ;;  %v1788_v46 = vmul.f32 %v3715_v0, %v745_v41  ;;  %v1789_v13 = vmul.f32 %v6645_v29, %v746_v26  ;;  %v6669_v62 = vld [vmem:[#allocation19_spill] sm:$0xff] }
  0x9e   : > { %6661 = vst [vmem:[#allocation25_spill] sm:$0xff] %v4358_v18  ;;  %6662 = vst [vmem:[#allocation26_spill] sm:$0xff] %v4361_v5  ;;  %v2564_v44 = vadd.f32 %v2563_v61, %v4277_v60  ;;  %v4372_v42 = vmul.f32 %v6649_v54, %v792_v17  ;;  %v4375_v59 = vmul.f32 %v6665_v22, %v793_v58  ;;  %v4379_v20 = vsel %vm2461_vm0, %v1837_v36, 0.0  ;;  %v263_v17 = vld [vmem:[%s3610_s25 + $0x288] sm:$0xff]  ;;  %v264_v58 = vld [vmem:[%s3610_s25 + $0x290] sm:$0xff] }
  0x9f   : > { %6663 = vst [vmem:[#allocation27_spill] sm:$0xff] %v4365_v56  ;;  %v2636_v55 = vadd.f32 %v2635_v27, %v1822_v23  ;;  %6667 = vst [vmem:[#allocation29_spill] sm:$0xff] %v4379_v20  ;;  %v749_v51 = vunpack.c.l.bf16 %v259_v1  ;;  %v750_v35 = vunpack.c.h.bf16 %v259_v1  ;;  %v1790_v24 = vmul.f32 %v6668_v43, %v747_v30  ;;  %v6670_v61 = vld [vmem:[#allocation5_spill] sm:$0xff]  ;;  %v6671_v20 = vld [vmem:[#allocation20_spill] sm:$0xff] }
  0xa0   : > { %6664 = vst [vmem:[#allocation28_spill] sm:$0xff] %v4372_v42  ;;  %6666 = vst [vmem:[#allocation15_spill] sm:$0xff] %v4375_v59  ;;  %v2565_v60 = vadd.f32 %v2564_v44, %v6669_v62  ;;  %v751_v26 = vunpack.c.l.bf16 %v260_v15  ;;  %v752_v14 = vunpack.c.h.bf16 %v260_v15  ;;  %v753_v40 = vunpack.c.l.bf16 %v261_v21  ;;  %v265_v42 = vld [vmem:[%s3610_s25 + $0x298] sm:$0xff]  ;;  %v266_v5 = vld [vmem:[%s3610_s25 + $0x2a0] sm:$0xff] }
  0xa1   : > { %v2637_v41 = vadd.f32 %v2636_v55, %v1823_v47  ;;  %v754_v23 = vunpack.c.h.bf16 %v261_v21  ;;  %v1791_v36 = vmul.f32 %v6670_v61, %v748_v57  ;;  %v2601_v27 = vadd.f32 %v1789_v13, %v1788_v46  ;;  %v6672_v62 = vld [vmem:[#allocation21_spill] sm:$0xff]  ;;  %v267_v21 = vld [vmem:[%s3610_s25 + $0x2a8] sm:$0xff] }
  0xa2   : > { %v2566_v59 = vadd.f32 %v2565_v60, %v6671_v20  ;;  %v755_v30 = vunpack.c.l.bf16 %v262_v45  ;;  %v756_v56 = vunpack.c.h.bf16 %v262_v45  ;;  %v757_v44 = vunpack.c.l.bf16 %v263_v17  ;;  %v268_v46 = vld [vmem:[%s3610_s25 + $0x2b0] sm:$0xff]  ;;  %v6673_v20 = vld [vmem:[#allocation7_spill] sm:$0xff] }
  0xa3   : > { %v2638_v1 = vadd.f32 %v2637_v41, %v1824_v38  ;;  %v758_v47 = vunpack.c.h.bf16 %v263_v17  ;;  %v1792_v55 = vmul.f32 %v3760_v25, %v749_v51  ;;  %v2602_v15 = vadd.f32 %v2601_v27, %v1790_v24  ;;  %v6674_v41 = vld [vmem:[#allocation22_spill] sm:$0xff] }
  0xa4   : > { %v2567_v43 = vadd.f32 %v2566_v59, %v6672_v62  ;;  %v759_v22 = vunpack.c.l.bf16 %v264_v58  ;;  %v760_v57 = vunpack.c.h.bf16 %v264_v58  ;;  %v761_v13 = vunpack.c.l.bf16 %v265_v42 }
  0xa5   : > { %v2639_v18 = vadd.f32 %v2638_v1, %v1825_v48  ;;  %v762_v61 = vunpack.c.h.bf16 %v265_v42  ;;  %v1793_v38 = vmul.f32 %v6673_v20, %v750_v35  ;;  %v2603_v60 = vadd.f32 %v2602_v15, %v1791_v36  ;;  %v6675_v1 = vld [vmem:[#allocation23_spill] sm:$0xff]  ;;  %v6676_v15 = vld [vmem:[#allocation24_spill] sm:$0xff] }
  0xa6   : > { %v2568_v45 = vadd.f32 %v2567_v43, %v6674_v41  ;;  %v763_v54 = vunpack.c.l.bf16 %v266_v5  ;;  %v764_v51 = vunpack.c.h.bf16 %v266_v5  ;;  %v765_v24 = vunpack.c.l.bf16 %v267_v21  ;;  %v296_v5 = vld [vmem:[%s3610_s25 + $0x384] sm:$0xff]  ;;  %v297_v41 = vld [vmem:[%s3610_s25 + $0x38c] sm:$0xff] }
  0xa7   : > { %v2640_v17 = vadd.f32 %v2639_v18, %v4337_v50  ;;  %v766_v27 = vunpack.c.h.bf16 %v267_v21  ;;  %v1794_v48 = vmul.f32 %v3767_v8, %v751_v26  ;;  %v2604_v59 = vadd.f32 %v2603_v60, %v1792_v55 }
  0xa8   : > { %v2569_v58 = vadd.f32 %v2568_v45, %v6675_v1  ;;  %v767_v42 = vunpack.c.l.bf16 %v268_v46  ;;  %v768_v35 = vunpack.c.h.bf16 %v268_v46  ;;  %v769_v36 = vunpack.c.l.bf16 %v4319_v52  ;;  %v299_v1 = vld [vmem:[%s3610_s25 + $0x39c] sm:$0xff] }
  0xa9   : > { %v2641_v62 = vadd.f32 %v2640_v17, %v4340_v37  ;;  %v1795_v43 = vmul.f32 %v3770_v9, %v752_v14  ;;  %v1796_v50 = vmul.f32 %v3773_v12, %v753_v40  ;;  %v2605_v18 = vadd.f32 %v2604_v59, %v1793_v38 }
  0xaa   : > { %v2571_v21 = vadd.f32 %v6676_v15, %v2569_v58  ;;  %v1797_v55 = vmul.f32 %v3776_v10, %v754_v23  ;;  %v1798_v60 = vmul.f32 %v3779_v16, %v755_v30  ;;  %v1799_v37 = vmul.f32 %v3782_v19, %v756_v56  ;;  %v4445_v58 = vld [vmem:[%s3610_s25 + $0x3a4] sm:$0xff]  ;;  %v301_v15 = vld [vmem:[%s3610_s25 + $0x3ac] sm:$0xff] }
  0xab   : > { %v2642_v26 = vadd.f32 %v2641_v62, %v4344_v49  ;;  %v1800_v46 = vmul.f32 %v3786_v28, %v757_v44  ;;  %v4411_v52 = vmul.f32 %v3789_v31, %v758_v47  ;;  %v2606_v14 = vadd.f32 %v2605_v18, %v1794_v48 }
  0xac   : > { %2572 = vadd.xlane.f32.xlu0 %v2571_v21  ;;  %v4416_v38 = vmul.f32 %v3792_v32, %v759_v22  ;;  %v820_v49 = vunpack.c.l.bf16 %v296_v5  ;;  %v821_v23 = vunpack.c.h.bf16 %v296_v5  ;;  %v4419_v56 = vmul.f32 %v3795_v33, %v760_v57  ;;  %v302_v21 = vld [vmem:[%s3610_s25 + $0x3b4] sm:$0xff] }
  0xad   : > { %v2643_v40 = vadd.f32 %v2642_v26, %v4347_v2  ;;  %v4422_v30 = vmul.f32 %v3798_v34, %v761_v13  ;;  %v1812_v44 = vmul.f32 %v3827_v3, %v769_v36  ;;  %v2607_v47 = vadd.f32 %v2606_v14, %v1795_v43  ;;  %v6680_v36 = vld [vmem:[#allocation12_spill] sm:$0xff]  ;;  %v6682_v43 = vld [vmem:[#allocation13_spill] sm:$0xff] }
  0xae   : > { %v4427_v2 = vmul.f32 %v3801_v39, %v762_v61  ;;  %v4430_v22 = vmul.f32 %v3805_v63, %v763_v54  ;;  %v822_v17 = vunpack.c.l.bf16 %v297_v41  ;;  %v4433_v48 = vmul.f32 %v3808_v6, %v764_v51 }
  0xaf   : > { %v2644_v45 = vadd.f32 %v2643_v40, %v4350_v4  ;;  %v4436_v57 = vmul.f32 %v3811_v11, %v765_v24  ;;  %v4439_v13 = vmul.f32 %v6647_v7, %v766_v27  ;;  %v2608_v59 = vadd.f32 %v2607_v47, %v1796_v50  ;;  %v298_v4 = vld [vmem:[%s3610_s25 + $0x394] sm:$0xff] }
  0xb0   : > { %6677 = vst [vmem:[#allocation16_spill] sm:$0xff] %v4433_v48  ;;  %v823_v54 = vunpack.c.h.bf16 %v297_v41  ;;  %v1863_v62 = vmul.f32 %v3715_v0, %v820_v49  ;;  %v1864_v51 = vmul.f32 %v6645_v29, %v821_v23  ;;  %v4450_v24 = vmul.f32 %v6680_v36, %v767_v42  ;;  %v6686_v41 = vld [vmem:[#allocation4_spill] sm:$0xff]  ;;  %v6687_v47 = vld [vmem:[#allocation26_spill] sm:$0xff] }
  0xb1   : > { %6678 = vst [vmem:[#allocation17_spill] sm:$0xff] %v4436_v57  ;;  %6679 = vst [vmem:[#allocation18_spill] sm:$0xff] %v4439_v13  ;;  %v2645_v61 = vadd.f32 %v2644_v45, %v4353_v53  ;;  %v4453_v27 = vmul.f32 %v6682_v43, %v768_v35  ;;  %v2609_v50 = vadd.f32 %v2608_v59, %v1797_v55  ;;  %v4456_v18 = vsel %vm2461_vm0, %v1812_v44, 0.0  ;;  %v6685_v53 = vld [vmem:[#allocation25_spill] sm:$0xff]  ;;  %v303_v45 = vld [vmem:[%s3610_s25 + $0x3bc] sm:$0xff] }
  0xb2   : > { %6681 = vst [vmem:[#allocation19_spill] sm:$0xff] %v4450_v24  ;;  %6684 = vst [vmem:[#allocation21_spill] sm:$0xff] %v4456_v18  ;;  %v824_v26 = vunpack.c.l.bf16 %v298_v4  ;;  %v825_v14 = vunpack.c.h.bf16 %v298_v4  ;;  %v1865_v40 = vmul.f32 %v6686_v41, %v822_v17  ;;  %v826_v42 = vunpack.c.l.bf16 %v299_v1  ;;  %v304_v44 = vld [vmem:[%s3610_s25 + $0x3c4] sm:$0xff]  ;;  %v306_v13 = vld [vmem:[%s3610_s25 + $0x3d4] sm:$0xff] }
  0xb3   : > { %6683 = vst [vmem:[#allocation20_spill] sm:$0xff] %v4453_v27  ;;  %v2646_v5 = vadd.f32 %v2645_v61, %v6685_v53  ;;  %v2610_v49 = vadd.f32 %v2609_v50, %v1798_v60  ;;  %v827_v23 = vunpack.c.h.bf16 %v299_v1  ;;  %v828_v35 = vunpack.c.l.bf16 %v4445_v58  ;;  %v6688_v61 = vld [vmem:[#allocation5_spill] sm:$0xff]  ;;  %v6689_v50 = vld [vmem:[#allocation27_spill] sm:$0xff] }
  0xb4   : > { %v829_v59 = vunpack.c.h.bf16 %v4445_v58  ;;  %v1866_v53 = vmul.f32 %v6688_v61, %v823_v54  ;;  %v2682_v18 = vadd.f32 %v1864_v51, %v1863_v62  ;;  %v830_v17 = vunpack.c.l.bf16 %v301_v15  ;;  %v305_v1 = vld [vmem:[%s3610_s25 + $0x3cc] sm:$0xff]  ;;  %v307_v51 = vld [vmem:[%s3610_s25 + $0x3dc] sm:$0xff] }
  0xb5   : > { %v2647_v55 = vadd.f32 %v2646_v5, %v6687_v47  ;;  %v2611_v4 = vadd.f32 %v2610_v49, %v1799_v37  ;;  %v831_v27 = vunpack.c.h.bf16 %v301_v15  ;;  %v832_v60 = vunpack.c.l.bf16 %v302_v21  ;;  %v6690_v54 = vld [vmem:[#allocation28_spill] sm:$0xff]  ;;  %v4475_v37 = vld [vmem:[%s3610_s25 + $0x380] ss:$100 sps:$4 sm:$0xff]  }
  0xb6   : > { %v833_v57 = vunpack.c.h.bf16 %v302_v21  ;;  %v1867_v5 = vmul.f32 %v3760_v25, %v824_v26  ;;  %v2683_v47 = vadd.f32 %v2682_v18, %v1865_v40  ;;  %v834_v48 = vunpack.c.l.bf16 %v303_v45  ;;  %v6691_v18 = vld [vmem:[#allocation15_spill] sm:$0xff] }
  0xb7   : > { %v2648_v24 = vadd.f32 %v2647_v55, %v6689_v50  ;;  %v2612_v41 = vadd.f32 %v2611_v4, %v1800_v46  ;;  %v835_v58 = vunpack.c.h.bf16 %v303_v45  ;;  %v836_v43 = vunpack.c.l.bf16 %v304_v44 }
  0xb8   : > { %v837_v49 = vunpack.c.h.bf16 %v304_v44  ;;  %v1868_v15 = vmul.f32 %v6673_v20, %v825_v14  ;;  %v2684_v61 = vadd.f32 %v2683_v47, %v1866_v53  ;;  %v838_v21 = vunpack.c.l.bf16 %v305_v1  ;;  %v6692_v44 = vld [vmem:[#allocation29_spill] sm:$0xff]  ;;  %v283_v47 = vld [vmem:[%s3610_s25 + $0x320] sm:$0xff] }
  0xb9   : > { %v2649_v62 = vadd.f32 %v2648_v24, %v6690_v54  ;;  %v2613_v55 = vadd.f32 %v2612_v41, %v4411_v52  ;;  %v839_v50 = vunpack.c.h.bf16 %v305_v1  ;;  %v840_v26 = vunpack.c.l.bf16 %v306_v13 }
  0xba   : > { %v841_v40 = vunpack.c.h.bf16 %v306_v13  ;;  %v1869_v45 = vmul.f32 %v3767_v8, %v826_v42  ;;  %v2685_v4 = vadd.f32 %v2684_v61, %v1867_v5  ;;  %v842_v54 = vunpack.c.l.bf16 %v307_v51 }
  0xbb   : > { %v2650_v46 = vadd.f32 %v2649_v62, %v6691_v18  ;;  %v2614_v24 = vadd.f32 %v2613_v55, %v4416_v38  ;;  %v843_v25 = vunpack.c.h.bf16 %v307_v51  ;;  %v844_v14 = vunpack.c.h.bf16 %v4475_v37  ;;  %v284_v51 = vld [vmem:[%s3610_s25 + $0x328] sm:$0xff]  ;;  %v285_v18 = vld [vmem:[%s3610_s25 + $0x330] sm:$0xff] }
  0xbc   : > { %v1870_v52 = vmul.f32 %v3770_v9, %v827_v23  ;;  %v1871_v41 = vmul.f32 %v3773_v12, %v828_v35  ;;  %v2686_v1 = vadd.f32 %v2685_v4, %v1868_v15  ;;  %v1872_v42 = vmul.f32 %v3776_v10, %v829_v59  ;;  %v286_v4 = vld [vmem:[%s3610_s25 + $0x338] sm:$0xff] }
  0xbd   : > { %v2652_v53 = vadd.f32 %v6692_v44, %v2650_v46  ;;  %v2615_v13 = vadd.f32 %v2614_v24, %v4419_v56  ;;  %v1873_v61 = vmul.f32 %v3779_v16, %v830_v17  ;;  %v1874_v38 = vmul.f32 %v3782_v19, %v831_v27 }
  0xbe   : > { %v1875_v5 = vmul.f32 %v3786_v28, %v832_v60  ;;  %v4493_v62 = vmul.f32 %v3789_v31, %v833_v57  ;;  %v4496_v23 = vmul.f32 %v3792_v32, %v834_v48  ;;  %v2687_v35 = vadd.f32 %v2686_v1, %v1869_v45  ;;  %v6701_v1 = vld [vmem:[#allocation16_spill] sm:$0xff] }
  0xbf   : > { %2653 = vadd.xlane.f32.xlu1 %v2652_v53  ;;  %v2616_v56 = vadd.f32 %v2615_v13, %v4422_v30  ;;  %v4501_v59 = vmul.f32 %v3795_v33, %v835_v58  ;;  %v795_v17 = vunpack.c.l.bf16 %v283_v47  ;;  %v796_v27 = vunpack.c.h.bf16 %v283_v47 }
  0xc0   : > { %v4504_v60 = vmul.f32 %v3798_v34, %v836_v43  ;;  %v4507_v57 = vmul.f32 %v3801_v39, %v837_v49  ;;  %v1887_v48 = vmul.f32 %v3827_v3, %v844_v14  ;;  %v2688_v15 = vadd.f32 %v2687_v35, %v1870_v52 }
  0xc1   : > { %v2617_v55 = vadd.f32 %v2616_v56, %v4427_v2  ;;  %v4512_v30 = vmul.f32 %v3805_v63, %v838_v21  ;;  %v4515_v58 = vmul.f32 %v3808_v6, %v839_v50  ;;  %v797_v46 = vunpack.c.l.bf16 %v284_v51  ;;  %v287_v50 = vld [vmem:[%s3610_s25 + $0x340] sm:$0xff] }
  0xc2   : > { %v4519_v43 = vmul.f32 %v3811_v11, %v840_v26  ;;  %v4522_v49 = vmul.f32 %v6647_v7, %v841_v40  ;;  %v4525_v45 = vmul.f32 %v6680_v36, %v842_v54  ;;  %v2689_v2 = vadd.f32 %v2688_v15, %v1871_v41  ;;  %v6698_v26 = vld [vmem:[#allocation13_spill] sm:$0xff]  ;;  %v288_v54 = vld [vmem:[%s3610_s25 + $0x348] sm:$0xff] }
  0xc3   : > { %6693 = vst [vmem:[#allocation22_spill] sm:$0xff] %v4512_v30  ;;  %6694 = vst [vmem:[#allocation23_spill] sm:$0xff] %v4515_v58  ;;  %v2618_v21 = vadd.f32 %v2617_v55, %v4430_v22  ;;  %v798_v24 = vunpack.c.h.bf16 %v284_v51  ;;  %v1838_v14 = vmul.f32 %v3715_v0, %v795_v17  ;;  %v1839_v44 = vmul.f32 %v6645_v29, %v796_v27  ;;  %v289_v22 = vld [vmem:[%s3610_s25 + $0x350] sm:$0xff]  ;;  %v290_v27 = vld [vmem:[%s3610_s25 + $0x358] sm:$0xff] }
  0xc4   : > { %6695 = vst [vmem:[#allocation24_spill] sm:$0xff] %v4519_v43  ;;  %6696 = vst [vmem:[#allocation25_spill] sm:$0xff] %v4522_v49  ;;  %v4533_v53 = vmul.f32 %v6698_v26, %v843_v25  ;;  %v2690_v40 = vadd.f32 %v2689_v2, %v1872_v42  ;;  %v4536_v52 = vsel %vm2461_vm0, %v1887_v48, 0.0  ;;  %v799_v41 = vunpack.c.l.bf16 %v285_v18  ;;  %v6702_v51 = vld [vmem:[#allocation4_spill] sm:$0xff]  ;;  %v6703_v42 = vld [vmem:[#allocation17_spill] sm:$0xff] }
  0xc5   : > { %6697 = vst [vmem:[#allocation26_spill] sm:$0xff] %v4525_v45  ;;  %6700 = vst [vmem:[#allocation28_spill] sm:$0xff] %v4536_v52  ;;  %v2619_v47 = vadd.f32 %v2618_v21, %v6701_v1  ;;  %v800_v13 = vunpack.c.h.bf16 %v285_v18  ;;  %v801_v35 = vunpack.c.l.bf16 %v286_v4  ;;  %v1840_v56 = vmul.f32 %v6702_v51, %v797_v46  ;;  %v291_v48 = vld [vmem:[%s3610_s25 + $0x360] sm:$0xff]  ;;  %v292_v49 = vld [vmem:[%s3610_s25 + $0x368] sm:$0xff] }
  0xc6   : > { %6699 = vst [vmem:[#allocation27_spill] sm:$0xff] %v4533_v53  ;;  %v2691_v17 = vadd.f32 %v2690_v40, %v1873_v61  ;;  %v802_v25 = vunpack.c.h.bf16 %v286_v4  ;;  %v803_v15 = vunpack.c.l.bf16 %v287_v50  ;;  %v804_v55 = vunpack.c.h.bf16 %v287_v50  ;;  %v6704_v53 = vld [vmem:[#allocation5_spill] sm:$0xff]  ;;  %v6705_v46 = vld [vmem:[#allocation18_spill] sm:$0xff]  ;;  %v6707_v29 = vld [vmem:[#allocation19_spill] sm:$0xff] }
  0xc7   : > { %v2620_v2 = vadd.f32 %v2619_v47, %v6703_v42  ;;  %v805_v52 = vunpack.c.l.bf16 %v288_v54  ;;  %v1841_v45 = vmul.f32 %v6704_v53, %v798_v24  ;;  %v2655_v21 = vadd.f32 %v1839_v44, %v1838_v14  ;;  %v293_v40 = vld [vmem:[%s3610_s25 + $0x370] sm:$0xff]  ;;  %v6706_v4 = vld [vmem:[#allocation6_spill] sm:$0xff] }
  0xc8   : > { %v2692_v1 = vadd.f32 %v2691_v17, %v1874_v38  ;;  %v806_v18 = vunpack.c.h.bf16 %v288_v54  ;;  %v807_v43 = vunpack.c.l.bf16 %v289_v22  ;;  %v808_v58 = vunpack.c.h.bf16 %v289_v22  ;;  %v294_v47 = vld [vmem:[%s3610_s25 + $0x378] sm:$0xff] }
  0xc9   : > { %v2621_v61 = vadd.f32 %v2620_v2, %v6705_v46  ;;  %v809_v51 = vunpack.c.l.bf16 %v290_v27  ;;  %v1842_v26 = vmul.f32 %v6706_v4, %v799_v41  ;;  %v2656_v50 = vadd.f32 %v2655_v21, %v1840_v56  ;;  %v6708_v46 = vld [vmem:[#allocation20_spill] sm:$0xff] }
  0xca   : > { %v2693_v36 = vadd.f32 %v2692_v1, %v1875_v5  ;;  %v810_v42 = vunpack.c.h.bf16 %v290_v27  ;;  %v811_v7 = vunpack.c.l.bf16 %v291_v48  ;;  %v812_v30 = vunpack.c.h.bf16 %v291_v48  ;;  %v6709_v1 = vld [vmem:[#allocation21_spill] sm:$0xff] }
  0xcb   : > { %v2622_v24 = vadd.f32 %v2621_v61, %v6707_v29  ;;  %v813_v38 = vunpack.c.l.bf16 %v292_v49  ;;  %v1843_v14 = vmul.f32 %v6673_v20, %v800_v13  ;;  %v2657_v44 = vadd.f32 %v2656_v50, %v1841_v45  ;;  %v322_v45 = vld [vmem:[%s3610_s25 + $0x44c] sm:$0xff]  ;;  %v323_v50 = vld [vmem:[%s3610_s25 + $0x454] sm:$0xff] }
  0xcc   : > { %v2694_v54 = vadd.f32 %v2693_v36, %v4493_v62  ;;  %v814_v22 = vunpack.c.h.bf16 %v292_v49  ;;  %v815_v17 = vunpack.c.l.bf16 %v293_v40  ;;  %v816_v2 = vunpack.c.h.bf16 %v293_v40 }
  0xcd   : > { %v2623_v41 = vadd.f32 %v2622_v24, %v6708_v46  ;;  %v817_v56 = vunpack.c.l.bf16 %v294_v47  ;;  %v1844_v5 = vmul.f32 %v3767_v8, %v801_v35  ;;  %v2658_v27 = vadd.f32 %v2657_v44, %v1842_v26 }
  0xce   : > { %v2695_v48 = vadd.f32 %v2694_v54, %v4496_v23  ;;  %v818_v29 = vunpack.c.h.bf16 %v294_v47  ;;  %v819_v21 = vunpack.c.l.bf16 %v4475_v37  ;;  %v1845_v13 = vmul.f32 %v3770_v9, %v802_v25  ;;  %v325_v54 = vld [vmem:[%s3610_s25 + $0x464] sm:$0xff] }
  0xcf   : > { %v2625_v36 = vadd.f32 %v6709_v1, %v2623_v41  ;;  %v1846_v62 = vmul.f32 %v3773_v12, %v803_v15  ;;  %v1847_v49 = vmul.f32 %v3776_v10, %v804_v55  ;;  %v2659_v61 = vadd.f32 %v2658_v27, %v1843_v14  ;;  %v326_v1 = vld [vmem:[%s3610_s25 + $0x46c] sm:$0xff] }
  0xd0   : > { %v2696_v40 = vadd.f32 %v2695_v48, %v4501_v59  ;;  %v1848_v35 = vmul.f32 %v3779_v16, %v805_v52  ;;  %v1849_v26 = vmul.f32 %v3782_v19, %v806_v18  ;;  %v1850_v23 = vmul.f32 %v3786_v28, %v807_v43 }
  0xd1   : > { %2626 = vadd.xlane.f32.xlu0 %v2625_v36  ;;  %v4569_v37 = vmul.f32 %v3789_v31, %v808_v58  ;;  %v2660_v25 = vadd.f32 %v2659_v61, %v1844_v5  ;;  %v870_v47 = vunpack.c.l.bf16 %v322_v45  ;;  %v871_v15 = vunpack.c.h.bf16 %v322_v45  ;;  %v6712_v5 = vld [vmem:[#allocation3_spill] sm:$0xff]  ;;  %v327_v61 = vld [vmem:[%s3610_s25 + $0x474] sm:$0xff] }
  0xd2   : > { %v2697_v55 = vadd.f32 %v2696_v40, %v4504_v60  ;;  %v4573_v59 = vmul.f32 %v3792_v32, %v809_v51  ;;  %v4576_v52 = vmul.f32 %v3795_v33, %v810_v42  ;;  %v4579_v43 = vmul.f32 %v3798_v34, %v811_v7  ;;  %v324_v42 = vld [vmem:[%s3610_s25 + $0x45c] sm:$0xff] }
  0xd3   : > { %v4582_v18 = vmul.f32 %v3801_v39, %v812_v30  ;;  %v1862_v58 = vmul.f32 %v3827_v3, %v819_v21  ;;  %v2661_v24 = vadd.f32 %v2660_v25, %v1845_v13  ;;  %v872_v14 = vunpack.c.l.bf16 %v323_v50 }
  0xd4   : > { %v2698_v44 = vadd.f32 %v2697_v55, %v4507_v57  ;;  %v4587_v60 = vmul.f32 %v3805_v63, %v813_v38  ;;  %v4590_v51 = vmul.f32 %v3808_v6, %v814_v22  ;;  %v4593_v7 = vmul.f32 %v3811_v11, %v815_v17  ;;  %v6713_v57 = vld [vmem:[#allocation22_spill] sm:$0xff]  ;;  %v6714_v38 = vld [vmem:[#allocation11_spill] sm:$0xff]  ;;  %v6716_v22 = vld [vmem:[#allocation12_spill] sm:$0xff] }
  0xd5   : > { %v2662_v30 = vadd.f32 %v2661_v24, %v1846_v62  ;;  %v873_v46 = vunpack.c.h.bf16 %v323_v50  ;;  %v1913_v41 = vmul.f32 %v3715_v0, %v870_v47  ;;  %v1914_v27 = vmul.f32 %v6712_v5, %v871_v15  ;;  %v6718_v17 = vld [vmem:[#allocation13_spill] sm:$0xff]  ;;  %v6721_v50 = vld [vmem:[#allocation4_spill] sm:$0xff]  ;;  %v6722_v47 = vld [vmem:[#allocation23_spill] sm:$0xff] }
  0xd6   : > { %6710 = vst [vmem:[#allocation15_spill] sm:$0xff] %v4590_v51  ;;  %6711 = vst [vmem:[#allocation29_spill] sm:$0xff] %v4593_v7  ;;  %v2699_v48 = vadd.f32 %v2698_v44, %v6713_v57  ;;  %v4601_v21 = vmul.f32 %v6714_v38, %v816_v2  ;;  %v4604_v13 = vmul.f32 %v6716_v22, %v817_v56  ;;  %v4611_v62 = vsel %vm2461_vm0, %v1862_v58, 0.0  ;;  %v328_v2 = vld [vmem:[%s3610_s25 + $0x47c] sm:$0xff]  ;;  %v6723_v58 = vld [vmem:[#allocation24_spill] sm:$0xff] }
  0xd7   : > { %v4607_v45 = vmul.f32 %v6718_v17, %v818_v29  ;;  %v2663_v36 = vadd.f32 %v2662_v30, %v1847_v49  ;;  %6720 = vst [vmem:[#allocation19_spill] sm:$0xff] %v4611_v62  ;;  %v874_v40 = vunpack.c.l.bf16 %v324_v42  ;;  %v1915_v25 = vmul.f32 %v6721_v50, %v872_v14  ;;  %v329_v29 = vld [vmem:[%s3610_s25 + $0x484] sm:$0xff]  ;;  %v332_v51 = vld [vmem:[%s3610_s25 + $0x49c] sm:$0xff] }
  0xd8   : > { %6715 = vst [vmem:[#allocation16_spill] sm:$0xff] %v4601_v21  ;;  %6717 = vst [vmem:[#allocation17_spill] sm:$0xff] %v4604_v13  ;;  %v2700_v15 = vadd.f32 %v2699_v48, %v6722_v47  ;;  %v875_v55 = vunpack.c.h.bf16 %v324_v42  ;;  %v876_v56 = vunpack.c.l.bf16 %v325_v54  ;;  %v877_v24 = vunpack.c.h.bf16 %v325_v54  ;;  %v331_v47 = vld [vmem:[%s3610_s25 + $0x494] sm:$0xff] }
  0xd9   : > { %6719 = vst [vmem:[#allocation18_spill] sm:$0xff] %v4607_v45  ;;  %v2664_v44 = vadd.f32 %v2663_v36, %v1848_v35  ;;  %v878_v57 = vunpack.c.l.bf16 %v326_v1  ;;  %v1916_v49 = vmul.f32 %v6704_v53, %v873_v46  ;;  %v2736_v30 = vadd.f32 %v1914_v27, %v1913_v41  ;;  %v330_v45 = vld [vmem:[%s3610_s25 + $0x48c] sm:$0xff] }
  0xda   : > { %v2701_v62 = vadd.f32 %v2700_v15, %v6723_v58  ;;  %v879_v13 = vunpack.c.h.bf16 %v326_v1  ;;  %v880_v14 = vunpack.c.l.bf16 %v327_v61  ;;  %v881_v21 = vunpack.c.h.bf16 %v327_v61  ;;  %v6724_v36 = vld [vmem:[#allocation25_spill] sm:$0xff]  ;;  %v333_v15 = vld [vmem:[%s3610_s25 + $0x4a4] sm:$0xff]  ;;  %v6725_v61 = vld [vmem:[#allocation26_spill] sm:$0xff] }
  0xdb   : > { %v2665_v48 = vadd.f32 %v2664_v44, %v1849_v26  ;;  %v882_v42 = vunpack.c.l.bf16 %v328_v2  ;;  %v1917_v54 = vmul.f32 %v6706_v4, %v874_v40  ;;  %v2737_v35 = vadd.f32 %v2736_v30, %v1915_v25  ;;  %v4629_v44 = vld [vmem:[%s3610_s25 + $0x448] ss:$100 sps:$4 sm:$0xff]  }
  0xdc   : > { %v2702_v7 = vadd.f32 %v2701_v62, %v6724_v36  ;;  %v883_v50 = vunpack.c.h.bf16 %v328_v2  ;;  %v884_v46 = vunpack.c.l.bf16 %v329_v29  ;;  %v885_v41 = vunpack.c.h.bf16 %v329_v29 }
  0xdd   : > { %v2666_v27 = vadd.f32 %v2665_v48, %v1850_v23  ;;  %v886_v58 = vunpack.c.l.bf16 %v330_v45  ;;  %v1918_v1 = vmul.f32 %v6673_v20, %v875_v55  ;;  %v2738_v53 = vadd.f32 %v2737_v35, %v1916_v49  ;;  %v6726_v23 = vld [vmem:[#allocation27_spill] sm:$0xff]  ;;  %v6727_v20 = vld [vmem:[#allocation28_spill] sm:$0xff] }
  0xde   : > { %v2703_v26 = vadd.f32 %v2702_v7, %v6725_v61  ;;  %v887_v17 = vunpack.c.h.bf16 %v330_v45  ;;  %v888_v40 = vunpack.c.l.bf16 %v331_v47  ;;  %v889_v25 = vunpack.c.h.bf16 %v331_v47  ;;  %v309_v47 = vld [vmem:[%s3610_s25 + $0x3e8] sm:$0xff] }
  0xdf   : > { %v2667_v62 = vadd.f32 %v2666_v27, %v4569_v37  ;;  %v890_v30 = vunpack.c.l.bf16 %v332_v51  ;;  %v1919_v2 = vmul.f32 %v3767_v8, %v876_v56  ;;  %v2739_v29 = vadd.f32 %v2738_v53, %v1917_v54 }
  0xe0   : > { %v2704_v48 = vadd.f32 %v2703_v26, %v6726_v23  ;;  %v891_v36 = vunpack.c.h.bf16 %v332_v51  ;;  %v892_v55 = vunpack.c.l.bf16 %v333_v15  ;;  %v893_v49 = vunpack.c.h.bf16 %v333_v15  ;;  %v310_v26 = vld [vmem:[%s3610_s25 + $0x3f0] sm:$0xff] }
  0xe1   : > { %v2668_v7 = vadd.f32 %v2667_v62, %v4573_v59  ;;  %v894_v35 = vunpack.c.h.bf16 %v4629_v44  ;;  %v1920_v45 = vmul.f32 %v3770_v9, %v877_v24  ;;  %v2740_v61 = vadd.f32 %v2739_v29, %v1918_v1  ;;  %v311_v29 = vld [vmem:[%s3610_s25 + $0x3f8] sm:$0xff] }
  0xe2   : > { %v2706_v37 = vadd.f32 %v6727_v20, %v2704_v48  ;;  %v1921_v27 = vmul.f32 %v3773_v12, %v878_v57  ;;  %v1922_v53 = vmul.f32 %v3776_v10, %v879_v13  ;;  %v1923_v56 = vmul.f32 %v3779_v16, %v880_v14 }
  0xe3   : > { %v2669_v51 = vadd.f32 %v2668_v7, %v4576_v52  ;;  %v1924_v54 = vmul.f32 %v3782_v19, %v881_v21  ;;  %v1925_v59 = vmul.f32 %v3786_v28, %v882_v42  ;;  %v2741_v15 = vadd.f32 %v2740_v61, %v1919_v2  ;;  %v313_v61 = vld [vmem:[%s3610_s25 + $0x408] sm:$0xff] }
  0xe4   : > { %2707 = vadd.xlane.f32.xlu1 %v2706_v37  ;;  %v4647_v24 = vmul.f32 %v3789_v31, %v883_v50  ;;  %v4650_v20 = vmul.f32 %v3792_v32, %v884_v46  ;;  %v845_v57 = vunpack.c.l.bf16 %v309_v47  ;;  %v846_v13 = vunpack.c.h.bf16 %v309_v47  ;;  %v314_v47 = vld [vmem:[%s3610_s25 + $0x410] sm:$0xff] }
  0xe5   : > { %v2670_v14 = vadd.f32 %v2669_v51, %v4579_v43  ;;  %v4654_v52 = vmul.f32 %v3795_v33, %v885_v41  ;;  %v4657_v21 = vmul.f32 %v3798_v34, %v886_v58  ;;  %v2742_v42 = vadd.f32 %v2741_v15, %v1920_v45  ;;  %v6735_v51 = vld [vmem:[#allocation4_spill] sm:$0xff] }
  0xe6   : > { %v4660_v1 = vmul.f32 %v3801_v39, %v887_v17  ;;  %v4663_v50 = vmul.f32 %v3805_v63, %v888_v40  ;;  %v1937_v46 = vmul.f32 %v3827_v3, %v894_v35  ;;  %v847_v62 = vunpack.c.l.bf16 %v310_v26  ;;  %v312_v40 = vld [vmem:[%s3610_s25 + $0x400] sm:$0xff] }
  0xe7   : > { %v2671_v2 = vadd.f32 %v2670_v14, %v4582_v18  ;;  %v4668_v43 = vmul.f32 %v3808_v6, %v889_v25  ;;  %v4671_v41 = vmul.f32 %v3811_v11, %v890_v30  ;;  %v2743_v58 = vadd.f32 %v2742_v42, %v1921_v27  ;;  %v6732_v30 = vld [vmem:[#allocation13_spill] sm:$0xff] }
  0xe8   : > { %v4675_v17 = vmul.f32 %v6714_v38, %v891_v36  ;;  %v848_v23 = vunpack.c.h.bf16 %v310_v26  ;;  %v1888_v48 = vmul.f32 %v3715_v0, %v845_v57  ;;  %v1889_v7 = vmul.f32 %v6712_v5, %v846_v13  ;;  %v6736_v26 = vld [vmem:[#allocation15_spill] sm:$0xff] }
  0xe9   : > { %6728 = vst [vmem:[#allocation20_spill] sm:$0xff] %v4668_v43  ;;  %6729 = vst [vmem:[#allocation21_spill] sm:$0xff] %v4671_v41  ;;  %v2672_v18 = vadd.f32 %v2671_v2, %v4587_v60  ;;  %v4682_v25 = vmul.f32 %v6716_v22, %v892_v55  ;;  %v4685_v35 = vmul.f32 %v6732_v30, %v893_v49  ;;  %v4689_v36 = vsel %vm2461_vm0, %v1937_v46, 0.0  ;;  %v315_v55 = vld [vmem:[%s3610_s25 + $0x418] sm:$0xff]  ;;  %v316_v49 = vld [vmem:[%s3610_s25 + $0x420] sm:$0xff] }
  0xea   : > { %6730 = vst [vmem:[#allocation22_spill] sm:$0xff] %v4675_v17  ;;  %v2744_v45 = vadd.f32 %v2743_v58, %v1922_v53  ;;  %6734 = vst [vmem:[#allocation25_spill] sm:$0xff] %v4689_v36  ;;  %v849_v37 = vunpack.c.l.bf16 %v311_v29  ;;  %v850_v27 = vunpack.c.h.bf16 %v311_v29  ;;  %v1890_v15 = vmul.f32 %v6735_v51, %v847_v62  ;;  %v6737_v2 = vld [vmem:[#allocation5_spill] sm:$0xff] }
  0xeb   : > { %6731 = vst [vmem:[#allocation23_spill] sm:$0xff] %v4682_v25  ;;  %6733 = vst [vmem:[#allocation24_spill] sm:$0xff] %v4685_v35  ;;  %v2673_v60 = vadd.f32 %v2672_v18, %v6736_v26  ;;  %v851_v13 = vunpack.c.l.bf16 %v312_v40  ;;  %v852_v14 = vunpack.c.h.bf16 %v312_v40  ;;  %v853_v42 = vunpack.c.l.bf16 %v313_v61  ;;  %v6738_v36 = vld [vmem:[#allocation29_spill] sm:$0xff]  ;;  %v317_v25 = vld [vmem:[%s3610_s25 + $0x428] sm:$0xff] }
  0xec   : > { %v2745_v57 = vadd.f32 %v2744_v45, %v1923_v56  ;;  %v854_v53 = vunpack.c.h.bf16 %v313_v61  ;;  %v1891_v46 = vmul.f32 %v6737_v2, %v848_v23  ;;  %v2709_v58 = vadd.f32 %v1889_v7, %v1888_v48  ;;  %v318_v41 = vld [vmem:[%s3610_s25 + $0x430] sm:$0xff]  ;;  %v319_v61 = vld [vmem:[%s3610_s25 + $0x438] sm:$0xff]  ;;  %v320_v48 = vld [vmem:[%s3610_s25 + $0x440] sm:$0xff] }
  0xed   : > { %v2674_v35 = vadd.f32 %v2673_v60, %v6738_v36  ;;  %v855_v62 = vunpack.c.l.bf16 %v314_v47  ;;  %v856_v17 = vunpack.c.h.bf16 %v314_v47  ;;  %v857_v18 = vunpack.c.l.bf16 %v315_v55  ;;  %v6739_v26 = vld [vmem:[#allocation16_spill] sm:$0xff]  ;;  %v6740_v36 = vld [vmem:[#allocation7_spill] sm:$0xff] }
  0xee   : > { %v2746_v29 = vadd.f32 %v2745_v57, %v1924_v54  ;;  %v858_v56 = vunpack.c.h.bf16 %v315_v55  ;;  %v1892_v45 = vmul.f32 %v6706_v4, %v849_v37  ;;  %v2710_v40 = vadd.f32 %v2709_v58, %v1890_v15  ;;  %v6741_v57 = vld [vmem:[#allocation17_spill] sm:$0xff] }
  0xef   : > { %v2675_v51 = vadd.f32 %v2674_v35, %v6739_v26  ;;  %v859_v30 = vunpack.c.l.bf16 %v316_v49  ;;  %v860_v23 = vunpack.c.h.bf16 %v316_v49  ;;  %v861_v7 = vunpack.c.l.bf16 %v317_v25 }
  0xf0   : > { %v2747_v43 = vadd.f32 %v2746_v29, %v1925_v59  ;;  %v862_v2 = vunpack.c.h.bf16 %v317_v25  ;;  %v1893_v54 = vmul.f32 %v6740_v36, %v850_v27  ;;  %v2711_v60 = vadd.f32 %v2710_v40, %v1891_v46  ;;  %v6742_v29 = vld [vmem:[#allocation18_spill] sm:$0xff]  ;;  %v6743_v40 = vld [vmem:[#allocation19_spill] sm:$0xff] }
  0xf1   : > { %v2676_v47 = vadd.f32 %v2675_v51, %v6741_v57  ;;  %v863_v22 = vunpack.c.l.bf16 %v318_v41  ;;  %v864_v37 = vunpack.c.h.bf16 %v318_v41  ;;  %v865_v15 = vunpack.c.l.bf16 %v319_v61  ;;  %v348_v41 = vld [vmem:[%s3610_s25 + $0x514] sm:$0xff]  ;;  %v349_v57 = vld [vmem:[%s3610_s25 + $0x51c] sm:$0xff] }
  0xf2   : > { %v2748_v55 = vadd.f32 %v2747_v43, %v4647_v24  ;;  %v866_v58 = vunpack.c.h.bf16 %v319_v61  ;;  %v1894_v59 = vmul.f32 %v3767_v8, %v851_v13  ;;  %v2712_v35 = vadd.f32 %v2711_v60, %v1892_v45 }
  0xf3   : > { %v2677_v49 = vadd.f32 %v2676_v47, %v6742_v29  ;;  %v867_v25 = vunpack.c.l.bf16 %v320_v48  ;;  %v868_v27 = vunpack.c.h.bf16 %v320_v48  ;;  %v869_v46 = vunpack.c.l.bf16 %v4629_v44  ;;  %v351_v29 = vld [vmem:[%s3610_s25 + $0x52c] sm:$0xff] }
  0xf4   : > { %v2749_v26 = vadd.f32 %v2748_v55, %v4650_v20  ;;  %v1895_v51 = vmul.f32 %v3770_v9, %v852_v14  ;;  %v1896_v24 = vmul.f32 %v3773_v12, %v853_v42  ;;  %v2713_v43 = vadd.f32 %v2712_v35, %v1893_v54 }
  0xf5   : > { %v2679_v61 = vadd.f32 %v6743_v40, %v2677_v49  ;;  %v1897_v45 = vmul.f32 %v3776_v10, %v854_v53  ;;  %v1898_v60 = vmul.f32 %v3779_v16, %v855_v62  ;;  %v1899_v20 = vmul.f32 %v3782_v19, %v856_v17  ;;  %v4755_v49 = vld [vmem:[%s3610_s25 + $0x534] sm:$0xff]  ;;  %v353_v40 = vld [vmem:[%s3610_s25 + $0x53c] sm:$0xff] }
  0xf6   : > { %v2750_v13 = vadd.f32 %v2749_v26, %v4654_v52  ;;  %v1900_v48 = vmul.f32 %v3786_v28, %v857_v18  ;;  %v4721_v44 = vmul.f32 %v3789_v31, %v858_v56  ;;  %v2714_v14 = vadd.f32 %v2713_v43, %v1894_v59 }
  0xf7   : > { %2680 = vadd.xlane.f32.xlu0 %v2679_v61  ;;  %v4726_v54 = vmul.f32 %v3792_v32, %v859_v30  ;;  %v920_v52 = vunpack.c.l.bf16 %v348_v41  ;;  %v921_v53 = vunpack.c.h.bf16 %v348_v41  ;;  %v4729_v17 = vmul.f32 %v3795_v33, %v860_v23  ;;  %v354_v61 = vld [vmem:[%s3610_s25 + $0x544] sm:$0xff] }
  0xf8   : > { %v2751_v42 = vadd.f32 %v2750_v13, %v4657_v21  ;;  %v4732_v62 = vmul.f32 %v3798_v34, %v861_v7  ;;  %v1912_v18 = vmul.f32 %v3827_v3, %v869_v46  ;;  %v2715_v56 = vadd.f32 %v2714_v14, %v1895_v51  ;;  %v6747_v46 = vld [vmem:[#allocation12_spill] sm:$0xff]  ;;  %v6749_v51 = vld [vmem:[#allocation13_spill] sm:$0xff] }
  0xf9   : > { %v4737_v21 = vmul.f32 %v3801_v39, %v862_v2  ;;  %v4740_v30 = vmul.f32 %v3805_v63, %v863_v22  ;;  %v922_v55 = vunpack.c.l.bf16 %v349_v57  ;;  %v4743_v59 = vmul.f32 %v3808_v6, %v864_v37 }
  0xfa   : > { %v2752_v47 = vadd.f32 %v2751_v42, %v4660_v1  ;;  %v4746_v23 = vmul.f32 %v3811_v11, %v865_v15  ;;  %v4749_v7 = vmul.f32 %v6714_v38, %v866_v58  ;;  %v2716_v35 = vadd.f32 %v2715_v56, %v1896_v24  ;;  %v350_v1 = vld [vmem:[%s3610_s25 + $0x524] sm:$0xff]  ;;  %v6754_v56 = vld [vmem:[#allocation21_spill] sm:$0xff] }
  0xfb   : > { %6744 = vst [vmem:[#allocation26_spill] sm:$0xff] %v4743_v59  ;;  %v923_v22 = vunpack.c.h.bf16 %v349_v57  ;;  %v1963_v26 = vmul.f32 %v3715_v0, %v920_v52  ;;  %v1964_v37 = vmul.f32 %v6712_v5, %v921_v53  ;;  %v4760_v15 = vmul.f32 %v6747_v46, %v867_v25  ;;  %v6753_v57 = vld [vmem:[#allocation4_spill] sm:$0xff] }
  0xfc   : > { %6745 = vst [vmem:[#allocation27_spill] sm:$0xff] %v4746_v23  ;;  %6746 = vst [vmem:[#allocation28_spill] sm:$0xff] %v4749_v7  ;;  %v2753_v2 = vadd.f32 %v2752_v47, %v4663_v50  ;;  %v4763_v58 = vmul.f32 %v6749_v51, %v868_v27  ;;  %v2717_v24 = vadd.f32 %v2716_v35, %v1897_v45  ;;  %v4766_v43 = vsel %vm2461_vm0, %v1912_v18, 0.0  ;;  %v6752_v50 = vld [vmem:[#allocation20_spill] sm:$0xff]  ;;  %v356_v18 = vld [vmem:[%s3610_s25 + $0x554] sm:$0xff] }
  0xfd   : > { %6748 = vst [vmem:[#allocation15_spill] sm:$0xff] %v4760_v15  ;;  %6751 = vst [vmem:[#allocation16_spill] sm:$0xff] %v4766_v43  ;;  %v924_v13 = vunpack.c.l.bf16 %v350_v1  ;;  %v925_v14 = vunpack.c.h.bf16 %v350_v1  ;;  %v1965_v42 = vmul.f32 %v6753_v57, %v922_v55  ;;  %v926_v25 = vunpack.c.l.bf16 %v351_v29  ;;  %v355_v47 = vld [vmem:[%s3610_s25 + $0x54c] sm:$0xff]  ;;  %v358_v7 = vld [vmem:[%s3610_s25 + $0x564] sm:$0xff] }
  0xfe   : > { %6750 = vst [vmem:[#allocation29_spill] sm:$0xff] %v4763_v58  ;;  %v2754_v41 = vadd.f32 %v2753_v2, %v6752_v50  ;;  %v2718_v52 = vadd.f32 %v2717_v24, %v1898_v60  ;;  %v927_v53 = vunpack.c.h.bf16 %v351_v29  ;;  %v928_v27 = vunpack.c.l.bf16 %v4755_v49  ;;  %v6755_v2 = vld [vmem:[#allocation5_spill] sm:$0xff]  ;;  %v6756_v24 = vld [vmem:[#allocation22_spill] sm:$0xff] }
  0xff   : > { %v929_v35 = vunpack.c.h.bf16 %v4755_v49  ;;  %v1966_v50 = vmul.f32 %v6755_v2, %v923_v22  ;;  %v2790_v43 = vadd.f32 %v1964_v37, %v1963_v26  ;;  %v930_v55 = vunpack.c.l.bf16 %v353_v40  ;;  %v357_v29 = vld [vmem:[%s3610_s25 + $0x55c] sm:$0xff]  ;;  %v359_v37 = vld [vmem:[%s3610_s25 + $0x56c] sm:$0xff] }
 0x100   : > { %v2755_v45 = vadd.f32 %v2754_v41, %v6754_v56  ;;  %v2719_v1 = vadd.f32 %v2718_v52, %v1899_v20  ;;  %v931_v58 = vunpack.c.h.bf16 %v353_v40  ;;  %v932_v60 = vunpack.c.l.bf16 %v354_v61  ;;  %v6757_v22 = vld [vmem:[#allocation23_spill] sm:$0xff]  ;;  %v4785_v20 = vld [vmem:[%s3610_s25 + $0x510] ss:$100 sps:$4 sm:$0xff]  }
 0x101   : > { %v933_v23 = vunpack.c.h.bf16 %v354_v61  ;;  %v1967_v41 = vmul.f32 %v6706_v4, %v924_v13  ;;  %v2791_v56 = vadd.f32 %v2790_v43, %v1965_v42  ;;  %v934_v59 = vunpack.c.l.bf16 %v355_v47  ;;  %v6758_v43 = vld [vmem:[#allocation24_spill] sm:$0xff] }
 0x102   : > { %v2756_v15 = vadd.f32 %v2755_v45, %v6756_v24  ;;  %v2720_v57 = vadd.f32 %v2719_v1, %v1900_v48  ;;  %v935_v49 = vunpack.c.h.bf16 %v355_v47  ;;  %v936_v51 = vunpack.c.l.bf16 %v356_v18 }
 0x103   : > { %v937_v52 = vunpack.c.h.bf16 %v356_v18  ;;  %v1968_v40 = vmul.f32 %v6740_v36, %v925_v14  ;;  %v2792_v2 = vadd.f32 %v2791_v56, %v1966_v50  ;;  %v938_v61 = vunpack.c.l.bf16 %v357_v29  ;;  %v6759_v18 = vld [vmem:[#allocation25_spill] sm:$0xff] }
 0x104   : > { %v2757_v26 = vadd.f32 %v2756_v15, %v6757_v22  ;;  %v2721_v45 = vadd.f32 %v2720_v57, %v4721_v44  ;;  %v939_v24 = vunpack.c.h.bf16 %v357_v29  ;;  %v940_v13 = vunpack.c.l.bf16 %v358_v7  ;;  %v335_v56 = vld [vmem:[%s3610_s25 + $0x4b0] sm:$0xff] }
 0x105   : > { %v941_v42 = vunpack.c.h.bf16 %v358_v7  ;;  %v1969_v47 = vmul.f32 %v3767_v8, %v926_v25  ;;  %v2793_v1 = vadd.f32 %v2792_v2, %v1967_v41  ;;  %v942_v22 = vunpack.c.l.bf16 %v359_v37 }
 0x106   : > { %v2758_v48 = vadd.f32 %v2757_v26, %v6758_v43  ;;  %v2722_v15 = vadd.f32 %v2721_v45, %v4726_v54  ;;  %v943_v4 = vunpack.c.h.bf16 %v359_v37  ;;  %v944_v14 = vunpack.c.h.bf16 %v4785_v20  ;;  %v336_v37 = vld [vmem:[%s3610_s25 + $0x4b8] sm:$0xff]  ;;  %v337_v43 = vld [vmem:[%s3610_s25 + $0x4c0] sm:$0xff] }
 0x107   : > { %v1970_v44 = vmul.f32 %v3770_v9, %v927_v53  ;;  %v1971_v57 = vmul.f32 %v3773_v12, %v928_v27  ;;  %v2794_v29 = vadd.f32 %v2793_v1, %v1968_v40  ;;  %v1972_v25 = vmul.f32 %v3776_v10, %v929_v35  ;;  %v338_v1 = vld [vmem:[%s3610_s25 + $0x4c8] sm:$0xff] }
 0x108   : > { %v2760_v50 = vadd.f32 %v6759_v18, %v2758_v48  ;;  %v2723_v7 = vadd.f32 %v2722_v15, %v4729_v17  ;;  %v1973_v2 = vmul.f32 %v3779_v16, %v930_v55  ;;  %v1974_v54 = vmul.f32 %v3782_v19, %v931_v58 }
 0x109   : > { %v1975_v41 = vmul.f32 %v3786_v28, %v932_v60  ;;  %v4803_v26 = vmul.f32 %v3789_v31, %v933_v23  ;;  %v4806_v53 = vmul.f32 %v3792_v32, %v934_v59  ;;  %v2795_v27 = vadd.f32 %v2794_v29, %v1969_v47  ;;  %v6768_v29 = vld [vmem:[#allocation26_spill] sm:$0xff] }
 0x10a   : > { %2761 = vadd.xlane.f32.xlu1 %v2760_v50  ;;  %v2724_v17 = vadd.f32 %v2723_v7, %v4732_v62  ;;  %v4811_v35 = vmul.f32 %v3795_v33, %v935_v49  ;;  %v895_v55 = vunpack.c.l.bf16 %v335_v56  ;;  %v896_v58 = vunpack.c.h.bf16 %v335_v56 }
 0x10b   : > { %v4814_v60 = vmul.f32 %v3798_v34, %v936_v51  ;;  %v4817_v23 = vmul.f32 %v3801_v39, %v937_v52  ;;  %v1987_v59 = vmul.f32 %v3827_v3, %v944_v14  ;;  %v2796_v40 = vadd.f32 %v2795_v27, %v1970_v44 }
 0x10c   : > { %v2725_v45 = vadd.f32 %v2724_v17, %v4737_v21  ;;  %v4822_v62 = vmul.f32 %v3805_v63, %v938_v61  ;;  %v4825_v49 = vmul.f32 %v3808_v6, %v939_v24  ;;  %v897_v48 = vunpack.c.l.bf16 %v336_v37  ;;  %v339_v24 = vld [vmem:[%s3610_s25 + $0x4d0] sm:$0xff] }
 0x10d   : > { %v4829_v51 = vmul.f32 %v3811_v11, %v940_v13  ;;  %v4832_v52 = vmul.f32 %v6714_v38, %v941_v42  ;;  %v4835_v47 = vmul.f32 %v6747_v46, %v942_v22  ;;  %v2797_v21 = vadd.f32 %v2796_v40, %v1971_v57  ;;  %v6765_v13 = vld [vmem:[#allocation13_spill] sm:$0xff] }
 0x10e   : > { %6760 = vst [vmem:[#allocation17_spill] sm:$0xff] %v4822_v62  ;;  %6761 = vst [vmem:[#allocation18_spill] sm:$0xff] %v4825_v49  ;;  %v2726_v61 = vadd.f32 %v2725_v45, %v4740_v30  ;;  %v898_v15 = vunpack.c.h.bf16 %v336_v37  ;;  %v1938_v14 = vmul.f32 %v3715_v0, %v895_v55  ;;  %v1939_v18 = vmul.f32 %v6712_v5, %v896_v58  ;;  %v340_v22 = vld [vmem:[%s3610_s25 + $0x4d8] sm:$0xff]  ;;  %v341_v30 = vld [vmem:[%s3610_s25 + $0x4e0] sm:$0xff] }
 0x10f   : > { %6762 = vst [vmem:[#allocation19_spill] sm:$0xff] %v4829_v51  ;;  %6763 = vst [vmem:[#allocation20_spill] sm:$0xff] %v4832_v52  ;;  %v4843_v50 = vmul.f32 %v6765_v13, %v943_v4  ;;  %v2798_v42 = vadd.f32 %v2797_v21, %v1972_v25  ;;  %v4846_v44 = vsel %vm2461_vm0, %v1987_v59, 0.0  ;;  %v899_v57 = vunpack.c.l.bf16 %v337_v43  ;;  %v6769_v37 = vld [vmem:[#allocation4_spill] sm:$0xff]  ;;  %v6770_v25 = vld [vmem:[#allocation27_spill] sm:$0xff] }
 0x110   : > { %6764 = vst [vmem:[#allocation21_spill] sm:$0xff] %v4835_v47  ;;  %6767 = vst [vmem:[#allocation23_spill] sm:$0xff] %v4846_v44  ;;  %v2727_v56 = vadd.f32 %v2726_v61, %v6768_v29  ;;  %v900_v7 = vunpack.c.h.bf16 %v337_v43  ;;  %v901_v27 = vunpack.c.l.bf16 %v338_v1  ;;  %v1940_v17 = vmul.f32 %v6769_v37, %v897_v48  ;;  %v342_v58 = vld [vmem:[%s3610_s25 + $0x4e8] sm:$0xff]  ;;  %v343_v59 = vld [vmem:[%s3610_s25 + $0x4f0] sm:$0xff] }
 0x111   : > { %6766 = vst [vmem:[#allocation22_spill] sm:$0xff] %v4843_v50  ;;  %v2799_v55 = vadd.f32 %v2798_v42, %v1973_v2  ;;  %v902_v4 = vunpack.c.h.bf16 %v338_v1  ;;  %v903_v40 = vunpack.c.l.bf16 %v339_v24  ;;  %v904_v45 = vunpack.c.h.bf16 %v339_v24  ;;  %v6771_v50 = vld [vmem:[#allocation5_spill] sm:$0xff]  ;;  %v6772_v48 = vld [vmem:[#allocation28_spill] sm:$0xff]  ;;  %v345_v42 = vld [vmem:[%s3610_s25 + $0x500] sm:$0xff] }
 0x112   : > { %v2728_v21 = vadd.f32 %v2727_v56, %v6770_v25  ;;  %v905_v44 = vunpack.c.l.bf16 %v340_v22  ;;  %v1941_v47 = vmul.f32 %v6771_v50, %v898_v15  ;;  %v2763_v61 = vadd.f32 %v1939_v18, %v1938_v14  ;;  %v344_v52 = vld [vmem:[%s3610_s25 + $0x4f8] sm:$0xff]  ;;  %v346_v56 = vld [vmem:[%s3610_s25 + $0x508] sm:$0xff] }
 0x113   : > { %v2800_v29 = vadd.f32 %v2799_v55, %v1974_v54  ;;  %v906_v43 = vunpack.c.h.bf16 %v340_v22  ;;  %v907_v51 = vunpack.c.l.bf16 %v341_v30  ;;  %v908_v49 = vunpack.c.h.bf16 %v341_v30  ;;  %v6773_v1 = vld [vmem:[#allocation6_spill] sm:$0xff]  ;;  %v6774_v5 = vld [vmem:[#allocation15_spill] sm:$0xff] }
 0x114   : > { %v2729_v2 = vadd.f32 %v2728_v21, %v6772_v48  ;;  %v909_v37 = vunpack.c.l.bf16 %v342_v58  ;;  %v1942_v13 = vmul.f32 %v6773_v1, %v899_v57  ;;  %v2764_v24 = vadd.f32 %v2763_v61, %v1940_v17  ;;  %v6775_v48 = vld [vmem:[#allocation29_spill] sm:$0xff] }
 0x115   : > { %v2801_v46 = vadd.f32 %v2800_v29, %v1975_v41  ;;  %v910_v25 = vunpack.c.h.bf16 %v342_v58  ;;  %v911_v38 = vunpack.c.l.bf16 %v343_v59  ;;  %v912_v62 = vunpack.c.h.bf16 %v343_v59  ;;  %v6776_v29 = vld [vmem:[#allocation16_spill] sm:$0xff] }
 0x116   : > { %v2730_v15 = vadd.f32 %v2729_v2, %v6774_v5  ;;  %v913_v54 = vunpack.c.l.bf16 %v344_v52  ;;  %v1943_v14 = vmul.f32 %v6740_v36, %v900_v7  ;;  %v2765_v18 = vadd.f32 %v2764_v24, %v1941_v47  ;;  %v374_v47 = vld [vmem:[%s3610_s25 + $0x5dc] sm:$0xff]  ;;  %v375_v24 = vld [vmem:[%s3610_s25 + $0x5e4] sm:$0xff] }
 0x117   : > { %v2802_v22 = vadd.f32 %v2801_v46, %v4803_v26  ;;  %v914_v30 = vunpack.c.h.bf16 %v344_v52  ;;  %v915_v55 = vunpack.c.l.bf16 %v345_v42  ;;  %v916_v21 = vunpack.c.h.bf16 %v345_v42 }
 0x118   : > { %v2731_v57 = vadd.f32 %v2730_v15, %v6775_v48  ;;  %v917_v17 = vunpack.c.l.bf16 %v346_v56  ;;  %v1944_v41 = vmul.f32 %v3767_v8, %v901_v27  ;;  %v2766_v58 = vadd.f32 %v2765_v18, %v1942_v13 }
 0x119   : > { %v2803_v59 = vadd.f32 %v2802_v22, %v4806_v53  ;;  %v918_v5 = vunpack.c.h.bf16 %v346_v56  ;;  %v919_v61 = vunpack.c.l.bf16 %v4785_v20  ;;  %v1945_v7 = vmul.f32 %v3770_v9, %v902_v4  ;;  %v377_v22 = vld [vmem:[%s3610_s25 + $0x5f4] sm:$0xff] }
 0x11a   : > { %v2733_v46 = vadd.f32 %v6776_v29, %v2731_v57  ;;  %v1946_v26 = vmul.f32 %v3773_v12, %v903_v40  ;;  %v1947_v52 = vmul.f32 %v3776_v10, %v904_v45  ;;  %v2767_v2 = vadd.f32 %v2766_v58, %v1943_v14  ;;  %v378_v29 = vld [vmem:[%s3610_s25 + $0x5fc] sm:$0xff] }
 0x11b   : > { %v2804_v42 = vadd.f32 %v2803_v59, %v4811_v35  ;;  %v1948_v27 = vmul.f32 %v3779_v16, %v905_v44  ;;  %v1949_v13 = vmul.f32 %v3782_v19, %v906_v43  ;;  %v1950_v53 = vmul.f32 %v3786_v28, %v907_v51 }
 0x11c   : > { %2734 = vadd.xlane.f32.xlu0 %v2733_v46  ;;  %v4879_v20 = vmul.f32 %v3789_v31, %v908_v49  ;;  %v2768_v4 = vadd.f32 %v2767_v2, %v1944_v41  ;;  %v970_v56 = vunpack.c.l.bf16 %v374_v47  ;;  %v971_v40 = vunpack.c.h.bf16 %v374_v47  ;;  %v6779_v41 = vld [vmem:[#allocation3_spill] sm:$0xff] }
 0x11d   : > { %v2805_v45 = vadd.f32 %v2804_v42, %v4814_v60  ;;  %v4883_v35 = vmul.f32 %v3792_v32, %v909_v37  ;;  %v4886_v44 = vmul.f32 %v3795_v33, %v910_v25  ;;  %v4889_v51 = vmul.f32 %v3798_v34, %v911_v38  ;;  %v376_v25 = vld [vmem:[%s3610_s25 + $0x5ec] sm:$0xff]  ;;  %v379_v2 = vld [vmem:[%s3610_s25 + $0x604] sm:$0xff] }
 0x11e   : > { %v4892_v43 = vmul.f32 %v3801_v39, %v912_v62  ;;  %v1962_v49 = vmul.f32 %v3827_v3, %v919_v61  ;;  %v2769_v15 = vadd.f32 %v2768_v4, %v1945_v7  ;;  %v972_v14 = vunpack.c.l.bf16 %v375_v24 }
 0x11f   : > { %v2806_v18 = vadd.f32 %v2805_v45, %v4817_v23  ;;  %v4897_v60 = vmul.f32 %v3805_v63, %v913_v54  ;;  %v4900_v37 = vmul.f32 %v3808_v6, %v914_v30  ;;  %v4903_v38 = vmul.f32 %v3811_v11, %v915_v55  ;;  %v6780_v23 = vld [vmem:[#allocation17_spill] sm:$0xff]  ;;  %v6781_v54 = vld [vmem:[#allocation11_spill] sm:$0xff]  ;;  %v6783_v30 = vld [vmem:[#allocation12_spill] sm:$0xff] }
 0x120   : > { %v2770_v62 = vadd.f32 %v2769_v15, %v1946_v26  ;;  %v973_v48 = vunpack.c.h.bf16 %v375_v24  ;;  %v2013_v57 = vmul.f32 %v3715_v0, %v970_v56  ;;  %v2014_v58 = vmul.f32 %v6779_v41, %v971_v40  ;;  %v6785_v55 = vld [vmem:[#allocation13_spill] sm:$0xff]  ;;  %v6788_v24 = vld [vmem:[#allocation4_spill] sm:$0xff]  ;;  %v6789_v56 = vld [vmem:[#allocation18_spill] sm:$0xff] }
 0x121   : > { %6777 = vst [vmem:[#allocation24_spill] sm:$0xff] %v4900_v37  ;;  %6778 = vst [vmem:[#allocation25_spill] sm:$0xff] %v4903_v38  ;;  %v2807_v59 = vadd.f32 %v2806_v18, %v6780_v23  ;;  %v4911_v61 = vmul.f32 %v6781_v54, %v916_v21  ;;  %v4914_v7 = vmul.f32 %v6783_v30, %v917_v17  ;;  %v4921_v26 = vsel %vm2461_vm0, %v1962_v49, 0.0  ;;  %v380_v21 = vld [vmem:[%s3610_s25 + $0x60c] sm:$0xff]  ;;  %v6790_v49 = vld [vmem:[#allocation19_spill] sm:$0xff] }
 0x122   : > { %v4917_v47 = vmul.f32 %v6785_v55, %v918_v5  ;;  %v2771_v46 = vadd.f32 %v2770_v62, %v1947_v52  ;;  %6787 = vst [vmem:[#allocation15_spill] sm:$0xff] %v4921_v26  ;;  %v974_v42 = vunpack.c.l.bf16 %v376_v25  ;;  %v2015_v4 = vmul.f32 %v6788_v24, %v972_v14  ;;  %v381_v5 = vld [vmem:[%s3610_s25 + $0x614] sm:$0xff]  ;;  %v384_v37 = vld [vmem:[%s3610_s25 + $0x62c] sm:$0xff] }
 0x123   : > { %6782 = vst [vmem:[#allocation26_spill] sm:$0xff] %v4911_v61  ;;  %6784 = vst [vmem:[#allocation27_spill] sm:$0xff] %v4914_v7  ;;  %v2808_v40 = vadd.f32 %v2807_v59, %v6789_v56  ;;  %v975_v45 = vunpack.c.h.bf16 %v376_v25  ;;  %v976_v17 = vunpack.c.l.bf16 %v377_v22  ;;  %v977_v15 = vunpack.c.h.bf16 %v377_v22  ;;  %v383_v56 = vld [vmem:[%s3610_s25 + $0x624] sm:$0xff] }
 0x124   : > { %6786 = vst [vmem:[#allocation28_spill] sm:$0xff] %v4917_v47  ;;  %v2772_v18 = vadd.f32 %v2771_v46, %v1948_v27  ;;  %v978_v23 = vunpack.c.l.bf16 %v378_v29  ;;  %v2016_v52 = vmul.f32 %v6771_v50, %v973_v48  ;;  %v2844_v62 = vadd.f32 %v2014_v58, %v2013_v57  ;;  %v382_v47 = vld [vmem:[%s3610_s25 + $0x61c] sm:$0xff]  ;;  %v6791_v46 = vld [vmem:[#allocation20_spill] sm:$0xff] }
 0x125   : > { %v2809_v26 = vadd.f32 %v2808_v40, %v6790_v49  ;;  %v979_v7 = vunpack.c.h.bf16 %v378_v29  ;;  %v980_v14 = vunpack.c.l.bf16 %v379_v2  ;;  %v981_v61 = vunpack.c.h.bf16 %v379_v2  ;;  %v385_v40 = vld [vmem:[%s3610_s25 + $0x634] sm:$0xff] }
 0x126   : > { %v2773_v59 = vadd.f32 %v2772_v18, %v1949_v13  ;;  %v982_v25 = vunpack.c.l.bf16 %v380_v21  ;;  %v2017_v22 = vmul.f32 %v6773_v1, %v974_v42  ;;  %v2845_v27 = vadd.f32 %v2844_v62, %v2015_v4  ;;  %v6792_v2 = vld [vmem:[#allocation21_spill] sm:$0xff] }
 0x127   : > { %v2810_v38 = vadd.f32 %v2809_v26, %v6791_v46  ;;  %v983_v24 = vunpack.c.h.bf16 %v380_v21  ;;  %v984_v48 = vunpack.c.l.bf16 %v381_v5  ;;  %v985_v57 = vunpack.c.h.bf16 %v381_v5  ;;  %v4939_v18 = vld [vmem:[%s3610_s25 + $0x5d8] ss:$100 sps:$4 sm:$0xff]  }
 0x128   : > { %v2774_v58 = vadd.f32 %v2773_v59, %v1950_v53  ;;  %v986_v49 = vunpack.c.l.bf16 %v382_v47  ;;  %v2018_v29 = vmul.f32 %v6740_v36, %v975_v45  ;;  %v2846_v50 = vadd.f32 %v2845_v27, %v2016_v52  ;;  %v6793_v53 = vld [vmem:[#allocation22_spill] sm:$0xff]  ;;  %v6794_v36 = vld [vmem:[#allocation23_spill] sm:$0xff] }
 0x129   : > { %v2811_v13 = vadd.f32 %v2810_v38, %v6792_v2  ;;  %v987_v55 = vunpack.c.h.bf16 %v382_v47  ;;  %v988_v42 = vunpack.c.l.bf16 %v383_v56  ;;  %v989_v4 = vunpack.c.h.bf16 %v383_v56  ;;  %v361_v56 = vld [vmem:[%s3610_s25 + $0x578] sm:$0xff] }
 0x12a   : > { %v2775_v26 = vadd.f32 %v2774_v58, %v4879_v20  ;;  %v990_v62 = vunpack.c.l.bf16 %v384_v37  ;;  %v2019_v21 = vmul.f32 %v3767_v8, %v976_v17  ;;  %v2847_v5 = vadd.f32 %v2846_v50, %v2017_v22 }
 0x12b   : > { %v2812_v59 = vadd.f32 %v2811_v13, %v6793_v53  ;;  %v991_v46 = vunpack.c.h.bf16 %v384_v37  ;;  %v992_v45 = vunpack.c.l.bf16 %v385_v40  ;;  %v993_v52 = vunpack.c.h.bf16 %v385_v40  ;;  %v362_v13 = vld [vmem:[%s3610_s25 + $0x580] sm:$0xff] }
 0x12c   : > { %v2776_v38 = vadd.f32 %v2775_v26, %v4883_v35  ;;  %v994_v27 = vunpack.c.h.bf16 %v4939_v18  ;;  %v2020_v47 = vmul.f32 %v3770_v9, %v977_v15  ;;  %v2848_v2 = vadd.f32 %v2847_v5, %v2018_v29  ;;  %v363_v5 = vld [vmem:[%s3610_s25 + $0x588] sm:$0xff] }
 0x12d   : > { %v2814_v20 = vadd.f32 %v6794_v36, %v2812_v59  ;;  %v2021_v58 = vmul.f32 %v3773_v12, %v978_v23  ;;  %v2022_v50 = vmul.f32 %v3776_v10, %v979_v7  ;;  %v2023_v17 = vmul.f32 %v3779_v16, %v980_v14 }
 0x12e   : > { %v2777_v37 = vadd.f32 %v2776_v38, %v4886_v44  ;;  %v2024_v22 = vmul.f32 %v3782_v19, %v981_v61  ;;  %v2025_v35 = vmul.f32 %v3786_v28, %v982_v25  ;;  %v2849_v40 = vadd.f32 %v2848_v2, %v2019_v21  ;;  %v365_v2 = vld [vmem:[%s3610_s25 + $0x598] sm:$0xff] }
 0x12f   : > { %2815 = vadd.xlane.f32.xlu1 %v2814_v20  ;;  %v4957_v15 = vmul.f32 %v3789_v31, %v983_v24  ;;  %v4960_v36 = vmul.f32 %v3792_v32, %v984_v48  ;;  %v945_v23 = vunpack.c.l.bf16 %v361_v56  ;;  %v946_v7 = vunpack.c.h.bf16 %v361_v56  ;;  %v366_v56 = vld [vmem:[%s3610_s25 + $0x5a0] sm:$0xff] }
 0x130   : > { %v2778_v14 = vadd.f32 %v2777_v37, %v4889_v51  ;;  %v4964_v44 = vmul.f32 %v3795_v33, %v985_v57  ;;  %v4967_v61 = vmul.f32 %v3798_v34, %v986_v49  ;;  %v2850_v25 = vadd.f32 %v2849_v40, %v2020_v47  ;;  %v6802_v37 = vld [vmem:[#allocation4_spill] sm:$0xff] }
 0x131   : > { %v4970_v29 = vmul.f32 %v3801_v39, %v987_v55  ;;  %v4973_v24 = vmul.f32 %v3805_v63, %v988_v42  ;;  %v2037_v48 = vmul.f32 %v3827_v3, %v994_v27  ;;  %v947_v26 = vunpack.c.l.bf16 %v362_v13  ;;  %v364_v42 = vld [vmem:[%s3610_s25 + $0x590] sm:$0xff] }
 0x132   : > { %v2779_v21 = vadd.f32 %v2778_v14, %v4892_v43  ;;  %v4978_v51 = vmul.f32 %v3808_v6, %v989_v4  ;;  %v4981_v57 = vmul.f32 %v3811_v11, %v990_v62  ;;  %v2851_v49 = vadd.f32 %v2850_v25, %v2021_v58  ;;  %v6799_v62 = vld [vmem:[#allocation13_spill] sm:$0xff] }
 0x133   : > { %v4985_v55 = vmul.f32 %v6781_v54, %v991_v46  ;;  %v948_v53 = vunpack.c.h.bf16 %v362_v13  ;;  %v1988_v59 = vmul.f32 %v3715_v0, %v945_v23  ;;  %v1989_v38 = vmul.f32 %v6779_v41, %v946_v7  ;;  %v6803_v13 = vld [vmem:[#allocation24_spill] sm:$0xff] }
 0x134   : > { %6795 = vst [vmem:[#allocation29_spill] sm:$0xff] %v4978_v51  ;;  %6796 = vst [vmem:[#allocation16_spill] sm:$0xff] %v4981_v57  ;;  %v2780_v43 = vadd.f32 %v2779_v21, %v4897_v60  ;;  %v4992_v4 = vmul.f32 %v6783_v30, %v992_v45  ;;  %v4995_v27 = vmul.f32 %v6799_v62, %v993_v52  ;;  %v4999_v46 = vsel %vm2461_vm0, %v2037_v48, 0.0  ;;  %v367_v45 = vld [vmem:[%s3610_s25 + $0x5a8] sm:$0xff]  ;;  %v368_v52 = vld [vmem:[%s3610_s25 + $0x5b0] sm:$0xff] }
 0x135   : > { %6797 = vst [vmem:[#allocation17_spill] sm:$0xff] %v4985_v55  ;;  %v2852_v47 = vadd.f32 %v2851_v49, %v2022_v50  ;;  %6801 = vst [vmem:[#allocation20_spill] sm:$0xff] %v4999_v46  ;;  %v949_v20 = vunpack.c.l.bf16 %v363_v5  ;;  %v950_v58 = vunpack.c.h.bf16 %v363_v5  ;;  %v1990_v40 = vmul.f32 %v6802_v37, %v947_v26  ;;  %v6804_v21 = vld [vmem:[#allocation5_spill] sm:$0xff]  ;;  %v370_v57 = vld [vmem:[%s3610_s25 + $0x5c0] sm:$0xff] }
 0x136   : > { %6798 = vst [vmem:[#allocation18_spill] sm:$0xff] %v4992_v4  ;;  %6800 = vst [vmem:[#allocation19_spill] sm:$0xff] %v4995_v27  ;;  %v2781_v60 = vadd.f32 %v2780_v43, %v6803_v13  ;;  %v951_v7 = vunpack.c.l.bf16 %v364_v42  ;;  %v952_v14 = vunpack.c.h.bf16 %v364_v42  ;;  %v953_v25 = vunpack.c.l.bf16 %v365_v2  ;;  %v6805_v46 = vld [vmem:[#allocation25_spill] sm:$0xff]  ;;  %v6806_v13 = vld [vmem:[#allocation26_spill] sm:$0xff] }
 0x137   : > { %v2853_v23 = vadd.f32 %v2852_v47, %v2023_v17  ;;  %v954_v50 = vunpack.c.h.bf16 %v365_v2  ;;  %v1991_v48 = vmul.f32 %v6804_v21, %v948_v53  ;;  %v2817_v49 = vadd.f32 %v1989_v38, %v1988_v59  ;;  %v369_v4 = vld [vmem:[%s3610_s25 + $0x5b8] sm:$0xff]  ;;  %v371_v2 = vld [vmem:[%s3610_s25 + $0x5c8] sm:$0xff]  ;;  %v372_v59 = vld [vmem:[%s3610_s25 + $0x5d0] sm:$0xff] }
 0x138   : > { %v2782_v27 = vadd.f32 %v2781_v60, %v6805_v46  ;;  %v955_v26 = vunpack.c.l.bf16 %v366_v56  ;;  %v956_v55 = vunpack.c.h.bf16 %v366_v56  ;;  %v957_v43 = vunpack.c.l.bf16 %v367_v45  ;;  %v6807_v46 = vld [vmem:[#allocation7_spill] sm:$0xff] }
 0x139   : > { %v2854_v5 = vadd.f32 %v2853_v23, %v2024_v22  ;;  %v958_v17 = vunpack.c.h.bf16 %v367_v45  ;;  %v1992_v47 = vmul.f32 %v6773_v1, %v949_v20  ;;  %v2818_v42 = vadd.f32 %v2817_v49, %v1990_v40  ;;  %v6808_v23 = vld [vmem:[#allocation27_spill] sm:$0xff] }
 0x13a   : > { %v2783_v37 = vadd.f32 %v2782_v27, %v6806_v13  ;;  %v959_v62 = vunpack.c.l.bf16 %v368_v52  ;;  %v960_v53 = vunpack.c.h.bf16 %v368_v52  ;;  %v961_v38 = vunpack.c.l.bf16 %v369_v4 }
 0x13b   : > { %v2855_v51 = vadd.f32 %v2854_v5, %v2025_v35  ;;  %v962_v21 = vunpack.c.h.bf16 %v369_v4  ;;  %v1993_v22 = vmul.f32 %v6807_v46, %v950_v58  ;;  %v2819_v60 = vadd.f32 %v2818_v42, %v1991_v48  ;;  %v6809_v5 = vld [vmem:[#allocation28_spill] sm:$0xff]  ;;  %v6810_v42 = vld [vmem:[#allocation15_spill] sm:$0xff] }
 0x13c   : > { %v2784_v56 = vadd.f32 %v2783_v37, %v6808_v23  ;;  %v963_v30 = vunpack.c.l.bf16 %v370_v57  ;;  %v964_v20 = vunpack.c.h.bf16 %v370_v57  ;;  %v965_v40 = vunpack.c.l.bf16 %v371_v2  ;;  %v400_v57 = vld [vmem:[%s3610_s25 + $0x6a4] sm:$0xff]  ;;  %v401_v23 = vld [vmem:[%s3610_s25 + $0x6ac] sm:$0xff] }
 0x13d   : > { %v2856_v45 = vadd.f32 %v2855_v51, %v4957_v15  ;;  %v966_v49 = vunpack.c.h.bf16 %v371_v2  ;;  %v1994_v35 = vmul.f32 %v3767_v8, %v951_v7  ;;  %v2820_v27 = vadd.f32 %v2819_v60, %v1992_v47 }
 0x13e   : > { %v2785_v52 = vadd.f32 %v2784_v56, %v6809_v5  ;;  %v967_v4 = vunpack.c.l.bf16 %v372_v59  ;;  %v968_v58 = vunpack.c.h.bf16 %v372_v59  ;;  %v969_v48 = vunpack.c.l.bf16 %v4939_v18  ;;  %v403_v5 = vld [vmem:[%s3610_s25 + $0x6bc] sm:$0xff] }
 0x13f   : > { %v2857_v13 = vadd.f32 %v2856_v45, %v4960_v36  ;;  %v1995_v37 = vmul.f32 %v3770_v9, %v952_v14  ;;  %v1996_v15 = vmul.f32 %v3773_v12, %v953_v25  ;;  %v2821_v51 = vadd.f32 %v2820_v27, %v1993_v22 }
 0x140   : > { %v2787_v2 = vadd.f32 %v6810_v42, %v2785_v52  ;;  %v1997_v47 = vmul.f32 %v3776_v10, %v954_v50  ;;  %v1998_v60 = vmul.f32 %v3779_v16, %v955_v26  ;;  %v1999_v36 = vmul.f32 %v3782_v19, %v956_v55  ;;  %v5065_v52 = vld [vmem:[%s3610_s25 + $0x6c4] sm:$0xff]  ;;  %v405_v42 = vld [vmem:[%s3610_s25 + $0x6cc] sm:$0xff] }
 0x141   : > { %v2858_v7 = vadd.f32 %v2857_v13, %v4964_v44  ;;  %v2000_v59 = vmul.f32 %v3786_v28, %v957_v43  ;;  %v5031_v18 = vmul.f32 %v3789_v31, %v958_v17  ;;  %v2822_v14 = vadd.f32 %v2821_v51, %v1994_v35 }
 0x142   : > { %2788 = vadd.xlane.f32.xlu0 %v2787_v2  ;;  %v5036_v22 = vmul.f32 %v3792_v32, %v959_v62  ;;  %v1020_v44 = vunpack.c.l.bf16 %v400_v57  ;;  %v1021_v50 = vunpack.c.h.bf16 %v400_v57  ;;  %v5039_v55 = vmul.f32 %v3795_v33, %v960_v53  ;;  %v406_v2 = vld [vmem:[%s3610_s25 + $0x6d4] sm:$0xff] }
 0x143   : > { %v2859_v25 = vadd.f32 %v2858_v7, %v4967_v61  ;;  %v5042_v26 = vmul.f32 %v3798_v34, %v961_v38  ;;  %v2012_v43 = vmul.f32 %v3827_v3, %v969_v48  ;;  %v2823_v17 = vadd.f32 %v2822_v14, %v1995_v37  ;;  %v6814_v48 = vld [vmem:[#allocation12_spill] sm:$0xff]  ;;  %v6816_v37 = vld [vmem:[#allocation13_spill] sm:$0xff] }
 0x144   : > { %v5047_v61 = vmul.f32 %v3801_v39, %v962_v21  ;;  %v5050_v62 = vmul.f32 %v3805_v63, %v963_v30  ;;  %v1022_v45 = vunpack.c.l.bf16 %v401_v23  ;;  %v5053_v35 = vmul.f32 %v3808_v6, %v964_v20 }
 0x145   : > { %v2860_v56 = vadd.f32 %v2859_v25, %v4970_v29  ;;  %v5056_v53 = vmul.f32 %v3811_v11, %v965_v40  ;;  %v5059_v38 = vmul.f32 %v6781_v54, %v966_v49  ;;  %v2824_v27 = vadd.f32 %v2823_v17, %v1996_v15  ;;  %v402_v29 = vld [vmem:[%s3610_s25 + $0x6b4] sm:$0xff]  ;;  %v6821_v17 = vld [vmem:[#allocation16_spill] sm:$0xff] }
 0x146   : > { %6811 = vst [vmem:[#allocation21_spill] sm:$0xff] %v5053_v35  ;;  %v1023_v30 = vunpack.c.h.bf16 %v401_v23  ;;  %v2063_v13 = vmul.f32 %v3715_v0, %v1020_v44  ;;  %v2064_v20 = vmul.f32 %v6779_v41, %v1021_v50  ;;  %v5070_v40 = vmul.f32 %v6814_v48, %v967_v4  ;;  %v6820_v23 = vld [vmem:[#allocation4_spill] sm:$0xff] }
 0x147   : > { %6812 = vst [vmem:[#allocation22_spill] sm:$0xff] %v5056_v53  ;;  %6813 = vst [vmem:[#allocation23_spill] sm:$0xff] %v5059_v38  ;;  %v2861_v21 = vadd.f32 %v2860_v56, %v4973_v24  ;;  %v5073_v49 = vmul.f32 %v6816_v37, %v968_v58  ;;  %v2825_v15 = vadd.f32 %v2824_v27, %v1997_v47  ;;  %v5076_v51 = vsel %vm2461_vm0, %v2012_v43, 0.0  ;;  %v6819_v24 = vld [vmem:[#allocation29_spill] sm:$0xff]  ;;  %v407_v56 = vld [vmem:[%s3610_s25 + $0x6dc] sm:$0xff] }
 0x148   : > { %6815 = vst [vmem:[#allocation24_spill] sm:$0xff] %v5070_v40  ;;  %6818 = vst [vmem:[#allocation26_spill] sm:$0xff] %v5076_v51  ;;  %v1024_v7 = vunpack.c.l.bf16 %v402_v29  ;;  %v1025_v14 = vunpack.c.h.bf16 %v402_v29  ;;  %v2065_v25 = vmul.f32 %v6820_v23, %v1022_v45  ;;  %v1026_v4 = vunpack.c.l.bf16 %v403_v5  ;;  %v408_v43 = vld [vmem:[%s3610_s25 + $0x6e4] sm:$0xff]  ;;  %v410_v38 = vld [vmem:[%s3610_s25 + $0x6f4] sm:$0xff] }
 0x149   : > { %6817 = vst [vmem:[#allocation25_spill] sm:$0xff] %v5073_v49  ;;  %v2862_v57 = vadd.f32 %v2861_v21, %v6819_v24  ;;  %v2826_v44 = vadd.f32 %v2825_v15, %v1998_v60  ;;  %v1027_v50 = vunpack.c.h.bf16 %v403_v5  ;;  %v1028_v58 = vunpack.c.l.bf16 %v5065_v52  ;;  %v6822_v21 = vld [vmem:[#allocation5_spill] sm:$0xff] }
 0x14a   : > { %v1029_v27 = vunpack.c.h.bf16 %v5065_v52  ;;  %v2066_v24 = vmul.f32 %v6822_v21, %v1023_v30  ;;  %v2898_v51 = vadd.f32 %v2064_v20, %v2063_v13  ;;  %v1030_v45 = vunpack.c.l.bf16 %v405_v42  ;;  %v6823_v15 = vld [vmem:[#allocation17_spill] sm:$0xff]  ;;  %v6824_v30 = vld [vmem:[#allocation18_spill] sm:$0xff] }
 0x14b   : > { %v2863_v47 = vadd.f32 %v2862_v57, %v6821_v17  ;;  %v2827_v29 = vadd.f32 %v2826_v44, %v1999_v36  ;;  %v1031_v49 = vunpack.c.h.bf16 %v405_v42  ;;  %v1032_v60 = vunpack.c.l.bf16 %v406_v2  ;;  %v409_v5 = vld [vmem:[%s3610_s25 + $0x6ec] sm:$0xff]  ;;  %v411_v20 = vld [vmem:[%s3610_s25 + $0x6fc] sm:$0xff] }
 0x14c   : > { %v1033_v53 = vunpack.c.h.bf16 %v406_v2  ;;  %v2067_v57 = vmul.f32 %v6773_v1, %v1024_v7  ;;  %v2899_v17 = vadd.f32 %v2898_v51, %v2065_v25  ;;  %v1034_v35 = vunpack.c.l.bf16 %v407_v56  ;;  %v5095_v36 = vld [vmem:[%s3610_s25 + $0x6a0] ss:$100 sps:$4 sm:$0xff]  }
 0x14d   : > { %v2864_v40 = vadd.f32 %v2863_v47, %v6823_v15  ;;  %v2828_v23 = vadd.f32 %v2827_v29, %v2000_v59  ;;  %v1035_v52 = vunpack.c.h.bf16 %v407_v56  ;;  %v1036_v37 = vunpack.c.l.bf16 %v408_v43  ;;  %v6825_v51 = vld [vmem:[#allocation19_spill] sm:$0xff] }
 0x14e   : > { %v1037_v44 = vunpack.c.h.bf16 %v408_v43  ;;  %v2068_v42 = vmul.f32 %v6807_v46, %v1025_v14  ;;  %v2900_v21 = vadd.f32 %v2899_v17, %v2066_v24  ;;  %v1038_v2 = vunpack.c.l.bf16 %v409_v5  ;;  %v6826_v43 = vld [vmem:[#allocation20_spill] sm:$0xff]  ;;  %v387_v17 = vld [vmem:[%s3610_s25 + $0x640] sm:$0xff] }
 0x14f   : > { %v2865_v13 = vadd.f32 %v2864_v40, %v6824_v30  ;;  %v2829_v47 = vadd.f32 %v2828_v23, %v5031_v18  ;;  %v1039_v15 = vunpack.c.h.bf16 %v409_v5  ;;  %v1040_v7 = vunpack.c.l.bf16 %v410_v38 }
 0x150   : > { %v1041_v25 = vunpack.c.h.bf16 %v410_v38  ;;  %v2069_v56 = vmul.f32 %v3767_v8, %v1026_v4  ;;  %v2901_v29 = vadd.f32 %v2900_v21, %v2067_v57  ;;  %v1042_v30 = vunpack.c.l.bf16 %v411_v20 }
 0x151   : > { %v2866_v59 = vadd.f32 %v2865_v13, %v6825_v51  ;;  %v2830_v40 = vadd.f32 %v2829_v47, %v5036_v22  ;;  %v1043_v1 = vunpack.c.h.bf16 %v411_v20  ;;  %v1044_v14 = vunpack.c.h.bf16 %v5095_v36  ;;  %v388_v20 = vld [vmem:[%s3610_s25 + $0x648] sm:$0xff]  ;;  %v389_v51 = vld [vmem:[%s3610_s25 + $0x650] sm:$0xff] }
 0x152   : > { %v2070_v18 = vmul.f32 %v3770_v9, %v1027_v50  ;;  %v2071_v23 = vmul.f32 %v3773_v12, %v1028_v58  ;;  %v2902_v5 = vadd.f32 %v2901_v29, %v2068_v42  ;;  %v2072_v4 = vmul.f32 %v3776_v10, %v1029_v27  ;;  %v390_v29 = vld [vmem:[%s3610_s25 + $0x658] sm:$0xff] }
 0x153   : > { %v2868_v24 = vadd.f32 %v6826_v43, %v2866_v59  ;;  %v2831_v38 = vadd.f32 %v2830_v40, %v5039_v55  ;;  %v2073_v21 = vmul.f32 %v3779_v16, %v1030_v45  ;;  %v2074_v22 = vmul.f32 %v3782_v19, %v1031_v49 }
 0x154   : > { %v2075_v57 = vmul.f32 %v3786_v28, %v1032_v60  ;;  %v5113_v13 = vmul.f32 %v3789_v31, %v1033_v53  ;;  %v5116_v50 = vmul.f32 %v3792_v32, %v1034_v35  ;;  %v2903_v58 = vadd.f32 %v2902_v5, %v2069_v56  ;;  %v6835_v5 = vld [vmem:[#allocation21_spill] sm:$0xff] }
 0x155   : > { %2869 = vadd.xlane.f32.xlu1 %v2868_v24  ;;  %v2832_v55 = vadd.f32 %v2831_v38, %v5042_v26  ;;  %v5121_v27 = vmul.f32 %v3795_v33, %v1035_v52  ;;  %v995_v45 = vunpack.c.l.bf16 %v387_v17  ;;  %v996_v49 = vunpack.c.h.bf16 %v387_v17 }
 0x156   : > { %v5124_v60 = vmul.f32 %v3798_v34, %v1036_v37  ;;  %v5127_v53 = vmul.f32 %v3801_v39, %v1037_v44  ;;  %v2087_v35 = vmul.f32 %v3827_v3, %v1044_v14  ;;  %v2904_v42 = vadd.f32 %v2903_v58, %v2070_v18 }
 0x157   : > { %v2833_v47 = vadd.f32 %v2832_v55, %v5047_v61  ;;  %v5132_v26 = vmul.f32 %v3805_v63, %v1038_v2  ;;  %v5135_v52 = vmul.f32 %v3808_v6, %v1039_v15  ;;  %v997_v59 = vunpack.c.l.bf16 %v388_v20  ;;  %v391_v15 = vld [vmem:[%s3610_s25 + $0x660] sm:$0xff] }
 0x158   : > { %v5139_v37 = vmul.f32 %v3811_v11, %v1040_v7  ;;  %v5142_v44 = vmul.f32 %v6781_v54, %v1041_v25  ;;  %v5145_v56 = vmul.f32 %v6814_v48, %v1042_v30  ;;  %v2905_v61 = vadd.f32 %v2904_v42, %v2071_v23  ;;  %v6832_v7 = vld [vmem:[#allocation13_spill] sm:$0xff]  ;;  %v392_v30 = vld [vmem:[%s3610_s25 + $0x668] sm:$0xff] }
 0x159   : > { %6827 = vst [vmem:[#allocation27_spill] sm:$0xff] %v5132_v26  ;;  %6828 = vst [vmem:[#allocation28_spill] sm:$0xff] %v5135_v52  ;;  %v2834_v2 = vadd.f32 %v2833_v47, %v5050_v62  ;;  %v998_v40 = vunpack.c.h.bf16 %v388_v20  ;;  %v2038_v14 = vmul.f32 %v3715_v0, %v995_v45  ;;  %v2039_v43 = vmul.f32 %v6779_v41, %v996_v49  ;;  %v393_v62 = vld [vmem:[%s3610_s25 + $0x670] sm:$0xff]  ;;  %v394_v49 = vld [vmem:[%s3610_s25 + $0x678] sm:$0xff] }
 0x15a   : > { %6829 = vst [vmem:[#allocation15_spill] sm:$0xff] %v5139_v37  ;;  %6830 = vst [vmem:[#allocation29_spill] sm:$0xff] %v5142_v44  ;;  %v5153_v24 = vmul.f32 %v6832_v7, %v1043_v1  ;;  %v2906_v25 = vadd.f32 %v2905_v61, %v2072_v4  ;;  %v5156_v18 = vsel %vm2461_vm0, %v2087_v35, 0.0  ;;  %v999_v23 = vunpack.c.l.bf16 %v389_v51  ;;  %v6836_v20 = vld [vmem:[#allocation4_spill] sm:$0xff]  ;;  %v6837_v4 = vld [vmem:[#allocation22_spill] sm:$0xff] }
 0x15b   : > { %6831 = vst [vmem:[#allocation16_spill] sm:$0xff] %v5145_v56  ;;  %6834 = vst [vmem:[#allocation18_spill] sm:$0xff] %v5156_v18  ;;  %v2835_v17 = vadd.f32 %v2834_v2, %v6835_v5  ;;  %v1000_v38 = vunpack.c.h.bf16 %v389_v51  ;;  %v1001_v58 = vunpack.c.l.bf16 %v390_v29  ;;  %v2040_v55 = vmul.f32 %v6836_v20, %v997_v59  ;;  %v395_v35 = vld [vmem:[%s3610_s25 + $0x680] sm:$0xff]  ;;  %v396_v44 = vld [vmem:[%s3610_s25 + $0x688] sm:$0xff] }
 0x15c   : > { %6833 = vst [vmem:[#allocation17_spill] sm:$0xff] %v5153_v24  ;;  %v2907_v45 = vadd.f32 %v2906_v25, %v2073_v21  ;;  %v1002_v1 = vunpack.c.h.bf16 %v390_v29  ;;  %v1003_v42 = vunpack.c.l.bf16 %v391_v15  ;;  %v1004_v47 = vunpack.c.h.bf16 %v391_v15  ;;  %v6838_v24 = vld [vmem:[#allocation5_spill] sm:$0xff]  ;;  %v6839_v59 = vld [vmem:[#allocation23_spill] sm:$0xff]  ;;  %v6840_v29 = vld [vmem:[#allocation6_spill] sm:$0xff] }
 0x15d   : > { %v2836_v61 = vadd.f32 %v2835_v17, %v6837_v4  ;;  %v1005_v18 = vunpack.c.l.bf16 %v392_v30  ;;  %v2041_v56 = vmul.f32 %v6838_v24, %v998_v40  ;;  %v2871_v2 = vadd.f32 %v2039_v43, %v2038_v14  ;;  %v397_v25 = vld [vmem:[%s3610_s25 + $0x690] sm:$0xff]  ;;  %v398_v17 = vld [vmem:[%s3610_s25 + $0x698] sm:$0xff] }
 0x15e   : > { %v2908_v5 = vadd.f32 %v2907_v45, %v2074_v22  ;;  %v1006_v51 = vunpack.c.h.bf16 %v392_v30  ;;  %v1007_v37 = vunpack.c.l.bf16 %v393_v62  ;;  %v1008_v52 = vunpack.c.h.bf16 %v393_v62  ;;  %v6841_v41 = vld [vmem:[#allocation24_spill] sm:$0xff] }
 0x15f   : > { %v2837_v21 = vadd.f32 %v2836_v61, %v6839_v59  ;;  %v1009_v20 = vunpack.c.l.bf16 %v394_v49  ;;  %v2042_v7 = vmul.f32 %v6840_v29, %v999_v23  ;;  %v2872_v15 = vadd.f32 %v2871_v2, %v2040_v55  ;;  %v6842_v59 = vld [vmem:[#allocation25_spill] sm:$0xff] }
 0x160   : > { %v2909_v48 = vadd.f32 %v2908_v5, %v2075_v57  ;;  %v1010_v4 = vunpack.c.h.bf16 %v394_v49  ;;  %v1011_v54 = vunpack.c.l.bf16 %v395_v35  ;;  %v1012_v26 = vunpack.c.h.bf16 %v395_v35  ;;  %v6843_v5 = vld [vmem:[#allocation26_spill] sm:$0xff] }
 0x161   : > { %v2838_v40 = vadd.f32 %v2837_v21, %v6841_v41  ;;  %v1013_v22 = vunpack.c.l.bf16 %v396_v44  ;;  %v2043_v14 = vmul.f32 %v6807_v46, %v1000_v38  ;;  %v2873_v43 = vadd.f32 %v2872_v15, %v2041_v56  ;;  %v426_v56 = vld [vmem:[%s3610_s25 + $0x76c] sm:$0xff]  ;;  %v427_v15 = vld [vmem:[%s3610_s25 + $0x774] sm:$0xff] }
 0x162   : > { %v2910_v30 = vadd.f32 %v2909_v48, %v5113_v13  ;;  %v1014_v62 = vunpack.c.h.bf16 %v396_v44  ;;  %v1015_v45 = vunpack.c.l.bf16 %v397_v25  ;;  %v1016_v61 = vunpack.c.h.bf16 %v397_v25 }
 0x163   : > { %v2839_v23 = vadd.f32 %v2838_v40, %v6842_v59  ;;  %v1017_v55 = vunpack.c.l.bf16 %v398_v17  ;;  %v2044_v57 = vmul.f32 %v3767_v8, %v1001_v58  ;;  %v2874_v49 = vadd.f32 %v2873_v43, %v2042_v7 }
 0x164   : > { %v2911_v35 = vadd.f32 %v2910_v30, %v5116_v50  ;;  %v1018_v41 = vunpack.c.h.bf16 %v398_v17  ;;  %v1019_v2 = vunpack.c.l.bf16 %v5095_v36  ;;  %v2045_v38 = vmul.f32 %v3770_v9, %v1002_v1  ;;  %v429_v30 = vld [vmem:[%s3610_s25 + $0x784] sm:$0xff] }
 0x165   : > { %v2841_v48 = vadd.f32 %v6843_v5, %v2839_v23  ;;  %v2046_v13 = vmul.f32 %v3773_v12, %v1003_v42  ;;  %v2047_v44 = vmul.f32 %v3776_v10, %v1004_v47  ;;  %v2875_v21 = vadd.f32 %v2874_v49, %v2043_v14  ;;  %v430_v5 = vld [vmem:[%s3610_s25 + $0x78c] sm:$0xff] }
 0x166   : > { %v2912_v25 = vadd.f32 %v2911_v35, %v5121_v27  ;;  %v2048_v58 = vmul.f32 %v3779_v16, %v1005_v18  ;;  %v2049_v7 = vmul.f32 %v3782_v19, %v1006_v51  ;;  %v2050_v50 = vmul.f32 %v3786_v28, %v1007_v37 }
 0x167   : > { %2842 = vadd.xlane.f32.xlu0 %v2841_v48  ;;  %v5189_v36 = vmul.f32 %v3789_v31, %v1008_v52  ;;  %v2876_v1 = vadd.f32 %v2875_v21, %v2044_v57  ;;  %v1070_v17 = vunpack.c.l.bf16 %v426_v56  ;;  %v1071_v42 = vunpack.c.h.bf16 %v426_v56  ;;  %v6846_v57 = vld [vmem:[#allocation3_spill] sm:$0xff]  ;;  %v431_v21 = vld [vmem:[%s3610_s25 + $0x794] sm:$0xff] }
 0x168   : > { %v2913_v47 = vadd.f32 %v2912_v25, %v5124_v60  ;;  %v5193_v27 = vmul.f32 %v3792_v32, %v1009_v20  ;;  %v5196_v18 = vmul.f32 %v3795_v33, %v1010_v4  ;;  %v5199_v37 = vmul.f32 %v3798_v34, %v1011_v54  ;;  %v428_v4 = vld [vmem:[%s3610_s25 + $0x77c] sm:$0xff] }
 0x169   : > { %v5202_v51 = vmul.f32 %v3801_v39, %v1012_v26  ;;  %v2062_v52 = vmul.f32 %v3827_v3, %v1019_v2  ;;  %v2877_v40 = vadd.f32 %v2876_v1, %v2045_v38  ;;  %v1072_v14 = vunpack.c.l.bf16 %v427_v15 }
 0x16a   : > { %v2914_v43 = vadd.f32 %v2913_v47, %v5127_v53  ;;  %v5207_v60 = vmul.f32 %v3805_v63, %v1013_v22  ;;  %v5210_v20 = vmul.f32 %v3808_v6, %v1014_v62  ;;  %v5213_v54 = vmul.f32 %v3811_v11, %v1015_v45  ;;  %v6847_v53 = vld [vmem:[#allocation27_spill] sm:$0xff]  ;;  %v6850_v62 = vld [vmem:[#allocation12_spill] sm:$0xff]  ;;  %v6852_v45 = vld [vmem:[#allocation13_spill] sm:$0xff] }
 0x16b   : > { %v2878_v26 = vadd.f32 %v2877_v40, %v2046_v13  ;;  %v1073_v59 = vunpack.c.h.bf16 %v427_v15  ;;  %v2113_v23 = vmul.f32 %v3715_v0, %v1070_v17  ;;  %v2114_v49 = vmul.f32 %v6846_v57, %v1071_v42  ;;  %v6848_v22 = vld [vmem:[#allocation11_spill] sm:$0xff]  ;;  %v6855_v15 = vld [vmem:[#allocation4_spill] sm:$0xff] }
 0x16c   : > { %6844 = vst [vmem:[#allocation19_spill] sm:$0xff] %v5210_v20  ;;  %6845 = vst [vmem:[#allocation20_spill] sm:$0xff] %v5213_v54  ;;  %v2915_v35 = vadd.f32 %v2914_v43, %v6847_v53  ;;  %v5221_v2 = vmul.f32 %v6848_v22, %v1016_v61  ;;  %v5224_v38 = vmul.f32 %v6850_v62, %v1017_v55  ;;  %v5231_v13 = vsel %vm2461_vm0, %v2062_v52, 0.0  ;;  %v6856_v17 = vld [vmem:[#allocation28_spill] sm:$0xff]  ;;  %v432_v61 = vld [vmem:[%s3610_s25 + $0x79c] sm:$0xff] }
 0x16d   : > { %v5227_v56 = vmul.f32 %v6852_v45, %v1018_v41  ;;  %v2879_v48 = vadd.f32 %v2878_v26, %v2047_v44  ;;  %6854 = vst [vmem:[#allocation24_spill] sm:$0xff] %v5231_v13  ;;  %v1074_v25 = vunpack.c.l.bf16 %v428_v4  ;;  %v2115_v1 = vmul.f32 %v6855_v15, %v1072_v14  ;;  %v433_v41 = vld [vmem:[%s3610_s25 + $0x7a4] sm:$0xff]  ;;  %v436_v20 = vld [vmem:[%s3610_s25 + $0x7bc] sm:$0xff] }
 0x16e   : > { %6849 = vst [vmem:[#allocation21_spill] sm:$0xff] %v5221_v2  ;;  %6851 = vst [vmem:[#allocation22_spill] sm:$0xff] %v5224_v38  ;;  %v2916_v42 = vadd.f32 %v2915_v35, %v6856_v17  ;;  %v1075_v47 = vunpack.c.h.bf16 %v428_v4  ;;  %v1076_v55 = vunpack.c.l.bf16 %v429_v30  ;;  %v1077_v40 = vunpack.c.h.bf16 %v429_v30  ;;  %v6857_v52 = vld [vmem:[#allocation15_spill] sm:$0xff]  ;;  %v435_v17 = vld [vmem:[%s3610_s25 + $0x7b4] sm:$0xff] }
 0x16f   : > { %6853 = vst [vmem:[#allocation23_spill] sm:$0xff] %v5227_v56  ;;  %v2880_v43 = vadd.f32 %v2879_v48, %v2048_v58  ;;  %v1078_v53 = vunpack.c.l.bf16 %v430_v5  ;;  %v2116_v44 = vmul.f32 %v6838_v24, %v1073_v59  ;;  %v2952_v26 = vadd.f32 %v2114_v49, %v2113_v23  ;;  %v434_v56 = vld [vmem:[%s3610_s25 + $0x7ac] sm:$0xff] }
 0x170   : > { %v2917_v13 = vadd.f32 %v2916_v42, %v6857_v52  ;;  %v1079_v38 = vunpack.c.h.bf16 %v430_v5  ;;  %v1080_v14 = vunpack.c.l.bf16 %v431_v21  ;;  %v1081_v2 = vunpack.c.h.bf16 %v431_v21  ;;  %v6858_v48 = vld [vmem:[#allocation29_spill] sm:$0xff]  ;;  %v437_v42 = vld [vmem:[%s3610_s25 + $0x7c4] sm:$0xff] }
 0x171   : > { %v2881_v35 = vadd.f32 %v2880_v43, %v2049_v7  ;;  %v1082_v4 = vunpack.c.l.bf16 %v432_v61  ;;  %v2117_v30 = vmul.f32 %v6840_v29, %v1074_v25  ;;  %v2953_v58 = vadd.f32 %v2952_v26, %v2115_v1  ;;  %v6859_v21 = vld [vmem:[#allocation16_spill] sm:$0xff] }
 0x172   : > { %v2918_v54 = vadd.f32 %v2917_v13, %v6858_v48  ;;  %v1083_v15 = vunpack.c.h.bf16 %v432_v61  ;;  %v1084_v59 = vunpack.c.l.bf16 %v433_v41  ;;  %v1085_v23 = vunpack.c.h.bf16 %v433_v41  ;;  %v5249_v43 = vld [vmem:[%s3610_s25 + $0x768] ss:$100 sps:$4 sm:$0xff]  }
 0x173   : > { %v2882_v49 = vadd.f32 %v2881_v35, %v2050_v50  ;;  %v1086_v52 = vunpack.c.l.bf16 %v434_v56  ;;  %v2118_v5 = vmul.f32 %v6807_v46, %v1075_v47  ;;  %v2954_v24 = vadd.f32 %v2953_v58, %v2116_v44  ;;  %v6860_v50 = vld [vmem:[#allocation17_spill] sm:$0xff]  ;;  %v6861_v46 = vld [vmem:[#allocation18_spill] sm:$0xff] }
 0x174   : > { %v2919_v7 = vadd.f32 %v2918_v54, %v6859_v21  ;;  %v1087_v45 = vunpack.c.h.bf16 %v434_v56  ;;  %v1088_v25 = vunpack.c.l.bf16 %v435_v17  ;;  %v1089_v1 = vunpack.c.h.bf16 %v435_v17  ;;  %v413_v17 = vld [vmem:[%s3610_s25 + $0x708] sm:$0xff] }
 0x175   : > { %v2883_v13 = vadd.f32 %v2882_v49, %v5189_v36  ;;  %v1090_v26 = vunpack.c.l.bf16 %v436_v20  ;;  %v2119_v61 = vmul.f32 %v3767_v8, %v1076_v55  ;;  %v2955_v41 = vadd.f32 %v2954_v24, %v2117_v30 }
 0x176   : > { %v2920_v35 = vadd.f32 %v2919_v7, %v6860_v50  ;;  %v1091_v48 = vunpack.c.h.bf16 %v436_v20  ;;  %v1092_v47 = vunpack.c.l.bf16 %v437_v42  ;;  %v1093_v44 = vunpack.c.h.bf16 %v437_v42  ;;  %v414_v7 = vld [vmem:[%s3610_s25 + $0x710] sm:$0xff] }
 0x177   : > { %v2884_v54 = vadd.f32 %v2883_v13, %v5193_v27  ;;  %v1094_v58 = vunpack.c.h.bf16 %v5249_v43  ;;  %v2120_v56 = vmul.f32 %v3770_v9, %v1077_v40  ;;  %v2956_v21 = vadd.f32 %v2955_v41, %v2118_v5  ;;  %v415_v41 = vld [vmem:[%s3610_s25 + $0x718] sm:$0xff] }
 0x178   : > { %v2922_v36 = vadd.f32 %v6861_v46, %v2920_v35  ;;  %v2121_v49 = vmul.f32 %v3773_v12, %v1078_v53  ;;  %v2122_v24 = vmul.f32 %v3776_v10, %v1079_v38  ;;  %v2123_v55 = vmul.f32 %v3779_v16, %v1080_v14 }
 0x179   : > { %v2885_v20 = vadd.f32 %v2884_v54, %v5196_v18  ;;  %v2124_v30 = vmul.f32 %v3782_v19, %v1081_v2  ;;  %v2125_v27 = vmul.f32 %v3786_v28, %v1082_v4  ;;  %v2957_v42 = vadd.f32 %v2956_v21, %v2119_v61  ;;  %v417_v21 = vld [vmem:[%s3610_s25 + $0x728] sm:$0xff] }
 0x17a   : > { %2923 = vadd.xlane.f32.xlu1 %v2922_v36  ;;  %v5267_v40 = vmul.f32 %v3789_v31, %v1083_v15  ;;  %v5270_v46 = vmul.f32 %v3792_v32, %v1084_v59  ;;  %v1045_v53 = vunpack.c.l.bf16 %v413_v17  ;;  %v1046_v38 = vunpack.c.h.bf16 %v413_v17  ;;  %v418_v17 = vld [vmem:[%s3610_s25 + $0x730] sm:$0xff] }
 0x17b   : > { %v2886_v14 = vadd.f32 %v2885_v20, %v5199_v37  ;;  %v5274_v18 = vmul.f32 %v3795_v33, %v1085_v23  ;;  %v5277_v2 = vmul.f32 %v3798_v34, %v1086_v52  ;;  %v2958_v4 = vadd.f32 %v2957_v42, %v2120_v56  ;;  %v6869_v20 = vld [vmem:[#allocation4_spill] sm:$0xff] }
 0x17c   : > { %v5280_v5 = vmul.f32 %v3801_v39, %v1087_v45  ;;  %v5283_v15 = vmul.f32 %v3805_v63, %v1088_v25  ;;  %v2137_v59 = vmul.f32 %v3827_v3, %v1094_v58  ;;  %v1047_v13 = vunpack.c.l.bf16 %v414_v7  ;;  %v416_v25 = vld [vmem:[%s3610_s25 + $0x720] sm:$0xff] }
 0x17d   : > { %v2887_v61 = vadd.f32 %v2886_v14, %v5202_v51  ;;  %v5288_v37 = vmul.f32 %v3808_v6, %v1089_v1  ;;  %v5291_v23 = vmul.f32 %v3811_v11, %v1090_v26  ;;  %v2959_v52 = vadd.f32 %v2958_v4, %v2121_v49  ;;  %v6866_v26 = vld [vmem:[#allocation13_spill] sm:$0xff] }
 0x17e   : > { %v5295_v45 = vmul.f32 %v6848_v22, %v1091_v48  ;;  %v1048_v50 = vunpack.c.h.bf16 %v414_v7  ;;  %v2088_v35 = vmul.f32 %v3715_v0, %v1045_v53  ;;  %v2089_v54 = vmul.f32 %v6846_v57, %v1046_v38  ;;  %v6870_v7 = vld [vmem:[#allocation19_spill] sm:$0xff] }
 0x17f   : > { %6862 = vst [vmem:[#allocation25_spill] sm:$0xff] %v5288_v37  ;;  %6863 = vst [vmem:[#allocation26_spill] sm:$0xff] %v5291_v23  ;;  %v2888_v51 = vadd.f32 %v2887_v61, %v5207_v60  ;;  %v5302_v1 = vmul.f32 %v6850_v62, %v1092_v47  ;;  %v5305_v58 = vmul.f32 %v6866_v26, %v1093_v44  ;;  %v5309_v48 = vsel %vm2461_vm0, %v2137_v59, 0.0  ;;  %v419_v47 = vld [vmem:[%s3610_s25 + $0x738] sm:$0xff]  ;;  %v420_v44 = vld [vmem:[%s3610_s25 + $0x740] sm:$0xff] }
 0x180   : > { %6864 = vst [vmem:[#allocation27_spill] sm:$0xff] %v5295_v45  ;;  %v2960_v56 = vadd.f32 %v2959_v52, %v2122_v24  ;;  %6868 = vst [vmem:[#allocation29_spill] sm:$0xff] %v5309_v48  ;;  %v1049_v36 = vunpack.c.l.bf16 %v415_v41  ;;  %v1050_v49 = vunpack.c.h.bf16 %v415_v41  ;;  %v2090_v42 = vmul.f32 %v6869_v20, %v1047_v13  ;;  %v6871_v61 = vld [vmem:[#allocation5_spill] sm:$0xff]  ;;  %v6872_v48 = vld [vmem:[#allocation20_spill] sm:$0xff] }
 0x181   : > { %6865 = vst [vmem:[#allocation28_spill] sm:$0xff] %v5302_v1  ;;  %6867 = vst [vmem:[#allocation15_spill] sm:$0xff] %v5305_v58  ;;  %v2889_v60 = vadd.f32 %v2888_v51, %v6870_v7  ;;  %v1051_v38 = vunpack.c.l.bf16 %v416_v25  ;;  %v1052_v14 = vunpack.c.h.bf16 %v416_v25  ;;  %v1053_v4 = vunpack.c.l.bf16 %v417_v21  ;;  %v421_v1 = vld [vmem:[%s3610_s25 + $0x748] sm:$0xff]  ;;  %v422_v23 = vld [vmem:[%s3610_s25 + $0x750] sm:$0xff] }
 0x182   : > { %v2961_v53 = vadd.f32 %v2960_v56, %v2123_v55  ;;  %v1054_v24 = vunpack.c.h.bf16 %v417_v21  ;;  %v2091_v59 = vmul.f32 %v6871_v61, %v1048_v50  ;;  %v2925_v52 = vadd.f32 %v2089_v54, %v2088_v35  ;;  %v6873_v7 = vld [vmem:[#allocation21_spill] sm:$0xff]  ;;  %v424_v35 = vld [vmem:[%s3610_s25 + $0x760] sm:$0xff] }
 0x183   : > { %v2890_v58 = vadd.f32 %v2889_v60, %v6872_v48  ;;  %v1055_v13 = vunpack.c.l.bf16 %v418_v17  ;;  %v1056_v45 = vunpack.c.h.bf16 %v418_v17  ;;  %v1057_v51 = vunpack.c.l.bf16 %v419_v47  ;;  %v423_v21 = vld [vmem:[%s3610_s25 + $0x758] sm:$0xff]  ;;  %v6874_v48 = vld [vmem:[#allocation7_spill] sm:$0xff] }
 0x184   : > { %v2962_v41 = vadd.f32 %v2961_v53, %v2124_v30  ;;  %v1058_v55 = vunpack.c.h.bf16 %v419_v47  ;;  %v2092_v56 = vmul.f32 %v6840_v29, %v1049_v36  ;;  %v2926_v25 = vadd.f32 %v2925_v52, %v2090_v42  ;;  %v6875_v53 = vld [vmem:[#allocation22_spill] sm:$0xff] }
 0x185   : > { %v2891_v20 = vadd.f32 %v2890_v58, %v6873_v7  ;;  %v1059_v26 = vunpack.c.l.bf16 %v420_v44  ;;  %v1060_v50 = vunpack.c.h.bf16 %v420_v44  ;;  %v1061_v54 = vunpack.c.l.bf16 %v421_v1 }
 0x186   : > { %v2963_v37 = vadd.f32 %v2962_v41, %v2125_v27  ;;  %v1062_v61 = vunpack.c.h.bf16 %v421_v1  ;;  %v2093_v30 = vmul.f32 %v6874_v48, %v1050_v49  ;;  %v2927_v60 = vadd.f32 %v2926_v25, %v2091_v59  ;;  %v6876_v41 = vld [vmem:[#allocation23_spill] sm:$0xff]  ;;  %v6877_v25 = vld [vmem:[#allocation24_spill] sm:$0xff] }
 0x187   : > { %v2892_v17 = vadd.f32 %v2891_v20, %v6875_v53  ;;  %v1063_v62 = vunpack.c.l.bf16 %v422_v23  ;;  %v1064_v36 = vunpack.c.h.bf16 %v422_v23  ;;  %v1065_v42 = vunpack.c.l.bf16 %v423_v21  ;;  %v452_v23 = vld [vmem:[%s3610_s25 + $0x834] sm:$0xff]  ;;  %v453_v53 = vld [vmem:[%s3610_s25 + $0x83c] sm:$0xff] }
 0x188   : > { %v2964_v47 = vadd.f32 %v2963_v37, %v5267_v40  ;;  %v1066_v52 = vunpack.c.h.bf16 %v423_v21  ;;  %v2094_v27 = vmul.f32 %v3767_v8, %v1051_v38  ;;  %v2928_v58 = vadd.f32 %v2927_v60, %v2092_v56 }
 0x189   : > { %v2893_v44 = vadd.f32 %v2892_v17, %v6876_v41  ;;  %v1067_v1 = vunpack.c.l.bf16 %v424_v35  ;;  %v1068_v49 = vunpack.c.h.bf16 %v424_v35  ;;  %v1069_v59 = vunpack.c.l.bf16 %v5249_v43  ;;  %v455_v41 = vld [vmem:[%s3610_s25 + $0x84c] sm:$0xff] }
 0x18a   : > { %v2965_v7 = vadd.f32 %v2964_v47, %v5270_v46  ;;  %v2095_v20 = vmul.f32 %v3770_v9, %v1052_v14  ;;  %v2096_v40 = vmul.f32 %v3773_v12, %v1053_v4  ;;  %v2929_v37 = vadd.f32 %v2928_v58, %v2093_v30 }
 0x18b   : > { %v2895_v21 = vadd.f32 %v6877_v25, %v2893_v44  ;;  %v2097_v56 = vmul.f32 %v3776_v10, %v1054_v24  ;;  %v2098_v60 = vmul.f32 %v3779_v16, %v1055_v13  ;;  %v2099_v46 = vmul.f32 %v3782_v19, %v1056_v45  ;;  %v5375_v44 = vld [vmem:[%s3610_s25 + $0x854] sm:$0xff]  ;;  %v457_v25 = vld [vmem:[%s3610_s25 + $0x85c] sm:$0xff] }
 0x18c   : > { %v2966_v38 = vadd.f32 %v2965_v7, %v5274_v18  ;;  %v2100_v35 = vmul.f32 %v3786_v28, %v1057_v51  ;;  %v5341_v43 = vmul.f32 %v3789_v31, %v1058_v55  ;;  %v2930_v14 = vadd.f32 %v2929_v37, %v2094_v27 }
 0x18d   : > { %2896 = vadd.xlane.f32.xlu0 %v2895_v21  ;;  %v5346_v30 = vmul.f32 %v3792_v32, %v1059_v26  ;;  %v1120_v18 = vunpack.c.l.bf16 %v452_v23  ;;  %v1121_v24 = vunpack.c.h.bf16 %v452_v23  ;;  %v5349_v45 = vmul.f32 %v3795_v33, %v1060_v50  ;;  %v458_v21 = vld [vmem:[%s3610_s25 + $0x864] sm:$0xff] }
 0x18e   : > { %v2967_v4 = vadd.f32 %v2966_v38, %v5277_v2  ;;  %v5352_v13 = vmul.f32 %v3798_v34, %v1061_v54  ;;  %v2112_v51 = vmul.f32 %v3827_v3, %v1069_v59  ;;  %v2931_v55 = vadd.f32 %v2930_v14, %v2095_v20  ;;  %v6881_v59 = vld [vmem:[#allocation12_spill] sm:$0xff]  ;;  %v6883_v20 = vld [vmem:[#allocation13_spill] sm:$0xff] }
 0x18f   : > { %v5357_v2 = vmul.f32 %v3801_v39, %v1062_v61  ;;  %v5360_v26 = vmul.f32 %v3805_v63, %v1063_v62  ;;  %v1122_v47 = vunpack.c.l.bf16 %v453_v53  ;;  %v5363_v27 = vmul.f32 %v3808_v6, %v1064_v36 }
 0x190   : > { %v2968_v17 = vadd.f32 %v2967_v4, %v5280_v5  ;;  %v5366_v50 = vmul.f32 %v3811_v11, %v1065_v42  ;;  %v5369_v54 = vmul.f32 %v6848_v22, %v1066_v52  ;;  %v2932_v58 = vadd.f32 %v2931_v55, %v2096_v40  ;;  %v454_v5 = vld [vmem:[%s3610_s25 + $0x844] sm:$0xff]  ;;  %v6888_v55 = vld [vmem:[#allocation26_spill] sm:$0xff] }
 0x191   : > { %6878 = vst [vmem:[#allocation16_spill] sm:$0xff] %v5363_v27  ;;  %v1123_v62 = vunpack.c.h.bf16 %v453_v53  ;;  %v2163_v7 = vmul.f32 %v3715_v0, %v1120_v18  ;;  %v2164_v36 = vmul.f32 %v6846_v57, %v1121_v24  ;;  %v5380_v42 = vmul.f32 %v6881_v59, %v1067_v1  ;;  %v6887_v53 = vld [vmem:[#allocation4_spill] sm:$0xff] }
 0x192   : > { %6879 = vst [vmem:[#allocation17_spill] sm:$0xff] %v5366_v50  ;;  %6880 = vst [vmem:[#allocation18_spill] sm:$0xff] %v5369_v54  ;;  %v2969_v61 = vadd.f32 %v2968_v17, %v5283_v15  ;;  %v5383_v52 = vmul.f32 %v6883_v20, %v1068_v49  ;;  %v2933_v40 = vadd.f32 %v2932_v58, %v2097_v56  ;;  %v5386_v37 = vsel %vm2461_vm0, %v2112_v51, 0.0  ;;  %v6886_v15 = vld [vmem:[#allocation25_spill] sm:$0xff]  ;;  %v462_v54 = vld [vmem:[%s3610_s25 + $0x884] sm:$0xff] }
 0x193   : > { %6882 = vst [vmem:[#allocation19_spill] sm:$0xff] %v5380_v42  ;;  %6885 = vst [vmem:[#allocation21_spill] sm:$0xff] %v5386_v37  ;;  %v1124_v38 = vunpack.c.l.bf16 %v454_v5  ;;  %v1125_v14 = vunpack.c.h.bf16 %v454_v5  ;;  %v2165_v4 = vmul.f32 %v6887_v53, %v1122_v47  ;;  %v1126_v1 = vunpack.c.l.bf16 %v455_v41  ;;  %v459_v17 = vld [vmem:[%s3610_s25 + $0x86c] sm:$0xff]  ;;  %v460_v51 = vld [vmem:[%s3610_s25 + $0x874] sm:$0xff] }
 0x194   : > { %6884 = vst [vmem:[#allocation20_spill] sm:$0xff] %v5383_v52  ;;  %v2970_v23 = vadd.f32 %v2969_v61, %v6886_v15  ;;  %v2934_v18 = vadd.f32 %v2933_v40, %v2098_v60  ;;  %v1127_v24 = vunpack.c.h.bf16 %v455_v41  ;;  %v1128_v49 = vunpack.c.l.bf16 %v5375_v44  ;;  %v6889_v61 = vld [vmem:[#allocation5_spill] sm:$0xff]  ;;  %v6890_v40 = vld [vmem:[#allocation27_spill] sm:$0xff] }
 0x195   : > { %v1129_v58 = vunpack.c.h.bf16 %v5375_v44  ;;  %v2166_v15 = vmul.f32 %v6889_v61, %v1123_v62  ;;  %v3006_v37 = vadd.f32 %v2164_v36, %v2163_v7  ;;  %v1130_v47 = vunpack.c.l.bf16 %v457_v25  ;;  %v461_v41 = vld [vmem:[%s3610_s25 + $0x87c] sm:$0xff]  ;;  %v6891_v62 = vld [vmem:[#allocation28_spill] sm:$0xff] }
 0x196   : > { %v2971_v56 = vadd.f32 %v2970_v23, %v6888_v55  ;;  %v2935_v5 = vadd.f32 %v2934_v18, %v2099_v46  ;;  %v1131_v52 = vunpack.c.h.bf16 %v457_v25  ;;  %v1132_v60 = vunpack.c.l.bf16 %v458_v21  ;;  %v463_v36 = vld [vmem:[%s3610_s25 + $0x88c] sm:$0xff] }
 0x197   : > { %v1133_v50 = vunpack.c.h.bf16 %v458_v21  ;;  %v2167_v23 = vmul.f32 %v6840_v29, %v1124_v38  ;;  %v3007_v55 = vadd.f32 %v3006_v37, %v2165_v4  ;;  %v1134_v27 = vunpack.c.l.bf16 %v459_v17  ;;  %v5405_v46 = vld [vmem:[%s3610_s25 + $0x830] ss:$100 sps:$4 sm:$0xff]   ;;  %v6892_v37 = vld [vmem:[#allocation15_spill] sm:$0xff] }
 0x198   : > { %v2972_v42 = vadd.f32 %v2971_v56, %v6890_v40  ;;  %v2936_v53 = vadd.f32 %v2935_v5, %v2100_v35  ;;  %v1135_v44 = vunpack.c.h.bf16 %v459_v17  ;;  %v1136_v20 = vunpack.c.l.bf16 %v460_v51 }
 0x199   : > { %v1137_v18 = vunpack.c.h.bf16 %v460_v51  ;;  %v2168_v25 = vmul.f32 %v6874_v48, %v1125_v14  ;;  %v3008_v61 = vadd.f32 %v3007_v55, %v2166_v15  ;;  %v1138_v21 = vunpack.c.l.bf16 %v461_v41  ;;  %v6893_v51 = vld [vmem:[#allocation29_spill] sm:$0xff] }
 0x19a   : > { %v2973_v7 = vadd.f32 %v2972_v42, %v6891_v62  ;;  %v2937_v56 = vadd.f32 %v2936_v53, %v5341_v43  ;;  %v1139_v40 = vunpack.c.h.bf16 %v461_v41  ;;  %v1140_v38 = vunpack.c.l.bf16 %v462_v54  ;;  %v439_v55 = vld [vmem:[%s3610_s25 + $0x7d0] sm:$0xff] }
 0x19b   : > { %v1141_v4 = vunpack.c.h.bf16 %v462_v54  ;;  %v2169_v17 = vmul.f32 %v3767_v8, %v1126_v1  ;;  %v3009_v5 = vadd.f32 %v3008_v61, %v2167_v23  ;;  %v1142_v62 = vunpack.c.l.bf16 %v463_v36 }
 0x19c   : > { %v2974_v35 = vadd.f32 %v2973_v7, %v6892_v37  ;;  %v2938_v42 = vadd.f32 %v2937_v56, %v5346_v30  ;;  %v1143_v29 = vunpack.c.h.bf16 %v463_v36  ;;  %v1144_v14 = vunpack.c.h.bf16 %v5405_v46  ;;  %v440_v36 = vld [vmem:[%s3610_s25 + $0x7d8] sm:$0xff]  ;;  %v441_v37 = vld [vmem:[%s3610_s25 + $0x7e0] sm:$0xff] }
 0x19d   : > { %v2170_v43 = vmul.f32 %v3770_v9, %v1127_v24  ;;  %v2171_v53 = vmul.f32 %v3773_v12, %v1128_v49  ;;  %v3010_v41 = vadd.f32 %v3009_v5, %v2168_v25  ;;  %v2172_v1 = vmul.f32 %v3776_v10, %v1129_v58  ;;  %v442_v5 = vld [vmem:[%s3610_s25 + $0x7e8] sm:$0xff] }
 0x19e   : > { %v2976_v15 = vadd.f32 %v6893_v51, %v2974_v35  ;;  %v2939_v54 = vadd.f32 %v2938_v42, %v5349_v45  ;;  %v2173_v61 = vmul.f32 %v3779_v16, %v1130_v47  ;;  %v2174_v30 = vmul.f32 %v3782_v19, %v1131_v52 }
 0x19f   : > { %v2175_v23 = vmul.f32 %v3786_v28, %v1132_v60  ;;  %v5423_v7 = vmul.f32 %v3789_v31, %v1133_v50  ;;  %v5426_v24 = vmul.f32 %v3792_v32, %v1134_v27  ;;  %v3011_v49 = vadd.f32 %v3010_v41, %v2169_v17  ;;  %v6902_v41 = vld [vmem:[#allocation16_spill] sm:$0xff] }
 0x1a0   : > { %2977 = vadd.xlane.f32.xlu1 %v2976_v15  ;;  %v2940_v45 = vadd.f32 %v2939_v54, %v5352_v13  ;;  %v5431_v58 = vmul.f32 %v3795_v33, %v1135_v44  ;;  %v1095_v47 = vunpack.c.l.bf16 %v439_v55  ;;  %v1096_v52 = vunpack.c.h.bf16 %v439_v55 }
 0x1a1   : > { %v5434_v60 = vmul.f32 %v3798_v34, %v1136_v20  ;;  %v5437_v50 = vmul.f32 %v3801_v39, %v1137_v18  ;;  %v2187_v27 = vmul.f32 %v3827_v3, %v1144_v14  ;;  %v3012_v25 = vadd.f32 %v3011_v49, %v2170_v43 }
 0x1a2   : > { %v2941_v56 = vadd.f32 %v2940_v45, %v5357_v2  ;;  %v5442_v13 = vmul.f32 %v3805_v63, %v1138_v21  ;;  %v5445_v44 = vmul.f32 %v3808_v6, %v1139_v40  ;;  %v1097_v35 = vunpack.c.l.bf16 %v440_v36  ;;  %v443_v40 = vld [vmem:[%s3610_s25 + $0x7f0] sm:$0xff] }
 0x1a3   : > { %v5449_v20 = vmul.f32 %v3811_v11, %v1140_v38  ;;  %v5452_v18 = vmul.f32 %v6848_v22, %v1141_v4  ;;  %v5455_v17 = vmul.f32 %v6881_v59, %v1142_v62  ;;  %v3013_v2 = vadd.f32 %v3012_v25, %v2171_v53  ;;  %v6899_v38 = vld [vmem:[#allocation13_spill] sm:$0xff] }
 0x1a4   : > { %6894 = vst [vmem:[#allocation22_spill] sm:$0xff] %v5442_v13  ;;  %6895 = vst [vmem:[#allocation23_spill] sm:$0xff] %v5445_v44  ;;  %v2942_v21 = vadd.f32 %v2941_v56, %v5360_v26  ;;  %v1098_v42 = vunpack.c.h.bf16 %v440_v36  ;;  %v2138_v14 = vmul.f32 %v3715_v0, %v1095_v47  ;;  %v2139_v51 = vmul.f32 %v6846_v57, %v1096_v52  ;;  %v444_v62 = vld [vmem:[%s3610_s25 + $0x7f8] sm:$0xff]  ;;  %v445_v26 = vld [vmem:[%s3610_s25 + $0x800] sm:$0xff] }
 0x1a5   : > { %6896 = vst [vmem:[#allocation24_spill] sm:$0xff] %v5449_v20  ;;  %6897 = vst [vmem:[#allocation25_spill] sm:$0xff] %v5452_v18  ;;  %v5463_v15 = vmul.f32 %v6899_v38, %v1143_v29  ;;  %v3014_v4 = vadd.f32 %v3013_v2, %v2172_v1  ;;  %v5466_v43 = vsel %vm2461_vm0, %v2187_v27, 0.0  ;;  %v1099_v53 = vunpack.c.l.bf16 %v441_v37  ;;  %v6903_v36 = vld [vmem:[#allocation4_spill] sm:$0xff]  ;;  %v6904_v1 = vld [vmem:[#allocation17_spill] sm:$0xff] }
 0x1a6   : > { %6898 = vst [vmem:[#allocation26_spill] sm:$0xff] %v5455_v17  ;;  %6901 = vst [vmem:[#allocation28_spill] sm:$0xff] %v5466_v43  ;;  %v2943_v55 = vadd.f32 %v2942_v21, %v6902_v41  ;;  %v1100_v54 = vunpack.c.h.bf16 %v441_v37  ;;  %v1101_v49 = vunpack.c.l.bf16 %v442_v5  ;;  %v2140_v45 = vmul.f32 %v6903_v36, %v1097_v35  ;;  %v446_v52 = vld [vmem:[%s3610_s25 + $0x808] sm:$0xff]  ;;  %v447_v27 = vld [vmem:[%s3610_s25 + $0x810] sm:$0xff] }
 0x1a7   : > { %6900 = vst [vmem:[#allocation27_spill] sm:$0xff] %v5463_v15  ;;  %v3015_v47 = vadd.f32 %v3014_v4, %v2173_v61  ;;  %v1102_v29 = vunpack.c.h.bf16 %v442_v5  ;;  %v1103_v25 = vunpack.c.l.bf16 %v443_v40  ;;  %v1104_v56 = vunpack.c.h.bf16 %v443_v40  ;;  %v6905_v15 = vld [vmem:[#allocation5_spill] sm:$0xff]  ;;  %v6906_v35 = vld [vmem:[#allocation18_spill] sm:$0xff]  ;;  %v6908_v57 = vld [vmem:[#allocation19_spill] sm:$0xff] }
 0x1a8   : > { %v2944_v2 = vadd.f32 %v2943_v55, %v6904_v1  ;;  %v1105_v43 = vunpack.c.l.bf16 %v444_v62  ;;  %v2141_v17 = vmul.f32 %v6905_v15, %v1098_v42  ;;  %v2979_v21 = vadd.f32 %v2139_v51, %v2138_v14  ;;  %v448_v18 = vld [vmem:[%s3610_s25 + $0x818] sm:$0xff]  ;;  %v449_v4 = vld [vmem:[%s3610_s25 + $0x820] sm:$0xff]  ;;  %v450_v55 = vld [vmem:[%s3610_s25 + $0x828] sm:$0xff] }
 0x1a9   : > { %v3016_v41 = vadd.f32 %v3015_v47, %v2174_v30  ;;  %v1106_v37 = vunpack.c.h.bf16 %v444_v62  ;;  %v1107_v20 = vunpack.c.l.bf16 %v445_v26  ;;  %v1108_v44 = vunpack.c.h.bf16 %v445_v26  ;;  %v6907_v5 = vld [vmem:[#allocation6_spill] sm:$0xff] }
 0x1aa   : > { %v2945_v61 = vadd.f32 %v2944_v2, %v6906_v35  ;;  %v1109_v36 = vunpack.c.l.bf16 %v446_v52  ;;  %v2142_v38 = vmul.f32 %v6907_v5, %v1099_v53  ;;  %v2980_v40 = vadd.f32 %v2979_v21, %v2140_v45  ;;  %v6909_v35 = vld [vmem:[#allocation20_spill] sm:$0xff] }
 0x1ab   : > { %v3017_v59 = vadd.f32 %v3016_v41, %v2175_v23  ;;  %v1110_v1 = vunpack.c.h.bf16 %v446_v52  ;;  %v1111_v22 = vunpack.c.l.bf16 %v447_v27  ;;  %v1112_v13 = vunpack.c.h.bf16 %v447_v27  ;;  %v6910_v41 = vld [vmem:[#allocation21_spill] sm:$0xff] }
 0x1ac   : > { %v2946_v42 = vadd.f32 %v2945_v61, %v6908_v57  ;;  %v1113_v30 = vunpack.c.l.bf16 %v448_v18  ;;  %v2143_v14 = vmul.f32 %v6874_v48, %v1100_v54  ;;  %v2981_v51 = vadd.f32 %v2980_v40, %v2141_v17  ;;  %v478_v17 = vld [vmem:[%s3610_s25 + $0x8fc] sm:$0xff]  ;;  %v479_v40 = vld [vmem:[%s3610_s25 + $0x904] sm:$0xff] }
 0x1ad   : > { %v3018_v62 = vadd.f32 %v3017_v59, %v5423_v7  ;;  %v1114_v26 = vunpack.c.h.bf16 %v448_v18  ;;  %v1115_v47 = vunpack.c.l.bf16 %v449_v4  ;;  %v1116_v2 = vunpack.c.h.bf16 %v449_v4 }
 0x1ae   : > { %v2947_v53 = vadd.f32 %v2946_v42, %v6909_v35  ;;  %v1117_v45 = vunpack.c.l.bf16 %v450_v55  ;;  %v2144_v23 = vmul.f32 %v3767_v8, %v1101_v49  ;;  %v2982_v52 = vadd.f32 %v2981_v51, %v2142_v38 }
 0x1af   : > { %v3019_v27 = vadd.f32 %v3018_v62, %v5426_v24  ;;  %v1118_v57 = vunpack.c.h.bf16 %v450_v55  ;;  %v1119_v21 = vunpack.c.l.bf16 %v5405_v46  ;;  %v2145_v54 = vmul.f32 %v3770_v9, %v1102_v29  ;;  %v481_v62 = vld [vmem:[%s3610_s25 + $0x914] sm:$0xff] }
 0x1b0   : > { %v2949_v59 = vadd.f32 %v6910_v41, %v2947_v53  ;;  %v2146_v7 = vmul.f32 %v3773_v12, %v1103_v25  ;;  %v2147_v18 = vmul.f32 %v3776_v10, %v1104_v56  ;;  %v2983_v61 = vadd.f32 %v2982_v52, %v2143_v14  ;;  %v482_v41 = vld [vmem:[%s3610_s25 + $0x91c] sm:$0xff] }
 0x1b1   : > { %v3020_v4 = vadd.f32 %v3019_v27, %v5431_v58  ;;  %v2148_v49 = vmul.f32 %v3779_v16, %v1105_v43  ;;  %v2149_v38 = vmul.f32 %v3782_v19, %v1106_v37  ;;  %v2150_v24 = vmul.f32 %v3786_v28, %v1107_v20 }
 0x1b2   : > { %2950 = vadd.xlane.f32.xlu0 %v2949_v59  ;;  %v5499_v46 = vmul.f32 %v3789_v31, %v1108_v44  ;;  %v2984_v29 = vadd.f32 %v2983_v61, %v2144_v23  ;;  %v1170_v55 = vunpack.c.l.bf16 %v478_v17  ;;  %v1171_v25 = vunpack.c.h.bf16 %v478_v17  ;;  %v6913_v23 = vld [vmem:[#allocation3_spill] sm:$0xff] }
 0x1b3   : > { %v3021_v56 = vadd.f32 %v3020_v4, %v5434_v60  ;;  %v5503_v58 = vmul.f32 %v3792_v32, %v1109_v36  ;;  %v5506_v43 = vmul.f32 %v3795_v33, %v1110_v1  ;;  %v5509_v20 = vmul.f32 %v3798_v34, %v1111_v22  ;;  %v480_v1 = vld [vmem:[%s3610_s25 + $0x90c] sm:$0xff]  ;;  %v483_v61 = vld [vmem:[%s3610_s25 + $0x924] sm:$0xff] }
 0x1b4   : > { %v5512_v37 = vmul.f32 %v3801_v39, %v1112_v13  ;;  %v2162_v44 = vmul.f32 %v3827_v3, %v1119_v21  ;;  %v2985_v42 = vadd.f32 %v2984_v29, %v2145_v54  ;;  %v1172_v14 = vunpack.c.l.bf16 %v479_v40 }
 0x1b5   : > { %v3022_v51 = vadd.f32 %v3021_v56, %v5437_v50  ;;  %v5517_v60 = vmul.f32 %v3805_v63, %v1113_v30  ;;  %v5520_v36 = vmul.f32 %v3808_v6, %v1114_v26  ;;  %v5523_v22 = vmul.f32 %v3811_v11, %v1115_v47  ;;  %v6914_v50 = vld [vmem:[#allocation22_spill] sm:$0xff]  ;;  %v6915_v30 = vld [vmem:[#allocation11_spill] sm:$0xff]  ;;  %v6917_v26 = vld [vmem:[#allocation12_spill] sm:$0xff] }
 0x1b6   : > { %v2986_v13 = vadd.f32 %v2985_v42, %v2146_v7  ;;  %v1173_v35 = vunpack.c.h.bf16 %v479_v40  ;;  %v2213_v53 = vmul.f32 %v3715_v0, %v1170_v55  ;;  %v2214_v52 = vmul.f32 %v6913_v23, %v1171_v25  ;;  %v6919_v47 = vld [vmem:[#allocation13_spill] sm:$0xff]  ;;  %v6922_v40 = vld [vmem:[#allocation4_spill] sm:$0xff]  ;;  %v6923_v55 = vld [vmem:[#allocation23_spill] sm:$0xff] }
 0x1b7   : > { %6911 = vst [vmem:[#allocation15_spill] sm:$0xff] %v5520_v36  ;;  %6912 = vst [vmem:[#allocation29_spill] sm:$0xff] %v5523_v22  ;;  %v3023_v27 = vadd.f32 %v3022_v51, %v6914_v50  ;;  %v5531_v21 = vmul.f32 %v6915_v30, %v1116_v2  ;;  %v5534_v54 = vmul.f32 %v6917_v26, %v1117_v45  ;;  %v5541_v7 = vsel %vm2461_vm0, %v2162_v44, 0.0  ;;  %v484_v2 = vld [vmem:[%s3610_s25 + $0x92c] sm:$0xff] }
 0x1b8   : > { %v5537_v17 = vmul.f32 %v6919_v47, %v1118_v57  ;;  %v2987_v59 = vadd.f32 %v2986_v13, %v2147_v18  ;;  %6921 = vst [vmem:[#allocation19_spill] sm:$0xff] %v5541_v7  ;;  %v1174_v4 = vunpack.c.l.bf16 %v480_v1  ;;  %v2215_v29 = vmul.f32 %v6922_v40, %v1172_v14  ;;  %v485_v57 = vld [vmem:[%s3610_s25 + $0x934] sm:$0xff]  ;;  %v6924_v44 = vld [vmem:[#allocation24_spill] sm:$0xff] }
 0x1b9   : > { %6916 = vst [vmem:[#allocation16_spill] sm:$0xff] %v5531_v21  ;;  %6918 = vst [vmem:[#allocation17_spill] sm:$0xff] %v5534_v54  ;;  %v3024_v25 = vadd.f32 %v3023_v27, %v6923_v55  ;;  %v1175_v56 = vunpack.c.h.bf16 %v480_v1  ;;  %v1176_v45 = vunpack.c.l.bf16 %v481_v62  ;;  %v1177_v42 = vunpack.c.h.bf16 %v481_v62  ;;  %v487_v55 = vld [vmem:[%s3610_s25 + $0x944] sm:$0xff]  ;;  %v488_v36 = vld [vmem:[%s3610_s25 + $0x94c] sm:$0xff] }
 0x1ba   : > { %6920 = vst [vmem:[#allocation18_spill] sm:$0xff] %v5537_v17  ;;  %v2988_v51 = vadd.f32 %v2987_v59, %v2148_v49  ;;  %v1178_v50 = vunpack.c.l.bf16 %v482_v41  ;;  %v2216_v18 = vmul.f32 %v6905_v15, %v1173_v35  ;;  %v3060_v13 = vadd.f32 %v2214_v52, %v2213_v53  ;;  %v486_v17 = vld [vmem:[%s3610_s25 + $0x93c] sm:$0xff]  ;;  %v6925_v59 = vld [vmem:[#allocation25_spill] sm:$0xff] }
 0x1bb   : > { %v3025_v7 = vadd.f32 %v3024_v25, %v6924_v44  ;;  %v1179_v54 = vunpack.c.h.bf16 %v482_v41  ;;  %v1180_v14 = vunpack.c.l.bf16 %v483_v61  ;;  %v1181_v21 = vunpack.c.h.bf16 %v483_v61  ;;  %v489_v25 = vld [vmem:[%s3610_s25 + $0x954] sm:$0xff] }
 0x1bc   : > { %v2989_v27 = vadd.f32 %v2988_v51, %v2149_v38  ;;  %v1182_v1 = vunpack.c.l.bf16 %v484_v2  ;;  %v2217_v62 = vmul.f32 %v6907_v5, %v1174_v4  ;;  %v3061_v49 = vadd.f32 %v3060_v13, %v2215_v29  ;;  %v6926_v61 = vld [vmem:[#allocation26_spill] sm:$0xff] }
 0x1bd   : > { %v3026_v22 = vadd.f32 %v3025_v7, %v6925_v59  ;;  %v1183_v40 = vunpack.c.h.bf16 %v484_v2  ;;  %v1184_v35 = vunpack.c.l.bf16 %v485_v57  ;;  %v1185_v53 = vunpack.c.h.bf16 %v485_v57  ;;  %v5559_v51 = vld [vmem:[%s3610_s25 + $0x8f8] ss:$100 sps:$4 sm:$0xff]  }
 0x1be   : > { %v2990_v52 = vadd.f32 %v2989_v27, %v2150_v24  ;;  %v1186_v44 = vunpack.c.l.bf16 %v486_v17  ;;  %v2218_v41 = vmul.f32 %v6874_v48, %v1175_v56  ;;  %v3062_v15 = vadd.f32 %v3061_v49, %v2216_v18  ;;  %v6927_v24 = vld [vmem:[#allocation27_spill] sm:$0xff]  ;;  %v6928_v48 = vld [vmem:[#allocation28_spill] sm:$0xff] }
 0x1bf   : > { %v3027_v38 = vadd.f32 %v3026_v22, %v6926_v61  ;;  %v1187_v47 = vunpack.c.h.bf16 %v486_v17  ;;  %v1188_v4 = vunpack.c.l.bf16 %v487_v55  ;;  %v1189_v29 = vunpack.c.h.bf16 %v487_v55  ;;  %v465_v55 = vld [vmem:[%s3610_s25 + $0x898] sm:$0xff] }
 0x1c0   : > { %v2991_v7 = vadd.f32 %v2990_v52, %v5499_v46  ;;  %v1190_v13 = vunpack.c.l.bf16 %v488_v36  ;;  %v2219_v2 = vmul.f32 %v3767_v8, %v1176_v45  ;;  %v3063_v57 = vadd.f32 %v3062_v15, %v2217_v62 }
 0x1c1   : > { %v3028_v27 = vadd.f32 %v3027_v38, %v6927_v24  ;;  %v1191_v59 = vunpack.c.h.bf16 %v488_v36  ;;  %v1192_v56 = vunpack.c.l.bf16 %v489_v25  ;;  %v1193_v18 = vunpack.c.h.bf16 %v489_v25  ;;  %v466_v38 = vld [vmem:[%s3610_s25 + $0x8a0] sm:$0xff] }
 0x1c2   : > { %v2992_v22 = vadd.f32 %v2991_v7, %v5503_v58  ;;  %v1194_v49 = vunpack.c.h.bf16 %v5559_v51  ;;  %v2220_v17 = vmul.f32 %v3770_v9, %v1177_v42  ;;  %v3064_v61 = vadd.f32 %v3063_v57, %v2218_v41  ;;  %v467_v57 = vld [vmem:[%s3610_s25 + $0x8a8] sm:$0xff] }
 0x1c3   : > { %v3030_v46 = vadd.f32 %v6928_v48, %v3028_v27  ;;  %v2221_v52 = vmul.f32 %v3773_v12, %v1178_v50  ;;  %v2222_v15 = vmul.f32 %v3776_v10, %v1179_v54  ;;  %v2223_v45 = vmul.f32 %v3779_v16, %v1180_v14 }
 0x1c4   : > { %v2993_v36 = vadd.f32 %v2992_v22, %v5506_v43  ;;  %v2224_v62 = vmul.f32 %v3782_v19, %v1181_v21  ;;  %v2225_v58 = vmul.f32 %v3786_v28, %v1182_v1  ;;  %v3065_v25 = vadd.f32 %v3064_v61, %v2219_v2  ;;  %v469_v61 = vld [vmem:[%s3610_s25 + $0x8b8] sm:$0xff] }
 0x1c5   : > { %3031 = vadd.xlane.f32.xlu1 %v3030_v46  ;;  %v5577_v42 = vmul.f32 %v3789_v31, %v1183_v40  ;;  %v5580_v48 = vmul.f32 %v3792_v32, %v1184_v35  ;;  %v1145_v50 = vunpack.c.l.bf16 %v465_v55  ;;  %v1146_v54 = vunpack.c.h.bf16 %v465_v55  ;;  %v470_v55 = vld [vmem:[%s3610_s25 + $0x8c0] sm:$0xff] }
 0x1c6   : > { %v2994_v14 = vadd.f32 %v2993_v36, %v5509_v20  ;;  %v5584_v43 = vmul.f32 %v3795_v33, %v1185_v53  ;;  %v5587_v21 = vmul.f32 %v3798_v34, %v1186_v44  ;;  %v3066_v1 = vadd.f32 %v3065_v25, %v2220_v17  ;;  %v6936_v36 = vld [vmem:[#allocation4_spill] sm:$0xff] }
 0x1c7   : > { %v5590_v41 = vmul.f32 %v3801_v39, %v1187_v47  ;;  %v5593_v40 = vmul.f32 %v3805_v63, %v1188_v4  ;;  %v2237_v35 = vmul.f32 %v3827_v3, %v1194_v49  ;;  %v1147_v7 = vunpack.c.l.bf16 %v466_v38  ;;  %v468_v4 = vld [vmem:[%s3610_s25 + $0x8b0] sm:$0xff] }
 0x1c8   : > { %v2995_v2 = vadd.f32 %v2994_v14, %v5512_v37  ;;  %v5598_v20 = vmul.f32 %v3808_v6, %v1189_v29  ;;  %v5601_v53 = vmul.f32 %v3811_v11, %v1190_v13  ;;  %v3067_v44 = vadd.f32 %v3066_v1, %v2221_v52  ;;  %v6933_v13 = vld [vmem:[#allocation13_spill] sm:$0xff] }
 0x1c9   : > { %v5605_v47 = vmul.f32 %v6915_v30, %v1191_v59  ;;  %v1148_v24 = vunpack.c.h.bf16 %v466_v38  ;;  %v2188_v27 = vmul.f32 %v3715_v0, %v1145_v50  ;;  %v2189_v22 = vmul.f32 %v6913_v23, %v1146_v54  ;;  %v6937_v38 = vld [vmem:[#allocation15_spill] sm:$0xff] }
 0x1ca   : > { %6929 = vst [vmem:[#allocation20_spill] sm:$0xff] %v5598_v20  ;;  %6930 = vst [vmem:[#allocation21_spill] sm:$0xff] %v5601_v53  ;;  %v2996_v37 = vadd.f32 %v2995_v2, %v5517_v60  ;;  %v5612_v29 = vmul.f32 %v6917_v26, %v1192_v56  ;;  %v5615_v49 = vmul.f32 %v6933_v13, %v1193_v18  ;;  %v5619_v59 = vsel %vm2461_vm0, %v2237_v35, 0.0  ;;  %v471_v56 = vld [vmem:[%s3610_s25 + $0x8c8] sm:$0xff]  ;;  %v472_v18 = vld [vmem:[%s3610_s25 + $0x8d0] sm:$0xff] }
 0x1cb   : > { %6931 = vst [vmem:[#allocation22_spill] sm:$0xff] %v5605_v47  ;;  %v3068_v17 = vadd.f32 %v3067_v44, %v2222_v15  ;;  %6935 = vst [vmem:[#allocation25_spill] sm:$0xff] %v5619_v59  ;;  %v1149_v46 = vunpack.c.l.bf16 %v467_v57  ;;  %v1150_v52 = vunpack.c.h.bf16 %v467_v57  ;;  %v2190_v25 = vmul.f32 %v6936_v36, %v1147_v7  ;;  %v6938_v2 = vld [vmem:[#allocation5_spill] sm:$0xff]  ;;  %v474_v53 = vld [vmem:[%s3610_s25 + $0x8e0] sm:$0xff] }
 0x1cc   : > { %6932 = vst [vmem:[#allocation23_spill] sm:$0xff] %v5612_v29  ;;  %6934 = vst [vmem:[#allocation24_spill] sm:$0xff] %v5615_v49  ;;  %v2997_v60 = vadd.f32 %v2996_v37, %v6937_v38  ;;  %v1151_v54 = vunpack.c.l.bf16 %v468_v4  ;;  %v1152_v14 = vunpack.c.h.bf16 %v468_v4  ;;  %v1153_v1 = vunpack.c.l.bf16 %v469_v61  ;;  %v6939_v59 = vld [vmem:[#allocation29_spill] sm:$0xff]  ;;  %v6940_v38 = vld [vmem:[#allocation16_spill] sm:$0xff] }
 0x1cd   : > { %v3069_v50 = vadd.f32 %v3068_v17, %v2223_v45  ;;  %v1154_v15 = vunpack.c.h.bf16 %v469_v61  ;;  %v2191_v35 = vmul.f32 %v6938_v2, %v1148_v24  ;;  %v3033_v44 = vadd.f32 %v2189_v22, %v2188_v27  ;;  %v473_v29 = vld [vmem:[%s3610_s25 + $0x8d8] sm:$0xff]  ;;  %v475_v61 = vld [vmem:[%s3610_s25 + $0x8e8] sm:$0xff]  ;;  %v476_v27 = vld [vmem:[%s3610_s25 + $0x8f0] sm:$0xff] }
 0x1ce   : > { %v2998_v49 = vadd.f32 %v2997_v60, %v6939_v59  ;;  %v1155_v7 = vunpack.c.l.bf16 %v470_v55  ;;  %v1156_v47 = vunpack.c.h.bf16 %v470_v55  ;;  %v1157_v37 = vunpack.c.l.bf16 %v471_v56  ;;  %v6941_v59 = vld [vmem:[#allocation7_spill] sm:$0xff] }
 0x1cf   : > { %v3070_v57 = vadd.f32 %v3069_v50, %v2224_v62  ;;  %v1158_v45 = vunpack.c.h.bf16 %v471_v56  ;;  %v2192_v17 = vmul.f32 %v6907_v5, %v1149_v46  ;;  %v3034_v4 = vadd.f32 %v3033_v44, %v2190_v25  ;;  %v6942_v50 = vld [vmem:[#allocation17_spill] sm:$0xff] }
 0x1d0   : > { %v2999_v36 = vadd.f32 %v2998_v49, %v6940_v38  ;;  %v1159_v13 = vunpack.c.l.bf16 %v472_v18  ;;  %v1160_v24 = vunpack.c.h.bf16 %v472_v18  ;;  %v1161_v22 = vunpack.c.l.bf16 %v473_v29 }
 0x1d1   : > { %v3071_v20 = vadd.f32 %v3070_v57, %v2225_v58  ;;  %v1162_v2 = vunpack.c.h.bf16 %v473_v29  ;;  %v2193_v62 = vmul.f32 %v6941_v59, %v1150_v52  ;;  %v3035_v60 = vadd.f32 %v3034_v4, %v2191_v35  ;;  %v6943_v57 = vld [vmem:[#allocation18_spill] sm:$0xff]  ;;  %v6944_v4 = vld [vmem:[#allocation19_spill] sm:$0xff] }
 0x1d2   : > { %v3000_v55 = vadd.f32 %v2999_v36, %v6942_v50  ;;  %v1163_v26 = vunpack.c.l.bf16 %v474_v53  ;;  %v1164_v46 = vunpack.c.h.bf16 %v474_v53  ;;  %v1165_v25 = vunpack.c.l.bf16 %v475_v61  ;;  %v504_v53 = vld [vmem:[%s3610_s25 + $0x9c4] sm:$0xff]  ;;  %v505_v50 = vld [vmem:[%s3610_s25 + $0x9cc] sm:$0xff] }
 0x1d3   : > { %v3072_v56 = vadd.f32 %v3071_v20, %v5577_v42  ;;  %v1166_v44 = vunpack.c.h.bf16 %v475_v61  ;;  %v2194_v58 = vmul.f32 %v3767_v8, %v1151_v54  ;;  %v3036_v49 = vadd.f32 %v3035_v60, %v2192_v17 }
 0x1d4   : > { %v3001_v18 = vadd.f32 %v3000_v55, %v6943_v57  ;;  %v1167_v29 = vunpack.c.l.bf16 %v476_v27  ;;  %v1168_v52 = vunpack.c.h.bf16 %v476_v27  ;;  %v1169_v35 = vunpack.c.l.bf16 %v5559_v51  ;;  %v507_v57 = vld [vmem:[%s3610_s25 + $0x9dc] sm:$0xff] }
 0x1d5   : > { %v3073_v38 = vadd.f32 %v3072_v56, %v5580_v48  ;;  %v2195_v36 = vmul.f32 %v3770_v9, %v1152_v14  ;;  %v2196_v42 = vmul.f32 %v3773_v12, %v1153_v1  ;;  %v3037_v20 = vadd.f32 %v3036_v49, %v2193_v62 }
 0x1d6   : > { %v3003_v61 = vadd.f32 %v6944_v4, %v3001_v18  ;;  %v2197_v17 = vmul.f32 %v3776_v10, %v1154_v15  ;;  %v2198_v60 = vmul.f32 %v3779_v16, %v1155_v7  ;;  %v2199_v48 = vmul.f32 %v3782_v19, %v1156_v47  ;;  %v5685_v18 = vld [vmem:[%s3610_s25 + $0x9e4] sm:$0xff]  ;;  %v509_v4 = vld [vmem:[%s3610_s25 + $0x9ec] sm:$0xff] }
 0x1d7   : > { %v3074_v54 = vadd.f32 %v3073_v38, %v5584_v43  ;;  %v2200_v27 = vmul.f32 %v3786_v28, %v1157_v37  ;;  %v5651_v51 = vmul.f32 %v3789_v31, %v1158_v45  ;;  %v3038_v14 = vadd.f32 %v3037_v20, %v2194_v58 }
 0x1d8   : > { %3004 = vadd.xlane.f32.xlu0 %v3003_v61  ;;  %v5656_v62 = vmul.f32 %v3792_v32, %v1159_v13  ;;  %v1220_v43 = vunpack.c.l.bf16 %v504_v53  ;;  %v1221_v15 = vunpack.c.h.bf16 %v504_v53  ;;  %v5659_v47 = vmul.f32 %v3795_v33, %v1160_v24  ;;  %v510_v61 = vld [vmem:[%s3610_s25 + $0x9f4] sm:$0xff] }
 0x1d9   : > { %v3075_v1 = vadd.f32 %v3074_v54, %v5587_v21  ;;  %v5662_v7 = vmul.f32 %v3798_v34, %v1161_v22  ;;  %v2212_v37 = vmul.f32 %v3827_v3, %v1169_v35  ;;  %v3039_v45 = vadd.f32 %v3038_v14, %v2195_v36  ;;  %v6948_v35 = vld [vmem:[#allocation12_spill] sm:$0xff]  ;;  %v6950_v36 = vld [vmem:[#allocation13_spill] sm:$0xff] }
 0x1da   : > { %v5667_v21 = vmul.f32 %v3801_v39, %v1162_v2  ;;  %v5670_v13 = vmul.f32 %v3805_v63, %v1163_v26  ;;  %v1222_v56 = vunpack.c.l.bf16 %v505_v50  ;;  %v5673_v58 = vmul.f32 %v3808_v6, %v1164_v46 }
 0x1db   : > { %v3076_v55 = vadd.f32 %v3075_v1, %v5590_v41  ;;  %v5676_v24 = vmul.f32 %v3811_v11, %v1165_v25  ;;  %v5679_v22 = vmul.f32 %v6915_v30, %v1166_v44  ;;  %v3040_v49 = vadd.f32 %v3039_v45, %v2196_v42  ;;  %v506_v41 = vld [vmem:[%s3610_s25 + $0x9d4] sm:$0xff] }
 0x1dc   : > { %6945 = vst [vmem:[#allocation26_spill] sm:$0xff] %v5673_v58  ;;  %v1223_v26 = vunpack.c.h.bf16 %v505_v50  ;;  %v2263_v38 = vmul.f32 %v3715_v0, %v1220_v43  ;;  %v2264_v46 = vmul.f32 %v6913_v23, %v1221_v15  ;;  %v5690_v25 = vmul.f32 %v6948_v35, %v1167_v29  ;;  %v6954_v50 = vld [vmem:[#allocation4_spill] sm:$0xff]  ;;  %v6955_v45 = vld [vmem:[#allocation21_spill] sm:$0xff] }
 0x1dd   : > { %6946 = vst [vmem:[#allocation27_spill] sm:$0xff] %v5676_v24  ;;  %6947 = vst [vmem:[#allocation28_spill] sm:$0xff] %v5679_v22  ;;  %v3077_v2 = vadd.f32 %v3076_v55, %v5593_v40  ;;  %v5693_v44 = vmul.f32 %v6950_v36, %v1168_v52  ;;  %v3041_v42 = vadd.f32 %v3040_v49, %v2197_v17  ;;  %v5696_v20 = vsel %vm2461_vm0, %v2212_v37, 0.0  ;;  %v6953_v40 = vld [vmem:[#allocation20_spill] sm:$0xff]  ;;  %v511_v55 = vld [vmem:[%s3610_s25 + $0x9fc] sm:$0xff] }
 0x1de   : > { %6949 = vst [vmem:[#allocation15_spill] sm:$0xff] %v5690_v25  ;;  %6952 = vst [vmem:[#allocation16_spill] sm:$0xff] %v5696_v20  ;;  %v1224_v54 = vunpack.c.l.bf16 %v506_v41  ;;  %v1225_v14 = vunpack.c.h.bf16 %v506_v41  ;;  %v2265_v1 = vmul.f32 %v6954_v50, %v1222_v56  ;;  %v1226_v29 = vunpack.c.l.bf16 %v507_v57  ;;  %v512_v37 = vld [vmem:[%s3610_s25 + $0xa04] sm:$0xff]  ;;  %v514_v22 = vld [vmem:[%s3610_s25 + $0xa14] sm:$0xff] }
 0x1df   : > { %6951 = vst [vmem:[#allocation29_spill] sm:$0xff] %v5693_v44  ;;  %v3078_v53 = vadd.f32 %v3077_v2, %v6953_v40  ;;  %v3042_v43 = vadd.f32 %v3041_v42, %v2198_v60  ;;  %v1227_v15 = vunpack.c.h.bf16 %v507_v57  ;;  %v1228_v52 = vunpack.c.l.bf16 %v5685_v18  ;;  %v6956_v2 = vld [vmem:[#allocation5_spill] sm:$0xff]  ;;  %v6957_v42 = vld [vmem:[#allocation22_spill] sm:$0xff] }
 0x1e0   : > { %v1229_v49 = vunpack.c.h.bf16 %v5685_v18  ;;  %v2266_v40 = vmul.f32 %v6956_v2, %v1223_v26  ;;  %v3114_v20 = vadd.f32 %v2264_v46, %v2263_v38  ;;  %v1230_v56 = vunpack.c.l.bf16 %v509_v4  ;;  %v513_v57 = vld [vmem:[%s3610_s25 + $0xa0c] sm:$0xff]  ;;  %v6958_v26 = vld [vmem:[#allocation23_spill] sm:$0xff] }
 0x1e1   : > { %v3079_v17 = vadd.f32 %v3078_v53, %v6955_v45  ;;  %v3043_v41 = vadd.f32 %v3042_v43, %v2199_v48  ;;  %v1231_v44 = vunpack.c.h.bf16 %v509_v4  ;;  %v1232_v60 = vunpack.c.l.bf16 %v510_v61  ;;  %v515_v46 = vld [vmem:[%s3610_s25 + $0xa1c] sm:$0xff] }
 0x1e2   : > { %v1233_v24 = vunpack.c.h.bf16 %v510_v61  ;;  %v2267_v53 = vmul.f32 %v6907_v5, %v1224_v54  ;;  %v3115_v45 = vadd.f32 %v3114_v20, %v2265_v1  ;;  %v1234_v58 = vunpack.c.l.bf16 %v511_v55  ;;  %v5715_v48 = vld [vmem:[%s3610_s25 + $0x9c0] ss:$100 sps:$4 sm:$0xff]   ;;  %v6959_v20 = vld [vmem:[#allocation24_spill] sm:$0xff] }
 0x1e3   : > { %v3080_v25 = vadd.f32 %v3079_v17, %v6957_v42  ;;  %v3044_v50 = vadd.f32 %v3043_v41, %v2200_v27  ;;  %v1235_v18 = vunpack.c.h.bf16 %v511_v55  ;;  %v1236_v36 = vunpack.c.l.bf16 %v512_v37 }
 0x1e4   : > { %v1237_v43 = vunpack.c.h.bf16 %v512_v37  ;;  %v2268_v4 = vmul.f32 %v6941_v59, %v1225_v14  ;;  %v3116_v2 = vadd.f32 %v3115_v45, %v2266_v40  ;;  %v1238_v61 = vunpack.c.l.bf16 %v513_v57  ;;  %v6960_v37 = vld [vmem:[#allocation25_spill] sm:$0xff]  ;;  %v491_v45 = vld [vmem:[%s3610_s25 + $0x960] sm:$0xff] }
 0x1e5   : > { %v3081_v38 = vadd.f32 %v3080_v25, %v6958_v26  ;;  %v3045_v17 = vadd.f32 %v3044_v50, %v5651_v51  ;;  %v1239_v42 = vunpack.c.h.bf16 %v513_v57  ;;  %v1240_v54 = vunpack.c.l.bf16 %v514_v22 }
 0x1e6   : > { %v1241_v1 = vunpack.c.h.bf16 %v514_v22  ;;  %v2269_v55 = vmul.f32 %v3767_v8, %v1226_v29  ;;  %v3117_v41 = vadd.f32 %v3116_v2, %v2267_v53  ;;  %v1242_v26 = vunpack.c.l.bf16 %v515_v46 }
 0x1e7   : > { %v3082_v27 = vadd.f32 %v3081_v38, %v6959_v20  ;;  %v3046_v25 = vadd.f32 %v3045_v17, %v5656_v62  ;;  %v1243_v5 = vunpack.c.h.bf16 %v515_v46  ;;  %v1244_v14 = vunpack.c.h.bf16 %v5715_v48  ;;  %v492_v46 = vld [vmem:[%s3610_s25 + $0x968] sm:$0xff]  ;;  %v493_v20 = vld [vmem:[%s3610_s25 + $0x970] sm:$0xff] }
 0x1e8   : > { %v2270_v51 = vmul.f32 %v3770_v9, %v1227_v15  ;;  %v2271_v50 = vmul.f32 %v3773_v12, %v1228_v52  ;;  %v3118_v57 = vadd.f32 %v3117_v41, %v2268_v4  ;;  %v2272_v29 = vmul.f32 %v3776_v10, %v1229_v49  ;;  %v494_v41 = vld [vmem:[%s3610_s25 + $0x978] sm:$0xff] }
 0x1e9   : > { %v3084_v40 = vadd.f32 %v6960_v37, %v3082_v27  ;;  %v3047_v22 = vadd.f32 %v3046_v25, %v5659_v47  ;;  %v2273_v2 = vmul.f32 %v3779_v16, %v1230_v56  ;;  %v2274_v62 = vmul.f32 %v3782_v19, %v1231_v44 }
 0x1ea   : > { %v2275_v53 = vmul.f32 %v3786_v28, %v1232_v60  ;;  %v5733_v38 = vmul.f32 %v3789_v31, %v1233_v24  ;;  %v5736_v15 = vmul.f32 %v3792_v32, %v1234_v58  ;;  %v3119_v52 = vadd.f32 %v3118_v57, %v2269_v55  ;;  %v6969_v57 = vld [vmem:[#allocation26_spill] sm:$0xff] }
 0x1eb   : > { %3085 = vadd.xlane.f32.xlu1 %v3084_v40  ;;  %v3048_v47 = vadd.f32 %v3047_v22, %v5662_v7  ;;  %v5741_v49 = vmul.f32 %v3795_v33, %v1235_v18  ;;  %v1195_v56 = vunpack.c.l.bf16 %v491_v45  ;;  %v1196_v44 = vunpack.c.h.bf16 %v491_v45 }
 0x1ec   : > { %v5744_v60 = vmul.f32 %v3798_v34, %v1236_v36  ;;  %v5747_v24 = vmul.f32 %v3801_v39, %v1237_v43  ;;  %v2287_v58 = vmul.f32 %v3827_v3, %v1244_v14  ;;  %v3120_v4 = vadd.f32 %v3119_v52, %v2270_v51 }
 0x1ed   : > { %v3049_v17 = vadd.f32 %v3048_v47, %v5667_v21  ;;  %v5752_v7 = vmul.f32 %v3805_v63, %v1238_v61  ;;  %v5755_v18 = vmul.f32 %v3808_v6, %v1239_v42  ;;  %v1197_v27 = vunpack.c.l.bf16 %v492_v46  ;;  %v495_v42 = vld [vmem:[%s3610_s25 + $0x980] sm:$0xff] }
 0x1ee   : > { %v5759_v36 = vmul.f32 %v3811_v11, %v1240_v54  ;;  %v5762_v43 = vmul.f32 %v6915_v30, %v1241_v1  ;;  %v5765_v55 = vmul.f32 %v6948_v35, %v1242_v26  ;;  %v3121_v21 = vadd.f32 %v3120_v4, %v2271_v50  ;;  %v6966_v54 = vld [vmem:[#allocation13_spill] sm:$0xff]  ;;  %v496_v26 = vld [vmem:[%s3610_s25 + $0x988] sm:$0xff] }
 0x1ef   : > { %6961 = vst [vmem:[#allocation17_spill] sm:$0xff] %v5752_v7  ;;  %6962 = vst [vmem:[#allocation18_spill] sm:$0xff] %v5755_v18  ;;  %v3050_v61 = vadd.f32 %v3049_v17, %v5670_v13  ;;  %v1198_v25 = vunpack.c.h.bf16 %v492_v46  ;;  %v2238_v14 = vmul.f32 %v3715_v0, %v1195_v56  ;;  %v2239_v37 = vmul.f32 %v6913_v23, %v1196_v44  ;;  %v497_v13 = vld [vmem:[%s3610_s25 + $0x990] sm:$0xff]  ;;  %v498_v44 = vld [vmem:[%s3610_s25 + $0x998] sm:$0xff] }
 0x1f0   : > { %6963 = vst [vmem:[#allocation19_spill] sm:$0xff] %v5759_v36  ;;  %6964 = vst [vmem:[#allocation20_spill] sm:$0xff] %v5762_v43  ;;  %v5773_v40 = vmul.f32 %v6966_v54, %v1243_v5  ;;  %v3122_v1 = vadd.f32 %v3121_v21, %v2272_v29  ;;  %v5776_v51 = vsel %vm2461_vm0, %v2287_v58, 0.0  ;;  %v1199_v50 = vunpack.c.l.bf16 %v493_v20  ;;  %v6970_v46 = vld [vmem:[#allocation4_spill] sm:$0xff]  ;;  %v6971_v29 = vld [vmem:[#allocation27_spill] sm:$0xff] }
 0x1f1   : > { %6965 = vst [vmem:[#allocation21_spill] sm:$0xff] %v5765_v55  ;;  %6968 = vst [vmem:[#allocation23_spill] sm:$0xff] %v5776_v51  ;;  %v3051_v45 = vadd.f32 %v3050_v61, %v6969_v57  ;;  %v1200_v22 = vunpack.c.h.bf16 %v493_v20  ;;  %v1201_v52 = vunpack.c.l.bf16 %v494_v41  ;;  %v2240_v47 = vmul.f32 %v6970_v46, %v1197_v27  ;;  %v499_v58 = vld [vmem:[%s3610_s25 + $0x9a0] sm:$0xff]  ;;  %v500_v43 = vld [vmem:[%s3610_s25 + $0x9a8] sm:$0xff] }
 0x1f2   : > { %6967 = vst [vmem:[#allocation22_spill] sm:$0xff] %v5773_v40  ;;  %v3123_v56 = vadd.f32 %v3122_v1, %v2273_v2  ;;  %v1202_v5 = vunpack.c.h.bf16 %v494_v41  ;;  %v1203_v4 = vunpack.c.l.bf16 %v495_v42  ;;  %v1204_v17 = vunpack.c.h.bf16 %v495_v42  ;;  %v6972_v40 = vld [vmem:[#allocation5_spill] sm:$0xff]  ;;  %v6973_v27 = vld [vmem:[#allocation28_spill] sm:$0xff]  ;;  %v6974_v41 = vld [vmem:[#allocation6_spill] sm:$0xff] }
 0x1f3   : > { %v3052_v21 = vadd.f32 %v3051_v45, %v6971_v29  ;;  %v1205_v51 = vunpack.c.l.bf16 %v496_v26  ;;  %v2241_v55 = vmul.f32 %v6972_v40, %v1198_v25  ;;  %v3087_v61 = vadd.f32 %v2239_v37, %v2238_v14  ;;  %v501_v1 = vld [vmem:[%s3610_s25 + $0x9b0] sm:$0xff]  ;;  %v502_v45 = vld [vmem:[%s3610_s25 + $0x9b8] sm:$0xff]  ;;  %v6975_v23 = vld [vmem:[#allocation15_spill] sm:$0xff] }
 0x1f4   : > { %v3124_v57 = vadd.f32 %v3123_v56, %v2274_v62  ;;  %v1206_v20 = vunpack.c.h.bf16 %v496_v26  ;;  %v1207_v36 = vunpack.c.l.bf16 %v497_v13  ;;  %v1208_v18 = vunpack.c.h.bf16 %v497_v13 }
 0x1f5   : > { %v3053_v2 = vadd.f32 %v3052_v21, %v6973_v27  ;;  %v1209_v46 = vunpack.c.l.bf16 %v498_v44  ;;  %v2242_v54 = vmul.f32 %v6974_v41, %v1199_v50  ;;  %v3088_v42 = vadd.f32 %v3087_v61, %v2240_v47  ;;  %v6976_v27 = vld [vmem:[#allocation29_spill] sm:$0xff] }
 0x1f6   : > { %v3125_v35 = vadd.f32 %v3124_v57, %v2275_v53  ;;  %v1210_v29 = vunpack.c.h.bf16 %v498_v44  ;;  %v1211_v30 = vunpack.c.l.bf16 %v499_v58  ;;  %v1212_v7 = vunpack.c.h.bf16 %v499_v58  ;;  %v6977_v57 = vld [vmem:[#allocation16_spill] sm:$0xff] }
 0x1f7   : > { %v3054_v25 = vadd.f32 %v3053_v2, %v6975_v23  ;;  %v1213_v62 = vunpack.c.l.bf16 %v500_v43  ;;  %v2243_v14 = vmul.f32 %v6941_v59, %v1200_v22  ;;  %v3089_v37 = vadd.f32 %v3088_v42, %v2241_v55  ;;  %v530_v55 = vld [vmem:[%s3610_s25 + $0xa8c] sm:$0xff]  ;;  %v531_v42 = vld [vmem:[%s3610_s25 + $0xa94] sm:$0xff] }
 0x1f8   : > { %v3126_v26 = vadd.f32 %v3125_v35, %v5733_v38  ;;  %v1214_v13 = vunpack.c.h.bf16 %v500_v43  ;;  %v1215_v56 = vunpack.c.l.bf16 %v501_v1  ;;  %v1216_v21 = vunpack.c.h.bf16 %v501_v1 }
 0x1f9   : > { %v3055_v50 = vadd.f32 %v3054_v25, %v6976_v27  ;;  %v1217_v47 = vunpack.c.l.bf16 %v502_v45  ;;  %v2244_v53 = vmul.f32 %v3767_v8, %v1201_v52  ;;  %v3090_v44 = vadd.f32 %v3089_v37, %v2242_v54 }
 0x1fa   : > { %v3127_v58 = vadd.f32 %v3126_v26, %v5736_v15  ;;  %v1218_v23 = vunpack.c.h.bf16 %v502_v45  ;;  %v1219_v61 = vunpack.c.l.bf16 %v5715_v48  ;;  %v2245_v22 = vmul.f32 %v3770_v9, %v1202_v5  ;;  %v533_v26 = vld [vmem:[%s3610_s25 + $0xaa4] sm:$0xff] }
 0x1fb   : > { %v3057_v35 = vadd.f32 %v6977_v57, %v3055_v50  ;;  %v2246_v38 = vmul.f32 %v3773_v12, %v1203_v4  ;;  %v2247_v43 = vmul.f32 %v3776_v10, %v1204_v17  ;;  %v3091_v2 = vadd.f32 %v3090_v44, %v2243_v14  ;;  %v534_v57 = vld [vmem:[%s3610_s25 + $0xaac] sm:$0xff] }
 0x1fc   : > { %v3128_v1 = vadd.f32 %v3127_v58, %v5741_v49  ;;  %v2248_v52 = vmul.f32 %v3779_v16, %v1205_v51  ;;  %v2249_v54 = vmul.f32 %v3782_v19, %v1206_v20  ;;  %v2250_v15 = vmul.f32 %v3786_v28, %v1207_v36 }
 0x1fd   : > { %3058 = vadd.xlane.f32.xlu0 %v3057_v35  ;;  %v5809_v48 = vmul.f32 %v3789_v31, %v1208_v18  ;;  %v3092_v5 = vadd.f32 %v3091_v2, %v2244_v53  ;;  %v1270_v45 = vunpack.c.l.bf16 %v530_v55  ;;  %v1271_v4 = vunpack.c.h.bf16 %v530_v55  ;;  %v6980_v53 = vld [vmem:[#allocation3_spill] sm:$0xff]  ;;  %v535_v2 = vld [vmem:[%s3610_s25 + $0xab4] sm:$0xff] }
 0x1fe   : > { %v3129_v17 = vadd.f32 %v3128_v1, %v5744_v60  ;;  %v5813_v49 = vmul.f32 %v3792_v32, %v1209_v46  ;;  %v5816_v51 = vmul.f32 %v3795_v33, %v1210_v29  ;;  %v5819_v36 = vmul.f32 %v3798_v34, %v1211_v30  ;;  %v532_v29 = vld [vmem:[%s3610_s25 + $0xa9c] sm:$0xff] }
 0x1ff   : > { %v5822_v20 = vmul.f32 %v3801_v39, %v1212_v7  ;;  %v2262_v18 = vmul.f32 %v3827_v3, %v1219_v61  ;;  %v3093_v25 = vadd.f32 %v3092_v5, %v2245_v22  ;;  %v1272_v14 = vunpack.c.l.bf16 %v531_v42 }
 0x200   : > { %v3130_v37 = vadd.f32 %v3129_v17, %v5747_v24  ;;  %v5827_v60 = vmul.f32 %v3805_v63, %v1213_v62  ;;  %v5830_v46 = vmul.f32 %v3808_v6, %v1214_v13  ;;  %v5833_v30 = vmul.f32 %v3811_v11, %v1215_v56  ;;  %v6981_v24 = vld [vmem:[#allocation17_spill] sm:$0xff]  ;;  %v6982_v62 = vld [vmem:[#allocation11_spill] sm:$0xff]  ;;  %v6984_v13 = vld [vmem:[#allocation12_spill] sm:$0xff] }
 0x201   : > { %v3094_v7 = vadd.f32 %v3093_v25, %v2246_v38  ;;  %v1273_v27 = vunpack.c.h.bf16 %v531_v42  ;;  %v2313_v50 = vmul.f32 %v3715_v0, %v1270_v45  ;;  %v2314_v44 = vmul.f32 %v6980_v53, %v1271_v4  ;;  %v6986_v56 = vld [vmem:[#allocation13_spill] sm:$0xff]  ;;  %v6989_v42 = vld [vmem:[#allocation4_spill] sm:$0xff]  ;;  %v6990_v45 = vld [vmem:[#allocation18_spill] sm:$0xff] }
 0x202   : > { %6978 = vst [vmem:[#allocation24_spill] sm:$0xff] %v5830_v46  ;;  %6979 = vst [vmem:[#allocation25_spill] sm:$0xff] %v5833_v30  ;;  %v3131_v58 = vadd.f32 %v3130_v37, %v6981_v24  ;;  %v5841_v61 = vmul.f32 %v6982_v62, %v1216_v21  ;;  %v5844_v22 = vmul.f32 %v6984_v13, %v1217_v47  ;;  %v5851_v38 = vsel %vm2461_vm0, %v2262_v18, 0.0  ;;  %v536_v21 = vld [vmem:[%s3610_s25 + $0xabc] sm:$0xff] }
 0x203   : > { %v5847_v55 = vmul.f32 %v6986_v56, %v1218_v23  ;;  %v3095_v35 = vadd.f32 %v3094_v7, %v2247_v43  ;;  %6988 = vst [vmem:[#allocation15_spill] sm:$0xff] %v5851_v38  ;;  %v1274_v1 = vunpack.c.l.bf16 %v532_v29  ;;  %v2315_v5 = vmul.f32 %v6989_v42, %v1272_v14  ;;  %v537_v23 = vld [vmem:[%s3610_s25 + $0xac4] sm:$0xff]  ;;  %v540_v46 = vld [vmem:[%s3610_s25 + $0xadc] sm:$0xff] }
 0x204   : > { %6983 = vst [vmem:[#allocation26_spill] sm:$0xff] %v5841_v61  ;;  %6985 = vst [vmem:[#allocation27_spill] sm:$0xff] %v5844_v22  ;;  %v3132_v4 = vadd.f32 %v3131_v58, %v6990_v45  ;;  %v1275_v17 = vunpack.c.h.bf16 %v532_v29  ;;  %v1276_v47 = vunpack.c.l.bf16 %v533_v26  ;;  %v1277_v25 = vunpack.c.h.bf16 %v533_v26  ;;  %v6991_v18 = vld [vmem:[#allocation19_spill] sm:$0xff]  ;;  %v539_v45 = vld [vmem:[%s3610_s25 + $0xad4] sm:$0xff] }
 0x205   : > { %6987 = vst [vmem:[#allocation28_spill] sm:$0xff] %v5847_v55  ;;  %v3096_v37 = vadd.f32 %v3095_v35, %v2248_v52  ;;  %v1278_v24 = vunpack.c.l.bf16 %v534_v57  ;;  %v2316_v43 = vmul.f32 %v6972_v40, %v1273_v27  ;;  %v3168_v7 = vadd.f32 %v2314_v44, %v2313_v50  ;;  %v538_v55 = vld [vmem:[%s3610_s25 + $0xacc] sm:$0xff] }
 0x206   : > { %v3133_v38 = vadd.f32 %v3132_v4, %v6991_v18  ;;  %v1279_v22 = vunpack.c.h.bf16 %v534_v57  ;;  %v1280_v14 = vunpack.c.l.bf16 %v535_v2  ;;  %v1281_v61 = vunpack.c.h.bf16 %v535_v2  ;;  %v6992_v35 = vld [vmem:[#allocation20_spill] sm:$0xff]  ;;  %v6993_v2 = vld [vmem:[#allocation21_spill] sm:$0xff] }
 0x207   : > { %v3097_v58 = vadd.f32 %v3096_v37, %v2249_v54  ;;  %v1282_v29 = vunpack.c.l.bf16 %v536_v21  ;;  %v2317_v26 = vmul.f32 %v6974_v41, %v1274_v1  ;;  %v3169_v52 = vadd.f32 %v3168_v7, %v2315_v5  ;;  %v541_v4 = vld [vmem:[%s3610_s25 + $0xae4] sm:$0xff] }
 0x208   : > { %v3134_v30 = vadd.f32 %v3133_v38, %v6992_v35  ;;  %v1283_v42 = vunpack.c.h.bf16 %v536_v21  ;;  %v1284_v27 = vunpack.c.l.bf16 %v537_v23  ;;  %v1285_v50 = vunpack.c.h.bf16 %v537_v23  ;;  %v5869_v37 = vld [vmem:[%s3610_s25 + $0xa88] ss:$100 sps:$4 sm:$0xff]  }
 0x209   : > { %v3098_v44 = vadd.f32 %v3097_v58, %v2250_v15  ;;  %v1286_v18 = vunpack.c.l.bf16 %v538_v55  ;;  %v2318_v57 = vmul.f32 %v6941_v59, %v1275_v17  ;;  %v3170_v40 = vadd.f32 %v3169_v52, %v2316_v43  ;;  %v6994_v15 = vld [vmem:[#allocation22_spill] sm:$0xff]  ;;  %v6995_v59 = vld [vmem:[#allocation23_spill] sm:$0xff] }
 0x20a   : > { %v3135_v54 = vadd.f32 %v3134_v30, %v6993_v2  ;;  %v1287_v56 = vunpack.c.h.bf16 %v538_v55  ;;  %v1288_v1 = vunpack.c.l.bf16 %v539_v45  ;;  %v1289_v5 = vunpack.c.h.bf16 %v539_v45  ;;  %v517_v45 = vld [vmem:[%s3610_s25 + $0xa28] sm:$0xff] }
 0x20b   : > { %v3099_v38 = vadd.f32 %v3098_v44, %v5809_v48  ;;  %v1290_v7 = vunpack.c.l.bf16 %v540_v46  ;;  %v2319_v21 = vmul.f32 %v3767_v8, %v1276_v47  ;;  %v3171_v23 = vadd.f32 %v3170_v40, %v2317_v26 }
 0x20c   : > { %v3136_v58 = vadd.f32 %v3135_v54, %v6994_v15  ;;  %v1291_v35 = vunpack.c.h.bf16 %v540_v46  ;;  %v1292_v17 = vunpack.c.l.bf16 %v541_v4  ;;  %v1293_v43 = vunpack.c.h.bf16 %v541_v4  ;;  %v518_v54 = vld [vmem:[%s3610_s25 + $0xa30] sm:$0xff] }
 0x20d   : > { %v3100_v30 = vadd.f32 %v3099_v38, %v5813_v49  ;;  %v1294_v52 = vunpack.c.h.bf16 %v5869_v37  ;;  %v2320_v55 = vmul.f32 %v3770_v9, %v1277_v25  ;;  %v3172_v2 = vadd.f32 %v3171_v23, %v2318_v57  ;;  %v519_v23 = vld [vmem:[%s3610_s25 + $0xa38] sm:$0xff] }
 0x20e   : > { %v3138_v48 = vadd.f32 %v6995_v59, %v3136_v58  ;;  %v2321_v44 = vmul.f32 %v3773_v12, %v1278_v24  ;;  %v2322_v40 = vmul.f32 %v3776_v10, %v1279_v22  ;;  %v2323_v47 = vmul.f32 %v3779_v16, %v1280_v14 }
 0x20f   : > { %v3101_v46 = vadd.f32 %v3100_v30, %v5816_v51  ;;  %v2324_v26 = vmul.f32 %v3782_v19, %v1281_v61  ;;  %v2325_v49 = vmul.f32 %v3786_v28, %v1282_v29  ;;  %v3173_v4 = vadd.f32 %v3172_v2, %v2319_v21  ;;  %v521_v2 = vld [vmem:[%s3610_s25 + $0xa48] sm:$0xff] }
 0x210   : > { %3139 = vadd.xlane.f32.xlu1 %v3138_v48  ;;  %v5887_v25 = vmul.f32 %v3789_v31, %v1283_v42  ;;  %v5890_v59 = vmul.f32 %v3792_v32, %v1284_v27  ;;  %v1245_v24 = vunpack.c.l.bf16 %v517_v45  ;;  %v1246_v22 = vunpack.c.h.bf16 %v517_v45  ;;  %v522_v45 = vld [vmem:[%s3610_s25 + $0xa50] sm:$0xff] }
 0x211   : > { %v3102_v14 = vadd.f32 %v3101_v46, %v5819_v36  ;;  %v5894_v51 = vmul.f32 %v3795_v33, %v1285_v50  ;;  %v5897_v61 = vmul.f32 %v3798_v34, %v1286_v18  ;;  %v3174_v29 = vadd.f32 %v3173_v4, %v2320_v55  ;;  %v7003_v46 = vld [vmem:[#allocation4_spill] sm:$0xff] }
 0x212   : > { %v5900_v57 = vmul.f32 %v3801_v39, %v1287_v56  ;;  %v5903_v42 = vmul.f32 %v3805_v63, %v1288_v1  ;;  %v2337_v27 = vmul.f32 %v3827_v3, %v1294_v52  ;;  %v1247_v38 = vunpack.c.l.bf16 %v518_v54  ;;  %v520_v1 = vld [vmem:[%s3610_s25 + $0xa40] sm:$0xff] }
 0x213   : > { %v3103_v21 = vadd.f32 %v3102_v14, %v5822_v20  ;;  %v5908_v36 = vmul.f32 %v3808_v6, %v1289_v5  ;;  %v5911_v50 = vmul.f32 %v3811_v11, %v1290_v7  ;;  %v3175_v18 = vadd.f32 %v3174_v29, %v2321_v44  ;;  %v7000_v7 = vld [vmem:[#allocation13_spill] sm:$0xff] }
 0x214   : > { %v5915_v56 = vmul.f32 %v6982_v62, %v1291_v35  ;;  %v1248_v15 = vunpack.c.h.bf16 %v518_v54  ;;  %v2288_v58 = vmul.f32 %v3715_v0, %v1245_v24  ;;  %v2289_v30 = vmul.f32 %v6980_v53, %v1246_v22  ;;  %v7004_v54 = vld [vmem:[#allocation24_spill] sm:$0xff] }
 0x215   : > { %6996 = vst [vmem:[#allocation29_spill] sm:$0xff] %v5908_v36  ;;  %6997 = vst [vmem:[#allocation16_spill] sm:$0xff] %v5911_v50  ;;  %v3104_v20 = vadd.f32 %v3103_v21, %v5827_v60  ;;  %v5922_v5 = vmul.f32 %v6984_v13, %v1292_v17  ;;  %v5925_v52 = vmul.f32 %v7000_v7, %v1293_v43  ;;  %v5929_v35 = vsel %vm2461_vm0, %v2337_v27, 0.0  ;;  %v523_v17 = vld [vmem:[%s3610_s25 + $0xa58] sm:$0xff]  ;;  %v524_v43 = vld [vmem:[%s3610_s25 + $0xa60] sm:$0xff] }
 0x216   : > { %6998 = vst [vmem:[#allocation3_spill] sm:$0xff] %v5915_v56  ;;  %v3176_v55 = vadd.f32 %v3175_v18, %v2322_v40  ;;  %7002 = vst [vmem:[#allocation19_spill] sm:$0xff] %v5929_v35  ;;  %v1249_v48 = vunpack.c.l.bf16 %v519_v23  ;;  %v1250_v44 = vunpack.c.h.bf16 %v519_v23  ;;  %v2290_v4 = vmul.f32 %v7003_v46, %v1247_v38  ;;  %v7005_v21 = vld [vmem:[#allocation5_spill] sm:$0xff] }
 0x217   : > { %6999 = vst [vmem:[#allocation17_spill] sm:$0xff] %v5922_v5  ;;  %7001 = vst [vmem:[#allocation18_spill] sm:$0xff] %v5925_v52  ;;  %v3105_v60 = vadd.f32 %v3104_v20, %v7004_v54  ;;  %v1251_v22 = vunpack.c.l.bf16 %v520_v1  ;;  %v1252_v14 = vunpack.c.h.bf16 %v520_v1  ;;  %v1253_v29 = vunpack.c.l.bf16 %v521_v2  ;;  %v7006_v35 = vld [vmem:[#allocation25_spill] sm:$0xff]  ;;  %v525_v5 = vld [vmem:[%s3610_s25 + $0xa68] sm:$0xff] }
 0x218   : > { %v3177_v24 = vadd.f32 %v3176_v55, %v2323_v47  ;;  %v1254_v40 = vunpack.c.h.bf16 %v521_v2  ;;  %v2291_v27 = vmul.f32 %v7005_v21, %v1248_v15  ;;  %v3141_v18 = vadd.f32 %v2289_v30, %v2288_v58  ;;  %v526_v50 = vld [vmem:[%s3610_s25 + $0xa70] sm:$0xff]  ;;  %v7007_v54 = vld [vmem:[#allocation26_spill] sm:$0xff] }
 0x219   : > { %v3106_v52 = vadd.f32 %v3105_v60, %v7006_v35  ;;  %v1255_v38 = vunpack.c.l.bf16 %v522_v45  ;;  %v1256_v56 = vunpack.c.h.bf16 %v522_v45  ;;  %v1257_v20 = vunpack.c.l.bf16 %v523_v17  ;;  %v527_v2 = vld [vmem:[%s3610_s25 + $0xa78] sm:$0xff]  ;;  %v528_v58 = vld [vmem:[%s3610_s25 + $0xa80] sm:$0xff] }
 0x21a   : > { %v3178_v23 = vadd.f32 %v3177_v24, %v2324_v26  ;;  %v1258_v47 = vunpack.c.h.bf16 %v523_v17  ;;  %v2292_v55 = vmul.f32 %v6974_v41, %v1249_v48  ;;  %v3142_v1 = vadd.f32 %v3141_v18, %v2290_v4  ;;  %v7008_v35 = vld [vmem:[#allocation7_spill] sm:$0xff] }
 0x21b   : > { %v3107_v46 = vadd.f32 %v3106_v52, %v7007_v54  ;;  %v1259_v7 = vunpack.c.l.bf16 %v524_v43  ;;  %v1260_v15 = vunpack.c.h.bf16 %v524_v43  ;;  %v1261_v30 = vunpack.c.l.bf16 %v525_v5  ;;  %v7009_v24 = vld [vmem:[#allocation27_spill] sm:$0xff] }
 0x21c   : > { %v3179_v36 = vadd.f32 %v3178_v23, %v2325_v49  ;;  %v1262_v21 = vunpack.c.h.bf16 %v525_v5  ;;  %v2293_v26 = vmul.f32 %v7008_v35, %v1250_v44  ;;  %v3143_v60 = vadd.f32 %v3142_v1, %v2291_v27  ;;  %v7010_v23 = vld [vmem:[#allocation28_spill] sm:$0xff]  ;;  %v7011_v1 = vld [vmem:[#allocation15_spill] sm:$0xff] }
 0x21d   : > { %v3108_v45 = vadd.f32 %v3107_v46, %v7009_v24  ;;  %v1263_v13 = vunpack.c.l.bf16 %v526_v50  ;;  %v1264_v48 = vunpack.c.h.bf16 %v526_v50  ;;  %v1265_v4 = vunpack.c.l.bf16 %v527_v2  ;;  %v556_v50 = vld [vmem:[%s3610_s25 + $0xb54] sm:$0xff]  ;;  %v557_v24 = vld [vmem:[%s3610_s25 + $0xb5c] sm:$0xff] }
 0x21e   : > { %v3180_v17 = vadd.f32 %v3179_v36, %v5887_v25  ;;  %v1266_v18 = vunpack.c.h.bf16 %v527_v2  ;;  %v2294_v49 = vmul.f32 %v3767_v8, %v1251_v22  ;;  %v3144_v52 = vadd.f32 %v3143_v60, %v2292_v55 }
 0x21f   : > { %v3109_v43 = vadd.f32 %v3108_v45, %v7010_v23  ;;  %v1267_v5 = vunpack.c.l.bf16 %v528_v58  ;;  %v1268_v44 = vunpack.c.h.bf16 %v528_v58  ;;  %v1269_v27 = vunpack.c.l.bf16 %v5869_v37  ;;  %v559_v23 = vld [vmem:[%s3610_s25 + $0xb6c] sm:$0xff] }
 0x220   : > { %v3181_v54 = vadd.f32 %v3180_v17, %v5890_v59  ;;  %v2295_v46 = vmul.f32 %v3770_v9, %v1252_v14  ;;  %v2296_v25 = vmul.f32 %v3773_v12, %v1253_v29  ;;  %v3145_v36 = vadd.f32 %v3144_v52, %v2293_v26 }
 0x221   : > { %v3111_v2 = vadd.f32 %v7011_v1, %v3109_v43  ;;  %v2297_v55 = vmul.f32 %v3776_v10, %v1254_v40  ;;  %v2298_v60 = vmul.f32 %v3779_v16, %v1255_v38  ;;  %v2299_v59 = vmul.f32 %v3782_v19, %v1256_v56  ;;  %v5995_v43 = vld [vmem:[%s3610_s25 + $0xb74] sm:$0xff]  ;;  %v561_v1 = vld [vmem:[%s3610_s25 + $0xb7c] sm:$0xff] }
 0x222   : > { %v3182_v22 = vadd.f32 %v3181_v54, %v5894_v51  ;;  %v2300_v58 = vmul.f32 %v3786_v28, %v1257_v20  ;;  %v5961_v37 = vmul.f32 %v3789_v31, %v1258_v47  ;;  %v3146_v14 = vadd.f32 %v3145_v36, %v2294_v49 }
 0x223   : > { %3112 = vadd.xlane.f32.xlu0 %v3111_v2  ;;  %v5966_v26 = vmul.f32 %v3792_v32, %v1259_v7  ;;  %v1320_v51 = vunpack.c.l.bf16 %v556_v50  ;;  %v1321_v40 = vunpack.c.h.bf16 %v556_v50  ;;  %v5969_v56 = vmul.f32 %v3795_v33, %v1260_v15  ;;  %v562_v2 = vld [vmem:[%s3610_s25 + $0xb84] sm:$0xff] }
 0x224   : > { %v3183_v29 = vadd.f32 %v3182_v22, %v5897_v61  ;;  %v5972_v38 = vmul.f32 %v3798_v34, %v1261_v30  ;;  %v2312_v20 = vmul.f32 %v3827_v3, %v1269_v27  ;;  %v3147_v47 = vadd.f32 %v3146_v14, %v2295_v46  ;;  %v7015_v27 = vld [vmem:[#allocation12_spill] sm:$0xff]  ;;  %v7017_v46 = vld [vmem:[#allocation13_spill] sm:$0xff] }
 0x225   : > { %v5977_v61 = vmul.f32 %v3801_v39, %v1262_v21  ;;  %v5980_v7 = vmul.f32 %v3805_v63, %v1263_v13  ;;  %v1322_v17 = vunpack.c.l.bf16 %v557_v24  ;;  %v5983_v49 = vmul.f32 %v3808_v6, %v1264_v48 }
 0x226   : > { %v3184_v45 = vadd.f32 %v3183_v29, %v5900_v57  ;;  %v5986_v15 = vmul.f32 %v3811_v11, %v1265_v4  ;;  %v5989_v30 = vmul.f32 %v6982_v62, %v1266_v18  ;;  %v3148_v52 = vadd.f32 %v3147_v47, %v2296_v25  ;;  %v558_v57 = vld [vmem:[%s3610_s25 + $0xb64] sm:$0xff] }
 0x227   : > { %7012 = vst [vmem:[#allocation20_spill] sm:$0xff] %v5983_v49  ;;  %v1323_v13 = vunpack.c.h.bf16 %v557_v24  ;;  %v2363_v54 = vmul.f32 %v3715_v0, %v1320_v51  ;;  %v2364_v48 = vmul.f32 %v6980_v53, %v1321_v40  ;;  %v6000_v4 = vmul.f32 %v7015_v27, %v1267_v5  ;;  %v7021_v24 = vld [vmem:[#allocation4_spill] sm:$0xff] }
 0x228   : > { %7013 = vst [vmem:[#allocation21_spill] sm:$0xff] %v5986_v15  ;;  %7014 = vst [vmem:[#allocation22_spill] sm:$0xff] %v5989_v30  ;;  %v3185_v21 = vadd.f32 %v3184_v45, %v5903_v42  ;;  %v6003_v18 = vmul.f32 %v7017_v46, %v1268_v44  ;;  %v3149_v25 = vadd.f32 %v3148_v52, %v2297_v55  ;;  %v6006_v36 = vsel %vm2461_vm0, %v2312_v20, 0.0  ;;  %v7020_v42 = vld [vmem:[#allocation29_spill] sm:$0xff]  ;;  %v7022_v47 = vld [vmem:[#allocation16_spill] sm:$0xff] }
 0x229   : > { %7016 = vst [vmem:[#allocation23_spill] sm:$0xff] %v6000_v4  ;;  %7019 = vst [vmem:[#allocation25_spill] sm:$0xff] %v6006_v36  ;;  %v1324_v22 = vunpack.c.l.bf16 %v558_v57  ;;  %v1325_v14 = vunpack.c.h.bf16 %v558_v57  ;;  %v2365_v29 = vmul.f32 %v7021_v24, %v1322_v17  ;;  %v1326_v5 = vunpack.c.l.bf16 %v559_v23  ;;  %v563_v45 = vld [vmem:[%s3610_s25 + $0xb8c] sm:$0xff]  ;;  %v564_v20 = vld [vmem:[%s3610_s25 + $0xb94] sm:$0xff] }
 0x22a   : > { %7018 = vst [vmem:[#allocation24_spill] sm:$0xff] %v6003_v18  ;;  %v3186_v50 = vadd.f32 %v3185_v21, %v7020_v42  ;;  %v3150_v51 = vadd.f32 %v3149_v25, %v2298_v60  ;;  %v1327_v40 = vunpack.c.h.bf16 %v559_v23  ;;  %v1328_v44 = vunpack.c.l.bf16 %v5995_v43  ;;  %v7023_v21 = vld [vmem:[#allocation5_spill] sm:$0xff]  ;;  %v7024_v25 = vld [vmem:[#allocation3_spill] sm:$0xff] }
 0x22b   : > { %v1329_v52 = vunpack.c.h.bf16 %v5995_v43  ;;  %v2366_v42 = vmul.f32 %v7023_v21, %v1323_v13  ;;  %v3222_v36 = vadd.f32 %v2364_v48, %v2363_v54  ;;  %v1330_v17 = vunpack.c.l.bf16 %v561_v1  ;;  %v565_v23 = vld [vmem:[%s3610_s25 + $0xb9c] sm:$0xff]  ;;  %v566_v30 = vld [vmem:[%s3610_s25 + $0xba4] sm:$0xff]  ;;  %v7025_v13 = vld [vmem:[#allocation17_spill] sm:$0xff] }
 0x22c   : > { %v3187_v55 = vadd.f32 %v3186_v50, %v7022_v47  ;;  %v3151_v57 = vadd.f32 %v3150_v51, %v2299_v59  ;;  %v1331_v18 = vunpack.c.h.bf16 %v561_v1  ;;  %v1332_v60 = vunpack.c.l.bf16 %v562_v2  ;;  %v567_v48 = vld [vmem:[%s3610_s25 + $0xbac] sm:$0xff] }
 0x22d   : > { %v1333_v15 = vunpack.c.h.bf16 %v562_v2  ;;  %v2367_v50 = vmul.f32 %v6974_v41, %v1324_v22  ;;  %v3223_v47 = vadd.f32 %v3222_v36, %v2365_v29  ;;  %v1334_v49 = vunpack.c.l.bf16 %v563_v45  ;;  %v6025_v59 = vld [vmem:[%s3610_s25 + $0xb50] ss:$100 sps:$4 sm:$0xff]   ;;  %v7026_v36 = vld [vmem:[#allocation18_spill] sm:$0xff] }
 0x22e   : > { %v3188_v4 = vadd.f32 %v3187_v55, %v7024_v25  ;;  %v3152_v24 = vadd.f32 %v3151_v57, %v2300_v58  ;;  %v1335_v43 = vunpack.c.h.bf16 %v563_v45  ;;  %v1336_v46 = vunpack.c.l.bf16 %v564_v20 }
 0x22f   : > { %v1337_v51 = vunpack.c.h.bf16 %v564_v20  ;;  %v2368_v1 = vmul.f32 %v7008_v35, %v1325_v14  ;;  %v3224_v21 = vadd.f32 %v3223_v47, %v2366_v42  ;;  %v1338_v2 = vunpack.c.l.bf16 %v565_v23  ;;  %v7027_v14 = vld [vmem:[#allocation19_spill] sm:$0xff]  ;;  %v543_v47 = vld [vmem:[%s3610_s25 + $0xaf0] sm:$0xff] }
 0x230   : > { %v3189_v54 = vadd.f32 %v3188_v4, %v7025_v13  ;;  %v3153_v55 = vadd.f32 %v3152_v24, %v5961_v37  ;;  %v1339_v25 = vunpack.c.h.bf16 %v565_v23  ;;  %v1340_v22 = vunpack.c.l.bf16 %v566_v30 }
 0x231   : > { %v1341_v29 = vunpack.c.h.bf16 %v566_v30  ;;  %v2369_v45 = vmul.f32 %v3767_v8, %v1326_v5  ;;  %v3225_v57 = vadd.f32 %v3224_v21, %v2367_v50  ;;  %v1342_v13 = vunpack.c.l.bf16 %v567_v48 }
 0x232   : > { %v3190_v58 = vadd.f32 %v3189_v54, %v7026_v36  ;;  %v3154_v4 = vadd.f32 %v3153_v55, %v5966_v26  ;;  %v1343_v41 = vunpack.c.h.bf16 %v567_v48  ;;  %v1344_v20 = vunpack.c.h.bf16 %v6025_v59  ;;  %v6037_v54 = vpop.xlane.xlu1 %2518 }
 0x233   : > { %v2370_v37 = vmul.f32 %v3770_v9, %v1327_v40  ;;  %v2371_v24 = vmul.f32 %v3773_v12, %v1328_v44  ;;  %v3226_v23 = vadd.f32 %v3225_v57, %v2368_v1  ;;  %7028 = vst [vmem:[#allocation26_spill] sm:$0xff] %v6037_v54  ;;  %v2372_v5 = vmul.f32 %v3776_v10, %v1329_v52  ;;  %v544_v1 = vld [vmem:[%s3610_s25 + $0xaf8] sm:$0xff]  ;;  %v551_v54 = vld [vmem:[%s3610_s25 + $0xb30] sm:$0xff] }
 0x234   : > { %v3192_v42 = vadd.f32 %v7027_v14, %v3190_v58  ;;  %v3155_v30 = vadd.f32 %v3154_v4, %v5969_v56  ;;  %v2373_v26 = vmul.f32 %v3779_v16, %v1330_v17  ;;  %v2374_v21 = vmul.f32 %v3782_v19, %v1331_v18  ;;  %v545_v58 = vld [vmem:[%s3610_s25 + $0xb00] sm:$0xff]  ;;  %v546_v4 = vld [vmem:[%s3610_s25 + $0xb08] sm:$0xff]  ;;  %v6086_v14 = vld [vmem:[%s3610_s25 + $0xb10] sm:$0xff] }
 0x235   : > { %v2375_v50 = vmul.f32 %v3786_v28, %v1332_v60  ;;  %v6045_v40 = vmul.f32 %v3789_v31, %v1333_v15  ;;  %v6048_v44 = vmul.f32 %v3792_v32, %v1334_v49  ;;  %v3227_v48 = vadd.f32 %v3226_v23, %v2369_v45 }
 0x236   : > { %3193 = vadd.xlane.f32.xlu1 %v3192_v42  ;;  %v3156_v56 = vadd.f32 %v3155_v30, %v5972_v38  ;;  %v6053_v52 = vmul.f32 %v3795_v33, %v1335_v43  ;;  %v1295_v17 = vunpack.c.l.bf16 %v543_v47  ;;  %v1296_v18 = vunpack.c.h.bf16 %v543_v47  ;;  %v548_v47 = vld [vmem:[%s3610_s25 + $0xb18] sm:$0xff] }
 0x237   : > { %v6056_v55 = vmul.f32 %v3798_v34, %v1336_v46  ;;  %v6059_v60 = vmul.f32 %v3801_v39, %v1337_v51  ;;  %v2387_v49 = vmul.f32 %v3827_v3, %v1344_v20  ;;  %v3228_v15 = vadd.f32 %v3227_v48, %v2370_v37  ;;  %v6070_v46 = vpop.xlane.xlu0 %2464  ;;  %v6082_v20 = vpop.xlane.xlu1 %2545  ;;  %v7038_v48 = vld [vmem:[#allocation20_spill] sm:$0xff] }
 0x238   : > { %v3157_v36 = vadd.f32 %v3156_v56, %v5977_v61  ;;  %v6064_v38 = vmul.f32 %v3805_v63, %v1338_v2  ;;  %v6067_v43 = vmul.f32 %v3808_v6, %v1339_v25  ;;  %v1297_v45 = vunpack.c.l.bf16 %v544_v1  ;;  %7030 = vst [vmem:[#allocation27_spill] sm:$0xff] %v6070_v46  ;;  %7034 = vst [vmem:[#allocation16_spill] sm:$0xff] %v6082_v20  ;;  %v549_v56 = vld [vmem:[%s3610_s25 + $0xb20] sm:$0xff] }
 0x239   : > { %v6073_v51 = vmul.f32 %v3811_v11, %v1340_v22  ;;  %v6076_v57 = vmul.f32 %v6982_v62, %v1341_v29  ;;  %v6079_v61 = vmul.f32 %v7015_v27, %v1342_v13  ;;  %v3229_v2 = vadd.f32 %v3228_v15, %v2371_v24  ;;  %v7035_v29 = vld [vmem:[#allocation13_spill] sm:$0xff] }
 0x23a   : > { %7029 = vst [vmem:[#allocation7_spill] sm:$0xff] %v6067_v43  ;;  %v3158_v25 = vadd.f32 %v3157_v36, %v5980_v7  ;;  %v1298_v42 = vunpack.c.h.bf16 %v544_v1  ;;  %v2338_v22 = vmul.f32 %v3715_v0, %v1295_v17  ;;  %v2339_v37 = vmul.f32 %v6980_v53, %v1296_v18  ;;  %v7039_v36 = vld [vmem:[#allocation4_spill] sm:$0xff] }
 0x23b   : > { %7031 = vst [vmem:[#allocation28_spill] sm:$0xff] %v6073_v51  ;;  %7032 = vst [vmem:[#allocation15_spill] sm:$0xff] %v6076_v57  ;;  %v6091_v23 = vmul.f32 %v7035_v29, %v1343_v41  ;;  %v3230_v13 = vadd.f32 %v3229_v2, %v2372_v5  ;;  %v6094_v24 = vsel %vm2461_vm0, %v2387_v49, 0.0  ;;  %v1299_v30 = vunpack.c.l.bf16 %v545_v58  ;;  %v550_v18 = vld [vmem:[%s3610_s25 + $0xb28] sm:$0xff]  ;;  %v7040_v49 = vld [vmem:[#allocation21_spill] sm:$0xff]  ;;  %v6109_v57 = vpop.xlane.xlu1 %2599 }
 0x23c   : > { %7033 = vst [vmem:[#allocation29_spill] sm:$0xff] %v6079_v61  ;;  %7037 = vst [vmem:[#allocation17_spill] sm:$0xff] %v6094_v24  ;;  %v3159_v7 = vadd.f32 %v3158_v25, %v7038_v48  ;;  %v1300_v15 = vunpack.c.h.bf16 %v545_v58  ;;  %v1301_v1 = vunpack.c.l.bf16 %v546_v4  ;;  %v2340_v17 = vmul.f32 %v7039_v36, %v1297_v45  ;;  %v6106_v58 = vpop.xlane.xlu0 %2491  ;;  %v552_v45 = vld [vmem:[%s3610_s25 + $0xb38] sm:$0xff] }
 0x23d   : > { %7036 = vst [vmem:[#allocation3_spill] sm:$0xff] %v6091_v23  ;;  %v3231_v20 = vadd.f32 %v3230_v13, %v2373_v26  ;;  %v1302_v46 = vunpack.c.h.bf16 %v546_v4  ;;  %v1303_v41 = vunpack.c.l.bf16 %v6086_v14  ;;  %v1304_v5 = vunpack.c.h.bf16 %v6086_v14  ;;  %v7041_v23 = vld [vmem:[#allocation5_spill] sm:$0xff]  ;;  %7042 = vst [vmem:[#allocation18_spill] sm:$0xff] %v6106_v58  ;;  %v7044_v51 = vld [vmem:[#allocation22_spill] sm:$0xff] }
 0x23e   : > { %v3160_v2 = vadd.f32 %v3159_v7, %v7040_v49  ;;  %v1305_v24 = vunpack.c.l.bf16 %v548_v47  ;;  %v2341_v25 = vmul.f32 %v7041_v23, %v1298_v42  ;;  %v3195_v48 = vadd.f32 %v2339_v37, %v2338_v22  ;;  %7043 = vst [vmem:[#allocation19_spill] sm:$0xff] %v6109_v57  ;;  %v6113_v14 = vld [vmem:[%s3610_s25 + $0xb40] sm:$0xff]  ;;  %v554_v42 = vld [vmem:[%s3610_s25 + $0xb48] sm:$0xff] }
 0x23f   : > { %v3232_v61 = vadd.f32 %v3231_v20, %v2374_v21  ;;  %v1306_v26 = vunpack.c.h.bf16 %v548_v47  ;;  %v1307_v13 = vunpack.c.l.bf16 %v549_v56  ;;  %v1308_v4 = vunpack.c.h.bf16 %v549_v56  ;;  %v7045_v49 = vld [vmem:[#allocation6_spill] sm:$0xff]  ;;  %v7046_v21 = vld [vmem:[#allocation23_spill] sm:$0xff] }
 0x240   : > { %v3161_v43 = vadd.f32 %v3160_v2, %v7044_v51  ;;  %v1309_v7 = vunpack.c.l.bf16 %v550_v18  ;;  %v2342_v36 = vmul.f32 %v7045_v49, %v1299_v30  ;;  %v3196_v29 = vadd.f32 %v3195_v48, %v2340_v17  ;;  %v7047_v17 = vld [vmem:[#allocation24_spill] sm:$0xff] }
 0x241   : > { %v3233_v27 = vadd.f32 %v3232_v61, %v2375_v50  ;;  %v1310_v22 = vunpack.c.h.bf16 %v550_v18  ;;  %v1311_v37 = vunpack.c.l.bf16 %v551_v54  ;;  %v1312_v58 = vunpack.c.h.bf16 %v551_v54 }
 0x242   : > { %v3162_v20 = vadd.f32 %v3161_v43, %v7046_v21  ;;  %v1313_v47 = vunpack.c.l.bf16 %v552_v45  ;;  %v2343_v56 = vmul.f32 %v7008_v35, %v1300_v15  ;;  %v3197_v57 = vadd.f32 %v3196_v29, %v2341_v25  ;;  %v6124_v43 = vpop.xlane.xlu0 %2572  ;;  %v6130_v25 = vpop.xlane.xlu1 %2653 }
 0x243   : > { %v3234_v51 = vadd.f32 %v3233_v27, %v6045_v40  ;;  %v1314_v2 = vunpack.c.h.bf16 %v552_v45  ;;  %v1315_v23 = vunpack.c.l.bf16 %v6113_v14  ;;  %v1316_v30 = vunpack.c.h.bf16 %v6113_v14  ;;  %7048 = vst [vmem:[#allocation20_spill] sm:$0xff] %v6124_v43  ;;  %v582_v40 = vld [vmem:[%s3610_s25 + $0xc1c] sm:$0xff]  ;;  %7049 = vst [vmem:[#allocation21_spill] sm:$0xff] %v6130_v25  ;;  %v7050_v45 = vld [vmem:[#allocation25_spill] sm:$0xff] }
 0x244   : > { %v3163_v50 = vadd.f32 %v3162_v20, %v7047_v17  ;;  %v1317_v61 = vunpack.c.l.bf16 %v554_v42  ;;  %v2344_v18 = vmul.f32 %v3767_v8, %v1301_v1  ;;  %v3198_v54 = vadd.f32 %v3197_v57, %v2342_v36  ;;  %v590_v25 = vld [vmem:[%s3610_s25 + $0xc5c] sm:$0xff] }
 0x245   : > { %v3235_v48 = vadd.f32 %v3234_v51, %v6048_v44  ;;  %v1318_v15 = vunpack.c.h.bf16 %v554_v42  ;;  %v1319_v29 = vunpack.c.l.bf16 %v6025_v59  ;;  %v2345_v27 = vmul.f32 %v3770_v9, %v1302_v46  ;;  %v583_v46 = vld [vmem:[%s3610_s25 + $0xc24] sm:$0xff] }
 0x246   : > { %v3165_v14 = vadd.f32 %v7050_v45, %v3163_v50  ;;  %v2346_v21 = vmul.f32 %v3773_v12, %v1303_v41  ;;  %v2347_v1 = vmul.f32 %v3776_v10, %v1304_v5  ;;  %v3199_v57 = vadd.f32 %v3198_v54, %v2343_v56  ;;  %v6172_v54 = vpop.xlane.xlu1 %2707 }
 0x247   : > { %v3236_v36 = vadd.f32 %v3235_v48, %v6053_v52  ;;  %v2348_v20 = vmul.f32 %v3779_v16, %v1305_v24  ;;  %v2349_v44 = vmul.f32 %v3782_v19, %v1306_v26  ;;  %v6139_v59 = vmul.f32 %v3786_v28, %v1307_v13  ;;  %7054 = vst [vmem:[#allocation25_spill] sm:$0xff] %v6172_v54  ;;  %v589_v54 = vld [vmem:[%s3610_s25 + $0xc54] sm:$0xff] }
 0x248   : > { %3166 = vadd.xlane.f32.xlu0 %v3165_v14  ;;  %v6143_v42 = vmul.f32 %v3789_v31, %v1308_v4  ;;  %v3200_v51 = vadd.f32 %v3199_v57, %v2344_v18  ;;  %v1370_v41 = vunpack.c.l.bf16 %v582_v40  ;;  %v1371_v17 = vunpack.c.h.bf16 %v582_v40  ;;  %v6159_v18 = vpop.xlane.xlu0 %2626  ;;  %v7058_v14 = vld [vmem:[#allocation13_spill] sm:$0xff] }
 0x249   : > { %v3237_v5 = vadd.f32 %v3236_v36, %v6056_v55  ;;  %v6147_v52 = vmul.f32 %v3792_v32, %v1309_v7  ;;  %v6150_v24 = vmul.f32 %v3795_v33, %v1310_v22  ;;  %v6153_v26 = vmul.f32 %v3798_v34, %v1311_v37  ;;  %7051 = vst [vmem:[#allocation22_spill] sm:$0xff] %v6159_v18  ;;  %v7065_v18 = vld [vmem:[#allocation28_spill] sm:$0xff] }
 0x24a   : > { %v6156_v13 = vmul.f32 %v3801_v39, %v1312_v58  ;;  %v2362_v4 = vmul.f32 %v3827_v3, %v1319_v29  ;;  %v3201_v56 = vadd.f32 %v3200_v51, %v2345_v27  ;;  %v1372_v50 = vunpack.c.l.bf16 %v583_v46  ;;  %v584_v58 = vld [vmem:[%s3610_s25 + $0xc2c] sm:$0xff]  ;;  %v6175_v29 = vld [vmem:[%s3610_s25 + $0xc34] sm:$0xff]  ;;  %v587_v51 = vld [vmem:[%s3610_s25 + $0xc44] sm:$0xff] }
 0x24b   : > { %v3238_v55 = vadd.f32 %v3237_v5, %v6059_v60  ;;  %v6163_v7 = vmul.f32 %v3805_v63, %v1313_v47  ;;  %v6166_v22 = vmul.f32 %v3808_v6, %v1314_v2  ;;  %v6169_v37 = vmul.f32 %v3811_v11, %v1315_v23  ;;  %v7056_v23 = vld [vmem:[#allocation12_spill] sm:$0xff]  ;;  %v7062_v5 = vld [vmem:[#allocation7_spill] sm:$0xff] }
 0x24c   : > { %v3202_v48 = vadd.f32 %v3201_v56, %v2346_v21  ;;  %v1373_v27 = vunpack.c.h.bf16 %v583_v46  ;;  %v2413_v60 = vmul.f32 %v3715_v0, %v1370_v41  ;;  %v2414_v47 = vmul.f32 %v6980_v53, %v1371_v17  ;;  %v586_v21 = vld [vmem:[%s3610_s25 + $0xc3c] sm:$0xff]  ;;  %v7061_v17 = vld [vmem:[#allocation4_spill] sm:$0xff] }
 0x24d   : > { %7052 = vst [vmem:[#allocation23_spill] sm:$0xff] %v6166_v22  ;;  %7053 = vst [vmem:[#allocation24_spill] sm:$0xff] %v6169_v37  ;;  %v3239_v40 = vadd.f32 %v3238_v55, %v6064_v38  ;;  %v6181_v2 = vmul.f32 %v6982_v62, %v1316_v30  ;;  %v6184_v45 = vmul.f32 %v7056_v23, %v1317_v61  ;;  %v6191_v46 = vsel %vm2461_vm0, %v2362_v4, 0.0  ;;  %v588_v30 = vld [vmem:[%s3610_s25 + $0xc4c] sm:$0xff]  ;;  %v6218_v22 = vld [vmem:[%s3610_s25 + $0xc18] ss:$100 sps:$4 sm:$0xff]  }
 0x24e   : > { %v6187_v57 = vmul.f32 %v7058_v14, %v1318_v15  ;;  %v3203_v36 = vadd.f32 %v3202_v48, %v2347_v1  ;;  %7060 = vst [vmem:[#allocation33_spill] sm:$0xff] %v6191_v46  ;;  %v1374_v41 = vunpack.c.l.bf16 %v584_v58  ;;  %v2415_v38 = vmul.f32 %v7061_v17, %v1372_v50  ;;  %v7063_v48 = vld [vmem:[#allocation5_spill] sm:$0xff]  ;;  %7069 = vst [vmem:[#allocation28_spill] sm:$0xff] %v6218_v22 }
 0x24f   : > { %7055 = vst [vmem:[#allocation30_spill] sm:$0xff] %v6181_v2  ;;  %7057 = vst [vmem:[#allocation31_spill] sm:$0xff] %v6184_v45  ;;  %v3240_v56 = vadd.f32 %v3239_v40, %v7062_v5  ;;  %v1375_v55 = vunpack.c.h.bf16 %v584_v58  ;;  %v1376_v61 = vunpack.c.l.bf16 %v6175_v29  ;;  %v1377_v15 = vunpack.c.h.bf16 %v6175_v29  ;;  %v6205_v45 = vpop.xlane.xlu1 %2761 }
 0x250   : > { %7059 = vst [vmem:[#allocation32_spill] sm:$0xff] %v6187_v57  ;;  %v3204_v14 = vadd.f32 %v3203_v36, %v2348_v20  ;;  %v1378_v1 = vunpack.c.l.bf16 %v586_v21  ;;  %v2416_v4 = vmul.f32 %v7063_v48, %v1373_v27  ;;  %v3276_v46 = vadd.f32 %v2414_v47, %v2413_v60  ;;  %v6201_v57 = vpop.xlane.xlu0 %2680  ;;  %7066 = vst [vmem:[#allocation7_spill] sm:$0xff] %v6205_v45  ;;  %v591_v20 = vld [vmem:[%s3610_s25 + $0xc64] sm:$0xff]  ;;  %v592_v47 = vld [vmem:[%s3610_s25 + $0xc6c] sm:$0xff] }
 0x251   : > { %7064 = vst [vmem:[#allocation4_spill] sm:$0xff] %v6201_v57  ;;  %v3241_v50 = vadd.f32 %v3240_v56, %v7065_v18  ;;  %v1379_v40 = vunpack.c.h.bf16 %v586_v21  ;;  %v1380_v58 = vunpack.c.l.bf16 %v587_v51  ;;  %v1381_v5 = vunpack.c.h.bf16 %v587_v51  ;;  %v7067_v27 = vld [vmem:[#allocation15_spill] sm:$0xff]  ;;  %v6213_v21 = vld [vmem:[%s3610_s25 + $0xc74] sm:$0xff] }
 0x252   : > { %v3205_v43 = vadd.f32 %v3204_v14, %v2349_v44  ;;  %v1382_v29 = vunpack.c.l.bf16 %v588_v30  ;;  %v2417_v36 = vmul.f32 %v7045_v49, %v1374_v41  ;;  %v3277_v2 = vadd.f32 %v3276_v46, %v2415_v38  ;;  %v7068_v14 = vld [vmem:[#allocation29_spill] sm:$0xff] }
 0x253   : > { %v3242_v60 = vadd.f32 %v3241_v50, %v7067_v27  ;;  %v1383_v57 = vunpack.c.h.bf16 %v588_v30  ;;  %v1384_v37 = vunpack.c.l.bf16 %v589_v54  ;;  %v1385_v18 = vunpack.c.h.bf16 %v589_v54  ;;  %v7070_v27 = vld [vmem:[#allocation3_spill] sm:$0xff] }
 0x254   : > { %v3206_v56 = vadd.f32 %v3205_v43, %v6139_v59  ;;  %v1386_v51 = vunpack.c.l.bf16 %v590_v25  ;;  %v2418_v45 = vmul.f32 %v7008_v35, %v1375_v55  ;;  %v3278_v44 = vadd.f32 %v3277_v2, %v2416_v4  ;;  %v6222_v59 = vpop.xlane.xlu0 %2734 }
 0x255   : > { %v3243_v48 = vadd.f32 %v3242_v60, %v7068_v14  ;;  %v1387_v41 = vunpack.c.h.bf16 %v590_v25  ;;  %v1388_v46 = vunpack.c.l.bf16 %v591_v20  ;;  %v1389_v38 = vunpack.c.h.bf16 %v591_v20  ;;  %v6227_v25 = vpop.xlane.xlu1 %2815 }
 0x256   : > { %v3207_v30 = vadd.f32 %v3206_v56, %v6143_v42  ;;  %v1390_v50 = vunpack.c.l.bf16 %v592_v47  ;;  %v2419_v54 = vmul.f32 %v3767_v8, %v1376_v61  ;;  %v3279_v43 = vadd.f32 %v3278_v44, %v2417_v36  ;;  %v569_v36 = vld [vmem:[%s3610_s25 + $0xbb8] sm:$0xff] }
 0x257   : > { %v3244_v49 = vadd.f32 %v3243_v48, %v7070_v27  ;;  %v1391_v55 = vunpack.c.h.bf16 %v592_v47  ;;  %v1392_v2 = vunpack.c.l.bf16 %v6213_v21  ;;  %v1394_v42 = vunpack.c.h.bf16 %v6218_v22  ;;  %v7071_v56 = vld [vmem:[#allocation17_spill] sm:$0xff]  ;;  %v570_v22 = vld [vmem:[%s3610_s25 + $0xbc0] sm:$0xff] }
 0x258   : > { %v3208_v20 = vadd.f32 %v3207_v30, %v6147_v52  ;;  %v2420_v60 = vmul.f32 %v3770_v9, %v1377_v15  ;;  %v3280_v61 = vadd.f32 %v3279_v43, %v2418_v45  ;;  %v2421_v48 = vmul.f32 %v3773_v12, %v1378_v1 }
 0x259   : > { %v3246_v44 = vadd.f32 %v7071_v56, %v3244_v49  ;;  %v2422_v47 = vmul.f32 %v3776_v10, %v1379_v40  ;;  %v2423_v14 = vmul.f32 %v3779_v16, %v1380_v58  ;;  %v2424_v4 = vmul.f32 %v3782_v19, %v1381_v5  ;;  %v6264_v43 = vpop.xlane.xlu1 %2869 }
 0x25a   : > { %v3209_v27 = vadd.f32 %v3208_v20, %v6150_v24  ;;  %v2425_v52 = vmul.f32 %v3786_v28, %v1382_v29  ;;  %v3281_v30 = vadd.f32 %v3280_v61, %v2419_v54  ;;  %v2426_v45 = vmul.f32 %v3789_v31, %v1383_v57  ;;  %v6252_v29 = vpop.xlane.xlu0 %2788  ;;  %v572_v61 = vld [vmem:[%s3610_s25 + $0xbd0] sm:$0xff] }
 0x25b   : > { %3247 = vadd.xlane.f32.xlu1 %v3246_v44  ;;  %v6243_v49 = vmul.f32 %v3792_v32, %v1384_v37  ;;  %v1345_v15 = vunpack.c.l.bf16 %v569_v36  ;;  %v1346_v1 = vunpack.c.h.bf16 %v569_v36  ;;  %v6247_v24 = vmul.f32 %v3795_v33, %v1385_v18 }
 0x25c   : > { %v3210_v40 = vadd.f32 %v3209_v27, %v6153_v26  ;;  %v6250_v58 = vmul.f32 %v3798_v34, %v1386_v51  ;;  %v3282_v5 = vadd.f32 %v3281_v30, %v2420_v60  ;;  %v6255_v57 = vmul.f32 %v3801_v39, %v1387_v41  ;;  %v571_v26 = vld [vmem:[%s3610_s25 + $0xbc8] sm:$0xff] }
 0x25d   : > { %v6258_v37 = vmul.f32 %v3805_v63, %v1388_v46  ;;  %v6261_v54 = vmul.f32 %v3808_v6, %v1389_v38  ;;  %v1347_v18 = vunpack.c.l.bf16 %v570_v22  ;;  %v6268_v20 = vmul.f32 %v3811_v11, %v1390_v50  ;;  %v6278_v38 = vld [vmem:[%s3610_s25 + $0xbd8] sm:$0xff]  ;;  %v7078_v6 = vld [vmem:[#allocation16_spill] sm:$0xff] }
 0x25e   : > { %v3211_v51 = vadd.f32 %v3210_v40, %v6156_v13  ;;  %v6271_v60 = vmul.f32 %v6982_v62, %v1391_v55  ;;  %v3283_v41 = vadd.f32 %v3282_v5, %v2421_v48  ;;  %v6275_v46 = vmul.f32 %v7056_v23, %v1392_v2  ;;  %v6287_v55 = vld [vmem:[%s3610_s25 + $0xbe0] sm:$0xff] }
 0x25f   : > { %v1348_v36 = vunpack.c.h.bf16 %v570_v22  ;;  %v2388_v56 = vmul.f32 %v3715_v0, %v1345_v15  ;;  %v2389_v44 = vmul.f32 %v6980_v53, %v1346_v1  ;;  %v6284_v50 = vmul.f32 %v3827_v3, %v1394_v42  ;;  %v6290_v23 = vld [vmem:[#allocation2] ss:$0 sm:$0xff]  ;;  %v7072_v22 = vld [vmem:[#allocation23_spill] sm:$0xff]  ;;  %v6295_v42 = vpop.xlane.xlu0 %2842 }
 0x260   : > { %v3212_v13 = vadd.f32 %v3211_v51, %v6163_v7  ;;  %v3284_v27 = vadd.f32 %v3283_v41, %v2422_v47  ;;  %v1349_v48 = vunpack.c.l.bf16 %v571_v26  ;;  %v1350_v30 = vunpack.c.h.bf16 %v571_v26  ;;  %v7073_v26 = vld [vmem:[#allocation5_spill] sm:$0xff]  ;;  %v7079_v63 = vld [vmem:[#allocation18_spill] sm:$0xff] }
 0x261   : > { %v1351_v40 = vunpack.c.l.bf16 %v572_v61  ;;  %v1352_v2 = vunpack.c.h.bf16 %v572_v61  ;;  %v2390_v5 = vmul.f32 %v7061_v17, %v1347_v18  ;;  %v1353_v53 = vunpack.c.l.bf16 %v6278_v38  ;;  %v6300_v61 = vpop.xlane.xlu1 %2923  ;;  %v7074_v17 = vld [vmem:[#allocation24_spill] sm:$0xff] }
 0x262   : > { %v3213_v0 = vadd.f32 %v3212_v13, %v7072_v22  ;;  %v3285_v15 = vadd.f32 %v3284_v27, %v2423_v14  ;;  %v1354_v7 = vunpack.c.h.bf16 %v6278_v38  ;;  %v1355_v47 = vunpack.c.l.bf16 %v6287_v55  ;;  %v7075_v13 = vld [vmem:[#allocation26_spill] sm:$0xff]  ;;  %v7076_v27 = vld [vmem:[#allocation27_spill] sm:$0xff] }
 0x263   : > { %v2391_v51 = vmul.f32 %v7073_v26, %v1348_v36  ;;  %v3249_v41 = vadd.f32 %v2389_v44, %v2388_v56  ;;  %v3312_v14 = vadd.f32 %v6290_v23, %v7075_v13  ;;  %v3310_v38 = vadd.f32 %v6290_v23, %v7076_v27  ;;  %v7077_v22 = vld [vmem:[#allocation6_spill] sm:$0xff]  ;;  %v7082_v13 = vld [vmem:[#allocation20_spill] sm:$0xff] }
 0x264   : > { %v3214_v18 = vadd.f32 %v3213_v0, %v7074_v17  ;;  %v3286_v3 = vadd.f32 %v3285_v15, %v2424_v4  ;;  %v2392_v62 = vmul.f32 %v7077_v22, %v1349_v48  ;;  %v3313_v1 = vadd.f32 %v6290_v23, %v7078_v6  ;;  %v7080_v56 = vld [vmem:[#allocation30_spill] sm:$0xff]  ;;  %v7081_v4 = vld [vmem:[#allocation19_spill] sm:$0xff]  ;;  %v7087_v22 = vld [vmem:[#allocation25_spill] sm:$0xff] }
 0x265   : > { %v3250_v11 = vadd.f32 %v3249_v41, %v2390_v5  ;;  %v3311_v36 = vadd.f32 %v6290_v23, %v7079_v63  ;;  %3484 = vtanh.f32 %v3312_v14  ;;  %v3315_v0 = vadd.f32 %v6290_v23, %v7081_v4  ;;  %v7083_v5 = vld [vmem:[#allocation31_spill] sm:$0xff]  ;;  %v7084_v63 = vld [vmem:[#allocation21_spill] sm:$0xff]  ;;  %v7085_v27 = vld [vmem:[#allocation22_spill] sm:$0xff] }
 0x266   : > { %v3215_v44 = vadd.f32 %v3214_v18, %v7080_v56  ;;  %v3287_v26 = vadd.f32 %v3286_v3, %v2425_v52  ;;  %v2393_v15 = vmul.f32 %v7008_v35, %v1350_v30  ;;  %3486 = vtanh.f32 %v3310_v38  ;;  %v2897_v3 = vpop.xlane.xlu0 %2896  ;;  %v2978_v35 = vpop.xlane.xlu1 %2977  ;;  %v7086_v30 = vld [vmem:[#allocation32_spill] sm:$0xff] }
 0x267   : > { %v3251_v17 = vadd.f32 %v3250_v11, %v2391_v51  ;;  %v3314_v48 = vadd.f32 %v6290_v23, %v7082_v13  ;;  %3488 = vtanh.f32 %v3313_v1  ;;  %v3317_v18 = vadd.f32 %v6290_v23, %v7084_v63  ;;  %v6329_v1 = vld [vmem:[%s3610_s25 + $0xbe8] sm:$0xff] }
 0x268   : > { %v3216_v6 = vadd.f32 %v3215_v44, %v7083_v5  ;;  %v3288_v41 = vadd.f32 %v3287_v26, %v2426_v45  ;;  %v2394_v52 = vmul.f32 %v3767_v8, %v1351_v40  ;;  %3490 = vtanh.f32 %v3311_v36  ;;  %v7089_v36 = vld [vmem:[#allocation33_spill] sm:$0xff] }
 0x269   : > { %v3252_v14 = vadd.f32 %v3251_v17, %v2392_v62  ;;  %v3316_v11 = vadd.f32 %v6290_v23, %v7085_v27  ;;  %3492 = vtanh.f32 %v3315_v0  ;;  %v3319_v45 = vadd.f32 %v6290_v23, %v7087_v22  ;;  %v7088_v62 = vld [vmem:[#allocation4_spill] sm:$0xff] }
 0x26a   : > { %v3217_v51 = vadd.f32 %v3216_v6, %v7086_v30  ;;  %v3289_v38 = vadd.f32 %v3288_v41, %v6243_v49  ;;  %v2395_v56 = vmul.f32 %v3770_v9, %v1352_v2  ;;  %3494 = vtanh.f32 %v3314_v48  ;;  %v7090_v49 = vld [vmem:[#allocation7_spill] sm:$0xff]  ;;  %v2951_v13 = vpop.xlane.xlu0 %2950  ;;  %v6354_v41 = vld [vmem:[%s3610_s25 + $0xbf0] sm:$0xff] }
 0x26b   : > { %v3253_v8 = vadd.f32 %v3252_v14, %v2393_v15  ;;  %v3318_v40 = vadd.f32 %v6290_v23, %v7088_v62  ;;  %3496 = vtanh.f32 %v3317_v18  ;;  %v3321_v4 = vadd.f32 %v6290_v23, %v7090_v49 }
 0x26c   : > { %v3219_v44 = vadd.f32 %v7089_v36, %v3217_v51  ;;  %v3290_v26 = vadd.f32 %v3289_v38, %v6247_v24  ;;  %v2396_v0 = vmul.f32 %v3773_v12, %v1353_v53  ;;  %3498 = vtanh.f32 %v3316_v11  ;;  %v577_v51 = vld [vmem:[%s3610_s25 + $0xbf8] sm:$0xff] }
 0x26d   : > { %v3254_v17 = vadd.f32 %v3253_v8, %v2394_v52  ;;  %v3320_v9 = vadd.f32 %v6290_v23, %v6222_v59  ;;  %v1357_v15 = vunpack.c.l.bf16 %v6329_v1  ;;  %3500 = vtanh.f32 %v3319_v45  ;;  %v3032_v59 = vpop.xlane.xlu1 %3031  ;;  %v7093_v8 = vld [vmem:[#allocation13_spill] sm:$0xff] }
 0x26e   : > { %3220 = vadd.xlane.f32.xlu0 %v3219_v44  ;;  %v3291_v2 = vadd.f32 %v3290_v26, %v6250_v58  ;;  %v3323_v24 = vadd.f32 %v6290_v23, %v6227_v25  ;;  %v2397_v48 = vmul.f32 %v3776_v10, %v1354_v7  ;;  %3502 = vtanh.f32 %v3318_v40  ;;  %v3005_v14 = vpop.xlane.xlu0 %3004 }
 0x26f   : > { %v3255_v12 = vadd.f32 %v3254_v17, %v2395_v56  ;;  %v3322_v53 = vadd.f32 %v6290_v23, %v6252_v29  ;;  %v2398_v58 = vmul.f32 %v3779_v16, %v1355_v47  ;;  %3504 = vtanh.f32 %v3321_v4 }
 0x270   : > { %v3292_v5 = vadd.f32 %v3291_v2, %v6255_v57  ;;  %v3325_v6 = vadd.f32 %v6290_v23, %v6264_v43  ;;  %3506 = vtanh.f32 %v3320_v9  ;;  %v3324_v10 = vadd.f32 %v6290_v23, %v6295_v42 }
 0x271   : > { %v3256_v25 = vadd.f32 %v3255_v12, %v2396_v0  ;;  %v1358_v29 = vunpack.c.h.bf16 %v6329_v1  ;;  %3508 = vtanh.f32 %v3323_v24  ;;  %v3327_v57 = vadd.f32 %v6290_v23, %v6300_v61  ;;  %v578_v0 = vld [vmem:[%s3610_s25 + $0xc00] sm:$0xff] }
 0x272   : > { %v3293_v16 = vadd.f32 %v3292_v5, %v6258_v37  ;;  %v3485_v43 = vpop.eup %3484  ;;  %v7091_v7 = vunpack.c.h.bf16 %v6287_v55  ;;  %3510 = vtanh.f32 %v3322_v53  ;;  %v3326_v18 = vadd.f32 %v6290_v23, %v2897_v3  ;;  %v579_v53 = vld [vmem:[%s3610_s25 + $0xc08] sm:$0xff] }
 0x273   : > { %v3257_v63 = vadd.f32 %v3256_v25, %v2397_v48  ;;  %v3487_v52 = vpop.eup %3486  ;;  %v1359_v42 = vunpack.c.l.bf16 %v6354_v41  ;;  %3377 = vst.msk [vmem:[%s6359_s4 + $0x10] sm:$0xff] %vm3374_vm1, %v3485_v43  ;;  %3512 = vtanh.f32 %v3325_v6  ;;  %v3329_v61 = vadd.f32 %v6290_v23, %v2978_v35  ;;  %v580_v43 = vld [vmem:[%s3610_s25 + $0xc10] sm:$0xff] }
 0x274   : > { %v2399_v47 = vmul.f32 %v3782_v19, %v7091_v7  ;;  %v3294_v37 = vadd.f32 %v3293_v16, %v6261_v54  ;;  %v3489_v55 = vpop.eup %3488  ;;  %v2400_v19 = vmul.f32 %v3786_v28, %v1357_v15  ;;  %3375 = vst.msk [vmem:[%s6359_s4] sm:$0xff] %vm3374_vm1, %v3487_v52  ;;  %3514 = vtanh.f32 %v3324_v10  ;;  %v3086_v54 = vpop.xlane.xlu1 %3085  ;;  %v7094_v10 = vld [vmem:[#allocation8_spill] sm:$0xff] }
 0x275   : > { %v3258_v27 = vadd.f32 %v3257_v63, %v2398_v58  ;;  %v3328_v3 = vadd.f32 %v6290_v23, %v2951_v13  ;;  %v3491_v11 = vpop.eup %3490  ;;  %v1360_v38 = vunpack.c.h.bf16 %v6354_v41  ;;  %3378 = vst.msk [vmem:[%s6359_s4 + $0x18] sm:$0xff] %vm3374_vm1, %v3489_v55  ;;  %3516 = vtanh.f32 %v3327_v57 }
 0x276   : > { %v3295_v30 = vadd.f32 %v3294_v37, %v6268_v20  ;;  %v3331_v28 = vadd.f32 %v6290_v23, %v3032_v59  ;;  %v3493_v35 = vpop.eup %3492  ;;  %v2401_v22 = vmul.f32 %v3789_v31, %v1358_v29  ;;  %3376 = vst.msk [vmem:[%s6359_s4 + $0x8] sm:$0xff] %vm3374_vm1, %v3491_v11  ;;  %3518 = vtanh.f32 %v3326_v18 }
 0x277   : > { %v3259_v45 = vadd.f32 %v3258_v27, %v2399_v47  ;;  %v3330_v1 = vadd.f32 %v6290_v23, %v3005_v14  ;;  %v3495_v20 = vpop.eup %3494  ;;  %v7092_v56 = vunpack.c.h.bf16 %v6213_v21  ;;  %3380 = vst.msk [vmem:[%s6359_s4 + $0x28] sm:$0xff] %vm3374_vm1, %v3493_v35  ;;  %3520 = vtanh.f32 %v3329_v61  ;;  %v7095_v47 = vld [vmem:[#allocation9_spill] sm:$0xff]  ;;  %v7096_v61 = vld [vmem:[#allocation10_spill] sm:$0xff]  ;;  %v7097_v27 = vld [vmem:[#allocation28_spill] sm:$0xff] }
 0x278   : > { %v3296_v40 = vadd.f32 %v3295_v30, %v6271_v60  ;;  %v3333_v31 = vadd.f32 %v6290_v23, %v3086_v54  ;;  %v3497_v36 = vpop.eup %3496  ;;  %v1361_v44 = vunpack.c.l.bf16 %v577_v51  ;;  %v2402_v26 = vmul.f32 %v3792_v32, %v1359_v42  ;;  %3379 = vst.msk [vmem:[%s6359_s4 + $0x20] sm:$0xff] %vm3374_vm1, %v3495_v20 }
 0x279   : > { %v2436_v62 = vmul.f32 %v7093_v8, %v7092_v56  ;;  %v3260_v49 = vadd.f32 %v3259_v45, %v2400_v19  ;;  %3522 = vtanh.f32 %v3328_v3  ;;  %v3499_v21 = vpop.eup %3498  ;;  %v3299_v60 = vsel %vm2461_vm0, %v6284_v50, 0.0  ;;  %3382 = vst.msk [vmem:[%s6359_s4 + $0x38] sm:$0xff] %vm3374_vm1, %v3497_v36 }
 0x27a   : > { %v3297_v4 = vadd.f32 %v3296_v40, %v6275_v46  ;;  %3524 = vtanh.f32 %v3331_v28  ;;  %v3501_v17 = vpop.eup %3500  ;;  %v1362_v9 = vunpack.c.h.bf16 %v577_v51  ;;  %v2403_v32 = vmul.f32 %v3795_v33, %v1360_v38  ;;  %3381 = vst.msk [vmem:[%s6359_s4 + $0x30] sm:$0xff] %vm3374_vm1, %v3499_v21  ;;  %v7098_v51 = vld [vmem:[#allocation11_spill] sm:$0xff] }
 0x27b   : > { %v3261_v2 = vadd.f32 %v3260_v49, %v2401_v22  ;;  %3526 = vtanh.f32 %v3330_v1  ;;  %v3503_v15 = vpop.eup %3502  ;;  %3384 = vst.msk [vmem:[%s6359_s4 + $0x48] sm:$0xff] %vm3374_vm1, %v3501_v17  ;;  %v1363_v24 = vunpack.c.l.bf16 %v578_v0  ;;  %v2404_v13 = vmul.f32 %v3798_v34, %v1361_v44  ;;  %v7099_v1 = vld [vmem:[#allocation12_spill] sm:$0xff] }
 0x27c   : > { %v3298_v46 = vadd.f32 %v3297_v4, %v2436_v62  ;;  %3528 = vtanh.f32 %v3333_v31  ;;  %v3505_v50 = vpop.eup %3504  ;;  %3383 = vst.msk [vmem:[%s6359_s4 + $0x40] sm:$0xff] %vm3374_vm1, %v3503_v15  ;;  %v1364_v5 = vunpack.c.h.bf16 %v578_v0  ;;  %v2405_v58 = vmul.f32 %v3801_v39, %v1362_v9  ;;  %v7100_v62 = vld [vmem:[#allocation14_spill] sm:$0xff] }
 0x27d   : > { %v3262_v48 = vadd.f32 %v3261_v2, %v2402_v26  ;;  %v3507_v33 = vpop.eup %3506  ;;  %3386 = vst.msk [vmem:[%s6359_s4 + $0x58] sm:$0xff] %vm3374_vm1, %v3505_v50  ;;  %v1365_v25 = vunpack.c.l.bf16 %v579_v53  ;;  %v2406_v16 = vmul.f32 %v7094_v10, %v1363_v24  ;;  %v1366_v7 = vunpack.c.h.bf16 %v579_v53 }
 0x27e   : > { %v3300_v12 = vadd.f32 %v3299_v60, %v3298_v46  ;;  %v3509_v59 = vpop.eup %3508  ;;  %3385 = vst.msk [vmem:[%s6359_s4 + $0x50] sm:$0xff] %vm3374_vm1, %v3507_v33  ;;  %v2407_v63 = vmul.f32 %v7095_v47, %v1364_v5  ;;  %v1367_v42 = vunpack.c.l.bf16 %v580_v43  ;;  %v1369_v3 = vunpack.c.l.bf16 %v7097_v27 }
 0x27f   : > { %v3263_v6 = vadd.f32 %v3262_v48, %v2403_v32  ;;  %v3511_v34 = vpop.eup %3510  ;;  %3388 = vst.msk [vmem:[%s6359_s4 + $0x68] sm:$0xff] %vm3374_vm1, %v3509_v59  ;;  %v2408_v14 = vmul.f32 %v7096_v61, %v1365_v25  ;;  %v1368_v30 = vunpack.c.h.bf16 %v580_v43  ;;  %v2409_v38 = vmul.f32 %v7098_v51, %v1366_v7 }
 0x280   : > { %3301 = vadd.xlane.f32.xlu1 %v3300_v12  ;;  %v3513_v41 = vpop.eup %3512  ;;  %3387 = vst.msk [vmem:[%s6359_s4 + $0x60] sm:$0xff] %vm3374_vm1, %v3511_v34  ;;  %v2410_v20 = vmul.f32 %v7099_v1, %v1367_v42  ;;  %v2412_v40 = vmul.f32 %v7100_v62, %v1369_v3 }
 0x281   : > { %v3264_v29 = vadd.f32 %v3263_v6, %v2404_v13  ;;  %v3515_v57 = vpop.eup %3514  ;;  %3390 = vst.msk [vmem:[%s6359_s4 + $0x78] sm:$0xff] %vm3374_vm1, %v3513_v41  ;;  %v2411_v31 = vmul.f32 %v7093_v8, %v1368_v30 }
 0x282   : > { %v3517_v39 = vpop.eup %3516  ;;  %3389 = vst.msk [vmem:[%s6359_s4 + $0x70] sm:$0xff] %vm3374_vm1, %v3515_v57  ;;  %v3272_v26 = vsel %vm2461_vm0, %v2412_v40, 0.0 }
 0x283   : > { %v3265_v18 = vadd.f32 %v3264_v29, %v2405_v58  ;;  %v3519_v52 = vpop.eup %3518  ;;  %3392 = vst.msk [vmem:[%s6359_s4 + $0x88] sm:$0xff] %vm3374_vm1, %v3517_v39 }
 0x284   : > { %v3521_v37 = vpop.eup %3520  ;;  %3391 = vst.msk [vmem:[%s6359_s4 + $0x80] sm:$0xff] %vm3374_vm1, %v3519_v52 }
 0x285   : > { %v3266_v55 = vadd.f32 %v3265_v18, %v2406_v16  ;;  %3394 = vst.msk [vmem:[%s6359_s4 + $0x98] sm:$0xff] %vm3374_vm1, %v3521_v37 }
 0x286   : > { %v3523_v19 = vpop.eup %3522  ;;  %v3059_v54 = vpop.xlane.xlu0 %3058 }
 0x287   : > { %v3525_v11 = vpop.eup %3524  ;;  %v3267_v28 = vadd.f32 %v3266_v55, %v2407_v63  ;;  %3393 = vst.msk [vmem:[%s6359_s4 + $0x90] sm:$0xff] %vm3374_vm1, %v3523_v19  ;;  %v3332_v35 = vadd.f32 %v6290_v23, %v3059_v54 }
 0x288   : > { %v3527_v22 = vpop.eup %3526  ;;  %3396 = vst.msk [vmem:[%s6359_s4 + $0xa8] sm:$0xff] %vm3374_vm1, %v3525_v11 }
 0x289   : > { %v3529_v45 = vpop.eup %3528  ;;  %v3268_v56 = vadd.f32 %v3267_v28, %v2408_v14  ;;  %3395 = vst.msk [vmem:[%s6359_s4 + $0xa0] sm:$0xff] %vm3374_vm1, %v3527_v22  ;;  %3530 = vtanh.f32 %v3332_v35 }
 0x28a   : > { %3398 = vst.msk [vmem:[%s6359_s4 + $0xb8] sm:$0xff] %vm3374_vm1, %v3529_v45 }
 0x28b   : > { %v3269_v36 = vadd.f32 %v3268_v56, %v2409_v38 }
 0x28d   : > { %v3270_v44 = vadd.f32 %v3269_v36, %v2410_v20 }
 0x28f   : > { %v3271_v49 = vadd.f32 %v3270_v44, %v2411_v31 }
 0x291   : > { %v3273_v21 = vadd.f32 %v3272_v26, %v3271_v49 }
 0x293   : > { %3274 = vadd.xlane.f32.xlu0 %v3273_v21 }
 0x296   : > { %v3531_v4 = vpop.eup %3530 }
 0x297   : > { %3397 = vst.msk [vmem:[%s6359_s4 + $0xb0] sm:$0xff] %vm3374_vm1, %v3531_v4 }
 0x299   : > { %v3140_v60 = vpop.xlane.xlu1 %3139 }
 0x29a   : > { %v3335_v0 = vadd.f32 %v6290_v23, %v3140_v60 }
 0x29c   : > { %3532 = vtanh.f32 %v3335_v0 }
 0x2a9   : > { %v3533_v17 = vpop.eup %3532 }
 0x2aa   : > { %3400 = vst.msk [vmem:[%s6359_s4 + $0xc8] sm:$0xff] %vm3374_vm1, %v3533_v17 }
 0x2ac   : > { %v3113_v8 = vpop.xlane.xlu0 %3112 }
 0x2ad   : > { %v3334_v9 = vadd.f32 %v6290_v23, %v3113_v8 }
 0x2af   : > { %3534 = vtanh.f32 %v3334_v9 }
 0x2bc   : > { %v3535_v32 = vpop.eup %3534 }
 0x2bd   : > { %3399 = vst.msk [vmem:[%s6359_s4 + $0xc0] sm:$0xff] %vm3374_vm1, %v3535_v32 }
 0x2bf   : > { %v3194_v2 = vpop.xlane.xlu1 %3193 }
 0x2c0   : > { %v3337_v15 = vadd.f32 %v6290_v23, %v3194_v2 }
 0x2c2   : > { %3536 = vtanh.f32 %v3337_v15 }
 0x2cf   : > { %v3537_v46 = vpop.eup %3536 }
 0x2d0   : > { %3402 = vst.msk [vmem:[%s6359_s4 + $0xd8] sm:$0xff] %vm3374_vm1, %v3537_v46 }
 0x2d1   : > { %v3167_v50 = vpop.xlane.xlu0 %3166 }
 0x2d2   : > { %v3336_v24 = vadd.f32 %v6290_v23, %v3167_v50 }
 0x2d4   : > { %3538 = vtanh.f32 %v3336_v24 }
 0x2e1   : > { %v3539_v13 = vpop.eup %3538 }
 0x2e2   : > { %3401 = vst.msk [vmem:[%s6359_s4 + $0xd0] sm:$0xff] %vm3374_vm1, %v3539_v13 }
 0x2e4   : > { %v3248_v48 = vpop.xlane.xlu1 %3247 }
 0x2e5   : > { %v3339_v33 = vadd.f32 %v6290_v23, %v3248_v48 }
 0x2e7   : > { %3540 = vtanh.f32 %v3339_v33 }
 0x2f4   : > { %v3541_v12 = vpop.eup %3540 }
 0x2f5   : > { %3404 = vst.msk [vmem:[%s6359_s4 + $0xe8] sm:$0xff] %vm3374_vm1, %v3541_v12 }
 0x2f7   : > { %v3221_v53 = vpop.xlane.xlu0 %3220 }
 0x2f8   : > { %v3338_v59 = vadd.f32 %v6290_v23, %v3221_v53 }
 0x2fa   : > { %3542 = vtanh.f32 %v3338_v59 }
 0x307   : > { %v3543_v5 = vpop.eup %3542 }
 0x308   : > { %3403 = vst.msk [vmem:[%s6359_s4 + $0xe0] sm:$0xff] %vm3374_vm1, %v3543_v5 }
 0x309   : > { %v3302_v58 = vpop.xlane.xlu1 %3301 }
 0x30a   : > { %v3341_v6 = vadd.f32 %v6290_v23, %v3302_v58 }
 0x30c   : > { %3544 = vtanh.f32 %v3341_v6 }
 0x319   : > { %v3545_v34 = vpop.eup %3544 }
 0x31a   : > { %3406 = vst.msk [vmem:[%s6359_s4 + $0xf8] sm:$0xff] %vm3374_vm1, %v3545_v34 }
 0x31c   : > { %v3275_v41 = vpop.xlane.xlu0 %3274 }
 0x31d   : > { %v3340_v25 = vadd.f32 %v6290_v23, %v3275_v41 }
 0x31f   : > { %3546 = vtanh.f32 %v3340_v25 }
 0x32c   : > { %v3547_v10 = vpop.eup %3546 }
 0x32d   : > { %3405 = vst.msk [vmem:[%s6359_s4 + $0xf0] sm:$0xff] %vm3374_vm1, %v3547_v10 }
 0x32e PF: > { %s15_s14 = sadd.s32 1, %s3554_s14  }
 0x32f   : > { %p12_p4 = scmp.ge.s32.totalorder %s15_s14, 4  }
 0x331   :  { %14 = sbr.rel (!%p12_p4) target bundleno = 3 (0x3), region = 62 }

</bundles_post_ra>
